<compile_context>
chip_gen: v7x
topology: tpu7x:2x2x1
jax: 0.10.0
libtpu: 0.0.40
codegen_flags: <defaults>
</compile_context>

<pallas_src>
import functools
import jax
import jax.numpy as jnp
from jax import lax
from jax.experimental import pallas as pl
from jax.experimental.pallas import tpu as pltpu  # noqa: F401  (TPU backend assumed)

D_MODEL = 32
NHEAD = 8
HEAD_DIM = D_MODEL // NHEAD
DIM_FF = 512
NUM_ENC = 3
NUM_DEC = 3
VOCAB = 50
MAX_LEN = 1000
LN_EPS = 1e-5
NEG = -1e30          # additive mask value (exp underflows to exactly 0 after max-sub)
W_DTYPE = jnp.bfloat16   # matmul-weight storage dtype


# ------------------------- the fused kernel -------------------------

def _transformer_kernel(treedef, *refs):
    """refs = (src_x, tgt_x, enc_mask, dec_mask, crs_mask,
               hb_src, hb_tgt, bd_src, bd_tgt, *param_leaves, out)."""
    (src_ref, tgt_ref, enc_mask_ref, dec_mask_ref, crs_mask_ref,
     hb_src_ref, hb_tgt_ref, bd_src_ref, bd_tgt_ref) = refs[:9]
    out_ref = refs[-1]
    p = jax.tree_util.tree_unflatten(treedef, refs[9:-1])

    enc_mask = enc_mask_ref[...]
    dec_mask = dec_mask_ref[...]
    crs_mask = crs_mask_ref[...]
    hb_src, hb_tgt = hb_src_ref[...], hb_tgt_ref[...]
    bd_src, bd_tgt = bd_src_ref[...], bd_tgt_ref[...]

    def dense(x, w, b):
        # Weights are stored bf16; cast the activation only at the MXU input,
        # accumulate in f32.  Everything else (biases, elementwise) stays f32.
        return jnp.dot(x.astype(w.dtype), w, preferred_element_type=jnp.float32) + b

    def layer_norm(x, g, b):
        # mean(x) and mean(x*x) are independent XLU reductions (can issue
        # back-to-back instead of reduce -> subtract -> reduce).
        m = jnp.mean(x, axis=-1, keepdims=True)
        msq = jnp.mean(x * x, axis=-1, keepdims=True)
        var = msq - m * m
        return (x - m) * lax.rsqrt(var + LN_EPS) * g + b

    def attention(q, k, v, mask_t, hb, bd):
        # Packed-head attention (all NHEAD heads in one lane-dense matmul).
        #   q:(Mq,E)  k,v:(Mk,E)
        #   hb:(NHEAD*Mk,E)   0/1 head-block column mask
        #   bd:(NHEAD*Mk,NHEAD*Mk) 0/1 block-diagonal ones (per-head segments)
        #   mask_t:(Mq,NHEAD*Mk) additive mask, pre-tiled per head in wrapper.
        k_packed = jnp.tile(k, (NHEAD, 1)) * hb          # (NHEAD*Mk, E)
        v_packed = jnp.tile(v, (NHEAD, 1)) * hb
        s = lax.dot_general(q, k_packed,
                            dimension_numbers=(((1,), (1,)), ((), ())),
                            preferred_element_type=jnp.float32) + mask_t
        # Global row max: the constant cancels per head, so the softmax is
        # exact; only a fully key-masked query row degenerates (uniform
        # distribution here vs. PyTorch's NaN) -- documented corner case.
        s = s - jnp.max(s, axis=-1, keepdims=True)
        e = jnp.exp(s)
        # Per-head softmax denominator via ONE block-diagonal-ones matmul
        # (avoids any in-kernel reshape/segmented reduce).
        denom = jnp.dot(e, bd, preferred_element_type=jnp.float32)
        pr = e / denom                                   # exact divide (no approx recip)
        # PV matmul also merges heads for free (head columns are disjoint).
        return jnp.dot(pr, v_packed, preferred_element_type=jnp.float32)

    def mha_self(x, w_qkv, b_qkv, w_o, b_o, mask_t, hb, bd):
        qkv = dense(x, w_qkv, b_qkv)                     # one fused (M, 3E) projection
        q = qkv[:, :D_MODEL]
        k = qkv[:, D_MODEL:2 * D_MODEL]
        v = qkv[:, 2 * D_MODEL:]
        return dense(attention(q, k, v, mask_t, hb, bd), w_o, b_o)

    def mha_cross(xq, xkv, w_q, b_q, w_kv, b_kv, w_o, b_o, mask_t, hb, bd):
        q = dense(xq, w_q, b_q)
        kv = dense(xkv, w_kv, b_kv)                      # fused (M, 2E) K/V projection
        k = kv[:, :D_MODEL]
        v = kv[:, D_MODEL:]
        return dense(attention(q, k, v, mask_t, hb, bd), w_o, b_o)

    # ---------------- encoder ----------------
    x = src_ref[...]
    for l in range(NUM_ENC):
        sa = mha_self(x, p["e_qkv_w"][l], p["e_qkv_b"][l],
                      p["e_out_w"][l], p["e_out_b"][l], enc_mask, hb_src, bd_src)
        x = layer_norm(x + sa, p["e_ln1_w"][l], p["e_ln1_b"][l])
        h = jnp.maximum(dense(x, p["e_ff1_w"][l], p["e_ff1_b"][l]), 0.0)
        ff = dense(h, p["e_ff2_w"][l], p["e_ff2_b"][l])
        x = layer_norm(x + ff, p["e_ln2_w"][l], p["e_ln2_b"][l])
    memory = layer_norm(x, p["enc_norm_w"][...], p["enc_norm_b"][...])

    # ---------------- decoder ----------------
    y = tgt_ref[...]
    for l in range(NUM_DEC):
        sa = mha_self(y, p["d_sa_qkv_w"][l], p["d_sa_qkv_b"][l],
                      p["d_sa_out_w"][l], p["d_sa_out_b"][l], dec_mask, hb_tgt, bd_tgt)
        y = layer_norm(y + sa, p["d_ln1_w"][l], p["d_ln1_b"][l])
        ca = mha_cross(y, memory,
                       p["d_ca_q_w"][l], p["d_ca_q_b"][l],
                       p["d_ca_kv_w"][l], p["d_ca_kv_b"][l],
                       p["d_ca_out_w"][l], p["d_ca_out_b"][l],
                       crs_mask, hb_src, bd_src)
        y = layer_norm(y + ca, p["d_ln2_w"][l], p["d_ln2_b"][l])
        h = jnp.maximum(dense(y, p["d_ff1_w"][l], p["d_ff1_b"][l]), 0.0)
        ff = dense(h, p["d_ff2_w"][l], p["d_ff2_b"][l])
        y = layer_norm(y + ff, p["d_ln3_w"][l], p["d_ln3_b"][l])
    y = layer_norm(y, p["dec_norm_w"][...], p["dec_norm_b"][...])

    out_ref[...] = y  # (N*S_tgt, E), n-major rows


# ------------------------- wrapper -------------------------

def _build_masks(src_tokens, tgt_tokens):
    """Additive masks over the flattened n-major (N*S) axis, pre-tiled per head
    for the packed-head attention layout (column = h*Mk + j)."""
    N, S_src = src_tokens.shape
    _, S_tgt = tgt_tokens.shape
    M_src, M_tgt = N * S_src, N * S_tgt

    def block_diag_batch(s_q, s_k):
        rb = jnp.arange(N * s_q, dtype=jnp.int32)[:, None] // s_q
        cb = jnp.arange(N * s_k, dtype=jnp.int32)[None, :] // s_k
        return jnp.where(rb == cb, 0.0, NEG).astype(jnp.float32)

    src_kpm = jnp.where(src_tokens == 1, NEG, 0.0).astype(jnp.float32).reshape(1, M_src)
    tgt_kpm = jnp.where(tgt_tokens == 1, NEG, 0.0).astype(jnp.float32).reshape(1, M_tgt)
    qpos = jnp.arange(M_tgt, dtype=jnp.int32) % S_tgt
    causal = jnp.where(qpos[:, None] < qpos[None, :], NEG, 0.0).astype(jnp.float32)

    enc_mask = block_diag_batch(S_src, S_src) + src_kpm            # enc self-attn
    dec_mask = block_diag_batch(S_tgt, S_tgt) + causal + tgt_kpm   # dec self-attn
    crs_mask = block_diag_batch(S_tgt, S_src)                      # cross (no mem mask)

    # NOTE: O((N*S)^2) f32 masks -- fine at these shapes; build in-kernel from
    # iota compares (or tile over a key grid) before scaling to large N*S.
    return (jnp.tile(enc_mask, (1, NHEAD)),
            jnp.tile(dec_mask, (1, NHEAD)),
            jnp.tile(crs_mask, (1, NHEAD)))


def _attn_constants(m_k):
    """Constants for packed-head attention with key length m_k:
       hb   (NHEAD*m_k, E): 0/1 head-block column mask
       bd   (NHEAD*m_k, NHEAD*m_k): 0/1 block-diagonal (per-head segments)."""
    rows = jnp.arange(NHEAD * m_k, dtype=jnp.int32)
    head_of_row = rows // m_k
    col = jnp.arange(D_MODEL, dtype=jnp.int32)
    hb = ((col[None, :] >= head_of_row[:, None] * HEAD_DIM)
          & (col[None, :] < (head_of_row[:, None] + 1) * HEAD_DIM)).astype(jnp.float32)
    bd = (head_of_row[:, None] == head_of_row[None, :]).astype(jnp.float32)
    return hb, bd


@jax.jit
def my_transformer_forward(prepped, src_tokens, tgt_tokens):
    """src_tokens, tgt_tokens: (N, S) int32. Returns (S_tgt, N, d_model) f32."""
    N, S_src = src_tokens.shape
    _, S_tgt = tgt_tokens.shape
    E = D_MODEL

    emb = prepped["embedding"]
    pos = prepped["pos_enc"]
    # TODO(synk): dropout (PositionalEncoding + Transformer sublayers) treated as identity (eval mode).
    src_x = (emb[src_tokens] + pos[None, :S_src, :]).reshape(N * S_src, E)
    tgt_x = (emb[tgt_tokens] + pos[None, :S_tgt, :]).reshape(N * S_tgt, E)

    enc_mask_t, dec_mask_t, crs_mask_t = _build_masks(src_tokens, tgt_tokens)
    hb_src, bd_src = _attn_constants(N * S_src)
    hb_tgt, bd_tgt = _attn_constants(N * S_tgt)

    kparams = {k: v for k, v in prepped.items() if k not in ("embedding", "pos_enc")}
    leaves, treedef = jax.tree_util.tree_flatten(kparams)

    out2d = pl.pallas_call(
        functools.partial(_transformer_kernel, treedef),
        out_shape=jax.ShapeDtypeStruct((N * S_tgt, E), jnp.float32),
    )(src_x, tgt_x, enc_mask_t, dec_mask_t, crs_mask_t,
      hb_src, hb_tgt, bd_src, bd_tgt, *leaves)

    # (N*S_tgt, E) n-major -> (S_tgt, N, E) to match nn.Transformer output.
    return out2d.reshape(N, S_tgt, E).transpose(1, 0, 2)


# ------------------------- parameter init & prep -------------------------

def positional_encoding_table():
    pos = jnp.arange(MAX_LEN, dtype=jnp.float32)[:, None]
    div = jnp.power(10000.0,
                    jnp.arange(0, D_MODEL, 2, dtype=jnp.float32) / D_MODEL)
    X = pos / div                                    # (max_len, d/2)
    P = jnp.zeros((MAX_LEN, D_MODEL), jnp.float32)
    P = P.at[:, 0::2].set(jnp.sin(X))
    P = P.at[:, 1::2].set(jnp.cos(X))
    return P


def init_params(key):
    """PyTorch-convention parameter shapes (Linear weights are (out, in))."""
    keys = iter(jax.random.split(key, 128))

    def rnd(shape, scale=0.05):
        return (scale * jax.random.normal(next(keys), shape)).astype(jnp.float32)

    def enc_layer_params():
        return dict(
            sa_in_w=rnd((3 * D_MODEL, D_MODEL)), sa_in_b=rnd((3 * D_MODEL,)),
            sa_out_w=rnd((D_MODEL, D_MODEL)), sa_out_b=rnd((D_MODEL,)),
            ff_w1=rnd((DIM_FF, D_MODEL)), ff_b1=rnd((DIM_FF,)),
            ff_w2=rnd((D_MODEL, DIM_FF)), ff_b2=rnd((D_MODEL,)),
            ln1_w=jnp.ones((D_MODEL,), jnp.float32), ln1_b=jnp.zeros((D_MODEL,), jnp.float32),
            ln2_w=jnp.ones((D_MODEL,), jnp.float32), ln2_b=jnp.zeros((D_MODEL,), jnp.float32),
        )

    def dec_layer_params():
        p = enc_layer_params()
        p.update(
            ca_in_w=rnd((3 * D_MODEL, D_MODEL)), ca_in_b=rnd((3 * D_MODEL,)),
            ca_out_w=rnd((D_MODEL, D_MODEL)), ca_out_b=rnd((D_MODEL,)),
            ln3_w=jnp.ones((D_MODEL,), jnp.float32), ln3_b=jnp.zeros((D_MODEL,), jnp.float32),
        )
        return p

    return dict(
        embedding=rnd((VOCAB, D_MODEL), scale=1.0),
        pos_enc=positional_encoding_table(),
        enc_layers=[enc_layer_params() for _ in range(NUM_ENC)],
        dec_layers=[dec_layer_params() for _ in range(NUM_DEC)],
        enc_norm_w=jnp.ones((D_MODEL,), jnp.float32),
        enc_norm_b=jnp.zeros((D_MODEL,), jnp.float32),
        dec_norm_w=jnp.ones((D_MODEL,), jnp.float32),
        dec_norm_b=jnp.zeros((D_MODEL,), jnp.float32),
    )


def prepare_params(params):
    """One-time prep: pre-transpose weights to (in, out), fuse Q/K/V into one
    (E, 3E) projection (K/V fused to (E, 2E) for cross-attn), fold the
    1/sqrt(head_dim) scale into the Q columns, cast matmul weights to bf16
    (biases / LayerNorm params stay f32), and stack per-layer tensors on a
    leading layer axis so the whole model runs as one pallas_call with
    VMEM-resident weights."""
    sc = 1.0 / (HEAD_DIM ** 0.5)
    E = D_MODEL

    def fused_qkv_w(w):                          # torch in_proj_weight (3E, E)
        wt = jnp.transpose(w)                    # (E, 3E): cols [Q | K | V]
        wt = wt.at[:, :E].multiply(sc)           # fold softmax scale into Q
        return wt.astype(W_DTYPE)

    def fused_qkv_b(b):                          # (3E,)
        return b.reshape(1, 3 * E).at[:, :E].multiply(sc).astype(jnp.float32)

    def q_w(w):                                  # cross-attn Q: rows 0:E of in_proj
        return (jnp.transpose(w[:E]) * sc).astype(W_DTYPE)

    def q_b(b):
        return (b[:E] * sc).reshape(1, E).astype(jnp.float32)

    def kv_w(w):                                 # cross-attn K/V fused: rows E:3E
        return jnp.transpose(w[E:]).astype(W_DTYPE)   # (E, 2E)

    def kv_b(b):
        return b[E:].reshape(1, 2 * E).astype(jnp.float32)

    def lin_w(w):                                # (out, in) -> (in, out), bf16
        return jnp.transpose(w).astype(W_DTYPE)

    def row(b):                                  # (D,) -> (1, D), f32
        return b.reshape(1, -1).astype(jnp.float32)

    def stack(fn, layers, key):
        return jnp.stack([fn(lp[key]) for lp in layers])

    enc, dec = params["enc_layers"], params["dec_layers"]
    return dict(
        embedding=params["embedding"],
        pos_enc=params["pos_enc"],
        e_qkv_w=stack(fused_qkv_w, enc, "sa_in_w"), e_qkv_b=stack(fused_qkv_b, enc, "sa_in_b"),
        e_out_w=stack(lin_w, enc, "sa_out_w"), e_out_b=stack(row, enc, "sa_out_b"),
        e_ln1_w=stack(row, enc, "ln1_w"), e_ln1_b=stack(row, enc, "ln1_b"),
        e_ff1_w=stack(lin_w, enc, "ff_w1"), e_ff1_b=stack(row, enc, "ff_b1"),
        e_ff2_w=stack(lin_w, enc, "ff_w2"), e_ff2_b=stack(row, enc, "ff_b2"),
        e_ln2_w=stack(row, enc, "ln2_w"), e_ln2_b=stack(row, enc, "ln2_b"),
        d_sa_qkv_w=stack(fused_qkv_w, dec, "sa_in_w"), d_sa_qkv_b=stack(fused_qkv_b, dec, "sa_in_b"),
        d_sa_out_w=stack(lin_w, dec, "sa_out_w"), d_sa_out_b=stack(row, dec, "sa_out_b"),
        d_ln1_w=stack(row, dec, "ln1_w"), d_ln1_b=stack(row, dec, "ln1_b"),
        d_ca_q_w=stack(q_w, dec, "ca_in_w"), d_ca_q_b=stack(q_b, dec, "ca_in_b"),
        d_ca_kv_w=stack(kv_w, dec, "ca_in_w"), d_ca_kv_b=stack(kv_b, dec, "ca_in_b"),
        d_ca_out_w=stack(lin_w, dec, "ca_out_w"), d_ca_out_b=stack(row, dec, "ca_out_b"),
        d_ln2_w=stack(row, dec, "ln2_w"), d_ln2_b=stack(row, dec, "ln2_b"),
        d_ff1_w=stack(lin_w, dec, "ff_w1"), d_ff1_b=stack(row, dec, "ff_b1"),
        d_ff2_w=stack(lin_w, dec, "ff_w2"), d_ff2_b=stack(row, dec, "ff_b2"),
        d_ln3_w=stack(row, dec, "ln3_w"), d_ln3_b=stack(row, dec, "ln3_b"),
        enc_norm_w=row(params["enc_norm_w"]), enc_norm_b=row(params["enc_norm_b"]),
        dec_norm_w=row(params["dec_norm_w"]), dec_norm_b=row(params["dec_norm_b"]),
    )


if __name__ == "__main__":
    key = jax.random.PRNGKey(0)
    pkey, skey, tkey = jax.random.split(key, 3)
    params = init_params(pkey)
    prepped = prepare_params(params)

    N, S = 2, 8
    # token ids in [2, VOCAB); one pad token (==1) at the end of src to exercise
    # the key-padding mask path.
    src = jax.random.randint(skey, (N, S), 2, VOCAB, dtype=jnp.int32)
    src = src.at[0, -1].set(1)
    tgt = jax.random.randint(tkey, (N, S), 2, VOCAB, dtype=jnp.int32)

    out = my_transformer_forward(prepped, src, tgt)
    out = jax.block_until_ready(out)
    assert out.shape == (S, N, D_MODEL) and out.dtype == jnp.float32
    assert bool(jnp.all(jnp.isfinite(out)))
    print("KERNEL_OK")
</pallas_src>

<mosaic_0001>
module attributes {stable_mosaic.version = 11 : i64} {
  func.func @_transformer_kernel(%arg0: memref<16x32xf32, #tpu.memory_space<vmem>>, %arg1: memref<16x32xf32, #tpu.memory_space<vmem>>, %arg2: memref<16x128xf32, #tpu.memory_space<vmem>>, %arg3: memref<16x128xf32, #tpu.memory_space<vmem>>, %arg4: memref<16x128xf32, #tpu.memory_space<vmem>>, %arg5: memref<128x32xf32, #tpu.memory_space<vmem>>, %arg6: memref<128x32xf32, #tpu.memory_space<vmem>>, %arg7: memref<128x128xf32, #tpu.memory_space<vmem>>, %arg8: memref<128x128xf32, #tpu.memory_space<vmem>>, %arg9: memref<3x1x64xf32, #tpu.memory_space<vmem>>, %arg10: memref<3x32x64xbf16, #tpu.memory_space<vmem>>, %arg11: memref<3x1x32xf32, #tpu.memory_space<vmem>>, %arg12: memref<3x32x32xbf16, #tpu.memory_space<vmem>>, %arg13: memref<3x1x32xf32, #tpu.memory_space<vmem>>, %arg14: memref<3x32x32xbf16, #tpu.memory_space<vmem>>, %arg15: memref<3x1x512xf32, #tpu.memory_space<vmem>>, %arg16: memref<3x32x512xbf16, #tpu.memory_space<vmem>>, %arg17: memref<3x1x32xf32, #tpu.memory_space<vmem>>, %arg18: memref<3x512x32xbf16, #tpu.memory_space<vmem>>, %arg19: memref<3x1x32xf32, #tpu.memory_space<vmem>>, %arg20: memref<3x1x32xf32, #tpu.memory_space<vmem>>, %arg21: memref<3x1x32xf32, #tpu.memory_space<vmem>>, %arg22: memref<3x1x32xf32, #tpu.memory_space<vmem>>, %arg23: memref<3x1x32xf32, #tpu.memory_space<vmem>>, %arg24: memref<3x1x32xf32, #tpu.memory_space<vmem>>, %arg25: memref<3x1x32xf32, #tpu.memory_space<vmem>>, %arg26: memref<3x32x32xbf16, #tpu.memory_space<vmem>>, %arg27: memref<3x1x96xf32, #tpu.memory_space<vmem>>, %arg28: memref<3x32x96xbf16, #tpu.memory_space<vmem>>, %arg29: memref<1x32xf32, #tpu.memory_space<vmem>>, %arg30: memref<1x32xf32, #tpu.memory_space<vmem>>, %arg31: memref<3x1x512xf32, #tpu.memory_space<vmem>>, %arg32: memref<3x32x512xbf16, #tpu.memory_space<vmem>>, %arg33: memref<3x1x32xf32, #tpu.memory_space<vmem>>, %arg34: memref<3x512x32xbf16, #tpu.memory_space<vmem>>, %arg35: memref<3x1x32xf32, #tpu.memory_space<vmem>>, %arg36: memref<3x1x32xf32, #tpu.memory_space<vmem>>, %arg37: memref<3x1x32xf32, #tpu.memory_space<vmem>>, %arg38: memref<3x1x32xf32, #tpu.memory_space<vmem>>, %arg39: memref<3x1x32xf32, #tpu.memory_space<vmem>>, %arg40: memref<3x32x32xbf16, #tpu.memory_space<vmem>>, %arg41: memref<3x1x96xf32, #tpu.memory_space<vmem>>, %arg42: memref<3x32x96xbf16, #tpu.memory_space<vmem>>, %arg43: memref<1x32xf32, #tpu.memory_space<vmem>>, %arg44: memref<1x32xf32, #tpu.memory_space<vmem>>, %arg45: memref<16x32xf32, #tpu.memory_space<vmem>>) attributes {dimension_semantics = [], scalar_prefetch = 0 : i64, scratch_operands = 0 : i64, tpu.core_type = #tpu.core_type<tc>} {
    %c0 = arith.constant 0 : index
    %c0_0 = arith.constant 0 : index
    %0 = vector.load %arg2[%c0, %c0_0] : memref<16x128xf32, #tpu.memory_space<vmem>>, vector<16x128xf32>
    %c0_1 = arith.constant 0 : index
    %c0_2 = arith.constant 0 : index
    %1 = vector.load %arg3[%c0_1, %c0_2] : memref<16x128xf32, #tpu.memory_space<vmem>>, vector<16x128xf32>
    %c0_3 = arith.constant 0 : index
    %c0_4 = arith.constant 0 : index
    %2 = vector.load %arg4[%c0_3, %c0_4] : memref<16x128xf32, #tpu.memory_space<vmem>>, vector<16x128xf32>
    %c0_5 = arith.constant 0 : index
    %c0_6 = arith.constant 0 : index
    %3 = vector.load %arg5[%c0_5, %c0_6] : memref<128x32xf32, #tpu.memory_space<vmem>>, vector<128x32xf32>
    %c0_7 = arith.constant 0 : index
    %c0_8 = arith.constant 0 : index
    %4 = vector.load %arg6[%c0_7, %c0_8] : memref<128x32xf32, #tpu.memory_space<vmem>>, vector<128x32xf32>
    %c0_9 = arith.constant 0 : index
    %c0_10 = arith.constant 0 : index
    %5 = vector.load %arg7[%c0_9, %c0_10] : memref<128x128xf32, #tpu.memory_space<vmem>>, vector<128x128xf32>
    %c0_11 = arith.constant 0 : index
    %c0_12 = arith.constant 0 : index
    %6 = vector.load %arg8[%c0_11, %c0_12] : memref<128x128xf32, #tpu.memory_space<vmem>>, vector<128x128xf32>
    %c0_13 = arith.constant 0 : index
    %c0_14 = arith.constant 0 : index
    %7 = vector.load %arg0[%c0_13, %c0_14] : memref<16x32xf32, #tpu.memory_space<vmem>>, vector<16x32xf32>
    %c0_15 = arith.constant 0 : index
    %c0_16 = arith.constant 0 : index
    %c0_17 = arith.constant 0 : index
    %8 = vector.load %arg42[%c0_15, %c0_16, %c0_17] : memref<3x32x96xbf16, #tpu.memory_space<vmem>>, vector<1x32x96xbf16>
    %9 = vector.shape_cast %8 : vector<1x32x96xbf16> to vector<32x96xbf16>
    %c0_18 = arith.constant 0 : index
    %c0_19 = arith.constant 0 : index
    %c0_20 = arith.constant 0 : index
    %10 = vector.load %arg41[%c0_18, %c0_19, %c0_20] : memref<3x1x96xf32, #tpu.memory_space<vmem>>, vector<1x1x96xf32>
    %11 = vector.shape_cast %10 : vector<1x1x96xf32> to vector<1x96xf32>
    %c0_21 = arith.constant 0 : index
    %c0_22 = arith.constant 0 : index
    %c0_23 = arith.constant 0 : index
    %12 = vector.load %arg40[%c0_21, %c0_22, %c0_23] : memref<3x32x32xbf16, #tpu.memory_space<vmem>>, vector<1x32x32xbf16>
    %13 = vector.shape_cast %12 : vector<1x32x32xbf16> to vector<32x32xbf16>
    %c0_24 = arith.constant 0 : index
    %c0_25 = arith.constant 0 : index
    %c0_26 = arith.constant 0 : index
    %14 = vector.load %arg39[%c0_24, %c0_25, %c0_26] : memref<3x1x32xf32, #tpu.memory_space<vmem>>, vector<1x1x32xf32>
    %15 = vector.shape_cast %14 : vector<1x1x32xf32> to vector<1x32xf32>
    %16 = arith.truncf %7 : vector<16x32xf32> to vector<16x32xbf16>
    %cst = arith.constant dense<0.000000e+00> : vector<16x96xf32>
    %17 = tpu.matmul %16, %9, %cst {dimension_numbers = #tpu.dot_dimension_numbers<[1], [0], [0], [1], [0, 0, 1, 1], [], []>} : vector<16x32xbf16>, vector<32x96xbf16>, vector<16x96xf32> -> vector<16x96xf32>
    %18 = vector.broadcast %11 : vector<1x96xf32> to vector<16x96xf32>
    %19 = arith.addf %17, %18 : vector<16x96xf32>
    %20 = vector.extract_strided_slice %19 {offsets = [0, 0], sizes = [16, 32], strides = [1, 1]} : vector<16x96xf32> to vector<16x32xf32>
    %21 = vector.extract_strided_slice %19 {offsets = [0, 32], sizes = [16, 32], strides = [1, 1]} : vector<16x96xf32> to vector<16x32xf32>
    %22 = vector.extract_strided_slice %19 {offsets = [0, 64], sizes = [16, 32], strides = [1, 1]} : vector<16x96xf32> to vector<16x32xf32>
    %23 = tpu.concatenate %21, %21, %21, %21, %21, %21, %21, %21 in 0 : vector<16x32xf32>, vector<16x32xf32>, vector<16x32xf32>, vector<16x32xf32>, vector<16x32xf32>, vector<16x32xf32>, vector<16x32xf32>, vector<16x32xf32> -> vector<128x32xf32>
    %24 = arith.mulf %23, %3 : vector<128x32xf32>
    %25 = tpu.concatenate %22, %22, %22, %22, %22, %22, %22, %22 in 0 : vector<16x32xf32>, vector<16x32xf32>, vector<16x32xf32>, vector<16x32xf32>, vector<16x32xf32>, vector<16x32xf32>, vector<16x32xf32>, vector<16x32xf32> -> vector<128x32xf32>
    %26 = arith.mulf %25, %3 : vector<128x32xf32>
    %cst_27 = arith.constant dense<0.000000e+00> : vector<16x128xf32>
    %27 = tpu.matmul %20, %24, %cst_27 {dimension_numbers = #tpu.dot_dimension_numbers<[1], [1], [0], [0], [0, 0, 1, 0], [], []>} : vector<16x32xf32>, vector<128x32xf32>, vector<16x128xf32> -> vector<16x128xf32>
    %28 = arith.addf %27, %0 : vector<16x128xf32>
    %cst_28 = arith.constant dense<0xFF800000> : vector<16xf32>
    %29 = vector.multi_reduction <maximumf>, %28, %cst_28 [1] : vector<16x128xf32> to vector<16xf32>
    %30 = vector.shape_cast %29 : vector<16xf32> to vector<16x1xf32>
    %31 = vector.broadcast %30 : vector<16x1xf32> to vector<16x128xf32>
    %32 = arith.subf %28, %31 : vector<16x128xf32>
    %33 = math.exp %32 : vector<16x128xf32>
    %cst_29 = arith.constant dense<0.000000e+00> : vector<16x128xf32>
    %34 = tpu.matmul %33, %5, %cst_29 {dimension_numbers = #tpu.dot_dimension_numbers<[1], [0], [0], [1], [0, 0, 1, 1], [], []>} : vector<16x128xf32>, vector<128x128xf32>, vector<16x128xf32> -> vector<16x128xf32>
    %35 = arith.divf %33, %34 : vector<16x128xf32>
    %cst_30 = arith.constant dense<0.000000e+00> : vector<16x32xf32>
    %36 = tpu.matmul %35, %26, %cst_30 {dimension_numbers = #tpu.dot_dimension_numbers<[1], [0], [0], [1], [0, 0, 1, 1], [], []>} : vector<16x128xf32>, vector<128x32xf32>, vector<16x32xf32> -> vector<16x32xf32>
    %37 = arith.truncf %36 : vector<16x32xf32> to vector<16x32xbf16>
    %cst_31 = arith.constant dense<0.000000e+00> : vector<16x32xf32>
    %38 = tpu.matmul %37, %13, %cst_31 {dimension_numbers = #tpu.dot_dimension_numbers<[1], [0], [0], [1], [0, 0, 1, 1], [], []>} : vector<16x32xbf16>, vector<32x32xbf16>, vector<16x32xf32> -> vector<16x32xf32>
    %39 = vector.broadcast %15 : vector<1x32xf32> to vector<16x32xf32>
    %40 = arith.addf %38, %39 : vector<16x32xf32>
    %41 = arith.addf %7, %40 : vector<16x32xf32>
    %c0_32 = arith.constant 0 : index
    %c0_33 = arith.constant 0 : index
    %c0_34 = arith.constant 0 : index
    %42 = vector.load %arg36[%c0_32, %c0_33, %c0_34] : memref<3x1x32xf32, #tpu.memory_space<vmem>>, vector<1x1x32xf32>
    %43 = vector.shape_cast %42 : vector<1x1x32xf32> to vector<1x32xf32>
    %c0_35 = arith.constant 0 : index
    %c0_36 = arith.constant 0 : index
    %c0_37 = arith.constant 0 : index
    %44 = vector.load %arg35[%c0_35, %c0_36, %c0_37] : memref<3x1x32xf32, #tpu.memory_space<vmem>>, vector<1x1x32xf32>
    %45 = vector.shape_cast %44 : vector<1x1x32xf32> to vector<1x32xf32>
    %cst_38 = arith.constant dense<0.000000e+00> : vector<16xf32>
    %46 = vector.multi_reduction <add>, %41, %cst_38 [1] : vector<16x32xf32> to vector<16xf32>
    %47 = vector.shape_cast %46 : vector<16xf32> to vector<16x1xf32>
    %cst_39 = arith.constant 3.200000e+01 : f32
    %48 = vector.broadcast %cst_39 : f32 to vector<16x1xf32>
    %49 = arith.divf %47, %48 : vector<16x1xf32>
    %50 = arith.mulf %41, %41 : vector<16x32xf32>
    %cst_40 = arith.constant dense<0.000000e+00> : vector<16xf32>
    %51 = vector.multi_reduction <add>, %50, %cst_40 [1] : vector<16x32xf32> to vector<16xf32>
    %52 = vector.shape_cast %51 : vector<16xf32> to vector<16x1xf32>
    %cst_41 = arith.constant 3.200000e+01 : f32
    %53 = vector.broadcast %cst_41 : f32 to vector<16x1xf32>
    %54 = arith.divf %52, %53 : vector<16x1xf32>
    %55 = arith.mulf %49, %49 : vector<16x1xf32>
    %56 = arith.subf %54, %55 : vector<16x1xf32>
    %57 = vector.broadcast %49 : vector<16x1xf32> to vector<16x32xf32>
    %58 = arith.subf %41, %57 : vector<16x32xf32>
    %cst_42 = arith.constant 9.99999974E-6 : f32
    %59 = vector.broadcast %cst_42 : f32 to vector<16x1xf32>
    %60 = arith.addf %56, %59 : vector<16x1xf32>
    %61 = math.rsqrt %60 : vector<16x1xf32>
    %62 = vector.broadcast %61 : vector<16x1xf32> to vector<16x32xf32>
    %63 = arith.mulf %58, %62 : vector<16x32xf32>
    %64 = vector.broadcast %43 : vector<1x32xf32> to vector<16x32xf32>
    %65 = arith.mulf %63, %64 : vector<16x32xf32>
    %66 = vector.broadcast %45 : vector<1x32xf32> to vector<16x32xf32>
    %67 = arith.addf %65, %66 : vector<16x32xf32>
    %c0_43 = arith.constant 0 : index
    %c0_44 = arith.constant 0 : index
    %c0_45 = arith.constant 0 : index
    %68 = vector.load %arg32[%c0_43, %c0_44, %c0_45] : memref<3x32x512xbf16, #tpu.memory_space<vmem>>, vector<1x32x512xbf16>
    %69 = vector.shape_cast %68 : vector<1x32x512xbf16> to vector<32x512xbf16>
    %c0_46 = arith.constant 0 : index
    %c0_47 = arith.constant 0 : index
    %c0_48 = arith.constant 0 : index
    %70 = vector.load %arg31[%c0_46, %c0_47, %c0_48] : memref<3x1x512xf32, #tpu.memory_space<vmem>>, vector<1x1x512xf32>
    %71 = vector.shape_cast %70 : vector<1x1x512xf32> to vector<1x512xf32>
    %72 = arith.truncf %67 : vector<16x32xf32> to vector<16x32xbf16>
    %cst_49 = arith.constant dense<0.000000e+00> : vector<16x512xf32>
    %73 = tpu.matmul %72, %69, %cst_49 {dimension_numbers = #tpu.dot_dimension_numbers<[1], [0], [0], [1], [0, 0, 1, 1], [], []>} : vector<16x32xbf16>, vector<32x512xbf16>, vector<16x512xf32> -> vector<16x512xf32>
    %74 = vector.broadcast %71 : vector<1x512xf32> to vector<16x512xf32>
    %75 = arith.addf %73, %74 : vector<16x512xf32>
    %cst_50 = arith.constant 0.000000e+00 : f32
    %76 = vector.broadcast %cst_50 : f32 to vector<16x512xf32>
    %77 = arith.maximumf %75, %76 : vector<16x512xf32>
    %c0_51 = arith.constant 0 : index
    %c0_52 = arith.constant 0 : index
    %c0_53 = arith.constant 0 : index
    %78 = vector.load %arg34[%c0_51, %c0_52, %c0_53] : memref<3x512x32xbf16, #tpu.memory_space<vmem>>, vector<1x512x32xbf16>
    %79 = vector.shape_cast %78 : vector<1x512x32xbf16> to vector<512x32xbf16>
    %c0_54 = arith.constant 0 : index
    %c0_55 = arith.constant 0 : index
    %c0_56 = arith.constant 0 : index
    %80 = vector.load %arg33[%c0_54, %c0_55, %c0_56] : memref<3x1x32xf32, #tpu.memory_space<vmem>>, vector<1x1x32xf32>
    %81 = vector.shape_cast %80 : vector<1x1x32xf32> to vector<1x32xf32>
    %82 = arith.truncf %77 : vector<16x512xf32> to vector<16x512xbf16>
    %cst_57 = arith.constant dense<0.000000e+00> : vector<16x32xf32>
    %83 = tpu.matmul %82, %79, %cst_57 {dimension_numbers = #tpu.dot_dimension_numbers<[1], [0], [0], [1], [0, 0, 1, 1], [], []>} : vector<16x512xbf16>, vector<512x32xbf16>, vector<16x32xf32> -> vector<16x32xf32>
    %84 = vector.broadcast %81 : vector<1x32xf32> to vector<16x32xf32>
    %85 = arith.addf %83, %84 : vector<16x32xf32>
    %86 = arith.addf %67, %85 : vector<16x32xf32>
    %c0_58 = arith.constant 0 : index
    %c0_59 = arith.constant 0 : index
    %c0_60 = arith.constant 0 : index
    %87 = vector.load %arg38[%c0_58, %c0_59, %c0_60] : memref<3x1x32xf32, #tpu.memory_space<vmem>>, vector<1x1x32xf32>
    %88 = vector.shape_cast %87 : vector<1x1x32xf32> to vector<1x32xf32>
    %c0_61 = arith.constant 0 : index
    %c0_62 = arith.constant 0 : index
    %c0_63 = arith.constant 0 : index
    %89 = vector.load %arg37[%c0_61, %c0_62, %c0_63] : memref<3x1x32xf32, #tpu.memory_space<vmem>>, vector<1x1x32xf32>
    %90 = vector.shape_cast %89 : vector<1x1x32xf32> to vector<1x32xf32>
    %cst_64 = arith.constant dense<0.000000e+00> : vector<16xf32>
    %91 = vector.multi_reduction <add>, %86, %cst_64 [1] : vector<16x32xf32> to vector<16xf32>
    %92 = vector.shape_cast %91 : vector<16xf32> to vector<16x1xf32>
    %cst_65 = arith.constant 3.200000e+01 : f32
    %93 = vector.broadcast %cst_65 : f32 to vector<16x1xf32>
    %94 = arith.divf %92, %93 : vector<16x1xf32>
    %95 = arith.mulf %86, %86 : vector<16x32xf32>
    %cst_66 = arith.constant dense<0.000000e+00> : vector<16xf32>
    %96 = vector.multi_reduction <add>, %95, %cst_66 [1] : vector<16x32xf32> to vector<16xf32>
    %97 = vector.shape_cast %96 : vector<16xf32> to vector<16x1xf32>
    %cst_67 = arith.constant 3.200000e+01 : f32
    %98 = vector.broadcast %cst_67 : f32 to vector<16x1xf32>
    %99 = arith.divf %97, %98 : vector<16x1xf32>
    %100 = arith.mulf %94, %94 : vector<16x1xf32>
    %101 = arith.subf %99, %100 : vector<16x1xf32>
    %102 = vector.broadcast %94 : vector<16x1xf32> to vector<16x32xf32>
    %103 = arith.subf %86, %102 : vector<16x32xf32>
    %cst_68 = arith.constant 9.99999974E-6 : f32
    %104 = vector.broadcast %cst_68 : f32 to vector<16x1xf32>
    %105 = arith.addf %101, %104 : vector<16x1xf32>
    %106 = math.rsqrt %105 : vector<16x1xf32>
    %107 = vector.broadcast %106 : vector<16x1xf32> to vector<16x32xf32>
    %108 = arith.mulf %103, %107 : vector<16x32xf32>
    %109 = vector.broadcast %88 : vector<1x32xf32> to vector<16x32xf32>
    %110 = arith.mulf %108, %109 : vector<16x32xf32>
    %111 = vector.broadcast %90 : vector<1x32xf32> to vector<16x32xf32>
    %112 = arith.addf %110, %111 : vector<16x32xf32>
    %c1 = arith.constant 1 : index
    %c0_69 = arith.constant 0 : index
    %c0_70 = arith.constant 0 : index
    %113 = vector.load %arg42[%c1, %c0_69, %c0_70] : memref<3x32x96xbf16, #tpu.memory_space<vmem>>, vector<1x32x96xbf16>
    %114 = vector.shape_cast %113 : vector<1x32x96xbf16> to vector<32x96xbf16>
    %c1_71 = arith.constant 1 : index
    %c0_72 = arith.constant 0 : index
    %c0_73 = arith.constant 0 : index
    %115 = vector.load %arg41[%c1_71, %c0_72, %c0_73] : memref<3x1x96xf32, #tpu.memory_space<vmem>>, vector<1x1x96xf32>
    %116 = vector.shape_cast %115 : vector<1x1x96xf32> to vector<1x96xf32>
    %c1_74 = arith.constant 1 : index
    %c0_75 = arith.constant 0 : index
    %c0_76 = arith.constant 0 : index
    %117 = vector.load %arg40[%c1_74, %c0_75, %c0_76] : memref<3x32x32xbf16, #tpu.memory_space<vmem>>, vector<1x32x32xbf16>
    %118 = vector.shape_cast %117 : vector<1x32x32xbf16> to vector<32x32xbf16>
    %c1_77 = arith.constant 1 : index
    %c0_78 = arith.constant 0 : index
    %c0_79 = arith.constant 0 : index
    %119 = vector.load %arg39[%c1_77, %c0_78, %c0_79] : memref<3x1x32xf32, #tpu.memory_space<vmem>>, vector<1x1x32xf32>
    %120 = vector.shape_cast %119 : vector<1x1x32xf32> to vector<1x32xf32>
    %121 = arith.truncf %112 : vector<16x32xf32> to vector<16x32xbf16>
    %cst_80 = arith.constant dense<0.000000e+00> : vector<16x96xf32>
    %122 = tpu.matmul %121, %114, %cst_80 {dimension_numbers = #tpu.dot_dimension_numbers<[1], [0], [0], [1], [0, 0, 1, 1], [], []>} : vector<16x32xbf16>, vector<32x96xbf16>, vector<16x96xf32> -> vector<16x96xf32>
    %123 = vector.broadcast %116 : vector<1x96xf32> to vector<16x96xf32>
    %124 = arith.addf %122, %123 : vector<16x96xf32>
    %125 = vector.extract_strided_slice %124 {offsets = [0, 0], sizes = [16, 32], strides = [1, 1]} : vector<16x96xf32> to vector<16x32xf32>
    %126 = vector.extract_strided_slice %124 {offsets = [0, 32], sizes = [16, 32], strides = [1, 1]} : vector<16x96xf32> to vector<16x32xf32>
    %127 = vector.extract_strided_slice %124 {offsets = [0, 64], sizes = [16, 32], strides = [1, 1]} : vector<16x96xf32> to vector<16x32xf32>
    %128 = tpu.concatenate %126, %126, %126, %126, %126, %126, %126, %126 in 0 : vector<16x32xf32>, vector<16x32xf32>, vector<16x32xf32>, vector<16x32xf32>, vector<16x32xf32>, vector<16x32xf32>, vector<16x32xf32>, vector<16x32xf32> -> vector<128x32xf32>
    %129 = arith.mulf %128, %3 : vector<128x32xf32>
    %130 = tpu.concatenate %127, %127, %127, %127, %127, %127, %127, %127 in 0 : vector<16x32xf32>, vector<16x32xf32>, vector<16x32xf32>, vector<16x32xf32>, vector<16x32xf32>, vector<16x32xf32>, vector<16x32xf32>, vector<16x32xf32> -> vector<128x32xf32>
    %131 = arith.mulf %130, %3 : vector<128x32xf32>
    %cst_81 = arith.constant dense<0.000000e+00> : vector<16x128xf32>
    %132 = tpu.matmul %125, %129, %cst_81 {dimension_numbers = #tpu.dot_dimension_numbers<[1], [1], [0], [0], [0, 0, 1, 0], [], []>} : vector<16x32xf32>, vector<128x32xf32>, vector<16x128xf32> -> vector<16x128xf32>
    %133 = arith.addf %132, %0 : vector<16x128xf32>
    %cst_82 = arith.constant dense<0xFF800000> : vector<16xf32>
    %134 = vector.multi_reduction <maximumf>, %133, %cst_82 [1] : vector<16x128xf32> to vector<16xf32>
    %135 = vector.shape_cast %134 : vector<16xf32> to vector<16x1xf32>
    %136 = vector.broadcast %135 : vector<16x1xf32> to vector<16x128xf32>
    %137 = arith.subf %133, %136 : vector<16x128xf32>
    %138 = math.exp %137 : vector<16x128xf32>
    %cst_83 = arith.constant dense<0.000000e+00> : vector<16x128xf32>
    %139 = tpu.matmul %138, %5, %cst_83 {dimension_numbers = #tpu.dot_dimension_numbers<[1], [0], [0], [1], [0, 0, 1, 1], [], []>} : vector<16x128xf32>, vector<128x128xf32>, vector<16x128xf32> -> vector<16x128xf32>
    %140 = arith.divf %138, %139 : vector<16x128xf32>
    %cst_84 = arith.constant dense<0.000000e+00> : vector<16x32xf32>
    %141 = tpu.matmul %140, %131, %cst_84 {dimension_numbers = #tpu.dot_dimension_numbers<[1], [0], [0], [1], [0, 0, 1, 1], [], []>} : vector<16x128xf32>, vector<128x32xf32>, vector<16x32xf32> -> vector<16x32xf32>
    %142 = arith.truncf %141 : vector<16x32xf32> to vector<16x32xbf16>
    %cst_85 = arith.constant dense<0.000000e+00> : vector<16x32xf32>
    %143 = tpu.matmul %142, %118, %cst_85 {dimension_numbers = #tpu.dot_dimension_numbers<[1], [0], [0], [1], [0, 0, 1, 1], [], []>} : vector<16x32xbf16>, vector<32x32xbf16>, vector<16x32xf32> -> vector<16x32xf32>
    %144 = vector.broadcast %120 : vector<1x32xf32> to vector<16x32xf32>
    %145 = arith.addf %143, %144 : vector<16x32xf32>
    %146 = arith.addf %112, %145 : vector<16x32xf32>
    %c1_86 = arith.constant 1 : index
    %c0_87 = arith.constant 0 : index
    %c0_88 = arith.constant 0 : index
    %147 = vector.load %arg36[%c1_86, %c0_87, %c0_88] : memref<3x1x32xf32, #tpu.memory_space<vmem>>, vector<1x1x32xf32>
    %148 = vector.shape_cast %147 : vector<1x1x32xf32> to vector<1x32xf32>
    %c1_89 = arith.constant 1 : index
    %c0_90 = arith.constant 0 : index
    %c0_91 = arith.constant 0 : index
    %149 = vector.load %arg35[%c1_89, %c0_90, %c0_91] : memref<3x1x32xf32, #tpu.memory_space<vmem>>, vector<1x1x32xf32>
    %150 = vector.shape_cast %149 : vector<1x1x32xf32> to vector<1x32xf32>
    %cst_92 = arith.constant dense<0.000000e+00> : vector<16xf32>
    %151 = vector.multi_reduction <add>, %146, %cst_92 [1] : vector<16x32xf32> to vector<16xf32>
    %152 = vector.shape_cast %151 : vector<16xf32> to vector<16x1xf32>
    %cst_93 = arith.constant 3.200000e+01 : f32
    %153 = vector.broadcast %cst_93 : f32 to vector<16x1xf32>
    %154 = arith.divf %152, %153 : vector<16x1xf32>
    %155 = arith.mulf %146, %146 : vector<16x32xf32>
    %cst_94 = arith.constant dense<0.000000e+00> : vector<16xf32>
    %156 = vector.multi_reduction <add>, %155, %cst_94 [1] : vector<16x32xf32> to vector<16xf32>
    %157 = vector.shape_cast %156 : vector<16xf32> to vector<16x1xf32>
    %cst_95 = arith.constant 3.200000e+01 : f32
    %158 = vector.broadcast %cst_95 : f32 to vector<16x1xf32>
    %159 = arith.divf %157, %158 : vector<16x1xf32>
    %160 = arith.mulf %154, %154 : vector<16x1xf32>
    %161 = arith.subf %159, %160 : vector<16x1xf32>
    %162 = vector.broadcast %154 : vector<16x1xf32> to vector<16x32xf32>
    %163 = arith.subf %146, %162 : vector<16x32xf32>
    %cst_96 = arith.constant 9.99999974E-6 : f32
    %164 = vector.broadcast %cst_96 : f32 to vector<16x1xf32>
    %165 = arith.addf %161, %164 : vector<16x1xf32>
    %166 = math.rsqrt %165 : vector<16x1xf32>
    %167 = vector.broadcast %166 : vector<16x1xf32> to vector<16x32xf32>
    %168 = arith.mulf %163, %167 : vector<16x32xf32>
    %169 = vector.broadcast %148 : vector<1x32xf32> to vector<16x32xf32>
    %170 = arith.mulf %168, %169 : vector<16x32xf32>
    %171 = vector.broadcast %150 : vector<1x32xf32> to vector<16x32xf32>
    %172 = arith.addf %170, %171 : vector<16x32xf32>
    %c1_97 = arith.constant 1 : index
    %c0_98 = arith.constant 0 : index
    %c0_99 = arith.constant 0 : index
    %173 = vector.load %arg32[%c1_97, %c0_98, %c0_99] : memref<3x32x512xbf16, #tpu.memory_space<vmem>>, vector<1x32x512xbf16>
    %174 = vector.shape_cast %173 : vector<1x32x512xbf16> to vector<32x512xbf16>
    %c1_100 = arith.constant 1 : index
    %c0_101 = arith.constant 0 : index
    %c0_102 = arith.constant 0 : index
    %175 = vector.load %arg31[%c1_100, %c0_101, %c0_102] : memref<3x1x512xf32, #tpu.memory_space<vmem>>, vector<1x1x512xf32>
    %176 = vector.shape_cast %175 : vector<1x1x512xf32> to vector<1x512xf32>
    %177 = arith.truncf %172 : vector<16x32xf32> to vector<16x32xbf16>
    %cst_103 = arith.constant dense<0.000000e+00> : vector<16x512xf32>
    %178 = tpu.matmul %177, %174, %cst_103 {dimension_numbers = #tpu.dot_dimension_numbers<[1], [0], [0], [1], [0, 0, 1, 1], [], []>} : vector<16x32xbf16>, vector<32x512xbf16>, vector<16x512xf32> -> vector<16x512xf32>
    %179 = vector.broadcast %176 : vector<1x512xf32> to vector<16x512xf32>
    %180 = arith.addf %178, %179 : vector<16x512xf32>
    %cst_104 = arith.constant 0.000000e+00 : f32
    %181 = vector.broadcast %cst_104 : f32 to vector<16x512xf32>
    %182 = arith.maximumf %180, %181 : vector<16x512xf32>
    %c1_105 = arith.constant 1 : index
    %c0_106 = arith.constant 0 : index
    %c0_107 = arith.constant 0 : index
    %183 = vector.load %arg34[%c1_105, %c0_106, %c0_107] : memref<3x512x32xbf16, #tpu.memory_space<vmem>>, vector<1x512x32xbf16>
    %184 = vector.shape_cast %183 : vector<1x512x32xbf16> to vector<512x32xbf16>
    %c1_108 = arith.constant 1 : index
    %c0_109 = arith.constant 0 : index
    %c0_110 = arith.constant 0 : index
    %185 = vector.load %arg33[%c1_108, %c0_109, %c0_110] : memref<3x1x32xf32, #tpu.memory_space<vmem>>, vector<1x1x32xf32>
    %186 = vector.shape_cast %185 : vector<1x1x32xf32> to vector<1x32xf32>
    %187 = arith.truncf %182 : vector<16x512xf32> to vector<16x512xbf16>
    %cst_111 = arith.constant dense<0.000000e+00> : vector<16x32xf32>
    %188 = tpu.matmul %187, %184, %cst_111 {dimension_numbers = #tpu.dot_dimension_numbers<[1], [0], [0], [1], [0, 0, 1, 1], [], []>} : vector<16x512xbf16>, vector<512x32xbf16>, vector<16x32xf32> -> vector<16x32xf32>
    %189 = vector.broadcast %186 : vector<1x32xf32> to vector<16x32xf32>
    %190 = arith.addf %188, %189 : vector<16x32xf32>
    %191 = arith.addf %172, %190 : vector<16x32xf32>
    %c1_112 = arith.constant 1 : index
    %c0_113 = arith.constant 0 : index
    %c0_114 = arith.constant 0 : index
    %192 = vector.load %arg38[%c1_112, %c0_113, %c0_114] : memref<3x1x32xf32, #tpu.memory_space<vmem>>, vector<1x1x32xf32>
    %193 = vector.shape_cast %192 : vector<1x1x32xf32> to vector<1x32xf32>
    %c1_115 = arith.constant 1 : index
    %c0_116 = arith.constant 0 : index
    %c0_117 = arith.constant 0 : index
    %194 = vector.load %arg37[%c1_115, %c0_116, %c0_117] : memref<3x1x32xf32, #tpu.memory_space<vmem>>, vector<1x1x32xf32>
    %195 = vector.shape_cast %194 : vector<1x1x32xf32> to vector<1x32xf32>
    %cst_118 = arith.constant dense<0.000000e+00> : vector<16xf32>
    %196 = vector.multi_reduction <add>, %191, %cst_118 [1] : vector<16x32xf32> to vector<16xf32>
    %197 = vector.shape_cast %196 : vector<16xf32> to vector<16x1xf32>
    %cst_119 = arith.constant 3.200000e+01 : f32
    %198 = vector.broadcast %cst_119 : f32 to vector<16x1xf32>
    %199 = arith.divf %197, %198 : vector<16x1xf32>
    %200 = arith.mulf %191, %191 : vector<16x32xf32>
    %cst_120 = arith.constant dense<0.000000e+00> : vector<16xf32>
    %201 = vector.multi_reduction <add>, %200, %cst_120 [1] : vector<16x32xf32> to vector<16xf32>
    %202 = vector.shape_cast %201 : vector<16xf32> to vector<16x1xf32>
    %cst_121 = arith.constant 3.200000e+01 : f32
    %203 = vector.broadcast %cst_121 : f32 to vector<16x1xf32>
    %204 = arith.divf %202, %203 : vector<16x1xf32>
    %205 = arith.mulf %199, %199 : vector<16x1xf32>
    %206 = arith.subf %204, %205 : vector<16x1xf32>
    %207 = vector.broadcast %199 : vector<16x1xf32> to vector<16x32xf32>
    %208 = arith.subf %191, %207 : vector<16x32xf32>
    %cst_122 = arith.constant 9.99999974E-6 : f32
    %209 = vector.broadcast %cst_122 : f32 to vector<16x1xf32>
    %210 = arith.addf %206, %209 : vector<16x1xf32>
    %211 = math.rsqrt %210 : vector<16x1xf32>
    %212 = vector.broadcast %211 : vector<16x1xf32> to vector<16x32xf32>
    %213 = arith.mulf %208, %212 : vector<16x32xf32>
    %214 = vector.broadcast %193 : vector<1x32xf32> to vector<16x32xf32>
    %215 = arith.mulf %213, %214 : vector<16x32xf32>
    %216 = vector.broadcast %195 : vector<1x32xf32> to vector<16x32xf32>
    %217 = arith.addf %215, %216 : vector<16x32xf32>
    %c2 = arith.constant 2 : index
    %c0_123 = arith.constant 0 : index
    %c0_124 = arith.constant 0 : index
    %218 = vector.load %arg42[%c2, %c0_123, %c0_124] : memref<3x32x96xbf16, #tpu.memory_space<vmem>>, vector<1x32x96xbf16>
    %219 = vector.shape_cast %218 : vector<1x32x96xbf16> to vector<32x96xbf16>
    %c2_125 = arith.constant 2 : index
    %c0_126 = arith.constant 0 : index
    %c0_127 = arith.constant 0 : index
    %220 = vector.load %arg41[%c2_125, %c0_126, %c0_127] : memref<3x1x96xf32, #tpu.memory_space<vmem>>, vector<1x1x96xf32>
    %221 = vector.shape_cast %220 : vector<1x1x96xf32> to vector<1x96xf32>
    %c2_128 = arith.constant 2 : index
    %c0_129 = arith.constant 0 : index
    %c0_130 = arith.constant 0 : index
    %222 = vector.load %arg40[%c2_128, %c0_129, %c0_130] : memref<3x32x32xbf16, #tpu.memory_space<vmem>>, vector<1x32x32xbf16>
    %223 = vector.shape_cast %222 : vector<1x32x32xbf16> to vector<32x32xbf16>
    %c2_131 = arith.constant 2 : index
    %c0_132 = arith.constant 0 : index
    %c0_133 = arith.constant 0 : index
    %224 = vector.load %arg39[%c2_131, %c0_132, %c0_133] : memref<3x1x32xf32, #tpu.memory_space<vmem>>, vector<1x1x32xf32>
    %225 = vector.shape_cast %224 : vector<1x1x32xf32> to vector<1x32xf32>
    %226 = arith.truncf %217 : vector<16x32xf32> to vector<16x32xbf16>
    %cst_134 = arith.constant dense<0.000000e+00> : vector<16x96xf32>
    %227 = tpu.matmul %226, %219, %cst_134 {dimension_numbers = #tpu.dot_dimension_numbers<[1], [0], [0], [1], [0, 0, 1, 1], [], []>} : vector<16x32xbf16>, vector<32x96xbf16>, vector<16x96xf32> -> vector<16x96xf32>
    %228 = vector.broadcast %221 : vector<1x96xf32> to vector<16x96xf32>
    %229 = arith.addf %227, %228 : vector<16x96xf32>
    %230 = vector.extract_strided_slice %229 {offsets = [0, 0], sizes = [16, 32], strides = [1, 1]} : vector<16x96xf32> to vector<16x32xf32>
    %231 = vector.extract_strided_slice %229 {offsets = [0, 32], sizes = [16, 32], strides = [1, 1]} : vector<16x96xf32> to vector<16x32xf32>
    %232 = vector.extract_strided_slice %229 {offsets = [0, 64], sizes = [16, 32], strides = [1, 1]} : vector<16x96xf32> to vector<16x32xf32>
    %233 = tpu.concatenate %231, %231, %231, %231, %231, %231, %231, %231 in 0 : vector<16x32xf32>, vector<16x32xf32>, vector<16x32xf32>, vector<16x32xf32>, vector<16x32xf32>, vector<16x32xf32>, vector<16x32xf32>, vector<16x32xf32> -> vector<128x32xf32>
    %234 = arith.mulf %233, %3 : vector<128x32xf32>
    %235 = tpu.concatenate %232, %232, %232, %232, %232, %232, %232, %232 in 0 : vector<16x32xf32>, vector<16x32xf32>, vector<16x32xf32>, vector<16x32xf32>, vector<16x32xf32>, vector<16x32xf32>, vector<16x32xf32>, vector<16x32xf32> -> vector<128x32xf32>
    %236 = arith.mulf %235, %3 : vector<128x32xf32>
    %cst_135 = arith.constant dense<0.000000e+00> : vector<16x128xf32>
    %237 = tpu.matmul %230, %234, %cst_135 {dimension_numbers = #tpu.dot_dimension_numbers<[1], [1], [0], [0], [0, 0, 1, 0], [], []>} : vector<16x32xf32>, vector<128x32xf32>, vector<16x128xf32> -> vector<16x128xf32>
    %238 = arith.addf %237, %0 : vector<16x128xf32>
    %cst_136 = arith.constant dense<0xFF800000> : vector<16xf32>
    %239 = vector.multi_reduction <maximumf>, %238, %cst_136 [1] : vector<16x128xf32> to vector<16xf32>
    %240 = vector.shape_cast %239 : vector<16xf32> to vector<16x1xf32>
    %241 = vector.broadcast %240 : vector<16x1xf32> to vector<16x128xf32>
    %242 = arith.subf %238, %241 : vector<16x128xf32>
    %243 = math.exp %242 : vector<16x128xf32>
    %cst_137 = arith.constant dense<0.000000e+00> : vector<16x128xf32>
    %244 = tpu.matmul %243, %5, %cst_137 {dimension_numbers = #tpu.dot_dimension_numbers<[1], [0], [0], [1], [0, 0, 1, 1], [], []>} : vector<16x128xf32>, vector<128x128xf32>, vector<16x128xf32> -> vector<16x128xf32>
    %245 = arith.divf %243, %244 : vector<16x128xf32>
    %cst_138 = arith.constant dense<0.000000e+00> : vector<16x32xf32>
    %246 = tpu.matmul %245, %236, %cst_138 {dimension_numbers = #tpu.dot_dimension_numbers<[1], [0], [0], [1], [0, 0, 1, 1], [], []>} : vector<16x128xf32>, vector<128x32xf32>, vector<16x32xf32> -> vector<16x32xf32>
    %247 = arith.truncf %246 : vector<16x32xf32> to vector<16x32xbf16>
    %cst_139 = arith.constant dense<0.000000e+00> : vector<16x32xf32>
    %248 = tpu.matmul %247, %223, %cst_139 {dimension_numbers = #tpu.dot_dimension_numbers<[1], [0], [0], [1], [0, 0, 1, 1], [], []>} : vector<16x32xbf16>, vector<32x32xbf16>, vector<16x32xf32> -> vector<16x32xf32>
    %249 = vector.broadcast %225 : vector<1x32xf32> to vector<16x32xf32>
    %250 = arith.addf %248, %249 : vector<16x32xf32>
    %251 = arith.addf %217, %250 : vector<16x32xf32>
    %c2_140 = arith.constant 2 : index
    %c0_141 = arith.constant 0 : index
    %c0_142 = arith.constant 0 : index
    %252 = vector.load %arg36[%c2_140, %c0_141, %c0_142] : memref<3x1x32xf32, #tpu.memory_space<vmem>>, vector<1x1x32xf32>
    %253 = vector.shape_cast %252 : vector<1x1x32xf32> to vector<1x32xf32>
    %c2_143 = arith.constant 2 : index
    %c0_144 = arith.constant 0 : index
    %c0_145 = arith.constant 0 : index
    %254 = vector.load %arg35[%c2_143, %c0_144, %c0_145] : memref<3x1x32xf32, #tpu.memory_space<vmem>>, vector<1x1x32xf32>
    %255 = vector.shape_cast %254 : vector<1x1x32xf32> to vector<1x32xf32>
    %cst_146 = arith.constant dense<0.000000e+00> : vector<16xf32>
    %256 = vector.multi_reduction <add>, %251, %cst_146 [1] : vector<16x32xf32> to vector<16xf32>
    %257 = vector.shape_cast %256 : vector<16xf32> to vector<16x1xf32>
    %cst_147 = arith.constant 3.200000e+01 : f32
    %258 = vector.broadcast %cst_147 : f32 to vector<16x1xf32>
    %259 = arith.divf %257, %258 : vector<16x1xf32>
    %260 = arith.mulf %251, %251 : vector<16x32xf32>
    %cst_148 = arith.constant dense<0.000000e+00> : vector<16xf32>
    %261 = vector.multi_reduction <add>, %260, %cst_148 [1] : vector<16x32xf32> to vector<16xf32>
    %262 = vector.shape_cast %261 : vector<16xf32> to vector<16x1xf32>
    %cst_149 = arith.constant 3.200000e+01 : f32
    %263 = vector.broadcast %cst_149 : f32 to vector<16x1xf32>
    %264 = arith.divf %262, %263 : vector<16x1xf32>
    %265 = arith.mulf %259, %259 : vector<16x1xf32>
    %266 = arith.subf %264, %265 : vector<16x1xf32>
    %267 = vector.broadcast %259 : vector<16x1xf32> to vector<16x32xf32>
    %268 = arith.subf %251, %267 : vector<16x32xf32>
    %cst_150 = arith.constant 9.99999974E-6 : f32
    %269 = vector.broadcast %cst_150 : f32 to vector<16x1xf32>
    %270 = arith.addf %266, %269 : vector<16x1xf32>
    %271 = math.rsqrt %270 : vector<16x1xf32>
    %272 = vector.broadcast %271 : vector<16x1xf32> to vector<16x32xf32>
    %273 = arith.mulf %268, %272 : vector<16x32xf32>
    %274 = vector.broadcast %253 : vector<1x32xf32> to vector<16x32xf32>
    %275 = arith.mulf %273, %274 : vector<16x32xf32>
    %276 = vector.broadcast %255 : vector<1x32xf32> to vector<16x32xf32>
    %277 = arith.addf %275, %276 : vector<16x32xf32>
    %c2_151 = arith.constant 2 : index
    %c0_152 = arith.constant 0 : index
    %c0_153 = arith.constant 0 : index
    %278 = vector.load %arg32[%c2_151, %c0_152, %c0_153] : memref<3x32x512xbf16, #tpu.memory_space<vmem>>, vector<1x32x512xbf16>
    %279 = vector.shape_cast %278 : vector<1x32x512xbf16> to vector<32x512xbf16>
    %c2_154 = arith.constant 2 : index
    %c0_155 = arith.constant 0 : index
    %c0_156 = arith.constant 0 : index
    %280 = vector.load %arg31[%c2_154, %c0_155, %c0_156] : memref<3x1x512xf32, #tpu.memory_space<vmem>>, vector<1x1x512xf32>
    %281 = vector.shape_cast %280 : vector<1x1x512xf32> to vector<1x512xf32>
    %282 = arith.truncf %277 : vector<16x32xf32> to vector<16x32xbf16>
    %cst_157 = arith.constant dense<0.000000e+00> : vector<16x512xf32>
    %283 = tpu.matmul %282, %279, %cst_157 {dimension_numbers = #tpu.dot_dimension_numbers<[1], [0], [0], [1], [0, 0, 1, 1], [], []>} : vector<16x32xbf16>, vector<32x512xbf16>, vector<16x512xf32> -> vector<16x512xf32>
    %284 = vector.broadcast %281 : vector<1x512xf32> to vector<16x512xf32>
    %285 = arith.addf %283, %284 : vector<16x512xf32>
    %cst_158 = arith.constant 0.000000e+00 : f32
    %286 = vector.broadcast %cst_158 : f32 to vector<16x512xf32>
    %287 = arith.maximumf %285, %286 : vector<16x512xf32>
    %c2_159 = arith.constant 2 : index
    %c0_160 = arith.constant 0 : index
    %c0_161 = arith.constant 0 : index
    %288 = vector.load %arg34[%c2_159, %c0_160, %c0_161] : memref<3x512x32xbf16, #tpu.memory_space<vmem>>, vector<1x512x32xbf16>
    %289 = vector.shape_cast %288 : vector<1x512x32xbf16> to vector<512x32xbf16>
    %c2_162 = arith.constant 2 : index
    %c0_163 = arith.constant 0 : index
    %c0_164 = arith.constant 0 : index
    %290 = vector.load %arg33[%c2_162, %c0_163, %c0_164] : memref<3x1x32xf32, #tpu.memory_space<vmem>>, vector<1x1x32xf32>
    %291 = vector.shape_cast %290 : vector<1x1x32xf32> to vector<1x32xf32>
    %292 = arith.truncf %287 : vector<16x512xf32> to vector<16x512xbf16>
    %cst_165 = arith.constant dense<0.000000e+00> : vector<16x32xf32>
    %293 = tpu.matmul %292, %289, %cst_165 {dimension_numbers = #tpu.dot_dimension_numbers<[1], [0], [0], [1], [0, 0, 1, 1], [], []>} : vector<16x512xbf16>, vector<512x32xbf16>, vector<16x32xf32> -> vector<16x32xf32>
    %294 = vector.broadcast %291 : vector<1x32xf32> to vector<16x32xf32>
    %295 = arith.addf %293, %294 : vector<16x32xf32>
    %296 = arith.addf %277, %295 : vector<16x32xf32>
    %c2_166 = arith.constant 2 : index
    %c0_167 = arith.constant 0 : index
    %c0_168 = arith.constant 0 : index
    %297 = vector.load %arg38[%c2_166, %c0_167, %c0_168] : memref<3x1x32xf32, #tpu.memory_space<vmem>>, vector<1x1x32xf32>
    %298 = vector.shape_cast %297 : vector<1x1x32xf32> to vector<1x32xf32>
    %c2_169 = arith.constant 2 : index
    %c0_170 = arith.constant 0 : index
    %c0_171 = arith.constant 0 : index
    %299 = vector.load %arg37[%c2_169, %c0_170, %c0_171] : memref<3x1x32xf32, #tpu.memory_space<vmem>>, vector<1x1x32xf32>
    %300 = vector.shape_cast %299 : vector<1x1x32xf32> to vector<1x32xf32>
    %cst_172 = arith.constant dense<0.000000e+00> : vector<16xf32>
    %301 = vector.multi_reduction <add>, %296, %cst_172 [1] : vector<16x32xf32> to vector<16xf32>
    %302 = vector.shape_cast %301 : vector<16xf32> to vector<16x1xf32>
    %cst_173 = arith.constant 3.200000e+01 : f32
    %303 = vector.broadcast %cst_173 : f32 to vector<16x1xf32>
    %304 = arith.divf %302, %303 : vector<16x1xf32>
    %305 = arith.mulf %296, %296 : vector<16x32xf32>
    %cst_174 = arith.constant dense<0.000000e+00> : vector<16xf32>
    %306 = vector.multi_reduction <add>, %305, %cst_174 [1] : vector<16x32xf32> to vector<16xf32>
    %307 = vector.shape_cast %306 : vector<16xf32> to vector<16x1xf32>
    %cst_175 = arith.constant 3.200000e+01 : f32
    %308 = vector.broadcast %cst_175 : f32 to vector<16x1xf32>
    %309 = arith.divf %307, %308 : vector<16x1xf32>
    %310 = arith.mulf %304, %304 : vector<16x1xf32>
    %311 = arith.subf %309, %310 : vector<16x1xf32>
    %312 = vector.broadcast %304 : vector<16x1xf32> to vector<16x32xf32>
    %313 = arith.subf %296, %312 : vector<16x32xf32>
    %cst_176 = arith.constant 9.99999974E-6 : f32
    %314 = vector.broadcast %cst_176 : f32 to vector<16x1xf32>
    %315 = arith.addf %311, %314 : vector<16x1xf32>
    %316 = math.rsqrt %315 : vector<16x1xf32>
    %317 = vector.broadcast %316 : vector<16x1xf32> to vector<16x32xf32>
    %318 = arith.mulf %313, %317 : vector<16x32xf32>
    %319 = vector.broadcast %298 : vector<1x32xf32> to vector<16x32xf32>
    %320 = arith.mulf %318, %319 : vector<16x32xf32>
    %321 = vector.broadcast %300 : vector<1x32xf32> to vector<16x32xf32>
    %322 = arith.addf %320, %321 : vector<16x32xf32>
    %c0_177 = arith.constant 0 : index
    %c0_178 = arith.constant 0 : index
    %323 = vector.load %arg44[%c0_177, %c0_178] : memref<1x32xf32, #tpu.memory_space<vmem>>, vector<1x32xf32>
    %c0_179 = arith.constant 0 : index
    %c0_180 = arith.constant 0 : index
    %324 = vector.load %arg43[%c0_179, %c0_180] : memref<1x32xf32, #tpu.memory_space<vmem>>, vector<1x32xf32>
    %cst_181 = arith.constant dense<0.000000e+00> : vector<16xf32>
    %325 = vector.multi_reduction <add>, %322, %cst_181 [1] : vector<16x32xf32> to vector<16xf32>
    %326 = vector.shape_cast %325 : vector<16xf32> to vector<16x1xf32>
    %cst_182 = arith.constant 3.200000e+01 : f32
    %327 = vector.broadcast %cst_182 : f32 to vector<16x1xf32>
    %328 = arith.divf %326, %327 : vector<16x1xf32>
    %329 = arith.mulf %322, %322 : vector<16x32xf32>
    %cst_183 = arith.constant dense<0.000000e+00> : vector<16xf32>
    %330 = vector.multi_reduction <add>, %329, %cst_183 [1] : vector<16x32xf32> to vector<16xf32>
    %331 = vector.shape_cast %330 : vector<16xf32> to vector<16x1xf32>
    %cst_184 = arith.constant 3.200000e+01 : f32
    %332 = vector.broadcast %cst_184 : f32 to vector<16x1xf32>
    %333 = arith.divf %331, %332 : vector<16x1xf32>
    %334 = arith.mulf %328, %328 : vector<16x1xf32>
    %335 = arith.subf %333, %334 : vector<16x1xf32>
    %336 = vector.broadcast %328 : vector<16x1xf32> to vector<16x32xf32>
    %337 = arith.subf %322, %336 : vector<16x32xf32>
    %cst_185 = arith.constant 9.99999974E-6 : f32
    %338 = vector.broadcast %cst_185 : f32 to vector<16x1xf32>
    %339 = arith.addf %335, %338 : vector<16x1xf32>
    %340 = math.rsqrt %339 : vector<16x1xf32>
    %341 = vector.broadcast %340 : vector<16x1xf32> to vector<16x32xf32>
    %342 = arith.mulf %337, %341 : vector<16x32xf32>
    %343 = vector.broadcast %323 : vector<1x32xf32> to vector<16x32xf32>
    %344 = arith.mulf %342, %343 : vector<16x32xf32>
    %345 = vector.broadcast %324 : vector<1x32xf32> to vector<16x32xf32>
    %346 = arith.addf %344, %345 : vector<16x32xf32>
    %c0_186 = arith.constant 0 : index
    %c0_187 = arith.constant 0 : index
    %347 = vector.load %arg1[%c0_186, %c0_187] : memref<16x32xf32, #tpu.memory_space<vmem>>, vector<16x32xf32>
    %c0_188 = arith.constant 0 : index
    %c0_189 = arith.constant 0 : index
    %c0_190 = arith.constant 0 : index
    %348 = vector.load %arg28[%c0_188, %c0_189, %c0_190] : memref<3x32x96xbf16, #tpu.memory_space<vmem>>, vector<1x32x96xbf16>
    %349 = vector.shape_cast %348 : vector<1x32x96xbf16> to vector<32x96xbf16>
    %c0_191 = arith.constant 0 : index
    %c0_192 = arith.constant 0 : index
    %c0_193 = arith.constant 0 : index
    %350 = vector.load %arg27[%c0_191, %c0_192, %c0_193] : memref<3x1x96xf32, #tpu.memory_space<vmem>>, vector<1x1x96xf32>
    %351 = vector.shape_cast %350 : vector<1x1x96xf32> to vector<1x96xf32>
    %c0_194 = arith.constant 0 : index
    %c0_195 = arith.constant 0 : index
    %c0_196 = arith.constant 0 : index
    %352 = vector.load %arg26[%c0_194, %c0_195, %c0_196] : memref<3x32x32xbf16, #tpu.memory_space<vmem>>, vector<1x32x32xbf16>
    %353 = vector.shape_cast %352 : vector<1x32x32xbf16> to vector<32x32xbf16>
    %c0_197 = arith.constant 0 : index
    %c0_198 = arith.constant 0 : index
    %c0_199 = arith.constant 0 : index
    %354 = vector.load %arg25[%c0_197, %c0_198, %c0_199] : memref<3x1x32xf32, #tpu.memory_space<vmem>>, vector<1x1x32xf32>
    %355 = vector.shape_cast %354 : vector<1x1x32xf32> to vector<1x32xf32>
    %356 = arith.truncf %347 : vector<16x32xf32> to vector<16x32xbf16>
    %cst_200 = arith.constant dense<0.000000e+00> : vector<16x96xf32>
    %357 = tpu.matmul %356, %349, %cst_200 {dimension_numbers = #tpu.dot_dimension_numbers<[1], [0], [0], [1], [0, 0, 1, 1], [], []>} : vector<16x32xbf16>, vector<32x96xbf16>, vector<16x96xf32> -> vector<16x96xf32>
    %358 = vector.broadcast %351 : vector<1x96xf32> to vector<16x96xf32>
    %359 = arith.addf %357, %358 : vector<16x96xf32>
    %360 = vector.extract_strided_slice %359 {offsets = [0, 0], sizes = [16, 32], strides = [1, 1]} : vector<16x96xf32> to vector<16x32xf32>
    %361 = vector.extract_strided_slice %359 {offsets = [0, 32], sizes = [16, 32], strides = [1, 1]} : vector<16x96xf32> to vector<16x32xf32>
    %362 = vector.extract_strided_slice %359 {offsets = [0, 64], sizes = [16, 32], strides = [1, 1]} : vector<16x96xf32> to vector<16x32xf32>
    %363 = tpu.concatenate %361, %361, %361, %361, %361, %361, %361, %361 in 0 : vector<16x32xf32>, vector<16x32xf32>, vector<16x32xf32>, vector<16x32xf32>, vector<16x32xf32>, vector<16x32xf32>, vector<16x32xf32>, vector<16x32xf32> -> vector<128x32xf32>
    %364 = arith.mulf %363, %4 : vector<128x32xf32>
    %365 = tpu.concatenate %362, %362, %362, %362, %362, %362, %362, %362 in 0 : vector<16x32xf32>, vector<16x32xf32>, vector<16x32xf32>, vector<16x32xf32>, vector<16x32xf32>, vector<16x32xf32>, vector<16x32xf32>, vector<16x32xf32> -> vector<128x32xf32>
    %366 = arith.mulf %365, %4 : vector<128x32xf32>
    %cst_201 = arith.constant dense<0.000000e+00> : vector<16x128xf32>
    %367 = tpu.matmul %360, %364, %cst_201 {dimension_numbers = #tpu.dot_dimension_numbers<[1], [1], [0], [0], [0, 0, 1, 0], [], []>} : vector<16x32xf32>, vector<128x32xf32>, vector<16x128xf32> -> vector<16x128xf32>
    %368 = arith.addf %367, %1 : vector<16x128xf32>
    %cst_202 = arith.constant dense<0xFF800000> : vector<16xf32>
    %369 = vector.multi_reduction <maximumf>, %368, %cst_202 [1] : vector<16x128xf32> to vector<16xf32>
    %370 = vector.shape_cast %369 : vector<16xf32> to vector<16x1xf32>
    %371 = vector.broadcast %370 : vector<16x1xf32> to vector<16x128xf32>
    %372 = arith.subf %368, %371 : vector<16x128xf32>
    %373 = math.exp %372 : vector<16x128xf32>
    %cst_203 = arith.constant dense<0.000000e+00> : vector<16x128xf32>
    %374 = tpu.matmul %373, %6, %cst_203 {dimension_numbers = #tpu.dot_dimension_numbers<[1], [0], [0], [1], [0, 0, 1, 1], [], []>} : vector<16x128xf32>, vector<128x128xf32>, vector<16x128xf32> -> vector<16x128xf32>
    %375 = arith.divf %373, %374 : vector<16x128xf32>
    %cst_204 = arith.constant dense<0.000000e+00> : vector<16x32xf32>
    %376 = tpu.matmul %375, %366, %cst_204 {dimension_numbers = #tpu.dot_dimension_numbers<[1], [0], [0], [1], [0, 0, 1, 1], [], []>} : vector<16x128xf32>, vector<128x32xf32>, vector<16x32xf32> -> vector<16x32xf32>
    %377 = arith.truncf %376 : vector<16x32xf32> to vector<16x32xbf16>
    %cst_205 = arith.constant dense<0.000000e+00> : vector<16x32xf32>
    %378 = tpu.matmul %377, %353, %cst_205 {dimension_numbers = #tpu.dot_dimension_numbers<[1], [0], [0], [1], [0, 0, 1, 1], [], []>} : vector<16x32xbf16>, vector<32x32xbf16>, vector<16x32xf32> -> vector<16x32xf32>
    %379 = vector.broadcast %355 : vector<1x32xf32> to vector<16x32xf32>
    %380 = arith.addf %378, %379 : vector<16x32xf32>
    %381 = arith.addf %347, %380 : vector<16x32xf32>
    %c0_206 = arith.constant 0 : index
    %c0_207 = arith.constant 0 : index
    %c0_208 = arith.constant 0 : index
    %382 = vector.load %arg20[%c0_206, %c0_207, %c0_208] : memref<3x1x32xf32, #tpu.memory_space<vmem>>, vector<1x1x32xf32>
    %383 = vector.shape_cast %382 : vector<1x1x32xf32> to vector<1x32xf32>
    %c0_209 = arith.constant 0 : index
    %c0_210 = arith.constant 0 : index
    %c0_211 = arith.constant 0 : index
    %384 = vector.load %arg19[%c0_209, %c0_210, %c0_211] : memref<3x1x32xf32, #tpu.memory_space<vmem>>, vector<1x1x32xf32>
    %385 = vector.shape_cast %384 : vector<1x1x32xf32> to vector<1x32xf32>
    %cst_212 = arith.constant dense<0.000000e+00> : vector<16xf32>
    %386 = vector.multi_reduction <add>, %381, %cst_212 [1] : vector<16x32xf32> to vector<16xf32>
    %387 = vector.shape_cast %386 : vector<16xf32> to vector<16x1xf32>
    %cst_213 = arith.constant 3.200000e+01 : f32
    %388 = vector.broadcast %cst_213 : f32 to vector<16x1xf32>
    %389 = arith.divf %387, %388 : vector<16x1xf32>
    %390 = arith.mulf %381, %381 : vector<16x32xf32>
    %cst_214 = arith.constant dense<0.000000e+00> : vector<16xf32>
    %391 = vector.multi_reduction <add>, %390, %cst_214 [1] : vector<16x32xf32> to vector<16xf32>
    %392 = vector.shape_cast %391 : vector<16xf32> to vector<16x1xf32>
    %cst_215 = arith.constant 3.200000e+01 : f32
    %393 = vector.broadcast %cst_215 : f32 to vector<16x1xf32>
    %394 = arith.divf %392, %393 : vector<16x1xf32>
    %395 = arith.mulf %389, %389 : vector<16x1xf32>
    %396 = arith.subf %394, %395 : vector<16x1xf32>
    %397 = vector.broadcast %389 : vector<16x1xf32> to vector<16x32xf32>
    %398 = arith.subf %381, %397 : vector<16x32xf32>
    %cst_216 = arith.constant 9.99999974E-6 : f32
    %399 = vector.broadcast %cst_216 : f32 to vector<16x1xf32>
    %400 = arith.addf %396, %399 : vector<16x1xf32>
    %401 = math.rsqrt %400 : vector<16x1xf32>
    %402 = vector.broadcast %401 : vector<16x1xf32> to vector<16x32xf32>
    %403 = arith.mulf %398, %402 : vector<16x32xf32>
    %404 = vector.broadcast %383 : vector<1x32xf32> to vector<16x32xf32>
    %405 = arith.mulf %403, %404 : vector<16x32xf32>
    %406 = vector.broadcast %385 : vector<1x32xf32> to vector<16x32xf32>
    %407 = arith.addf %405, %406 : vector<16x32xf32>
    %c0_217 = arith.constant 0 : index
    %c0_218 = arith.constant 0 : index
    %c0_219 = arith.constant 0 : index
    %408 = vector.load %arg14[%c0_217, %c0_218, %c0_219] : memref<3x32x32xbf16, #tpu.memory_space<vmem>>, vector<1x32x32xbf16>
    %409 = vector.shape_cast %408 : vector<1x32x32xbf16> to vector<32x32xbf16>
    %c0_220 = arith.constant 0 : index
    %c0_221 = arith.constant 0 : index
    %c0_222 = arith.constant 0 : index
    %410 = vector.load %arg13[%c0_220, %c0_221, %c0_222] : memref<3x1x32xf32, #tpu.memory_space<vmem>>, vector<1x1x32xf32>
    %411 = vector.shape_cast %410 : vector<1x1x32xf32> to vector<1x32xf32>
    %c0_223 = arith.constant 0 : index
    %c0_224 = arith.constant 0 : index
    %c0_225 = arith.constant 0 : index
    %412 = vector.load %arg10[%c0_223, %c0_224, %c0_225] : memref<3x32x64xbf16, #tpu.memory_space<vmem>>, vector<1x32x64xbf16>
    %413 = vector.shape_cast %412 : vector<1x32x64xbf16> to vector<32x64xbf16>
    %c0_226 = arith.constant 0 : index
    %c0_227 = arith.constant 0 : index
    %c0_228 = arith.constant 0 : index
    %414 = vector.load %arg9[%c0_226, %c0_227, %c0_228] : memref<3x1x64xf32, #tpu.memory_space<vmem>>, vector<1x1x64xf32>
    %415 = vector.shape_cast %414 : vector<1x1x64xf32> to vector<1x64xf32>
    %c0_229 = arith.constant 0 : index
    %c0_230 = arith.constant 0 : index
    %c0_231 = arith.constant 0 : index
    %416 = vector.load %arg12[%c0_229, %c0_230, %c0_231] : memref<3x32x32xbf16, #tpu.memory_space<vmem>>, vector<1x32x32xbf16>
    %417 = vector.shape_cast %416 : vector<1x32x32xbf16> to vector<32x32xbf16>
    %c0_232 = arith.constant 0 : index
    %c0_233 = arith.constant 0 : index
    %c0_234 = arith.constant 0 : index
    %418 = vector.load %arg11[%c0_232, %c0_233, %c0_234] : memref<3x1x32xf32, #tpu.memory_space<vmem>>, vector<1x1x32xf32>
    %419 = vector.shape_cast %418 : vector<1x1x32xf32> to vector<1x32xf32>
    %420 = arith.truncf %407 : vector<16x32xf32> to vector<16x32xbf16>
    %cst_235 = arith.constant dense<0.000000e+00> : vector<16x32xf32>
    %421 = tpu.matmul %420, %409, %cst_235 {dimension_numbers = #tpu.dot_dimension_numbers<[1], [0], [0], [1], [0, 0, 1, 1], [], []>} : vector<16x32xbf16>, vector<32x32xbf16>, vector<16x32xf32> -> vector<16x32xf32>
    %422 = vector.broadcast %411 : vector<1x32xf32> to vector<16x32xf32>
    %423 = arith.addf %421, %422 : vector<16x32xf32>
    %424 = arith.truncf %346 : vector<16x32xf32> to vector<16x32xbf16>
    %cst_236 = arith.constant dense<0.000000e+00> : vector<16x64xf32>
    %425 = tpu.matmul %424, %413, %cst_236 {dimension_numbers = #tpu.dot_dimension_numbers<[1], [0], [0], [1], [0, 0, 1, 1], [], []>} : vector<16x32xbf16>, vector<32x64xbf16>, vector<16x64xf32> -> vector<16x64xf32>
    %426 = vector.broadcast %415 : vector<1x64xf32> to vector<16x64xf32>
    %427 = arith.addf %425, %426 : vector<16x64xf32>
    %428 = vector.extract_strided_slice %427 {offsets = [0, 0], sizes = [16, 32], strides = [1, 1]} : vector<16x64xf32> to vector<16x32xf32>
    %429 = vector.extract_strided_slice %427 {offsets = [0, 32], sizes = [16, 32], strides = [1, 1]} : vector<16x64xf32> to vector<16x32xf32>
    %430 = tpu.concatenate %428, %428, %428, %428, %428, %428, %428, %428 in 0 : vector<16x32xf32>, vector<16x32xf32>, vector<16x32xf32>, vector<16x32xf32>, vector<16x32xf32>, vector<16x32xf32>, vector<16x32xf32>, vector<16x32xf32> -> vector<128x32xf32>
    %431 = arith.mulf %430, %3 : vector<128x32xf32>
    %432 = tpu.concatenate %429, %429, %429, %429, %429, %429, %429, %429 in 0 : vector<16x32xf32>, vector<16x32xf32>, vector<16x32xf32>, vector<16x32xf32>, vector<16x32xf32>, vector<16x32xf32>, vector<16x32xf32>, vector<16x32xf32> -> vector<128x32xf32>
    %433 = arith.mulf %432, %3 : vector<128x32xf32>
    %cst_237 = arith.constant dense<0.000000e+00> : vector<16x128xf32>
    %434 = tpu.matmul %423, %431, %cst_237 {dimension_numbers = #tpu.dot_dimension_numbers<[1], [1], [0], [0], [0, 0, 1, 0], [], []>} : vector<16x32xf32>, vector<128x32xf32>, vector<16x128xf32> -> vector<16x128xf32>
    %435 = arith.addf %434, %2 : vector<16x128xf32>
    %cst_238 = arith.constant dense<0xFF800000> : vector<16xf32>
    %436 = vector.multi_reduction <maximumf>, %435, %cst_238 [1] : vector<16x128xf32> to vector<16xf32>
    %437 = vector.shape_cast %436 : vector<16xf32> to vector<16x1xf32>
    %438 = vector.broadcast %437 : vector<16x1xf32> to vector<16x128xf32>
    %439 = arith.subf %435, %438 : vector<16x128xf32>
    %440 = math.exp %439 : vector<16x128xf32>
    %cst_239 = arith.constant dense<0.000000e+00> : vector<16x128xf32>
    %441 = tpu.matmul %440, %5, %cst_239 {dimension_numbers = #tpu.dot_dimension_numbers<[1], [0], [0], [1], [0, 0, 1, 1], [], []>} : vector<16x128xf32>, vector<128x128xf32>, vector<16x128xf32> -> vector<16x128xf32>
    %442 = arith.divf %440, %441 : vector<16x128xf32>
    %cst_240 = arith.constant dense<0.000000e+00> : vector<16x32xf32>
    %443 = tpu.matmul %442, %433, %cst_240 {dimension_numbers = #tpu.dot_dimension_numbers<[1], [0], [0], [1], [0, 0, 1, 1], [], []>} : vector<16x128xf32>, vector<128x32xf32>, vector<16x32xf32> -> vector<16x32xf32>
    %444 = arith.truncf %443 : vector<16x32xf32> to vector<16x32xbf16>
    %cst_241 = arith.constant dense<0.000000e+00> : vector<16x32xf32>
    %445 = tpu.matmul %444, %417, %cst_241 {dimension_numbers = #tpu.dot_dimension_numbers<[1], [0], [0], [1], [0, 0, 1, 1], [], []>} : vector<16x32xbf16>, vector<32x32xbf16>, vector<16x32xf32> -> vector<16x32xf32>
    %446 = vector.broadcast %419 : vector<1x32xf32> to vector<16x32xf32>
    %447 = arith.addf %445, %446 : vector<16x32xf32>
    %448 = arith.addf %407, %447 : vector<16x32xf32>
    %c0_242 = arith.constant 0 : index
    %c0_243 = arith.constant 0 : index
    %c0_244 = arith.constant 0 : index
    %449 = vector.load %arg22[%c0_242, %c0_243, %c0_244] : memref<3x1x32xf32, #tpu.memory_space<vmem>>, vector<1x1x32xf32>
    %450 = vector.shape_cast %449 : vector<1x1x32xf32> to vector<1x32xf32>
    %c0_245 = arith.constant 0 : index
    %c0_246 = arith.constant 0 : index
    %c0_247 = arith.constant 0 : index
    %451 = vector.load %arg21[%c0_245, %c0_246, %c0_247] : memref<3x1x32xf32, #tpu.memory_space<vmem>>, vector<1x1x32xf32>
    %452 = vector.shape_cast %451 : vector<1x1x32xf32> to vector<1x32xf32>
    %cst_248 = arith.constant dense<0.000000e+00> : vector<16xf32>
    %453 = vector.multi_reduction <add>, %448, %cst_248 [1] : vector<16x32xf32> to vector<16xf32>
    %454 = vector.shape_cast %453 : vector<16xf32> to vector<16x1xf32>
    %cst_249 = arith.constant 3.200000e+01 : f32
    %455 = vector.broadcast %cst_249 : f32 to vector<16x1xf32>
    %456 = arith.divf %454, %455 : vector<16x1xf32>
    %457 = arith.mulf %448, %448 : vector<16x32xf32>
    %cst_250 = arith.constant dense<0.000000e+00> : vector<16xf32>
    %458 = vector.multi_reduction <add>, %457, %cst_250 [1] : vector<16x32xf32> to vector<16xf32>
    %459 = vector.shape_cast %458 : vector<16xf32> to vector<16x1xf32>
    %cst_251 = arith.constant 3.200000e+01 : f32
    %460 = vector.broadcast %cst_251 : f32 to vector<16x1xf32>
    %461 = arith.divf %459, %460 : vector<16x1xf32>
    %462 = arith.mulf %456, %456 : vector<16x1xf32>
    %463 = arith.subf %461, %462 : vector<16x1xf32>
    %464 = vector.broadcast %456 : vector<16x1xf32> to vector<16x32xf32>
    %465 = arith.subf %448, %464 : vector<16x32xf32>
    %cst_252 = arith.constant 9.99999974E-6 : f32
    %466 = vector.broadcast %cst_252 : f32 to vector<16x1xf32>
    %467 = arith.addf %463, %466 : vector<16x1xf32>
    %468 = math.rsqrt %467 : vector<16x1xf32>
    %469 = vector.broadcast %468 : vector<16x1xf32> to vector<16x32xf32>
    %470 = arith.mulf %465, %469 : vector<16x32xf32>
    %471 = vector.broadcast %450 : vector<1x32xf32> to vector<16x32xf32>
    %472 = arith.mulf %470, %471 : vector<16x32xf32>
    %473 = vector.broadcast %452 : vector<1x32xf32> to vector<16x32xf32>
    %474 = arith.addf %472, %473 : vector<16x32xf32>
    %c0_253 = arith.constant 0 : index
    %c0_254 = arith.constant 0 : index
    %c0_255 = arith.constant 0 : index
    %475 = vector.load %arg16[%c0_253, %c0_254, %c0_255] : memref<3x32x512xbf16, #tpu.memory_space<vmem>>, vector<1x32x512xbf16>
    %476 = vector.shape_cast %475 : vector<1x32x512xbf16> to vector<32x512xbf16>
    %c0_256 = arith.constant 0 : index
    %c0_257 = arith.constant 0 : index
    %c0_258 = arith.constant 0 : index
    %477 = vector.load %arg15[%c0_256, %c0_257, %c0_258] : memref<3x1x512xf32, #tpu.memory_space<vmem>>, vector<1x1x512xf32>
    %478 = vector.shape_cast %477 : vector<1x1x512xf32> to vector<1x512xf32>
    %479 = arith.truncf %474 : vector<16x32xf32> to vector<16x32xbf16>
    %cst_259 = arith.constant dense<0.000000e+00> : vector<16x512xf32>
    %480 = tpu.matmul %479, %476, %cst_259 {dimension_numbers = #tpu.dot_dimension_numbers<[1], [0], [0], [1], [0, 0, 1, 1], [], []>} : vector<16x32xbf16>, vector<32x512xbf16>, vector<16x512xf32> -> vector<16x512xf32>
    %481 = vector.broadcast %478 : vector<1x512xf32> to vector<16x512xf32>
    %482 = arith.addf %480, %481 : vector<16x512xf32>
    %cst_260 = arith.constant 0.000000e+00 : f32
    %483 = vector.broadcast %cst_260 : f32 to vector<16x512xf32>
    %484 = arith.maximumf %482, %483 : vector<16x512xf32>
    %c0_261 = arith.constant 0 : index
    %c0_262 = arith.constant 0 : index
    %c0_263 = arith.constant 0 : index
    %485 = vector.load %arg18[%c0_261, %c0_262, %c0_263] : memref<3x512x32xbf16, #tpu.memory_space<vmem>>, vector<1x512x32xbf16>
    %486 = vector.shape_cast %485 : vector<1x512x32xbf16> to vector<512x32xbf16>
    %c0_264 = arith.constant 0 : index
    %c0_265 = arith.constant 0 : index
    %c0_266 = arith.constant 0 : index
    %487 = vector.load %arg17[%c0_264, %c0_265, %c0_266] : memref<3x1x32xf32, #tpu.memory_space<vmem>>, vector<1x1x32xf32>
    %488 = vector.shape_cast %487 : vector<1x1x32xf32> to vector<1x32xf32>
    %489 = arith.truncf %484 : vector<16x512xf32> to vector<16x512xbf16>
    %cst_267 = arith.constant dense<0.000000e+00> : vector<16x32xf32>
    %490 = tpu.matmul %489, %486, %cst_267 {dimension_numbers = #tpu.dot_dimension_numbers<[1], [0], [0], [1], [0, 0, 1, 1], [], []>} : vector<16x512xbf16>, vector<512x32xbf16>, vector<16x32xf32> -> vector<16x32xf32>
    %491 = vector.broadcast %488 : vector<1x32xf32> to vector<16x32xf32>
    %492 = arith.addf %490, %491 : vector<16x32xf32>
    %493 = arith.addf %474, %492 : vector<16x32xf32>
    %c0_268 = arith.constant 0 : index
    %c0_269 = arith.constant 0 : index
    %c0_270 = arith.constant 0 : index
    %494 = vector.load %arg24[%c0_268, %c0_269, %c0_270] : memref<3x1x32xf32, #tpu.memory_space<vmem>>, vector<1x1x32xf32>
    %495 = vector.shape_cast %494 : vector<1x1x32xf32> to vector<1x32xf32>
    %c0_271 = arith.constant 0 : index
    %c0_272 = arith.constant 0 : index
    %c0_273 = arith.constant 0 : index
    %496 = vector.load %arg23[%c0_271, %c0_272, %c0_273] : memref<3x1x32xf32, #tpu.memory_space<vmem>>, vector<1x1x32xf32>
    %497 = vector.shape_cast %496 : vector<1x1x32xf32> to vector<1x32xf32>
    %cst_274 = arith.constant dense<0.000000e+00> : vector<16xf32>
    %498 = vector.multi_reduction <add>, %493, %cst_274 [1] : vector<16x32xf32> to vector<16xf32>
    %499 = vector.shape_cast %498 : vector<16xf32> to vector<16x1xf32>
    %cst_275 = arith.constant 3.200000e+01 : f32
    %500 = vector.broadcast %cst_275 : f32 to vector<16x1xf32>
    %501 = arith.divf %499, %500 : vector<16x1xf32>
    %502 = arith.mulf %493, %493 : vector<16x32xf32>
    %cst_276 = arith.constant dense<0.000000e+00> : vector<16xf32>
    %503 = vector.multi_reduction <add>, %502, %cst_276 [1] : vector<16x32xf32> to vector<16xf32>
    %504 = vector.shape_cast %503 : vector<16xf32> to vector<16x1xf32>
    %cst_277 = arith.constant 3.200000e+01 : f32
    %505 = vector.broadcast %cst_277 : f32 to vector<16x1xf32>
    %506 = arith.divf %504, %505 : vector<16x1xf32>
    %507 = arith.mulf %501, %501 : vector<16x1xf32>
    %508 = arith.subf %506, %507 : vector<16x1xf32>
    %509 = vector.broadcast %501 : vector<16x1xf32> to vector<16x32xf32>
    %510 = arith.subf %493, %509 : vector<16x32xf32>
    %cst_278 = arith.constant 9.99999974E-6 : f32
    %511 = vector.broadcast %cst_278 : f32 to vector<16x1xf32>
    %512 = arith.addf %508, %511 : vector<16x1xf32>
    %513 = math.rsqrt %512 : vector<16x1xf32>
    %514 = vector.broadcast %513 : vector<16x1xf32> to vector<16x32xf32>
    %515 = arith.mulf %510, %514 : vector<16x32xf32>
    %516 = vector.broadcast %495 : vector<1x32xf32> to vector<16x32xf32>
    %517 = arith.mulf %515, %516 : vector<16x32xf32>
    %518 = vector.broadcast %497 : vector<1x32xf32> to vector<16x32xf32>
    %519 = arith.addf %517, %518 : vector<16x32xf32>
    %c1_279 = arith.constant 1 : index
    %c0_280 = arith.constant 0 : index
    %c0_281 = arith.constant 0 : index
    %520 = vector.load %arg28[%c1_279, %c0_280, %c0_281] : memref<3x32x96xbf16, #tpu.memory_space<vmem>>, vector<1x32x96xbf16>
    %521 = vector.shape_cast %520 : vector<1x32x96xbf16> to vector<32x96xbf16>
    %c1_282 = arith.constant 1 : index
    %c0_283 = arith.constant 0 : index
    %c0_284 = arith.constant 0 : index
    %522 = vector.load %arg27[%c1_282, %c0_283, %c0_284] : memref<3x1x96xf32, #tpu.memory_space<vmem>>, vector<1x1x96xf32>
    %523 = vector.shape_cast %522 : vector<1x1x96xf32> to vector<1x96xf32>
    %c1_285 = arith.constant 1 : index
    %c0_286 = arith.constant 0 : index
    %c0_287 = arith.constant 0 : index
    %524 = vector.load %arg26[%c1_285, %c0_286, %c0_287] : memref<3x32x32xbf16, #tpu.memory_space<vmem>>, vector<1x32x32xbf16>
    %525 = vector.shape_cast %524 : vector<1x32x32xbf16> to vector<32x32xbf16>
    %c1_288 = arith.constant 1 : index
    %c0_289 = arith.constant 0 : index
    %c0_290 = arith.constant 0 : index
    %526 = vector.load %arg25[%c1_288, %c0_289, %c0_290] : memref<3x1x32xf32, #tpu.memory_space<vmem>>, vector<1x1x32xf32>
    %527 = vector.shape_cast %526 : vector<1x1x32xf32> to vector<1x32xf32>
    %528 = arith.truncf %519 : vector<16x32xf32> to vector<16x32xbf16>
    %cst_291 = arith.constant dense<0.000000e+00> : vector<16x96xf32>
    %529 = tpu.matmul %528, %521, %cst_291 {dimension_numbers = #tpu.dot_dimension_numbers<[1], [0], [0], [1], [0, 0, 1, 1], [], []>} : vector<16x32xbf16>, vector<32x96xbf16>, vector<16x96xf32> -> vector<16x96xf32>
    %530 = vector.broadcast %523 : vector<1x96xf32> to vector<16x96xf32>
    %531 = arith.addf %529, %530 : vector<16x96xf32>
    %532 = vector.extract_strided_slice %531 {offsets = [0, 0], sizes = [16, 32], strides = [1, 1]} : vector<16x96xf32> to vector<16x32xf32>
    %533 = vector.extract_strided_slice %531 {offsets = [0, 32], sizes = [16, 32], strides = [1, 1]} : vector<16x96xf32> to vector<16x32xf32>
    %534 = vector.extract_strided_slice %531 {offsets = [0, 64], sizes = [16, 32], strides = [1, 1]} : vector<16x96xf32> to vector<16x32xf32>
    %535 = tpu.concatenate %533, %533, %533, %533, %533, %533, %533, %533 in 0 : vector<16x32xf32>, vector<16x32xf32>, vector<16x32xf32>, vector<16x32xf32>, vector<16x32xf32>, vector<16x32xf32>, vector<16x32xf32>, vector<16x32xf32> -> vector<128x32xf32>
    %536 = arith.mulf %535, %4 : vector<128x32xf32>
    %537 = tpu.concatenate %534, %534, %534, %534, %534, %534, %534, %534 in 0 : vector<16x32xf32>, vector<16x32xf32>, vector<16x32xf32>, vector<16x32xf32>, vector<16x32xf32>, vector<16x32xf32>, vector<16x32xf32>, vector<16x32xf32> -> vector<128x32xf32>
    %538 = arith.mulf %537, %4 : vector<128x32xf32>
    %cst_292 = arith.constant dense<0.000000e+00> : vector<16x128xf32>
    %539 = tpu.matmul %532, %536, %cst_292 {dimension_numbers = #tpu.dot_dimension_numbers<[1], [1], [0], [0], [0, 0, 1, 0], [], []>} : vector<16x32xf32>, vector<128x32xf32>, vector<16x128xf32> -> vector<16x128xf32>
    %540 = arith.addf %539, %1 : vector<16x128xf32>
    %cst_293 = arith.constant dense<0xFF800000> : vector<16xf32>
    %541 = vector.multi_reduction <maximumf>, %540, %cst_293 [1] : vector<16x128xf32> to vector<16xf32>
    %542 = vector.shape_cast %541 : vector<16xf32> to vector<16x1xf32>
    %543 = vector.broadcast %542 : vector<16x1xf32> to vector<16x128xf32>
    %544 = arith.subf %540, %543 : vector<16x128xf32>
    %545 = math.exp %544 : vector<16x128xf32>
    %cst_294 = arith.constant dense<0.000000e+00> : vector<16x128xf32>
    %546 = tpu.matmul %545, %6, %cst_294 {dimension_numbers = #tpu.dot_dimension_numbers<[1], [0], [0], [1], [0, 0, 1, 1], [], []>} : vector<16x128xf32>, vector<128x128xf32>, vector<16x128xf32> -> vector<16x128xf32>
    %547 = arith.divf %545, %546 : vector<16x128xf32>
    %cst_295 = arith.constant dense<0.000000e+00> : vector<16x32xf32>
    %548 = tpu.matmul %547, %538, %cst_295 {dimension_numbers = #tpu.dot_dimension_numbers<[1], [0], [0], [1], [0, 0, 1, 1], [], []>} : vector<16x128xf32>, vector<128x32xf32>, vector<16x32xf32> -> vector<16x32xf32>
    %549 = arith.truncf %548 : vector<16x32xf32> to vector<16x32xbf16>
    %cst_296 = arith.constant dense<0.000000e+00> : vector<16x32xf32>
    %550 = tpu.matmul %549, %525, %cst_296 {dimension_numbers = #tpu.dot_dimension_numbers<[1], [0], [0], [1], [0, 0, 1, 1], [], []>} : vector<16x32xbf16>, vector<32x32xbf16>, vector<16x32xf32> -> vector<16x32xf32>
    %551 = vector.broadcast %527 : vector<1x32xf32> to vector<16x32xf32>
    %552 = arith.addf %550, %551 : vector<16x32xf32>
    %553 = arith.addf %519, %552 : vector<16x32xf32>
    %c1_297 = arith.constant 1 : index
    %c0_298 = arith.constant 0 : index
    %c0_299 = arith.constant 0 : index
    %554 = vector.load %arg20[%c1_297, %c0_298, %c0_299] : memref<3x1x32xf32, #tpu.memory_space<vmem>>, vector<1x1x32xf32>
    %555 = vector.shape_cast %554 : vector<1x1x32xf32> to vector<1x32xf32>
    %c1_300 = arith.constant 1 : index
    %c0_301 = arith.constant 0 : index
    %c0_302 = arith.constant 0 : index
    %556 = vector.load %arg19[%c1_300, %c0_301, %c0_302] : memref<3x1x32xf32, #tpu.memory_space<vmem>>, vector<1x1x32xf32>
    %557 = vector.shape_cast %556 : vector<1x1x32xf32> to vector<1x32xf32>
    %cst_303 = arith.constant dense<0.000000e+00> : vector<16xf32>
    %558 = vector.multi_reduction <add>, %553, %cst_303 [1] : vector<16x32xf32> to vector<16xf32>
    %559 = vector.shape_cast %558 : vector<16xf32> to vector<16x1xf32>
    %cst_304 = arith.constant 3.200000e+01 : f32
    %560 = vector.broadcast %cst_304 : f32 to vector<16x1xf32>
    %561 = arith.divf %559, %560 : vector<16x1xf32>
    %562 = arith.mulf %553, %553 : vector<16x32xf32>
    %cst_305 = arith.constant dense<0.000000e+00> : vector<16xf32>
    %563 = vector.multi_reduction <add>, %562, %cst_305 [1] : vector<16x32xf32> to vector<16xf32>
    %564 = vector.shape_cast %563 : vector<16xf32> to vector<16x1xf32>
    %cst_306 = arith.constant 3.200000e+01 : f32
    %565 = vector.broadcast %cst_306 : f32 to vector<16x1xf32>
    %566 = arith.divf %564, %565 : vector<16x1xf32>
    %567 = arith.mulf %561, %561 : vector<16x1xf32>
    %568 = arith.subf %566, %567 : vector<16x1xf32>
    %569 = vector.broadcast %561 : vector<16x1xf32> to vector<16x32xf32>
    %570 = arith.subf %553, %569 : vector<16x32xf32>
    %cst_307 = arith.constant 9.99999974E-6 : f32
    %571 = vector.broadcast %cst_307 : f32 to vector<16x1xf32>
    %572 = arith.addf %568, %571 : vector<16x1xf32>
    %573 = math.rsqrt %572 : vector<16x1xf32>
    %574 = vector.broadcast %573 : vector<16x1xf32> to vector<16x32xf32>
    %575 = arith.mulf %570, %574 : vector<16x32xf32>
    %576 = vector.broadcast %555 : vector<1x32xf32> to vector<16x32xf32>
    %577 = arith.mulf %575, %576 : vector<16x32xf32>
    %578 = vector.broadcast %557 : vector<1x32xf32> to vector<16x32xf32>
    %579 = arith.addf %577, %578 : vector<16x32xf32>
    %c1_308 = arith.constant 1 : index
    %c0_309 = arith.constant 0 : index
    %c0_310 = arith.constant 0 : index
    %580 = vector.load %arg14[%c1_308, %c0_309, %c0_310] : memref<3x32x32xbf16, #tpu.memory_space<vmem>>, vector<1x32x32xbf16>
    %581 = vector.shape_cast %580 : vector<1x32x32xbf16> to vector<32x32xbf16>
    %c1_311 = arith.constant 1 : index
    %c0_312 = arith.constant 0 : index
    %c0_313 = arith.constant 0 : index
    %582 = vector.load %arg13[%c1_311, %c0_312, %c0_313] : memref<3x1x32xf32, #tpu.memory_space<vmem>>, vector<1x1x32xf32>
    %583 = vector.shape_cast %582 : vector<1x1x32xf32> to vector<1x32xf32>
    %c1_314 = arith.constant 1 : index
    %c0_315 = arith.constant 0 : index
    %c0_316 = arith.constant 0 : index
    %584 = vector.load %arg10[%c1_314, %c0_315, %c0_316] : memref<3x32x64xbf16, #tpu.memory_space<vmem>>, vector<1x32x64xbf16>
    %585 = vector.shape_cast %584 : vector<1x32x64xbf16> to vector<32x64xbf16>
    %c1_317 = arith.constant 1 : index
    %c0_318 = arith.constant 0 : index
    %c0_319 = arith.constant 0 : index
    %586 = vector.load %arg9[%c1_317, %c0_318, %c0_319] : memref<3x1x64xf32, #tpu.memory_space<vmem>>, vector<1x1x64xf32>
    %587 = vector.shape_cast %586 : vector<1x1x64xf32> to vector<1x64xf32>
    %c1_320 = arith.constant 1 : index
    %c0_321 = arith.constant 0 : index
    %c0_322 = arith.constant 0 : index
    %588 = vector.load %arg12[%c1_320, %c0_321, %c0_322] : memref<3x32x32xbf16, #tpu.memory_space<vmem>>, vector<1x32x32xbf16>
    %589 = vector.shape_cast %588 : vector<1x32x32xbf16> to vector<32x32xbf16>
    %c1_323 = arith.constant 1 : index
    %c0_324 = arith.constant 0 : index
    %c0_325 = arith.constant 0 : index
    %590 = vector.load %arg11[%c1_323, %c0_324, %c0_325] : memref<3x1x32xf32, #tpu.memory_space<vmem>>, vector<1x1x32xf32>
    %591 = vector.shape_cast %590 : vector<1x1x32xf32> to vector<1x32xf32>
    %592 = arith.truncf %579 : vector<16x32xf32> to vector<16x32xbf16>
    %cst_326 = arith.constant dense<0.000000e+00> : vector<16x32xf32>
    %593 = tpu.matmul %592, %581, %cst_326 {dimension_numbers = #tpu.dot_dimension_numbers<[1], [0], [0], [1], [0, 0, 1, 1], [], []>} : vector<16x32xbf16>, vector<32x32xbf16>, vector<16x32xf32> -> vector<16x32xf32>
    %594 = vector.broadcast %583 : vector<1x32xf32> to vector<16x32xf32>
    %595 = arith.addf %593, %594 : vector<16x32xf32>
    %596 = arith.truncf %346 : vector<16x32xf32> to vector<16x32xbf16>
    %cst_327 = arith.constant dense<0.000000e+00> : vector<16x64xf32>
    %597 = tpu.matmul %596, %585, %cst_327 {dimension_numbers = #tpu.dot_dimension_numbers<[1], [0], [0], [1], [0, 0, 1, 1], [], []>} : vector<16x32xbf16>, vector<32x64xbf16>, vector<16x64xf32> -> vector<16x64xf32>
    %598 = vector.broadcast %587 : vector<1x64xf32> to vector<16x64xf32>
    %599 = arith.addf %597, %598 : vector<16x64xf32>
    %600 = vector.extract_strided_slice %599 {offsets = [0, 0], sizes = [16, 32], strides = [1, 1]} : vector<16x64xf32> to vector<16x32xf32>
    %601 = vector.extract_strided_slice %599 {offsets = [0, 32], sizes = [16, 32], strides = [1, 1]} : vector<16x64xf32> to vector<16x32xf32>
    %602 = tpu.concatenate %600, %600, %600, %600, %600, %600, %600, %600 in 0 : vector<16x32xf32>, vector<16x32xf32>, vector<16x32xf32>, vector<16x32xf32>, vector<16x32xf32>, vector<16x32xf32>, vector<16x32xf32>, vector<16x32xf32> -> vector<128x32xf32>
    %603 = arith.mulf %602, %3 : vector<128x32xf32>
    %604 = tpu.concatenate %601, %601, %601, %601, %601, %601, %601, %601 in 0 : vector<16x32xf32>, vector<16x32xf32>, vector<16x32xf32>, vector<16x32xf32>, vector<16x32xf32>, vector<16x32xf32>, vector<16x32xf32>, vector<16x32xf32> -> vector<128x32xf32>
    %605 = arith.mulf %604, %3 : vector<128x32xf32>
    %cst_328 = arith.constant dense<0.000000e+00> : vector<16x128xf32>
    %606 = tpu.matmul %595, %603, %cst_328 {dimension_numbers = #tpu.dot_dimension_numbers<[1], [1], [0], [0], [0, 0, 1, 0], [], []>} : vector<16x32xf32>, vector<128x32xf32>, vector<16x128xf32> -> vector<16x128xf32>
    %607 = arith.addf %606, %2 : vector<16x128xf32>
    %cst_329 = arith.constant dense<0xFF800000> : vector<16xf32>
    %608 = vector.multi_reduction <maximumf>, %607, %cst_329 [1] : vector<16x128xf32> to vector<16xf32>
    %609 = vector.shape_cast %608 : vector<16xf32> to vector<16x1xf32>
    %610 = vector.broadcast %609 : vector<16x1xf32> to vector<16x128xf32>
    %611 = arith.subf %607, %610 : vector<16x128xf32>
    %612 = math.exp %611 : vector<16x128xf32>
    %cst_330 = arith.constant dense<0.000000e+00> : vector<16x128xf32>
    %613 = tpu.matmul %612, %5, %cst_330 {dimension_numbers = #tpu.dot_dimension_numbers<[1], [0], [0], [1], [0, 0, 1, 1], [], []>} : vector<16x128xf32>, vector<128x128xf32>, vector<16x128xf32> -> vector<16x128xf32>
    %614 = arith.divf %612, %613 : vector<16x128xf32>
    %cst_331 = arith.constant dense<0.000000e+00> : vector<16x32xf32>
    %615 = tpu.matmul %614, %605, %cst_331 {dimension_numbers = #tpu.dot_dimension_numbers<[1], [0], [0], [1], [0, 0, 1, 1], [], []>} : vector<16x128xf32>, vector<128x32xf32>, vector<16x32xf32> -> vector<16x32xf32>
    %616 = arith.truncf %615 : vector<16x32xf32> to vector<16x32xbf16>
    %cst_332 = arith.constant dense<0.000000e+00> : vector<16x32xf32>
    %617 = tpu.matmul %616, %589, %cst_332 {dimension_numbers = #tpu.dot_dimension_numbers<[1], [0], [0], [1], [0, 0, 1, 1], [], []>} : vector<16x32xbf16>, vector<32x32xbf16>, vector<16x32xf32> -> vector<16x32xf32>
    %618 = vector.broadcast %591 : vector<1x32xf32> to vector<16x32xf32>
    %619 = arith.addf %617, %618 : vector<16x32xf32>
    %620 = arith.addf %579, %619 : vector<16x32xf32>
    %c1_333 = arith.constant 1 : index
    %c0_334 = arith.constant 0 : index
    %c0_335 = arith.constant 0 : index
    %621 = vector.load %arg22[%c1_333, %c0_334, %c0_335] : memref<3x1x32xf32, #tpu.memory_space<vmem>>, vector<1x1x32xf32>
    %622 = vector.shape_cast %621 : vector<1x1x32xf32> to vector<1x32xf32>
    %c1_336 = arith.constant 1 : index
    %c0_337 = arith.constant 0 : index
    %c0_338 = arith.constant 0 : index
    %623 = vector.load %arg21[%c1_336, %c0_337, %c0_338] : memref<3x1x32xf32, #tpu.memory_space<vmem>>, vector<1x1x32xf32>
    %624 = vector.shape_cast %623 : vector<1x1x32xf32> to vector<1x32xf32>
    %cst_339 = arith.constant dense<0.000000e+00> : vector<16xf32>
    %625 = vector.multi_reduction <add>, %620, %cst_339 [1] : vector<16x32xf32> to vector<16xf32>
    %626 = vector.shape_cast %625 : vector<16xf32> to vector<16x1xf32>
    %cst_340 = arith.constant 3.200000e+01 : f32
    %627 = vector.broadcast %cst_340 : f32 to vector<16x1xf32>
    %628 = arith.divf %626, %627 : vector<16x1xf32>
    %629 = arith.mulf %620, %620 : vector<16x32xf32>
    %cst_341 = arith.constant dense<0.000000e+00> : vector<16xf32>
    %630 = vector.multi_reduction <add>, %629, %cst_341 [1] : vector<16x32xf32> to vector<16xf32>
    %631 = vector.shape_cast %630 : vector<16xf32> to vector<16x1xf32>
    %cst_342 = arith.constant 3.200000e+01 : f32
    %632 = vector.broadcast %cst_342 : f32 to vector<16x1xf32>
    %633 = arith.divf %631, %632 : vector<16x1xf32>
    %634 = arith.mulf %628, %628 : vector<16x1xf32>
    %635 = arith.subf %633, %634 : vector<16x1xf32>
    %636 = vector.broadcast %628 : vector<16x1xf32> to vector<16x32xf32>
    %637 = arith.subf %620, %636 : vector<16x32xf32>
    %cst_343 = arith.constant 9.99999974E-6 : f32
    %638 = vector.broadcast %cst_343 : f32 to vector<16x1xf32>
    %639 = arith.addf %635, %638 : vector<16x1xf32>
    %640 = math.rsqrt %639 : vector<16x1xf32>
    %641 = vector.broadcast %640 : vector<16x1xf32> to vector<16x32xf32>
    %642 = arith.mulf %637, %641 : vector<16x32xf32>
    %643 = vector.broadcast %622 : vector<1x32xf32> to vector<16x32xf32>
    %644 = arith.mulf %642, %643 : vector<16x32xf32>
    %645 = vector.broadcast %624 : vector<1x32xf32> to vector<16x32xf32>
    %646 = arith.addf %644, %645 : vector<16x32xf32>
    %c1_344 = arith.constant 1 : index
    %c0_345 = arith.constant 0 : index
    %c0_346 = arith.constant 0 : index
    %647 = vector.load %arg16[%c1_344, %c0_345, %c0_346] : memref<3x32x512xbf16, #tpu.memory_space<vmem>>, vector<1x32x512xbf16>
    %648 = vector.shape_cast %647 : vector<1x32x512xbf16> to vector<32x512xbf16>
    %c1_347 = arith.constant 1 : index
    %c0_348 = arith.constant 0 : index
    %c0_349 = arith.constant 0 : index
    %649 = vector.load %arg15[%c1_347, %c0_348, %c0_349] : memref<3x1x512xf32, #tpu.memory_space<vmem>>, vector<1x1x512xf32>
    %650 = vector.shape_cast %649 : vector<1x1x512xf32> to vector<1x512xf32>
    %651 = arith.truncf %646 : vector<16x32xf32> to vector<16x32xbf16>
    %cst_350 = arith.constant dense<0.000000e+00> : vector<16x512xf32>
    %652 = tpu.matmul %651, %648, %cst_350 {dimension_numbers = #tpu.dot_dimension_numbers<[1], [0], [0], [1], [0, 0, 1, 1], [], []>} : vector<16x32xbf16>, vector<32x512xbf16>, vector<16x512xf32> -> vector<16x512xf32>
    %653 = vector.broadcast %650 : vector<1x512xf32> to vector<16x512xf32>
    %654 = arith.addf %652, %653 : vector<16x512xf32>
    %cst_351 = arith.constant 0.000000e+00 : f32
    %655 = vector.broadcast %cst_351 : f32 to vector<16x512xf32>
    %656 = arith.maximumf %654, %655 : vector<16x512xf32>
    %c1_352 = arith.constant 1 : index
    %c0_353 = arith.constant 0 : index
    %c0_354 = arith.constant 0 : index
    %657 = vector.load %arg18[%c1_352, %c0_353, %c0_354] : memref<3x512x32xbf16, #tpu.memory_space<vmem>>, vector<1x512x32xbf16>
    %658 = vector.shape_cast %657 : vector<1x512x32xbf16> to vector<512x32xbf16>
    %c1_355 = arith.constant 1 : index
    %c0_356 = arith.constant 0 : index
    %c0_357 = arith.constant 0 : index
    %659 = vector.load %arg17[%c1_355, %c0_356, %c0_357] : memref<3x1x32xf32, #tpu.memory_space<vmem>>, vector<1x1x32xf32>
    %660 = vector.shape_cast %659 : vector<1x1x32xf32> to vector<1x32xf32>
    %661 = arith.truncf %656 : vector<16x512xf32> to vector<16x512xbf16>
    %cst_358 = arith.constant dense<0.000000e+00> : vector<16x32xf32>
    %662 = tpu.matmul %661, %658, %cst_358 {dimension_numbers = #tpu.dot_dimension_numbers<[1], [0], [0], [1], [0, 0, 1, 1], [], []>} : vector<16x512xbf16>, vector<512x32xbf16>, vector<16x32xf32> -> vector<16x32xf32>
    %663 = vector.broadcast %660 : vector<1x32xf32> to vector<16x32xf32>
    %664 = arith.addf %662, %663 : vector<16x32xf32>
    %665 = arith.addf %646, %664 : vector<16x32xf32>
    %c1_359 = arith.constant 1 : index
    %c0_360 = arith.constant 0 : index
    %c0_361 = arith.constant 0 : index
    %666 = vector.load %arg24[%c1_359, %c0_360, %c0_361] : memref<3x1x32xf32, #tpu.memory_space<vmem>>, vector<1x1x32xf32>
    %667 = vector.shape_cast %666 : vector<1x1x32xf32> to vector<1x32xf32>
    %c1_362 = arith.constant 1 : index
    %c0_363 = arith.constant 0 : index
    %c0_364 = arith.constant 0 : index
    %668 = vector.load %arg23[%c1_362, %c0_363, %c0_364] : memref<3x1x32xf32, #tpu.memory_space<vmem>>, vector<1x1x32xf32>
    %669 = vector.shape_cast %668 : vector<1x1x32xf32> to vector<1x32xf32>
    %cst_365 = arith.constant dense<0.000000e+00> : vector<16xf32>
    %670 = vector.multi_reduction <add>, %665, %cst_365 [1] : vector<16x32xf32> to vector<16xf32>
    %671 = vector.shape_cast %670 : vector<16xf32> to vector<16x1xf32>
    %cst_366 = arith.constant 3.200000e+01 : f32
    %672 = vector.broadcast %cst_366 : f32 to vector<16x1xf32>
    %673 = arith.divf %671, %672 : vector<16x1xf32>
    %674 = arith.mulf %665, %665 : vector<16x32xf32>
    %cst_367 = arith.constant dense<0.000000e+00> : vector<16xf32>
    %675 = vector.multi_reduction <add>, %674, %cst_367 [1] : vector<16x32xf32> to vector<16xf32>
    %676 = vector.shape_cast %675 : vector<16xf32> to vector<16x1xf32>
    %cst_368 = arith.constant 3.200000e+01 : f32
    %677 = vector.broadcast %cst_368 : f32 to vector<16x1xf32>
    %678 = arith.divf %676, %677 : vector<16x1xf32>
    %679 = arith.mulf %673, %673 : vector<16x1xf32>
    %680 = arith.subf %678, %679 : vector<16x1xf32>
    %681 = vector.broadcast %673 : vector<16x1xf32> to vector<16x32xf32>
    %682 = arith.subf %665, %681 : vector<16x32xf32>
    %cst_369 = arith.constant 9.99999974E-6 : f32
    %683 = vector.broadcast %cst_369 : f32 to vector<16x1xf32>
    %684 = arith.addf %680, %683 : vector<16x1xf32>
    %685 = math.rsqrt %684 : vector<16x1xf32>
    %686 = vector.broadcast %685 : vector<16x1xf32> to vector<16x32xf32>
    %687 = arith.mulf %682, %686 : vector<16x32xf32>
    %688 = vector.broadcast %667 : vector<1x32xf32> to vector<16x32xf32>
    %689 = arith.mulf %687, %688 : vector<16x32xf32>
    %690 = vector.broadcast %669 : vector<1x32xf32> to vector<16x32xf32>
    %691 = arith.addf %689, %690 : vector<16x32xf32>
    %c2_370 = arith.constant 2 : index
    %c0_371 = arith.constant 0 : index
    %c0_372 = arith.constant 0 : index
    %692 = vector.load %arg28[%c2_370, %c0_371, %c0_372] : memref<3x32x96xbf16, #tpu.memory_space<vmem>>, vector<1x32x96xbf16>
    %693 = vector.shape_cast %692 : vector<1x32x96xbf16> to vector<32x96xbf16>
    %c2_373 = arith.constant 2 : index
    %c0_374 = arith.constant 0 : index
    %c0_375 = arith.constant 0 : index
    %694 = vector.load %arg27[%c2_373, %c0_374, %c0_375] : memref<3x1x96xf32, #tpu.memory_space<vmem>>, vector<1x1x96xf32>
    %695 = vector.shape_cast %694 : vector<1x1x96xf32> to vector<1x96xf32>
    %c2_376 = arith.constant 2 : index
    %c0_377 = arith.constant 0 : index
    %c0_378 = arith.constant 0 : index
    %696 = vector.load %arg26[%c2_376, %c0_377, %c0_378] : memref<3x32x32xbf16, #tpu.memory_space<vmem>>, vector<1x32x32xbf16>
    %697 = vector.shape_cast %696 : vector<1x32x32xbf16> to vector<32x32xbf16>
    %c2_379 = arith.constant 2 : index
    %c0_380 = arith.constant 0 : index
    %c0_381 = arith.constant 0 : index
    %698 = vector.load %arg25[%c2_379, %c0_380, %c0_381] : memref<3x1x32xf32, #tpu.memory_space<vmem>>, vector<1x1x32xf32>
    %699 = vector.shape_cast %698 : vector<1x1x32xf32> to vector<1x32xf32>
    %700 = arith.truncf %691 : vector<16x32xf32> to vector<16x32xbf16>
    %cst_382 = arith.constant dense<0.000000e+00> : vector<16x96xf32>
    %701 = tpu.matmul %700, %693, %cst_382 {dimension_numbers = #tpu.dot_dimension_numbers<[1], [0], [0], [1], [0, 0, 1, 1], [], []>} : vector<16x32xbf16>, vector<32x96xbf16>, vector<16x96xf32> -> vector<16x96xf32>
    %702 = vector.broadcast %695 : vector<1x96xf32> to vector<16x96xf32>
    %703 = arith.addf %701, %702 : vector<16x96xf32>
    %704 = vector.extract_strided_slice %703 {offsets = [0, 0], sizes = [16, 32], strides = [1, 1]} : vector<16x96xf32> to vector<16x32xf32>
    %705 = vector.extract_strided_slice %703 {offsets = [0, 32], sizes = [16, 32], strides = [1, 1]} : vector<16x96xf32> to vector<16x32xf32>
    %706 = vector.extract_strided_slice %703 {offsets = [0, 64], sizes = [16, 32], strides = [1, 1]} : vector<16x96xf32> to vector<16x32xf32>
    %707 = tpu.concatenate %705, %705, %705, %705, %705, %705, %705, %705 in 0 : vector<16x32xf32>, vector<16x32xf32>, vector<16x32xf32>, vector<16x32xf32>, vector<16x32xf32>, vector<16x32xf32>, vector<16x32xf32>, vector<16x32xf32> -> vector<128x32xf32>
    %708 = arith.mulf %707, %4 : vector<128x32xf32>
    %709 = tpu.concatenate %706, %706, %706, %706, %706, %706, %706, %706 in 0 : vector<16x32xf32>, vector<16x32xf32>, vector<16x32xf32>, vector<16x32xf32>, vector<16x32xf32>, vector<16x32xf32>, vector<16x32xf32>, vector<16x32xf32> -> vector<128x32xf32>
    %710 = arith.mulf %709, %4 : vector<128x32xf32>
    %cst_383 = arith.constant dense<0.000000e+00> : vector<16x128xf32>
    %711 = tpu.matmul %704, %708, %cst_383 {dimension_numbers = #tpu.dot_dimension_numbers<[1], [1], [0], [0], [0, 0, 1, 0], [], []>} : vector<16x32xf32>, vector<128x32xf32>, vector<16x128xf32> -> vector<16x128xf32>
    %712 = arith.addf %711, %1 : vector<16x128xf32>
    %cst_384 = arith.constant dense<0xFF800000> : vector<16xf32>
    %713 = vector.multi_reduction <maximumf>, %712, %cst_384 [1] : vector<16x128xf32> to vector<16xf32>
    %714 = vector.shape_cast %713 : vector<16xf32> to vector<16x1xf32>
    %715 = vector.broadcast %714 : vector<16x1xf32> to vector<16x128xf32>
    %716 = arith.subf %712, %715 : vector<16x128xf32>
    %717 = math.exp %716 : vector<16x128xf32>
    %cst_385 = arith.constant dense<0.000000e+00> : vector<16x128xf32>
    %718 = tpu.matmul %717, %6, %cst_385 {dimension_numbers = #tpu.dot_dimension_numbers<[1], [0], [0], [1], [0, 0, 1, 1], [], []>} : vector<16x128xf32>, vector<128x128xf32>, vector<16x128xf32> -> vector<16x128xf32>
    %719 = arith.divf %717, %718 : vector<16x128xf32>
    %cst_386 = arith.constant dense<0.000000e+00> : vector<16x32xf32>
    %720 = tpu.matmul %719, %710, %cst_386 {dimension_numbers = #tpu.dot_dimension_numbers<[1], [0], [0], [1], [0, 0, 1, 1], [], []>} : vector<16x128xf32>, vector<128x32xf32>, vector<16x32xf32> -> vector<16x32xf32>
    %721 = arith.truncf %720 : vector<16x32xf32> to vector<16x32xbf16>
    %cst_387 = arith.constant dense<0.000000e+00> : vector<16x32xf32>
    %722 = tpu.matmul %721, %697, %cst_387 {dimension_numbers = #tpu.dot_dimension_numbers<[1], [0], [0], [1], [0, 0, 1, 1], [], []>} : vector<16x32xbf16>, vector<32x32xbf16>, vector<16x32xf32> -> vector<16x32xf32>
    %723 = vector.broadcast %699 : vector<1x32xf32> to vector<16x32xf32>
    %724 = arith.addf %722, %723 : vector<16x32xf32>
    %725 = arith.addf %691, %724 : vector<16x32xf32>
    %c2_388 = arith.constant 2 : index
    %c0_389 = arith.constant 0 : index
    %c0_390 = arith.constant 0 : index
    %726 = vector.load %arg20[%c2_388, %c0_389, %c0_390] : memref<3x1x32xf32, #tpu.memory_space<vmem>>, vector<1x1x32xf32>
    %727 = vector.shape_cast %726 : vector<1x1x32xf32> to vector<1x32xf32>
    %c2_391 = arith.constant 2 : index
    %c0_392 = arith.constant 0 : index
    %c0_393 = arith.constant 0 : index
    %728 = vector.load %arg19[%c2_391, %c0_392, %c0_393] : memref<3x1x32xf32, #tpu.memory_space<vmem>>, vector<1x1x32xf32>
    %729 = vector.shape_cast %728 : vector<1x1x32xf32> to vector<1x32xf32>
    %cst_394 = arith.constant dense<0.000000e+00> : vector<16xf32>
    %730 = vector.multi_reduction <add>, %725, %cst_394 [1] : vector<16x32xf32> to vector<16xf32>
    %731 = vector.shape_cast %730 : vector<16xf32> to vector<16x1xf32>
    %cst_395 = arith.constant 3.200000e+01 : f32
    %732 = vector.broadcast %cst_395 : f32 to vector<16x1xf32>
    %733 = arith.divf %731, %732 : vector<16x1xf32>
    %734 = arith.mulf %725, %725 : vector<16x32xf32>
    %cst_396 = arith.constant dense<0.000000e+00> : vector<16xf32>
    %735 = vector.multi_reduction <add>, %734, %cst_396 [1] : vector<16x32xf32> to vector<16xf32>
    %736 = vector.shape_cast %735 : vector<16xf32> to vector<16x1xf32>
    %cst_397 = arith.constant 3.200000e+01 : f32
    %737 = vector.broadcast %cst_397 : f32 to vector<16x1xf32>
    %738 = arith.divf %736, %737 : vector<16x1xf32>
    %739 = arith.mulf %733, %733 : vector<16x1xf32>
    %740 = arith.subf %738, %739 : vector<16x1xf32>
    %741 = vector.broadcast %733 : vector<16x1xf32> to vector<16x32xf32>
    %742 = arith.subf %725, %741 : vector<16x32xf32>
    %cst_398 = arith.constant 9.99999974E-6 : f32
    %743 = vector.broadcast %cst_398 : f32 to vector<16x1xf32>
    %744 = arith.addf %740, %743 : vector<16x1xf32>
    %745 = math.rsqrt %744 : vector<16x1xf32>
    %746 = vector.broadcast %745 : vector<16x1xf32> to vector<16x32xf32>
    %747 = arith.mulf %742, %746 : vector<16x32xf32>
    %748 = vector.broadcast %727 : vector<1x32xf32> to vector<16x32xf32>
    %749 = arith.mulf %747, %748 : vector<16x32xf32>
    %750 = vector.broadcast %729 : vector<1x32xf32> to vector<16x32xf32>
    %751 = arith.addf %749, %750 : vector<16x32xf32>
    %c2_399 = arith.constant 2 : index
    %c0_400 = arith.constant 0 : index
    %c0_401 = arith.constant 0 : index
    %752 = vector.load %arg14[%c2_399, %c0_400, %c0_401] : memref<3x32x32xbf16, #tpu.memory_space<vmem>>, vector<1x32x32xbf16>
    %753 = vector.shape_cast %752 : vector<1x32x32xbf16> to vector<32x32xbf16>
    %c2_402 = arith.constant 2 : index
    %c0_403 = arith.constant 0 : index
    %c0_404 = arith.constant 0 : index
    %754 = vector.load %arg13[%c2_402, %c0_403, %c0_404] : memref<3x1x32xf32, #tpu.memory_space<vmem>>, vector<1x1x32xf32>
    %755 = vector.shape_cast %754 : vector<1x1x32xf32> to vector<1x32xf32>
    %c2_405 = arith.constant 2 : index
    %c0_406 = arith.constant 0 : index
    %c0_407 = arith.constant 0 : index
    %756 = vector.load %arg10[%c2_405, %c0_406, %c0_407] : memref<3x32x64xbf16, #tpu.memory_space<vmem>>, vector<1x32x64xbf16>
    %757 = vector.shape_cast %756 : vector<1x32x64xbf16> to vector<32x64xbf16>
    %c2_408 = arith.constant 2 : index
    %c0_409 = arith.constant 0 : index
    %c0_410 = arith.constant 0 : index
    %758 = vector.load %arg9[%c2_408, %c0_409, %c0_410] : memref<3x1x64xf32, #tpu.memory_space<vmem>>, vector<1x1x64xf32>
    %759 = vector.shape_cast %758 : vector<1x1x64xf32> to vector<1x64xf32>
    %c2_411 = arith.constant 2 : index
    %c0_412 = arith.constant 0 : index
    %c0_413 = arith.constant 0 : index
    %760 = vector.load %arg12[%c2_411, %c0_412, %c0_413] : memref<3x32x32xbf16, #tpu.memory_space<vmem>>, vector<1x32x32xbf16>
    %761 = vector.shape_cast %760 : vector<1x32x32xbf16> to vector<32x32xbf16>
    %c2_414 = arith.constant 2 : index
    %c0_415 = arith.constant 0 : index
    %c0_416 = arith.constant 0 : index
    %762 = vector.load %arg11[%c2_414, %c0_415, %c0_416] : memref<3x1x32xf32, #tpu.memory_space<vmem>>, vector<1x1x32xf32>
    %763 = vector.shape_cast %762 : vector<1x1x32xf32> to vector<1x32xf32>
    %764 = arith.truncf %751 : vector<16x32xf32> to vector<16x32xbf16>
    %cst_417 = arith.constant dense<0.000000e+00> : vector<16x32xf32>
    %765 = tpu.matmul %764, %753, %cst_417 {dimension_numbers = #tpu.dot_dimension_numbers<[1], [0], [0], [1], [0, 0, 1, 1], [], []>} : vector<16x32xbf16>, vector<32x32xbf16>, vector<16x32xf32> -> vector<16x32xf32>
    %766 = vector.broadcast %755 : vector<1x32xf32> to vector<16x32xf32>
    %767 = arith.addf %765, %766 : vector<16x32xf32>
    %768 = arith.truncf %346 : vector<16x32xf32> to vector<16x32xbf16>
    %cst_418 = arith.constant dense<0.000000e+00> : vector<16x64xf32>
    %769 = tpu.matmul %768, %757, %cst_418 {dimension_numbers = #tpu.dot_dimension_numbers<[1], [0], [0], [1], [0, 0, 1, 1], [], []>} : vector<16x32xbf16>, vector<32x64xbf16>, vector<16x64xf32> -> vector<16x64xf32>
    %770 = vector.broadcast %759 : vector<1x64xf32> to vector<16x64xf32>
    %771 = arith.addf %769, %770 : vector<16x64xf32>
    %772 = vector.extract_strided_slice %771 {offsets = [0, 0], sizes = [16, 32], strides = [1, 1]} : vector<16x64xf32> to vector<16x32xf32>
    %773 = vector.extract_strided_slice %771 {offsets = [0, 32], sizes = [16, 32], strides = [1, 1]} : vector<16x64xf32> to vector<16x32xf32>
    %774 = tpu.concatenate %772, %772, %772, %772, %772, %772, %772, %772 in 0 : vector<16x32xf32>, vector<16x32xf32>, vector<16x32xf32>, vector<16x32xf32>, vector<16x32xf32>, vector<16x32xf32>, vector<16x32xf32>, vector<16x32xf32> -> vector<128x32xf32>
    %775 = arith.mulf %774, %3 : vector<128x32xf32>
    %776 = tpu.concatenate %773, %773, %773, %773, %773, %773, %773, %773 in 0 : vector<16x32xf32>, vector<16x32xf32>, vector<16x32xf32>, vector<16x32xf32>, vector<16x32xf32>, vector<16x32xf32>, vector<16x32xf32>, vector<16x32xf32> -> vector<128x32xf32>
    %777 = arith.mulf %776, %3 : vector<128x32xf32>
    %cst_419 = arith.constant dense<0.000000e+00> : vector<16x128xf32>
    %778 = tpu.matmul %767, %775, %cst_419 {dimension_numbers = #tpu.dot_dimension_numbers<[1], [1], [0], [0], [0, 0, 1, 0], [], []>} : vector<16x32xf32>, vector<128x32xf32>, vector<16x128xf32> -> vector<16x128xf32>
    %779 = arith.addf %778, %2 : vector<16x128xf32>
    %cst_420 = arith.constant dense<0xFF800000> : vector<16xf32>
    %780 = vector.multi_reduction <maximumf>, %779, %cst_420 [1] : vector<16x128xf32> to vector<16xf32>
    %781 = vector.shape_cast %780 : vector<16xf32> to vector<16x1xf32>
    %782 = vector.broadcast %781 : vector<16x1xf32> to vector<16x128xf32>
    %783 = arith.subf %779, %782 : vector<16x128xf32>
    %784 = math.exp %783 : vector<16x128xf32>
    %cst_421 = arith.constant dense<0.000000e+00> : vector<16x128xf32>
    %785 = tpu.matmul %784, %5, %cst_421 {dimension_numbers = #tpu.dot_dimension_numbers<[1], [0], [0], [1], [0, 0, 1, 1], [], []>} : vector<16x128xf32>, vector<128x128xf32>, vector<16x128xf32> -> vector<16x128xf32>
    %786 = arith.divf %784, %785 : vector<16x128xf32>
    %cst_422 = arith.constant dense<0.000000e+00> : vector<16x32xf32>
    %787 = tpu.matmul %786, %777, %cst_422 {dimension_numbers = #tpu.dot_dimension_numbers<[1], [0], [0], [1], [0, 0, 1, 1], [], []>} : vector<16x128xf32>, vector<128x32xf32>, vector<16x32xf32> -> vector<16x32xf32>
    %788 = arith.truncf %787 : vector<16x32xf32> to vector<16x32xbf16>
    %cst_423 = arith.constant dense<0.000000e+00> : vector<16x32xf32>
    %789 = tpu.matmul %788, %761, %cst_423 {dimension_numbers = #tpu.dot_dimension_numbers<[1], [0], [0], [1], [0, 0, 1, 1], [], []>} : vector<16x32xbf16>, vector<32x32xbf16>, vector<16x32xf32> -> vector<16x32xf32>
    %790 = vector.broadcast %763 : vector<1x32xf32> to vector<16x32xf32>
    %791 = arith.addf %789, %790 : vector<16x32xf32>
    %792 = arith.addf %751, %791 : vector<16x32xf32>
    %c2_424 = arith.constant 2 : index
    %c0_425 = arith.constant 0 : index
    %c0_426 = arith.constant 0 : index
    %793 = vector.load %arg22[%c2_424, %c0_425, %c0_426] : memref<3x1x32xf32, #tpu.memory_space<vmem>>, vector<1x1x32xf32>
    %794 = vector.shape_cast %793 : vector<1x1x32xf32> to vector<1x32xf32>
    %c2_427 = arith.constant 2 : index
    %c0_428 = arith.constant 0 : index
    %c0_429 = arith.constant 0 : index
    %795 = vector.load %arg21[%c2_427, %c0_428, %c0_429] : memref<3x1x32xf32, #tpu.memory_space<vmem>>, vector<1x1x32xf32>
    %796 = vector.shape_cast %795 : vector<1x1x32xf32> to vector<1x32xf32>
    %cst_430 = arith.constant dense<0.000000e+00> : vector<16xf32>
    %797 = vector.multi_reduction <add>, %792, %cst_430 [1] : vector<16x32xf32> to vector<16xf32>
    %798 = vector.shape_cast %797 : vector<16xf32> to vector<16x1xf32>
    %cst_431 = arith.constant 3.200000e+01 : f32
    %799 = vector.broadcast %cst_431 : f32 to vector<16x1xf32>
    %800 = arith.divf %798, %799 : vector<16x1xf32>
    %801 = arith.mulf %792, %792 : vector<16x32xf32>
    %cst_432 = arith.constant dense<0.000000e+00> : vector<16xf32>
    %802 = vector.multi_reduction <add>, %801, %cst_432 [1] : vector<16x32xf32> to vector<16xf32>
    %803 = vector.shape_cast %802 : vector<16xf32> to vector<16x1xf32>
    %cst_433 = arith.constant 3.200000e+01 : f32
    %804 = vector.broadcast %cst_433 : f32 to vector<16x1xf32>
    %805 = arith.divf %803, %804 : vector<16x1xf32>
    %806 = arith.mulf %800, %800 : vector<16x1xf32>
    %807 = arith.subf %805, %806 : vector<16x1xf32>
    %808 = vector.broadcast %800 : vector<16x1xf32> to vector<16x32xf32>
    %809 = arith.subf %792, %808 : vector<16x32xf32>
    %cst_434 = arith.constant 9.99999974E-6 : f32
    %810 = vector.broadcast %cst_434 : f32 to vector<16x1xf32>
    %811 = arith.addf %807, %810 : vector<16x1xf32>
    %812 = math.rsqrt %811 : vector<16x1xf32>
    %813 = vector.broadcast %812 : vector<16x1xf32> to vector<16x32xf32>
    %814 = arith.mulf %809, %813 : vector<16x32xf32>
    %815 = vector.broadcast %794 : vector<1x32xf32> to vector<16x32xf32>
    %816 = arith.mulf %814, %815 : vector<16x32xf32>
    %817 = vector.broadcast %796 : vector<1x32xf32> to vector<16x32xf32>
    %818 = arith.addf %816, %817 : vector<16x32xf32>
    %c2_435 = arith.constant 2 : index
    %c0_436 = arith.constant 0 : index
    %c0_437 = arith.constant 0 : index
    %819 = vector.load %arg16[%c2_435, %c0_436, %c0_437] : memref<3x32x512xbf16, #tpu.memory_space<vmem>>, vector<1x32x512xbf16>
    %820 = vector.shape_cast %819 : vector<1x32x512xbf16> to vector<32x512xbf16>
    %c2_438 = arith.constant 2 : index
    %c0_439 = arith.constant 0 : index
    %c0_440 = arith.constant 0 : index
    %821 = vector.load %arg15[%c2_438, %c0_439, %c0_440] : memref<3x1x512xf32, #tpu.memory_space<vmem>>, vector<1x1x512xf32>
    %822 = vector.shape_cast %821 : vector<1x1x512xf32> to vector<1x512xf32>
    %823 = arith.truncf %818 : vector<16x32xf32> to vector<16x32xbf16>
    %cst_441 = arith.constant dense<0.000000e+00> : vector<16x512xf32>
    %824 = tpu.matmul %823, %820, %cst_441 {dimension_numbers = #tpu.dot_dimension_numbers<[1], [0], [0], [1], [0, 0, 1, 1], [], []>} : vector<16x32xbf16>, vector<32x512xbf16>, vector<16x512xf32> -> vector<16x512xf32>
    %825 = vector.broadcast %822 : vector<1x512xf32> to vector<16x512xf32>
    %826 = arith.addf %824, %825 : vector<16x512xf32>
    %cst_442 = arith.constant 0.000000e+00 : f32
    %827 = vector.broadcast %cst_442 : f32 to vector<16x512xf32>
    %828 = arith.maximumf %826, %827 : vector<16x512xf32>
    %c2_443 = arith.constant 2 : index
    %c0_444 = arith.constant 0 : index
    %c0_445 = arith.constant 0 : index
    %829 = vector.load %arg18[%c2_443, %c0_444, %c0_445] : memref<3x512x32xbf16, #tpu.memory_space<vmem>>, vector<1x512x32xbf16>
    %830 = vector.shape_cast %829 : vector<1x512x32xbf16> to vector<512x32xbf16>
    %c2_446 = arith.constant 2 : index
    %c0_447 = arith.constant 0 : index
    %c0_448 = arith.constant 0 : index
    %831 = vector.load %arg17[%c2_446, %c0_447, %c0_448] : memref<3x1x32xf32, #tpu.memory_space<vmem>>, vector<1x1x32xf32>
    %832 = vector.shape_cast %831 : vector<1x1x32xf32> to vector<1x32xf32>
    %833 = arith.truncf %828 : vector<16x512xf32> to vector<16x512xbf16>
    %cst_449 = arith.constant dense<0.000000e+00> : vector<16x32xf32>
    %834 = tpu.matmul %833, %830, %cst_449 {dimension_numbers = #tpu.dot_dimension_numbers<[1], [0], [0], [1], [0, 0, 1, 1], [], []>} : vector<16x512xbf16>, vector<512x32xbf16>, vector<16x32xf32> -> vector<16x32xf32>
    %835 = vector.broadcast %832 : vector<1x32xf32> to vector<16x32xf32>
    %836 = arith.addf %834, %835 : vector<16x32xf32>
    %837 = arith.addf %818, %836 : vector<16x32xf32>
    %c2_450 = arith.constant 2 : index
    %c0_451 = arith.constant 0 : index
    %c0_452 = arith.constant 0 : index
    %838 = vector.load %arg24[%c2_450, %c0_451, %c0_452] : memref<3x1x32xf32, #tpu.memory_space<vmem>>, vector<1x1x32xf32>
    %839 = vector.shape_cast %838 : vector<1x1x32xf32> to vector<1x32xf32>
    %c2_453 = arith.constant 2 : index
    %c0_454 = arith.constant 0 : index
    %c0_455 = arith.constant 0 : index
    %840 = vector.load %arg23[%c2_453, %c0_454, %c0_455] : memref<3x1x32xf32, #tpu.memory_space<vmem>>, vector<1x1x32xf32>
    %841 = vector.shape_cast %840 : vector<1x1x32xf32> to vector<1x32xf32>
    %cst_456 = arith.constant dense<0.000000e+00> : vector<16xf32>
    %842 = vector.multi_reduction <add>, %837, %cst_456 [1] : vector<16x32xf32> to vector<16xf32>
    %843 = vector.shape_cast %842 : vector<16xf32> to vector<16x1xf32>
    %cst_457 = arith.constant 3.200000e+01 : f32
    %844 = vector.broadcast %cst_457 : f32 to vector<16x1xf32>
    %845 = arith.divf %843, %844 : vector<16x1xf32>
    %846 = arith.mulf %837, %837 : vector<16x32xf32>
    %cst_458 = arith.constant dense<0.000000e+00> : vector<16xf32>
    %847 = vector.multi_reduction <add>, %846, %cst_458 [1] : vector<16x32xf32> to vector<16xf32>
    %848 = vector.shape_cast %847 : vector<16xf32> to vector<16x1xf32>
    %cst_459 = arith.constant 3.200000e+01 : f32
    %849 = vector.broadcast %cst_459 : f32 to vector<16x1xf32>
    %850 = arith.divf %848, %849 : vector<16x1xf32>
    %851 = arith.mulf %845, %845 : vector<16x1xf32>
    %852 = arith.subf %850, %851 : vector<16x1xf32>
    %853 = vector.broadcast %845 : vector<16x1xf32> to vector<16x32xf32>
    %854 = arith.subf %837, %853 : vector<16x32xf32>
    %cst_460 = arith.constant 9.99999974E-6 : f32
    %855 = vector.broadcast %cst_460 : f32 to vector<16x1xf32>
    %856 = arith.addf %852, %855 : vector<16x1xf32>
    %857 = math.rsqrt %856 : vector<16x1xf32>
    %858 = vector.broadcast %857 : vector<16x1xf32> to vector<16x32xf32>
    %859 = arith.mulf %854, %858 : vector<16x32xf32>
    %860 = vector.broadcast %839 : vector<1x32xf32> to vector<16x32xf32>
    %861 = arith.mulf %859, %860 : vector<16x32xf32>
    %862 = vector.broadcast %841 : vector<1x32xf32> to vector<16x32xf32>
    %863 = arith.addf %861, %862 : vector<16x32xf32>
    %c0_461 = arith.constant 0 : index
    %c0_462 = arith.constant 0 : index
    %864 = vector.load %arg30[%c0_461, %c0_462] : memref<1x32xf32, #tpu.memory_space<vmem>>, vector<1x32xf32>
    %c0_463 = arith.constant 0 : index
    %c0_464 = arith.constant 0 : index
    %865 = vector.load %arg29[%c0_463, %c0_464] : memref<1x32xf32, #tpu.memory_space<vmem>>, vector<1x32xf32>
    %cst_465 = arith.constant dense<0.000000e+00> : vector<16xf32>
    %866 = vector.multi_reduction <add>, %863, %cst_465 [1] : vector<16x32xf32> to vector<16xf32>
    %867 = vector.shape_cast %866 : vector<16xf32> to vector<16x1xf32>
    %cst_466 = arith.constant 3.200000e+01 : f32
    %868 = vector.broadcast %cst_466 : f32 to vector<16x1xf32>
    %869 = arith.divf %867, %868 : vector<16x1xf32>
    %870 = arith.mulf %863, %863 : vector<16x32xf32>
    %cst_467 = arith.constant dense<0.000000e+00> : vector<16xf32>
    %871 = vector.multi_reduction <add>, %870, %cst_467 [1] : vector<16x32xf32> to vector<16xf32>
    %872 = vector.shape_cast %871 : vector<16xf32> to vector<16x1xf32>
    %cst_468 = arith.constant 3.200000e+01 : f32
    %873 = vector.broadcast %cst_468 : f32 to vector<16x1xf32>
    %874 = arith.divf %872, %873 : vector<16x1xf32>
    %875 = arith.mulf %869, %869 : vector<16x1xf32>
    %876 = arith.subf %874, %875 : vector<16x1xf32>
    %877 = vector.broadcast %869 : vector<16x1xf32> to vector<16x32xf32>
    %878 = arith.subf %863, %877 : vector<16x32xf32>
    %cst_469 = arith.constant 9.99999974E-6 : f32
    %879 = vector.broadcast %cst_469 : f32 to vector<16x1xf32>
    %880 = arith.addf %876, %879 : vector<16x1xf32>
    %881 = math.rsqrt %880 : vector<16x1xf32>
    %882 = vector.broadcast %881 : vector<16x1xf32> to vector<16x32xf32>
    %883 = arith.mulf %878, %882 : vector<16x32xf32>
    %884 = vector.broadcast %864 : vector<1x32xf32> to vector<16x32xf32>
    %885 = arith.mulf %883, %884 : vector<16x32xf32>
    %886 = vector.broadcast %865 : vector<1x32xf32> to vector<16x32xf32>
    %887 = arith.addf %885, %886 : vector<16x32xf32>
    %c0_470 = arith.constant 0 : index
    %c0_471 = arith.constant 0 : index
    %888 = vector.load %arg45[%c0_470, %c0_471] : memref<16x32xf32, #tpu.memory_space<vmem>>, vector<16x32xf32>
    tpu.vector_store %arg45[%c0_470, %c0_471], %887 {strides = array<i32>} : memref<16x32xf32, #tpu.memory_space<vmem>>, vector<16x32xf32>,
    return
  }
}

</mosaic_0001>

<bundles_post_ra>
// kernel: tile.29
= control target key start
LH: loop header
LB: loop body
LE: loop exit
PB: predicated region body
PF: predicated region fallthrough
CT: control target
= control target key end

     0   :  { %vm4_vm0 = vcmask 1047556   ;;  %s209_s14 = smov 96   ;;  %s210_s19 = smov 112   ;;  %vm6_vm1 = vcmask 130048   ;;  %vm25_vm2 = vcmask 1048448   ;;  %vm46_vm3 = vcmask 917248   ;;  %s388_s0 = inlined_call_operand.vmem [shape: f32[16,8,16], index: 0, kind: input, shape index: {}]   ;;  %s389_s1 = inlined_call_operand.vmem [shape: f32[16,128], index: 1, kind: output, shape index: {}]  }
   0x1   :  { %v172_v0 = vld [vmem:[%s388_s0 + $0x6] ss:$8 sm:$0xf]   ;;  %v167_v3 = vld [vmem:[%s388_s0 + $0x7] ss:$8 sm:$0xf]  }
   0x2   :  { %v173_v1 = vld [vmem:[%s388_s0 + $0x6] ss:$8 sm:$0xf0]   ;;  %v168_v4 = vld [vmem:[%s388_s0 + $0x7] ss:$8 sm:$0xf0]  }
   0x3   :  { %v43_v2 = vsel %vm4_vm0, %v173_v1, %v172_v0  ;;  %v22_v5 = vsel %vm4_vm0, %v168_v4, %v167_v3  ;;  %v174_v6 = vld [vmem:[%s388_s0 + $0x46] ss:$8 sm:$0xf]   ;;  %v169_v9 = vld [vmem:[%s388_s0 + $0x47] ss:$8 sm:$0xf]  }
   0x4   :  { %44 = vrot.lane.b32.xlu1 %v43_v2, %s209_s14  ;;  %v175_v7 = vld [vmem:[%s388_s0 + $0x46] ss:$8 sm:$0xf0]   ;;  %23 = vrot.lane.b32.xlu0 %v22_v5, %s210_s19  ;;  %v170_v10 = vld [vmem:[%s388_s0 + $0x47] ss:$8 sm:$0xf0]  }
   0x5   :  { %v53_v8 = vsel %vm4_vm0, %v175_v7, %v174_v6  ;;  %v32_v11 = vsel %vm4_vm0, %v170_v10, %v169_v9  ;;  %v179_v12 = vld [vmem:[%s388_s0 + $0x45] ss:$8 sm:$0xf]   ;;  %v184_v18 = vld [vmem:[%s388_s0 + $0x44] ss:$8 sm:$0xf]  }
   0x6   :  { %v180_v13 = vld [vmem:[%s388_s0 + $0x45] ss:$8 sm:$0xf0]   ;;  %v185_v19 = vld [vmem:[%s388_s0 + $0x44] ss:$8 sm:$0xf0]  }
   0x7   :  { %v177_v14 = vld [vmem:[%s388_s0 + $0x5] ss:$8 sm:$0xf]   ;;  %v74_v16 = vsel %vm4_vm0, %v180_v13, %v179_v12  ;;  %v182_v20 = vld [vmem:[%s388_s0 + $0x4] ss:$8 sm:$0xf]   ;;  %v95_v22 = vsel %vm4_vm0, %v185_v19, %v184_v18 }
   0x8   :  { %54 = vrot.lane.b32.xlu1 %v53_v8, %s209_s14  ;;  %v178_v15 = vld [vmem:[%s388_s0 + $0x5] ss:$8 sm:$0xf0]   ;;  %33 = vrot.lane.b32.xlu0 %v32_v11, %s210_s19  ;;  %v183_v21 = vld [vmem:[%s388_s0 + $0x4] ss:$8 sm:$0xf0]  }
   0x9   :  { %v64_v17 = vsel %vm4_vm0, %v178_v15, %v177_v14  ;;  %s211_s11 = smov 80   ;;  %v85_v23 = vsel %vm4_vm0, %v183_v21, %v182_v20  ;;  %v189_v24 = vld [vmem:[%s388_s0 + $0x43] ss:$8 sm:$0xf]   ;;  %s212_s20 = smov 64   ;;  %vm67_vm4 = vcmask 786048  }
   0xa   :  { %v190_v25 = vld [vmem:[%s388_s0 + $0x43] ss:$8 sm:$0xf0]   ;;  %v194_v28 = vld [vmem:[%s388_s0 + $0x42] ss:$8 sm:$0xf]  }
   0xb   :  { %v187_v26 = vld [vmem:[%s388_s0 + $0x3] ss:$8 sm:$0xf]   ;;  %v195_v29 = vld [vmem:[%s388_s0 + $0x42] ss:$8 sm:$0xf0]   ;;  %v116_v30 = vsel %vm4_vm0, %v190_v25, %v189_v24 }
   0xc   :  { %75 = vrot.lane.b32.xlu1 %v74_v16, %s211_s11  ;;  %65 = vrot.lane.b32.xlu0 %v64_v17, %s211_s11  ;;  %v188_v27 = vld [vmem:[%s388_s0 + $0x3] ss:$8 sm:$0xf0]   ;;  %v192_v31 = vld [vmem:[%s388_s0 + $0x2] ss:$8 sm:$0xf]   ;;  %v137_v40 = vsel %vm4_vm0, %v195_v29, %v194_v28 }
   0xd   :  { %v2_v32 = vld [vmem:[%s388_s0] ss:$8 sm:$0xf]   ;;  %v106_v33 = vsel %vm4_vm0, %v188_v27, %v187_v26  ;;  %v193_v36 = vld [vmem:[%s388_s0 + $0x2] ss:$8 sm:$0xf0]  }
   0xe   :  { %v3_v34 = vld [vmem:[%s388_s0] ss:$8 sm:$0xf0]   ;;  %s213_s8 = smov 48   ;;  %v127_v41 = vsel %vm4_vm0, %v193_v36, %v192_v31  ;;  %s215_s21 = smov 16   ;;  %vm88_vm5 = vcmask 654848  }
   0xf   :  { %v164_v35 = vld [vmem:[%s388_s0 + $0x40] ss:$8 sm:$0xf]   ;;  %v5_v37 = vsel %vm4_vm0, %v3_v34, %v2_v32  ;;  %v199_v42 = vld [vmem:[%s388_s0 + $0x41] ss:$8 sm:$0xf]  }
  0x10   :  { %96 = vrot.lane.b32.xlu1 %v95_v22, %s212_s20  ;;  %86 = vrot.lane.b32.xlu0 %v85_v23, %s212_s20  ;;  %v165_v38 = vld [vmem:[%s388_s0 + $0x40] ss:$8 sm:$0xf0]   ;;  %7 = vst.msk [vmem:[%s389_s1] sm:$0xff] %vm6_vm1, %v5_v37   ;;  %vm109_vm6 = vcmask 523648   ;;  %vm130_vm7 = vcmask 392448  }
  0x11   :  { %v13_v39 = vsel %vm4_vm0, %v165_v38, %v164_v35  ;;  %v200_v43 = vld [vmem:[%s388_s0 + $0x41] ss:$8 sm:$0xf0]   ;;  %vm151_vm8 = vcmask 261248  }
  0x12   :  { %166 = vst.msk [vmem:[%s389_s1 + $0x8] sm:$0xff] %vm6_vm1, %v13_v39   ;;  %v197_v44 = vld [vmem:[%s388_s0 + $0x1] ss:$8 sm:$0xf]   ;;  %v158_v46 = vsel %vm4_vm0, %v200_v43, %v199_v42 }
  0x13   :  { %v198_v45 = vld [vmem:[%s388_s0 + $0x1] ss:$8 sm:$0xf0]   ;;  %s214_s0 = smov 32  }
  0x14   :  { %117 = vrot.lane.b32.xlu1 %v116_v30, %s213_s8  ;;  %107 = vrot.lane.b32.xlu0 %v106_v33, %s213_s8  ;;  %v148_v47 = vsel %vm4_vm0, %v198_v45, %v197_v44 }
  0x18   :  { %138 = vrot.lane.b32.xlu1 %v137_v40, %s214_s0  ;;  %128 = vrot.lane.b32.xlu0 %v127_v41, %s214_s0 }
  0x1c   :  { %159 = vrot.lane.b32.xlu1 %v158_v46, %s215_s21  ;;  %149 = vrot.lane.b32.xlu0 %v148_v47, %s215_s21 }
  0x76   :  { %v45_v48 = vpop.permute.xlu1 %44   ;;  %v24_v49 = vpop.permute.xlu0 %23  }
  0x77   :  { %26 = vst.msk [vmem:[%s389_s1] sm:$0xff] %vm25_vm2, %v24_v49  }
  0x78   :  { %47 = vst.msk [vmem:[%s389_s1] sm:$0xff] %vm46_vm3, %v45_v48  }
  0x7a   :  { %v55_v50 = vpop.permute.xlu1 %54   ;;  %v34_v51 = vpop.permute.xlu0 %33  }
  0x7b   :  { %171 = vst.msk [vmem:[%s389_s1 + $0x8] sm:$0xff] %vm25_vm2, %v34_v51  }
  0x7c   :  { %176 = vst.msk [vmem:[%s389_s1 + $0x8] sm:$0xff] %vm46_vm3, %v55_v50  }
  0x7e   :  { %v76_v52 = vpop.permute.xlu1 %75   ;;  %v66_v53 = vpop.permute.xlu0 %65  }
  0x7f   :  { %181 = vst.msk [vmem:[%s389_s1 + $0x8] sm:$0xff] %vm67_vm4, %v76_v52   ;;  %68 = vst.msk [vmem:[%s389_s1] sm:$0xff] %vm67_vm4, %v66_v53  }
  0x82   :  { %v97_v54 = vpop.permute.xlu1 %96   ;;  %v87_v55 = vpop.permute.xlu0 %86  }
  0x83   :  { %186 = vst.msk [vmem:[%s389_s1 + $0x8] sm:$0xff] %vm88_vm5, %v97_v54   ;;  %89 = vst.msk [vmem:[%s389_s1] sm:$0xff] %vm88_vm5, %v87_v55  }
  0x86   :  { %v118_v56 = vpop.permute.xlu1 %117   ;;  %v108_v57 = vpop.permute.xlu0 %107  }
  0x87   :  { %191 = vst.msk [vmem:[%s389_s1 + $0x8] sm:$0xff] %vm109_vm6, %v118_v56   ;;  %110 = vst.msk [vmem:[%s389_s1] sm:$0xff] %vm109_vm6, %v108_v57  }
  0x8a   :  { %v139_v58 = vpop.permute.xlu1 %138   ;;  %v129_v59 = vpop.permute.xlu0 %128  }
  0x8b   :  { %196 = vst.msk [vmem:[%s389_s1 + $0x8] sm:$0xff] %vm130_vm7, %v139_v58   ;;  %131 = vst.msk [vmem:[%s389_s1] sm:$0xff] %vm130_vm7, %v129_v59  }
  0x8e   :  { %v160_v60 = vpop.permute.xlu1 %159   ;;  %v150_v61 = vpop.permute.xlu0 %149  }
  0x8f   :  { %201 = vst.msk [vmem:[%s389_s1 + $0x8] sm:$0xff] %vm151_vm8, %v160_v60   ;;  %152 = vst.msk [vmem:[%s389_s1] sm:$0xff] %vm151_vm8, %v150_v61  }

// kernel: my_transformer_forward.1
= control target key start
LH: loop header
LB: loop body
LE: loop exit
PB: predicated region body
PF: predicated region fallthrough
CT: control target
= control target key end

     0   :  { %v17685_v0 = vmov 0.0   ;;  %s14676_s3 = smov 42   ;;  %vm14677_vm0 = vmmov 0   ;;  %s14678_s10 = smov 5   ;;  %vm288_vm1 = vcmask 261120   ;;  %s17682_s0 = inlined_call_operand.smem [shape: u32[46], index: -1, kind: input, shape index: {}] }
   0x1   :  { %11400 = vmatprep.subr.bf16.mxu0 %v17685_v0  ;;  %s14734_s6 = sld [smem:[%s17682_s0 + %s14676_s3]]   ;;  %11404 = vmatprep.mubr.msk.bf16.mxu0 %vm14677_vm0, %v17685_v0  ;;  %s14679_s14 = smov 32   ;;  %vm14922_vm2 = vmpackc.low %vm288_vm1, %vm288_vm1 }
   0x2   :  { %s1_s9 = sld [smem:[%s17682_s0]]   ;;  %s14680_s15 = smov 41  }
   0x3   :  { %s14744_s13 = sld [smem:[%s17682_s0 + %s14678_s10]]   ;;  %s14681_s19 = smov 96  }
   0x4   :  { %s14855_s18 = sld [smem:[%s17682_s0 + %s14680_s15]]   ;;  %s14682_s20 = smov 7  }
   0x5   :  { %s14966_s23 = sld [smem:[%s17682_s0 + %s14682_s20]]   ;;  %s14683_s24 = smov 2  }
   0x6   :  { %s14995_s27 = sld [smem:[%s17682_s0 + %s14683_s24]]   ;;  %s17804_s28 = smov 64  }
   0x7   :  { %v14171_v1 = vld [vmem:[%s14734_s6] sm:$0xff]   ;;  %v14172_v2 = vld [vmem:[%s14734_s6 + $0x8] sm:$0xff]   ;;  %s14685_s29 = smov 40   ;;  %s14686_s3 = smov 39  }
   0x8   :  { %11401 = vmatpush3.bf16.msra.mxu0 %v14171_v1  ;;  %v14748_v3 = vld [vmem:[%s1_s9] sm:$0xff]  ;;  %v14750_v4 = vld [vmem:[%s1_s9 + $0x8] sm:$0xff]  ;;  %s15136_s2 = sld [smem:[%s17682_s0 + %s14685_s29]]   ;;  %s14688_s11 = smov 34  }
   0x9   :  { %v14753_v5 = vld [vmem:[%s14744_s13] sm:$0xff]  ;;  %11402 = vmatprep.subr.bf16.mxu0 %v17685_v0  ;;  %v14759_v6 = vld [vmem:[%s14744_s13 + $0x10] sm:$0xff]  ;;  %v14764_v7 = vld [vmem:[%s14744_s13 + $0x8] sm:$0xff]  ;;  %v269_v8 = vpack.c.bf16 %v14750_v4, %v14748_v3  ;;  %s15147_s7 = sld [smem:[%s17682_s0 + %s14686_s3]]   ;;  %s14689_s17 = smov 36  }
   0xa   :  { %349 = vrot.lane.b32.xlu0 %v14753_v5, %s14679_s14  ;;  %353 = vrot.lane.b32.xlu1 %v14759_v6, %s14679_s14  ;;  %v14769_v9 = vld [vmem:[%s14744_s13 + $0x18] sm:$0xff]  ;;  %v14774_v10 = vld [vmem:[%s14744_s13 + $0x20] sm:$0xff]  ;;  %s15170_s10 = sld [smem:[%s17682_s0 + %s14679_s14]]   ;;  %s14691_s29 = smov 31  }
   0xb   :  { %v14777_v11 = vld [vmem:[%s14744_s13 + $0x28] sm:$0xff]  ;;  %v14787_v12 = vld [vmem:[%s14744_s13 + $0x30] sm:$0xff]  ;;  %v14790_v13 = vld [vmem:[%s14744_s13 + $0x38] sm:$0xff]  ;;  %s15185_s16 = sld [smem:[%s17682_s0 + %s14688_s11]]   ;;  %s14692_s4 = smov 33  }
   0xc   :  { %11403 = vmatpush3.bf16.msra.mxu0 %v14172_v2  ;;  %v14797_v14 = vld [vmem:[%s14744_s13 + $0x40] sm:$0xff]  ;;  %v14800_v15 = vld [vmem:[%s14744_s13 + $0x48] sm:$0xff]  ;;  %v14807_v16 = vld [vmem:[%s14744_s13 + $0x50] sm:$0xff]  ;;  %s15192_s22 = sld [smem:[%s17682_s0 + %s14689_s17]]   ;;  %s14693_s11 = smov 38  }
   0xd   :  { %v14810_v17 = vld [vmem:[%s14744_s13 + $0x58] sm:$0xff]  ;;  %v14817_v18 = vld [vmem:[%s14744_s13 + $0x60] sm:$0xff]  ;;  %v14820_v19 = vld [vmem:[%s14744_s13 + $0x68] sm:$0xff]  ;;  %s15245_s3 = sld [smem:[%s17682_s0 + %s14691_s29]]   ;;  %s14694_s20 = smov 37  }
   0xe   :  { %351 = vrot.lane.b32.xlu0 %v14764_v7, %s14679_s14  ;;  %355 = vrot.lane.b32.xlu1 %v14769_v9, %s14679_s14  ;;  %v14827_v20 = vld [vmem:[%s14744_s13 + $0x70] sm:$0xff]  ;;  %v14830_v21 = vld [vmem:[%s14744_s13 + $0x78] sm:$0xff]  ;;  %s15265_s9 = sld [smem:[%s17682_s0 + %s14692_s4]]   ;;  %s14698_s30 = smov 27  }
   0xf   :  { %11405 = vmatmul.mubr.msk.bf16.vlgmr.msra.gmra.mrb[0].mxu0 %vm288_vm1, %v269_v8  ;;  %v9663_v32 = vld [vmem:[%s14855_s18] ss:$0 sm:$0xff]  ;;  %s15281_s17 = sld [smem:[%s17682_s0 + %s14693_s11]]   ;;  %s14699_s5 = smov 8  }
  0x10   :  { %s15286_s24 = sld [smem:[%s17682_s0 + %s14694_s20]]   ;;  %s14700_s12 = smov 3  }
  0x11   :  { %s15869_s4 = sld [smem:[%s17682_s0 + %s14698_s30]]   ;;  %s14710_s30 = smov 13  }
  0x12   :  { %357 = vrot.lane.b32.xlu0 %v14774_v10, %s14679_s14  ;;  %359 = vrot.lane.b32.xlu1 %v14777_v11, %s14679_s14  ;;  %s15979_s11 = sld [smem:[%s17682_s0 + %s14699_s5]]   ;;  %s14711_s8 = smov 4  }
  0x13   :  { %s16008_s21 = sld [smem:[%s17682_s0 + %s14700_s12]]  }
  0x14   :  { %s16464_s5 = sld [smem:[%s17682_s0 + %s14710_s30]]   ;;  %s14720_s30 = smov 24  }
  0x15   :  { %s16474_s15 = sld [smem:[%s17682_s0 + %s14711_s8]]   ;;  %s14715_s8 = smov 18  }
  0x16   :  { %361 = vrot.lane.b32.xlu0 %v14787_v12, %s14679_s14  ;;  %363 = vrot.lane.b32.xlu1 %v14790_v13, %s14679_s14  ;;  %s16635_s12 = sld [smem:[%s17682_s0 + %s14720_s30]]   ;;  %s17953_s30 = smov 64  }
  0x1a   :  { %365 = vrot.lane.b32.xlu0 %v14797_v14, %s14679_s14  ;;  %367 = vrot.lane.b32.xlu1 %v14800_v15, %s14679_s14 }
  0x1e   :  { %369 = vrot.lane.b32.xlu0 %v14807_v16, %s14679_s14  ;;  %371 = vrot.lane.b32.xlu1 %v14810_v17, %s14679_s14 }
  0x22   :  { %373 = vrot.lane.b32.xlu0 %v14817_v18, %s14679_s14  ;;  %375 = vrot.lane.b32.xlu1 %v14820_v19, %s14679_s14 }
  0x26   :  { %377 = vrot.lane.b32.xlu0 %v14827_v20, %s14679_s14  ;;  %379 = vrot.lane.b32.xlu1 %v14830_v21, %s14679_s14 }
  0x7c   :  { %v14836_v22 = vpop.permute.xlu1 %353  ;;  %v14838_v23 = vpop.permute.xlu0 %349 }
  0x7d   :  { %17823 = vst [vmem:[#allocation2_spill] sm:$0xff] %v14836_v22  ;;  %17824 = vst [vmem:[#allocation3_spill] sm:$0xff] %v14838_v23 }
  0x80   :  { %v14840_v24 = vpop.permute.xlu1 %355  ;;  %v14842_v25 = vpop.permute.xlu0 %351 }
  0x81   :  { %17825 = vst [vmem:[#allocation4_spill] sm:$0xff] %v14840_v24  ;;  %17826 = vst [vmem:[#allocation5_spill] sm:$0xff] %v14842_v25 }
  0x84   :  { %v14844_v26 = vpop.permute.xlu1 %359  ;;  %v14846_v27 = vpop.permute.xlu0 %357 }
  0x85   :  { %17827 = vst [vmem:[#allocation6_spill] sm:$0xff] %v14844_v26  ;;  %17828 = vst [vmem:[#allocation7_spill] sm:$0xff] %v14846_v27 }
  0x88   :  { %v14848_v28 = vpop.permute.xlu1 %363  ;;  %v14850_v29 = vpop.permute.xlu0 %361 }
  0x89   :  { %17829 = vst [vmem:[#allocation8_spill] sm:$0xff] %v14848_v28  ;;  %17830 = vst [vmem:[#allocation9_spill] sm:$0xff] %v14850_v29 }
  0x8c   :  { %v14857_v30 = vpop.permute.xlu1 %367  ;;  %v14859_v31 = vpop.permute.xlu0 %365 }
  0x8d   :  { %17831 = vst [vmem:[#allocation10_spill] sm:$0xff] %v14857_v30  ;;  %17832 = vst [vmem:[#allocation11_spill] sm:$0xff] %v14859_v31 }
  0x90   :  { %v14862_v33 = vpop.permute.xlu1 %371  ;;  %v14866_v37 = vpop.permute.xlu0 %369 }
  0x91   :  { %17833 = vst [vmem:[#allocation12_spill] sm:$0xff] %v14862_v33  ;;  %17834 = vst [vmem:[#allocation13_spill] sm:$0xff] %v14866_v37 }
  0x94   :  { %v14880_v45 = vpop.permute.xlu1 %375  ;;  %v14886_v50 = vpop.permute.xlu0 %373 }
  0x95   :  { %17835 = vst [vmem:[#allocation14_spill] sm:$0xff] %v14880_v45  ;;  %17836 = vst [vmem:[#allocation15_spill] sm:$0xff] %v14886_v50 }
  0x98   :  { %v14898_v57 = vpop.permute.xlu1 %379  ;;  %v14906_v60 = vpop.permute.xlu0 %377 }
  0x99   :  { %17837 = vst [vmem:[#allocation16_spill] sm:$0xff] %v14898_v57  ;;  %17838 = vst [vmem:[#allocation17_spill] sm:$0xff] %v14906_v60 }
  0xe2   :  { %v326_v34 = vpop.f32.mrb[0].mxu0 }
  0xe3   :  { %v14864_v35 = vadd.f32 %v9663_v32, %v326_v34  ;;  %v11406_v36 = vpop.f32.mrb[1].mxu0 }
  0xe4   :  { %v329_v38 = vpop.f32.mrb[2].mxu0 }
  0xe5   :  { %v14868_v39 = vadd.f32 %v9663_v32, %v329_v38  ;;  %v11407_v40 = vpop.f32.mrb[3].mxu0  ;;  %11440 = vmatprep.mubr.msk.f32.mxu1 %vm288_vm1, %v14864_v35  ;;  %v399_v41 = vmul.f32 %v14836_v22, %v14864_v35  ;;  %v397_v43 = vmul.f32 %v14838_v23, %v14864_v35  ;;  %v403_v51 = vmul.f32 %v14850_v29, %v14864_v35 }
  0xe6   :  { %v401_v52 = vmul.f32 %v14846_v27, %v14864_v35  ;;  %v407_v58 = vmul.f32 %v14866_v37, %v14864_v35  ;;  %v405_v59 = vmul.f32 %v14859_v31, %v14864_v35  ;;  %v411_v2 = vmul.f32 %v14906_v60, %v14864_v35 }
  0xe7   :  { %v400_v42 = vmul.f32 %v14840_v24, %v14868_v39  ;;  %v398_v44 = vmul.f32 %v14842_v25, %v14868_v39  ;;  %v404_v48 = vmul.f32 %v14848_v28, %v14868_v39  ;;  %v402_v49 = vmul.f32 %v14844_v26, %v14868_v39 }
  0xe8   :  { %v408_v55 = vmul.f32 %v14862_v33, %v14868_v39  ;;  %v406_v56 = vmul.f32 %v14857_v30, %v14868_v39  ;;  %v412_v63 = vmul.f32 %v14898_v57, %v14868_v39  ;;  %v410_v1 = vmul.f32 %v14880_v45, %v14868_v39 }
  0xe9   :  { %v13576_v46 = vpack.i.bf16 %v400_v42, %v399_v41  ;;  %v13571_v47 = vpack.i.bf16 %v398_v44, %v397_v43  ;;  %v13586_v53 = vpack.i.bf16 %v404_v48, %v403_v51  ;;  %v13581_v54 = vpack.i.bf16 %v402_v49, %v401_v52  ;;  %v14673_v44 = vld [vmem:[%s16474_s15 + $0x8] sm:$0xff] }
  0xea   :  { %v13596_v61 = vpack.i.bf16 %v408_v55, %v407_v58  ;;  %v13591_v62 = vpack.i.bf16 %v406_v56, %v405_v59  ;;  %v409_v8 = vmul.f32 %v14886_v50, %v14864_v35  ;;  %v13606_v32 = vpack.i.bf16 %v412_v63, %v411_v2 }
  0xeb   :  { %13577 = vrot.lane.b32.xlu1 %v13576_v46, %s14681_s19  ;;  %13572 = vrot.lane.b32.xlu0 %v13571_v47, %s14681_s19 }
  0xec   :  { %v13601_v34 = vpack.i.bf16 %v410_v1, %v409_v8 }
  0xef   :  { %13587 = vrot.lane.b32.xlu1 %v13586_v53, %s14681_s19  ;;  %13582 = vrot.lane.b32.xlu0 %v13581_v54, %s14681_s19 }
  0xf3   :  { %13597 = vrot.lane.b32.xlu1 %v13596_v61, %s14681_s19  ;;  %13592 = vrot.lane.b32.xlu0 %v13591_v62, %s14681_s19 }
  0xf7   :  { %13607 = vrot.lane.b32.xlu1 %v13606_v32, %s14681_s19  ;;  %13602 = vrot.lane.b32.xlu0 %v13601_v34, %s14681_s19 }
 0x15d   :  { %v13578_v36 = vpop.permute.xlu1 %13577  ;;  %v13573_v38 = vpop.permute.xlu0 %13572 }
 0x15e   :  { %v13580_v40 = vunpack.i.h.bf16 %v13578_v36  ;;  %v13579_v41 = vunpack.i.l.bf16 %v13578_v36  ;;  %v13575_v42 = vunpack.i.h.bf16 %v13573_v38  ;;  %v13574_v43 = vunpack.i.l.bf16 %v13573_v38 }
 0x160   :  { %v12513_v46 = vpack.c.bf16 %v13575_v42, %v13574_v43  ;;  %v12519_v47 = vpack.c.bf16 %v13580_v40, %v13579_v41 }
 0x161   :  { %v13583_v48 = vpop.permute.xlu0 %13582  ;;  %v13588_v53 = vpop.permute.xlu1 %13587 }
 0x162   :  { %12515 = vmatprep.subr.msk.bf16.mxu1 %vm14922_vm2, %v12513_v46  ;;  %v13585_v49 = vunpack.i.h.bf16 %v13583_v48  ;;  %v13584_v51 = vunpack.i.l.bf16 %v13583_v48  ;;  %v13590_v54 = vunpack.i.h.bf16 %v13588_v53  ;;  %v13589_v55 = vunpack.i.l.bf16 %v13588_v53  ;;  %v227_v48 = vld [vmem:[%s14966_s23 + $0x10] sm:$0xff]  ;;  %v229_v53 = vld [vmem:[%s14966_s23 + $0x20] sm:$0xff] }
 0x163   :  { %12518 = vmatpush3.bf16.xpose.msk.msra.mxu1 %vm14922_vm2, %v12513_v46  ;;  %v225_v46 = vld [vmem:[%s14966_s23] sm:$0xff] }
 0x164   :  { %12521 = vmatprep.subr.msk.bf16.mxu1 %vm14922_vm2, %v12519_v47  ;;  %v12525_v52 = vpack.c.bf16 %v13585_v49, %v13584_v51  ;;  %v12531_v56 = vpack.c.bf16 %v13590_v54, %v13589_v55  ;;  %v228_v51 = vld [vmem:[%s14966_s23 + $0x18] sm:$0xff]  ;;  %v230_v54 = vld [vmem:[%s14966_s23 + $0x28] sm:$0xff] }
 0x165   :  { %v13593_v58 = vpop.permute.xlu0 %13592  ;;  %v13598_v63 = vpop.permute.xlu1 %13597  ;;  %v14981_v55 = vpack.c.bf16 %v230_v54, %v229_v53 }
 0x166   :  { %v13595_v59 = vunpack.i.h.bf16 %v13593_v58  ;;  %v13594_v61 = vunpack.i.l.bf16 %v13593_v58  ;;  %v13600_v1 = vunpack.i.h.bf16 %v13598_v63  ;;  %v13599_v2 = vunpack.i.l.bf16 %v13598_v63  ;;  %v232_v58 = vld [vmem:[%s14966_s23 + $0x38] sm:$0xff] }
 0x167   :  { %17843 = vst [vmem:[#allocation20_spill] sm:$0xff] %v14981_v55 }
 0x168   :  { %v12537_v62 = vpack.c.bf16 %v13595_v59, %v13594_v61  ;;  %v12543_v8 = vpack.c.bf16 %v13600_v1, %v13599_v2  ;;  %v188_v61 = vld [vmem:[%s14995_s27 + $0x8] sm:$0xff] }
 0x169   :  { %v13603_v32 = vpop.permute.xlu0 %13602  ;;  %v13608_v40 = vpop.permute.xlu1 %13607 }
 0x16a   :  { %v13605_v34 = vunpack.i.h.bf16 %v13603_v32  ;;  %v13604_v36 = vunpack.i.l.bf16 %v13603_v32  ;;  %v13610_v41 = vunpack.i.h.bf16 %v13608_v40  ;;  %v13609_v42 = vunpack.i.l.bf16 %v13608_v40  ;;  %v233_v32 = vld [vmem:[%s14966_s23 + $0x40] sm:$0xff]  ;;  %v236_v40 = vld [vmem:[%s14966_s23 + $0x58] sm:$0xff] }
 0x16b   :  { %12524 = vmatpush3.bf16.xpose.msk.msra.mxu1 %vm14922_vm2, %v12519_v47  ;;  %v226_v47 = vld [vmem:[%s14966_s23 + $0x8] sm:$0xff] }
 0x16c   :  { %12527 = vmatprep.subr.msk.bf16.mxu1 %vm14922_vm2, %v12525_v52  ;;  %v12549_v38 = vpack.c.bf16 %v13605_v34, %v13604_v36  ;;  %v12555_v43 = vpack.c.bf16 %v13610_v41, %v13609_v42  ;;  %v14971_v49 = vpack.c.bf16 %v226_v47, %v225_v46  ;;  %v234_v34 = vld [vmem:[%s14966_s23 + $0x48] sm:$0xff]  ;;  %v240_v46 = vld [vmem:[%s14966_s23 + $0x78] sm:$0xff] }
 0x16d   :  { %v15001_v36 = vpack.c.bf16 %v234_v34, %v233_v32  ;;  %v238_v42 = vld [vmem:[%s14966_s23 + $0x68] sm:$0xff] }
 0x16e   :  { %17841 = vst [vmem:[#allocation18_spill] sm:$0xff] %v14971_v49  ;;  %12562 = vmatprep.subr.bf16.mxu0 %v14971_v49 }
 0x16f   :  { %12564 = vmatpush3.bf16.msra.mxu0 %v14971_v49  ;;  %17845 = vst [vmem:[#allocation22_spill] sm:$0xff] %v15001_v36 }
 0x173   :  { %12530 = vmatpush3.bf16.xpose.msk.msra.mxu1 %vm14922_vm2, %v12525_v52  ;;  %v14974_v52 = vpack.c.bf16 %v228_v51, %v227_v48 }
 0x174   :  { %12533 = vmatprep.subr.msk.bf16.mxu1 %vm14922_vm2, %v12531_v56 }
 0x175   :  { %17842 = vst [vmem:[#allocation19_spill] sm:$0xff] %v14974_v52  ;;  %12566 = vmatprep.subr.bf16.mxu0 %v14974_v52 }
 0x176   :  { %12568 = vmatpush3.bf16.msra.mxu0 %v14974_v52 }
 0x177   :  { %12570 = vmatprep.subr.bf16.mxu0 %v14981_v55 }
 0x17a   :  { %12572 = vmatpush3.bf16.msra.mxu0 %v14981_v55 }
 0x17b   :  { %12536 = vmatpush3.bf16.xpose.msk.msra.mxu1 %vm14922_vm2, %v12531_v56  ;;  %v231_v56 = vld [vmem:[%s14966_s23 + $0x30] sm:$0xff] }
 0x17c   :  { %12539 = vmatprep.subr.msk.bf16.mxu1 %vm14922_vm2, %v12537_v62  ;;  %v14987_v59 = vpack.c.bf16 %v232_v58, %v231_v56 }
 0x17e   :  { %17844 = vst [vmem:[#allocation21_spill] sm:$0xff] %v14987_v59  ;;  %12574 = vmatprep.subr.bf16.mxu0 %v14987_v59 }
 0x17f   :  { %12576 = vmatpush3.bf16.msra.mxu0 %v14987_v59 }
 0x180   :  { %12578 = vmatprep.subr.bf16.mxu0 %v15001_v36 }
 0x183   :  { %12542 = vmatpush3.bf16.xpose.msk.msra.mxu1 %vm14922_vm2, %v12537_v62  ;;  %v187_v62 = vld [vmem:[%s14995_s27] sm:$0xff]  ;;  %12580 = vmatpush3.bf16.msra.mxu0 %v15001_v36 }
 0x184   :  { %12545 = vmatprep.subr.msk.bf16.mxu1 %vm14922_vm2, %v12543_v8 }
 0x18b   :  { %12548 = vmatpush3.bf16.xpose.msk.msra.mxu1 %vm14922_vm2, %v12543_v8 }
 0x18c   :  { %12551 = vmatprep.subr.msk.bf16.mxu1 %vm14922_vm2, %v12549_v38 }
 0x193   :  { %12554 = vmatpush3.bf16.xpose.msk.msra.mxu1 %vm14922_vm2, %v12549_v38  ;;  %v235_v38 = vld [vmem:[%s14966_s23 + $0x50] sm:$0xff] }
 0x194   :  { %12557 = vmatprep.subr.msk.bf16.mxu1 %vm14922_vm2, %v12555_v43  ;;  %v15009_v41 = vpack.c.bf16 %v236_v40, %v235_v38 }
 0x196   :  { %17846 = vst [vmem:[#allocation23_spill] sm:$0xff] %v15009_v41  ;;  %12582 = vmatprep.subr.bf16.mxu0 %v15009_v41 }
 0x197   :  { %12584 = vmatpush3.bf16.msra.mxu0 %v15009_v41 }
 0x19b   :  { %12560 = vmatpush3.bf16.xpose.msk.msra.mxu1 %vm14922_vm2, %v12555_v43 }
 0x19c   :  { %11513 = vmatprep.subr.bf16.mxu1 %v17685_v0 }
 0x1a2   :  { %11441 = vmatmul.mubr.msk.f32.vlgmr.msra.gmra.mrb[0].mxu1 %vm288_vm1, %v14868_v39 }
 0x1a3   :  { %11517 = vmatprep.mubr.msk.bf16.mxu1 %vm14677_vm0, %v17685_v0 }
 0x275   :  { %v11442_v63 = vpop.f32.mrb[0].mxu1 }
 0x276   :  { %v635_v1 = vadd.f32 %v11442_v63, %v188_v61  ;;  %v629_v2 = vpop.f32.mrb[1].mxu1 }
 0x277   :  { %v630_v8 = vadd.f32 %v629_v2, %v187_v62 }
 0x278   :  { %640 = vmax.xlane.f32.xlu1 %v635_v1 }
 0x279   :  { %638 = vmax.xlane.f32.xlu0 %v630_v8 }
 0x289   :  { %415 = vrot.lane.b32.xlu1 %v14764_v7, %s17804_s28  ;;  %v237_v7 = vld [vmem:[%s14966_s23 + $0x60] sm:$0xff] }
 0x28a   :  { %v15019_v43 = vpack.c.bf16 %v238_v42, %v237_v7 }
 0x28c   :  { %17847 = vst [vmem:[#allocation24_spill] sm:$0xff] %v15019_v43  ;;  %12586 = vmatprep.subr.bf16.mxu0 %v15019_v43 }
 0x28d   :  { %419 = vrot.lane.b32.xlu1 %v14769_v9, %s17804_s28  ;;  %12588 = vmatpush3.bf16.msra.mxu0 %v15019_v43  ;;  %v239_v9 = vld [vmem:[%s14966_s23 + $0x70] sm:$0xff]  ;;  %s14690_s23 = smov 35  }
 0x28e   :  { %v15029_v47 = vpack.c.bf16 %v240_v46, %v239_v9  ;;  %s15197_s26 = sld [smem:[%s17682_s0 + %s14690_s23]]   ;;  %s14716_s23 = smov 22  }
 0x28f   :  { %413 = vrot.lane.b32.xlu0 %v14753_v5, %s17804_s28 }
 0x290   :  { %17848 = vst [vmem:[#allocation25_spill] sm:$0xff] %v15029_v47  ;;  %12590 = vmatprep.subr.bf16.mxu0 %v15029_v47 }
 0x291   :  { %423 = vrot.lane.b32.xlu1 %v14777_v11, %s17804_s28  ;;  %12592 = vmatpush3.bf16.msra.mxu0 %v15029_v47 }
 0x293   :  { %417 = vrot.lane.b32.xlu0 %v14759_v6, %s17804_s28 }
 0x295   :  { %427 = vrot.lane.b32.xlu1 %v14790_v13, %s17804_s28 }
 0x297   :  { %421 = vrot.lane.b32.xlu0 %v14774_v10, %s17804_s28 }
 0x299   :  { %431 = vrot.lane.b32.xlu1 %v14800_v15, %s17804_s28 }
 0x29b   :  { %425 = vrot.lane.b32.xlu0 %v14787_v12, %s17804_s28 }
 0x29d   :  { %435 = vrot.lane.b32.xlu1 %v14810_v17, %s17804_s28 }
 0x29f   :  { %429 = vrot.lane.b32.xlu0 %v14797_v14, %s17804_s28 }
 0x2a1   :  { %439 = vrot.lane.b32.xlu1 %v14820_v19, %s17804_s28 }
 0x2a3   :  { %433 = vrot.lane.b32.xlu0 %v14807_v16, %s17804_s28 }
 0x2a5   :  { %443 = vrot.lane.b32.xlu1 %v14830_v21, %s17804_s28 }
 0x2a7   :  { %437 = vrot.lane.b32.xlu0 %v14817_v18, %s17804_s28 }
 0x2ab   :  { %441 = vrot.lane.b32.xlu0 %v14827_v20, %s17804_s28 }
 0x305   :  { %v641_v5 = vpop.xlane.xlu1 %640 }
 0x306   :  { %v643_v6 = vsub.f32 %v635_v1, %v641_v5  ;;  %v639_v10 = vpop.xlane.xlu0 %638 }
 0x307   :  { %v642_v11 = vsub.f32 %v630_v8, %v639_v10 }
 0x308   :  { %v646_v12 = vmul.f32 1.442695, %v643_v6 }
 0x309   :  { %v644_v13 = vmul.f32 1.442695, %v642_v11  ;;  %v15055_v14 = vpop.permute.xlu1 %415 }
 0x30a   :  { %v462_v15 = vmul.f32 %v15055_v14, %v14868_v39  ;;  %v15059_v16 = vpop.permute.xlu0 %413 }
 0x30b   :  { %14477 = vpow2.f32 %v644_v13  ;;  %v461_v17 = vmul.f32 %v15059_v16, %v14864_v35 }
 0x30c   :  { %14479 = vpow2.f32 %v646_v12 }
 0x30d   :  { %v15063_v18 = vpop.permute.xlu1 %419  ;;  %v13611_v19 = vpack.i.bf16 %v462_v15, %v461_v17 }
 0x30e   :  { %v464_v20 = vmul.f32 %v15063_v18, %v14868_v39  ;;  %v15067_v21 = vpop.permute.xlu0 %417 }
 0x30f   :  { %v463_v48 = vmul.f32 %v15067_v21, %v14864_v35  ;;  %13612 = vrot.lane.b32.xlu0 %v13611_v19, %s17804_s28 }
 0x311   :  { %v15072_v51 = vpop.permute.xlu1 %423  ;;  %v13616_v53 = vpack.i.bf16 %v464_v20, %v463_v48 }
 0x312   :  { %17849 = vst [vmem:[#allocation26_spill] sm:$0xff] %v15072_v51  ;;  %v466_v54 = vmul.f32 %v15072_v51, %v14868_v39  ;;  %v15076_v56 = vpop.permute.xlu0 %421 }
 0x313   :  { %17850 = vst [vmem:[#allocation27_spill] sm:$0xff] %v15076_v56  ;;  %v465_v58 = vmul.f32 %v15076_v56, %v14864_v35  ;;  %13617 = vrot.lane.b32.xlu1 %v13616_v53, %s17804_s28 }
 0x315   :  { %v15081_v61 = vpop.eup %14477  ;;  %v15083_v62 = vpop.permute.xlu1 %427  ;;  %v13621_v63 = vpack.i.bf16 %v466_v54, %v465_v58 }
 0x316   :  { %v15085_v1 = vpop.eup %14479  ;;  %v468_v2 = vmul.f32 %v15083_v62, %v14868_v39  ;;  %11475 = vmatprep.mubr.f32.mxu0 %v15081_v61  ;;  %v15090_v8 = vpop.permute.xlu0 %425 }
 0x317   :  { %v467_v32 = vmul.f32 %v15090_v8, %v14864_v35  ;;  %11476 = vmatmul.mubr.f32.vlgmr.msra.gmra.mrb[4].mxu0 %v15085_v1  ;;  %13622 = vrot.lane.b32.xlu0 %v13621_v63, %s17804_s28 }
 0x319   :  { %v15096_v34 = vpop.permute.xlu1 %431  ;;  %v13626_v38 = vpack.i.bf16 %v468_v2, %v467_v32  ;;  %v14173_v2 = vld [vmem:[%s15136_s2] sm:$0xff]  }
 0x31a   :  { %17851 = vst [vmem:[#allocation28_spill] sm:$0xff] %v15096_v34  ;;  %v470_v40 = vmul.f32 %v15096_v34, %v14868_v39  ;;  %v15100_v7 = vpop.permute.xlu0 %429  ;;  %11514 = vmatpush3.bf16.msra.mxu1 %v14173_v2 }
 0x31b   :  { %17852 = vst [vmem:[#allocation29_spill] sm:$0xff] %v15100_v7  ;;  %v469_v42 = vmul.f32 %v15100_v7, %v14864_v35  ;;  %13627 = vrot.lane.b32.xlu1 %v13626_v38, %s17804_s28  ;;  %11515 = vmatprep.subr.bf16.mxu1 %v17685_v0 }
 0x31d   :  { %v15105_v9 = vpop.permute.xlu1 %435  ;;  %v13631_v46 = vpack.i.bf16 %v470_v40, %v469_v42 }
 0x31e   :  { %17853 = vst [vmem:[#allocation30_spill] sm:$0xff] %v15105_v9  ;;  %v472_v5 = vmul.f32 %v15105_v9, %v14868_v39  ;;  %v15109_v6 = vpop.permute.xlu0 %433 }
 0x31f   :  { %17854 = vst [vmem:[#allocation31_spill] sm:$0xff] %v15109_v6  ;;  %v471_v10 = vmul.f32 %v15109_v6, %v14864_v35  ;;  %13632 = vrot.lane.b32.xlu0 %v13631_v46, %s17804_s28 }
 0x321   :  { %v15114_v11 = vpop.permute.xlu1 %439  ;;  %v13636_v12 = vpack.i.bf16 %v472_v5, %v471_v10 }
 0x322   :  { %17855 = vst [vmem:[#allocation32_spill] sm:$0xff] %v15114_v11  ;;  %v474_v13 = vmul.f32 %v15114_v11, %v14868_v39  ;;  %v15118_v15 = vpop.permute.xlu0 %437 }
 0x323   :  { %17856 = vst [vmem:[#allocation33_spill] sm:$0xff] %v15118_v15  ;;  %v473_v17 = vmul.f32 %v15118_v15, %v14864_v35  ;;  %13637 = vrot.lane.b32.xlu1 %v13636_v12, %s17804_s28 }
 0x325   :  { %v15123_v19 = vpop.permute.xlu1 %443  ;;  %v13641_v20 = vpack.i.bf16 %v474_v13, %v473_v17 }
 0x326   :  { %17857 = vst [vmem:[#allocation34_spill] sm:$0xff] %v15123_v19  ;;  %v476_v48 = vmul.f32 %v15123_v19, %v14868_v39  ;;  %v15127_v53 = vpop.permute.xlu0 %441 }
 0x327   :  { %17858 = vst [vmem:[#allocation35_spill] sm:$0xff] %v15127_v53  ;;  %v475_v54 = vmul.f32 %v15127_v53, %v14864_v35  ;;  %13642 = vrot.lane.b32.xlu0 %v13641_v20, %s17804_s28 }
 0x329   :  { %v13646_v58 = vpack.i.bf16 %v476_v48, %v475_v54 }
 0x32b   :  { %13647 = vrot.lane.b32.xlu1 %v13646_v58, %s17804_s28 }
 0x381   :  { %v13613_v63 = vpop.permute.xlu0 %13612 }
 0x382   :  { %v13615_v39 = vunpack.i.h.bf16 %v13613_v63  ;;  %v13614_v32 = vunpack.i.l.bf16 %v13613_v63 }
 0x384   :  { %v12593_v38 = vpack.c.bf16 %v13615_v39, %v13614_v32 }
 0x385   :  { %v13618_v35 = vpop.permute.xlu1 %13617 }
 0x386   :  { %v13620_v40 = vunpack.i.h.bf16 %v13618_v35  ;;  %v13619_v42 = vunpack.i.l.bf16 %v13618_v35  ;;  %12594 = vmatprep.subr.bf16.mxu0 %v12593_v38 }
 0x387   :  { %12596 = vmatpush3.bf16.msra.mxu0 %v12593_v38 }
 0x388   :  { %v12597_v46 = vpack.c.bf16 %v13620_v40, %v13619_v42 }
 0x389   :  { %v13623_v5 = vpop.permute.xlu0 %13622 }
 0x38a   :  { %v13625_v10 = vunpack.i.h.bf16 %v13623_v5  ;;  %v13624_v12 = vunpack.i.l.bf16 %v13623_v5  ;;  %12598 = vmatprep.subr.bf16.mxu0 %v12597_v46 }
 0x38b   :  { %12600 = vmatpush3.bf16.msra.mxu0 %v12597_v46 }
 0x38c   :  { %v12601_v13 = vpack.c.bf16 %v13625_v10, %v13624_v12 }
 0x38d   :  { %v13628_v17 = vpop.permute.xlu1 %13627 }
 0x38e   :  { %v13630_v20 = vunpack.i.h.bf16 %v13628_v17  ;;  %v13629_v48 = vunpack.i.l.bf16 %v13628_v17  ;;  %12602 = vmatprep.subr.bf16.mxu0 %v12601_v13 }
 0x38f   :  { %12604 = vmatpush3.bf16.msra.mxu0 %v12601_v13 }
 0x390   :  { %v12605_v54 = vpack.c.bf16 %v13630_v20, %v13629_v48 }
 0x391   :  { %v13633_v58 = vpop.permute.xlu0 %13632 }
 0x392   :  { %v13635_v63 = vunpack.i.h.bf16 %v13633_v58  ;;  %v13634_v2 = vunpack.i.l.bf16 %v13633_v58  ;;  %12606 = vmatprep.subr.bf16.mxu0 %v12605_v54 }
 0x393   :  { %12608 = vmatpush3.bf16.msra.mxu0 %v12605_v54 }
 0x394   :  { %v12609_v39 = vpack.c.bf16 %v13635_v63, %v13634_v2 }
 0x395   :  { %v13638_v32 = vpop.permute.xlu1 %13637 }
 0x396   :  { %v13640_v38 = vunpack.i.h.bf16 %v13638_v32  ;;  %v13639_v35 = vunpack.i.l.bf16 %v13638_v32  ;;  %12610 = vmatprep.subr.bf16.mxu0 %v12609_v39  ;;  %v14174_v32 = vld [vmem:[%s15136_s2 + $0x8] sm:$0xff]  }
 0x397   :  { %12612 = vmatpush3.bf16.msra.mxu0 %v12609_v39  ;;  %11516 = vmatpush3.bf16.msra.mxu1 %v14174_v32  ;;  %v14178_v32 = vld [vmem:[%s15170_s10 + $0x8] ss:$16 sps:$4 sm:$0xff]  }
 0x398   :  { %v12613_v40 = vpack.c.bf16 %v13640_v38, %v13639_v35 }
 0x399   :  { %v13643_v42 = vpop.permute.xlu0 %13642 }
 0x39a   :  { %v13645_v46 = vunpack.i.h.bf16 %v13643_v42  ;;  %v13644_v5 = vunpack.i.l.bf16 %v13643_v42  ;;  %12614 = vmatprep.subr.bf16.mxu0 %v12613_v40  ;;  %v9685_v42 = vld [vmem:[%s15147_s7] ss:$0 sm:$0xff] }
 0x39b   :  { %12616 = vmatpush3.bf16.msra.mxu0 %v12613_v40 }
 0x39c   :  { %v12617_v10 = vpack.c.bf16 %v13645_v46, %v13644_v5 }
 0x39d   :  { %v13648_v12 = vpop.permute.xlu1 %13647 }
 0x39e   :  { %v13650_v13 = vunpack.i.h.bf16 %v13648_v12  ;;  %v13649_v17 = vunpack.i.l.bf16 %v13648_v12  ;;  %12618 = vmatprep.subr.bf16.mxu0 %v12617_v10 }
 0x39f   :  { %12620 = vmatpush3.bf16.msra.mxu0 %v12617_v10 }
 0x3a0   :  { %v12621_v20 = vpack.c.bf16 %v13650_v13, %v13649_v17 }
 0x3a2   :  { %12622 = vmatprep.subr.bf16.mxu0 %v12621_v20 }
 0x3a3   :  { %12624 = vmatpush3.bf16.msra.mxu0 %v12621_v20 }
 0x3ea   :  { %v11477_v48 = vpop.f32.mrb[4].mxu0 }
 0x3eb   :  { %14481 = vrcp.f32 %v11477_v48  ;;  %v714_v54 = vpop.f32.mrb[5].mxu0 }
 0x3ec   :  { %14483 = vrcp.f32 %v714_v54 }
 0x3f5   :  { %v14482_v58 = vpop.eup %14481 }
 0x3f6   :  { %v14484_v63 = vpop.eup %14483  ;;  %v726_v39 = vmul.f32 %v14482_v58, %v15085_v1 }
 0x3f7   :  { %v724_v2 = vmul.f32 %v14484_v63, %v15081_v61  ;;  %v14175_v63 = vld [vmem:[%s15170_s10] ss:$16 sps:$4 sm:$0xff]  }
 0x3f9   :  { %11510 = vmatprep.mubr.f32.mxu0 %v724_v2  ;;  %v17683_v2 = vmov 0  }
 0x3fa   :  { %11511 = vmatmul.mubr.f32.vlgmr.msra.gmra.mrb[6].mxu0 %v726_v39  ;;  %v14177_v39 = vld [vmem:[%s15170_s10 + $0x4] ss:$16 sps:$4 sm:$0xff]  }
 0x3fb   :  { %1086 = vmatprep.mubr.bf16.mxu0 %v17683_v2  ;;  %1054 = vmatprep.subr.bf16.mxu0 %v14177_v39 }
 0x3fc   :  { %1055 = vmatpush1.bf16.msra.mxu0 %v14175_v63 }
 0x4cd   :  { %v11512_v38 = vpop.f32.mrb[6].mxu0 }
 0x4ce   :  { %v857_v35 = vpop.f32.mrb[7].mxu0 }
 0x4cf   :  { %v866_v40 = vpack.c.bf16 %v11512_v38, %v857_v35  ;;  %v14180_v38 = vld [vmem:[%s15170_s10 + $0xc] ss:$16 sps:$4 sm:$0xff]   ;;  %v14183_v35 = vld [vmem:[%s15170_s10 + $0x24] ss:$16 sps:$4 sm:$0xff]  }
 0x4d0   :  { %1097 = vmatprep.subr.bf16.mxu1 %v14180_v38  ;;  %1056 = vmatprep.subr.bf16.mxu0 %v14183_v35 }
 0x4d1   :  { %11518 = vmatmul.mubr.msk.bf16.vlgmr.msra.gmra.mrb[4].mxu1 %vm288_vm1, %v866_v40  ;;  %v14181_v40 = vld [vmem:[%s15170_s10 + $0x20] ss:$16 sps:$4 sm:$0xff]  }
 0x4d2   :  { %1129 = vmatprep.mubr.bf16.mxu1 %v17683_v2  ;;  %1098 = vmatpush1.bf16.msra.mxu1 %v14178_v32 }
 0x4d3   :  { %1057 = vmatpush1.bf16.msra.mxu0 %v14181_v40 }
 0x5a4   :  { %v922_v61 = vpop.f32.mrb[4].mxu1 }
 0x5a5   :  { %v923_v46 = vadd.f32 %v9685_v42, %v922_v61  ;;  %v11519_v1 = vpop.f32.mrb[5].mxu1  ;;  %v14186_v61 = vld [vmem:[%s15170_s10 + $0x2c] ss:$16 sps:$4 sm:$0xff]  }
 0x5a6   :  { %v925_v5 = vpop.f32.mrb[6].mxu1  ;;  %1099 = vmatprep.subr.bf16.mxu1 %v14186_v61  ;;  %v14188_v1 = vld [vmem:[%s15185_s16 + $0xc0] sm:$0xff]  }
 0x5a7   :  { %v15151_v10 = vadd.f32 %v923_v46, %v14748_v3  ;;  %v926_v12 = vadd.f32 %v9685_v42, %v925_v5  ;;  %v11520_v13 = vpop.f32.mrb[7].mxu1  ;;  %v14184_v42 = vld [vmem:[%s15170_s10 + $0x28] ss:$16 sps:$4 sm:$0xff]   ;;  %v14187_v46 = vld [vmem:[%s15185_s16 + $0x40] sm:$0xff]  }
 0x5a8   :  { %1100 = vmatpush1.bf16.msra.mxu1 %v14184_v42  ;;  %10647 = vmatprep.subr.bf16.mxu0 %v14187_v46  ;;  %v9689_v46 = vld [vmem:[%s15192_s22] ss:$0 sm:$0xff] }
 0x5a9   :  { %v15154_v17 = vadd.f32 %v926_v12, %v14750_v4  ;;  %v933_v20 = vsel %vm288_vm1, %v15151_v10, 0.0  ;;  %v942_v48 = vmul.f32 %v15151_v10, %v15151_v10  ;;  %10669 = vmatprep.subr.bf16.mxu1 %v14188_v1 }
 0x5aa   :  { %934 = vadd.xlane.f32.xlu0 %v933_v20 }
 0x5ab   :  { %v936_v54 = vsel %vm288_vm1, %v15154_v17, 0.0  ;;  %v944_v58 = vsel %vm288_vm1, %v942_v48, 0.0  ;;  %v943_v3 = vmul.f32 %v15154_v17, %v15154_v17 }
 0x5ac   :  { %937 = vadd.xlane.f32.xlu1 %v936_v54 }
 0x5ad   :  { %v947_v4 = vsel %vm288_vm1, %v943_v3, 0.0 }
 0x5ae   :  { %945 = vadd.xlane.f32.xlu0 %v944_v58 }
 0x5b2   :  { %948 = vadd.xlane.f32.xlu0 %v947_v4 }
 0x637   :  { %v935_v5 = vpop.xlane.xlu0 %934 }
 0x638   :  { %v940_v12 = vmul.f32 0.03125, %v935_v5 }
 0x639   :  { %v938_v13 = vpop.xlane.xlu1 %937 }
 0x63a   :  { %v952_v48 = vmul.f32 %v940_v12, %v940_v12  ;;  %v941_v54 = vmul.f32 0.03125, %v938_v13  ;;  %v956_v40 = vsub.f32 %v15151_v10, %v940_v12  ;;  %v14189_v10 = vld [vmem:[%s15185_s16] sm:$0xff]  }
 0x63b   :  { %v946_v20 = vpop.xlane.xlu0 %945  ;;  %v14190_v12 = vld [vmem:[%s15185_s16 + $0x80] sm:$0xff]  }
 0x63c   :  { %v950_v58 = vmul.f32 0.03125, %v946_v20  ;;  %v953_v63 = vmul.f32 %v941_v54, %v941_v54  ;;  %v957_v1 = vsub.f32 %v15154_v17, %v941_v54  ;;  %v14191_v17 = vld [vmem:[%s15185_s16 + $0x48] sm:$0xff]  }
 0x63d   :  { %v14192_v54 = vld [vmem:[%s15185_s16 + $0xc8] sm:$0xff]  }
 0x63e   :  { %v954_v3 = vsub.f32 %v950_v58, %v952_v48  ;;  %v9690_v48 = vld [vmem:[%s15197_s26] ss:$0 sm:$0xff] }
 0x63f   :  { %v949_v4 = vpop.xlane.xlu0 %948 }
 0x640   :  { %v958_v39 = vadd.f32 1e-05, %v954_v3  ;;  %v951_v32 = vmul.f32 0.03125, %v949_v4 }
 0x642   :  { %14485 = vrsqrt.f32 %v958_v39  ;;  %v955_v38 = vsub.f32 %v951_v32, %v953_v63  ;;  %v14193_v39 = vld [vmem:[%s15185_s16 + $0x8] sm:$0xff]  }
 0x643   :  { %v14194_v32 = vld [vmem:[%s15185_s16 + $0x88] sm:$0xff]  }
 0x644   :  { %v959_v35 = vadd.f32 1e-05, %v955_v38  ;;  %v14195_v38 = vld [vmem:[%s15185_s16 + $0x50] sm:$0xff]  }
 0x646   :  { %14487 = vrsqrt.f32 %v959_v35  ;;  %v14196_v35 = vld [vmem:[%s15185_s16 + $0xd0] sm:$0xff]  }
 0x64c   :  { %v14486_v42 = vpop.eup %14485 }
 0x64d   :  { %v962_v61 = vmul.f32 %v14486_v42, %v956_v40  ;;  %v14197_v40 = vld [vmem:[%s15185_s16 + $0x10] sm:$0xff]  }
 0x64e   :  { %v14198_v42 = vld [vmem:[%s15185_s16 + $0x90] sm:$0xff]  }
 0x64f   :  { %v970_v20 = vmul.f32 %v9689_v46, %v962_v61  ;;  %v14199_v61 = vld [vmem:[%s15185_s16 + $0x58] sm:$0xff]  }
 0x650   :  { %v14488_v5 = vpop.eup %14487 }
 0x651   :  { %v963_v13 = vmul.f32 %v14488_v5, %v957_v1  ;;  %v15203_v3 = vadd.f32 %v9690_v48, %v970_v20  ;;  %v14201_v1 = vld [vmem:[%s15185_s16 + $0x18] sm:$0xff]   ;;  %v14204_v20 = vld [vmem:[%s15185_s16 + $0xe0] sm:$0xff]  }
 0x652   :  { %v14202_v5 = vld [vmem:[%s15185_s16 + $0x98] sm:$0xff]  }
 0x653   :  { %v971_v58 = vmul.f32 %v9689_v46, %v963_v13  ;;  %v14200_v46 = vld [vmem:[%s15185_s16 + $0xd8] sm:$0xff]   ;;  %v14203_v13 = vld [vmem:[%s15185_s16 + $0x60] sm:$0xff]  }
 0x655   :  { %v15205_v4 = vadd.f32 %v9690_v48, %v971_v58  ;;  %v14205_v48 = vld [vmem:[%s15185_s16 + $0x20] sm:$0xff]  }
 0x656   :  { %v14206_v58 = vld [vmem:[%s15185_s16 + $0xa0] sm:$0xff]  }
 0x657   :  { %v989_v63 = vpack.c.bf16 %v15205_v4, %v15203_v3 }
 0x659   :  { %9699 = vmatmul.mubr.msk.bf16.vlgmr.msra.gmra.mrb[8].mxu0 %vm288_vm1, %v989_v63  ;;  %9700 = vmatmul.mubr.msk.bf16.vlgmr.msra.gmra.mrb[8].mxu1 %vm288_vm1, %v989_v63  ;;  %v14209_v63 = vld [vmem:[%s15185_s16 + $0x28] sm:$0xff]  }
 0x65a   :  { %10648 = vmatpush3.bf16.msra.mxu0 %v14189_v10  ;;  %10670 = vmatpush3.bf16.msra.mxu1 %v14190_v12  ;;  %v14207_v10 = vld [vmem:[%s15185_s16 + $0x68] sm:$0xff]  }
 0x65b   :  { %10649 = vmatprep.subr.bf16.mxu0 %v14191_v17  ;;  %10671 = vmatprep.subr.bf16.mxu1 %v14192_v54  ;;  %v14208_v12 = vld [vmem:[%s15185_s16 + $0xe8] sm:$0xff]   ;;  %v14211_v54 = vld [vmem:[%s15185_s16 + $0x70] sm:$0xff]  }
 0x65c   :  { %v14210_v17 = vld [vmem:[%s15185_s16 + $0xa8] sm:$0xff]  }
 0x65e   :  { %10650 = vmatpush3.bf16.msra.mxu0 %v14193_v39  ;;  %10672 = vmatpush3.bf16.msra.mxu1 %v14194_v32  ;;  %v14212_v39 = vld [vmem:[%s15185_s16 + $0xf0] sm:$0xff]  }
 0x65f   :  { %10651 = vmatprep.subr.bf16.mxu0 %v14195_v38  ;;  %10673 = vmatprep.subr.bf16.mxu1 %v14196_v35  ;;  %v14213_v32 = vld [vmem:[%s15185_s16 + $0x30] sm:$0xff]   ;;  %v14215_v35 = vld [vmem:[%s15185_s16 + $0x78] sm:$0xff]  }
 0x660   :  { %v14214_v38 = vld [vmem:[%s15185_s16 + $0xb0] sm:$0xff]  }
 0x662   :  { %10652 = vmatpush3.bf16.msra.mxu0 %v14197_v40  ;;  %10674 = vmatpush3.bf16.msra.mxu1 %v14198_v42  ;;  %v14216_v40 = vld [vmem:[%s15185_s16 + $0xf8] sm:$0xff]  }
 0x663   :  { %10653 = vmatprep.subr.bf16.mxu0 %v14199_v61  ;;  %10675 = vmatprep.subr.bf16.mxu1 %v14200_v46  ;;  %v14217_v42 = vld [vmem:[%s15185_s16 + $0x38] sm:$0xff]   ;;  %v991_v46 = vlaneseq }
 0x664   :  { %v14218_v61 = vld [vmem:[%s15185_s16 + $0xb8] sm:$0xff]  }
 0x666   :  { %10654 = vmatpush3.bf16.msra.mxu0 %v14201_v1  ;;  %10676 = vmatpush3.bf16.msra.mxu1 %v14202_v5  ;;  %v992_v1 = vshrl.u32 %v991_v46, 7 }
 0x667   :  { %10655 = vmatprep.subr.bf16.mxu0 %v14203_v13  ;;  %10677 = vmatprep.subr.bf16.mxu1 %v14204_v20  ;;  %v988_v20 = vld [vmem:[%s15245_s3] sm:$0xf] }
 0x668   :  { %v15247_v5 = vsub.s32 0, %v992_v1  ;;  %v15249_v13 = vsub.s32 2, %v992_v1 }
 0x66a   :  { %10656 = vmatpush3.bf16.msra.mxu0 %v14205_v48  ;;  %10678 = vmatpush3.bf16.msra.mxu1 %v14206_v58  ;;  %17859 = vst [vmem:[#allocation36_spill] sm:$0xff] %v15247_v5  ;;  %17860 = vst [vmem:[#allocation37_spill] sm:$0xff] %v15249_v13  ;;  %v15252_v48 = vsub.s32 1, %v992_v1  ;;  %v15254_v58 = vsub.s32 3, %v992_v1 }
 0x66b   :  { %10657 = vmatprep.subr.bf16.mxu0 %v14207_v10  ;;  %10679 = vmatprep.subr.bf16.mxu1 %v14208_v12  ;;  %v994_v10 = vrot.slane %v988_v20, %v15247_v5  ;;  %v1002_v12 = vrot.slane %v988_v20, %v15249_v13 }
 0x66c   :  { %17861 = vst [vmem:[#allocation38_spill] sm:$0xff] %v15252_v48  ;;  %17862 = vst [vmem:[#allocation39_spill] sm:$0xff] %v15254_v58 }
 0x66e   :  { %10658 = vmatpush3.bf16.msra.mxu0 %v14209_v63  ;;  %10680 = vmatpush3.bf16.msra.mxu1 %v14210_v17  ;;  %v998_v63 = vrot.slane %v988_v20, %v15252_v48  ;;  %v1006_v17 = vrot.slane %v988_v20, %v15254_v58 }
 0x66f   :  { %10659 = vmatprep.subr.bf16.mxu0 %v14211_v54  ;;  %10681 = vmatprep.subr.bf16.mxu1 %v14212_v39 }
 0x672   :  { %10660 = vmatpush3.bf16.msra.mxu0 %v14213_v32  ;;  %10682 = vmatpush3.bf16.msra.mxu1 %v14214_v38 }
 0x673   :  { %10661 = vmatprep.subr.bf16.mxu0 %v14215_v35  ;;  %10683 = vmatprep.subr.bf16.mxu1 %v14216_v40 }
 0x676   :  { %10662 = vmatpush3.bf16.msra.mxu0 %v14217_v42  ;;  %10684 = vmatpush3.bf16.msra.mxu1 %v14218_v61 }
 0x677   :  { %11521 = vmatprep.subr.bf16.mxu0 %v17685_v0 }
 0x72c   :  { %v1088_v54 = vpop.f32.mrb[8].mxu0  ;;  %v1131_v39 = vpop.f32.mrb[8].mxu1 }
 0x72d   :  { %v1089_v32 = vadd.f32 %v1088_v54, %v994_v10  ;;  %v1132_v38 = vadd.f32 %v1131_v39, %v1002_v12  ;;  %v1090_v35 = vpop.f32.mrb[9].mxu0  ;;  %v1133_v40 = vpop.f32.mrb[9].mxu1 }
 0x72e   :  { %v1091_v42 = vadd.f32 %v1090_v35, %v998_v63  ;;  %v1134_v61 = vadd.f32 %v1133_v40, %v1006_v17  ;;  %v1092_v46 = vpop.f32.mrb[10].mxu0  ;;  %v1135_v2 = vpop.f32.mrb[10].mxu1 }
 0x72f   :  { %v1093_v1 = vadd.f32 %v1092_v46, %v994_v10  ;;  %v1136_v0 = vadd.f32 %v1135_v2, %v1002_v12  ;;  %v1094_v15 = vpop.f32.mrb[11].mxu0  ;;  %v1137_v5 = vpop.f32.mrb[11].mxu1  ;;  %v1140_v7 = vmax.f32 %v1089_v32, 0.0  ;;  %v1142_v48 = vmax.f32 %v1132_v38, 0.0 }
 0x730   :  { %v1095_v11 = vadd.f32 %v1094_v15, %v998_v63  ;;  %v1138_v13 = vadd.f32 %v1137_v5, %v1006_v17  ;;  %v1141_v58 = vmax.f32 %v1091_v42, 0.0  ;;  %v1143_v53 = vmax.f32 %v1134_v61, 0.0 }
 0x731   :  { %v1144_v34 = vmax.f32 %v1093_v1, 0.0  ;;  %v1146_v20 = vmax.f32 %v1136_v0, 0.0  ;;  %v17863_v2 = vmov 0.0  }
 0x732   :  { %v1145_v54 = vmax.f32 %v1095_v11, 0.0  ;;  %v1147_v39 = vmax.f32 %v1138_v13, 0.0 }
 0x733   :  { %v1213_v19 = vpack.c.bf16 %v1144_v34, %v1140_v7  ;;  %v1215_v56 = vpack.c.bf16 %v1146_v20, %v1142_v48  ;;  %v9701_v34 = vld [vmem:[%s15265_s9] ss:$0 sm:$0xff] }
 0x734   :  { %v1214_v35 = vpack.c.bf16 %v1145_v54, %v1141_v58  ;;  %v1216_v40 = vpack.c.bf16 %v1147_v39, %v1143_v53 }
 0x736   :  { %1447 = vmatprep.mubr.bf16.mxu0 %v1214_v35  ;;  %1488 = vmatprep.mubr.bf16.mxu1 %v1216_v40  ;;  %v14219_v35 = vld [vmem:[%s14734_s6 + $0x10] sm:$0xff]  }
 0x737   :  { %1448 = vmatmul.mubr.bf16.vlgmr.msra.gmra.mrb[12].mxu0 %v1213_v19  ;;  %1489 = vmatmul.mubr.bf16.vlgmr.msra.gmra.mrb[12].mxu1 %v1215_v56 }
 0x738   :  { %11525 = vmatprep.mubr.msk.bf16.mxu0 %vm14677_vm0, %v17863_v2  ;;  %11522 = vmatpush3.bf16.msra.mxu0 %v14219_v35 }
 0x739   :  { %11523 = vmatprep.subr.bf16.mxu0 %v17863_v2 }
 0x80a   :  { %v10663_v0 = vpop.f32.mrb[12].mxu0  ;;  %v10685_v11 = vpop.f32.mrb[12].mxu1 }
 0x80b   :  { %v10664_v7 = vpop.f32.mrb[13].mxu0  ;;  %v10686_v15 = vpop.f32.mrb[13].mxu1 }
 0x80c   :  { %v10665_v53 = vadd.f32 %v10664_v7, %v10663_v0  ;;  %v10687_v5 = vadd.f32 %v10686_v15, %v10685_v11  ;;  %v10666_v13 = vpop.f32.mrb[14].mxu0  ;;  %v10688_v19 = vpop.f32.mrb[14].mxu1 }
 0x80d   :  { %v10667_v56 = vpop.f32.mrb[15].mxu0  ;;  %v10689_v48 = vpop.f32.mrb[15].mxu1 }
 0x80e   :  { %v1450_v58 = vadd.f32 %v10665_v53, %v9701_v34  ;;  %v10668_v10 = vadd.f32 %v10667_v56, %v10666_v13  ;;  %v10690_v12 = vadd.f32 %v10689_v48, %v10688_v19 }
 0x810   :  { %v1491_v63 = vadd.f32 %v10687_v5, %v1450_v58  ;;  %v1453_v17 = vadd.f32 %v10668_v10, %v9701_v34 }
 0x812   :  { %v1497_v32 = vadd.f32 %v1491_v63, %v15203_v3  ;;  %v1494_v38 = vadd.f32 %v10690_v12, %v1453_v17  ;;  %v14220_v3 = vld [vmem:[%s14734_s6 + $0x18] sm:$0xff]   ;;  %v9734_v63 = vld [vmem:[%s15281_s17] ss:$0 sm:$0xff] }
 0x813   :  { %11524 = vmatpush3.bf16.msra.mxu0 %v14220_v3 }
 0x814   :  { %v1498_v42 = vadd.f32 %v1494_v38, %v15205_v4  ;;  %v1501_v61 = vsel %vm288_vm1, %v1497_v32, 0.0  ;;  %v1509_v46 = vmul.f32 %v1497_v32, %v1497_v32  ;;  %12674 = vmatprep.subr.bf16.mxu0 %v14971_v49 }
 0x815   :  { %1502 = vadd.xlane.f32.xlu1 %v1501_v61 }
 0x816   :  { %v1504_v1 = vsel %vm288_vm1, %v1498_v42, 0.0  ;;  %v1510_v20 = vmul.f32 %v1498_v42, %v1498_v42  ;;  %v1511_v54 = vsel %vm288_vm1, %v1509_v46, 0.0 }
 0x817   :  { %1505 = vadd.xlane.f32.xlu0 %v1504_v1 }
 0x818   :  { %v1514_v39 = vsel %vm288_vm1, %v1510_v20, 0.0  ;;  %v9735_v20 = vld [vmem:[%s15286_s24] ss:$0 sm:$0xff] }
 0x819   :  { %1512 = vadd.xlane.f32.xlu1 %v1511_v54 }
 0x81b   :  { %1515 = vadd.xlane.f32.xlu0 %v1514_v39 }
 0x8a2   :  { %v1503_v4 = vpop.xlane.xlu1 %1502 }
 0x8a3   :  { %v1507_v40 = vmul.f32 0.03125, %v1503_v4 }
 0x8a4   :  { %v1506_v0 = vpop.xlane.xlu0 %1505 }
 0x8a5   :  { %v1508_v11 = vmul.f32 0.03125, %v1506_v0  ;;  %v1519_v7 = vmul.f32 %v1507_v40, %v1507_v40  ;;  %v1523_v10 = vsub.f32 %v1497_v32, %v1507_v40  ;;  %v9746_v32 = vld [vmem:[%s14855_s18 + $0x1] ss:$0 sm:$0xff] }
 0x8a6   :  { %v1513_v34 = vpop.xlane.xlu1 %1512 }
 0x8a7   :  { %v1517_v15 = vmul.f32 0.03125, %v1513_v34  ;;  %v1520_v5 = vmul.f32 %v1508_v11, %v1508_v11  ;;  %v1524_v17 = vsub.f32 %v1498_v42, %v1508_v11 }
 0x8a8   :  { %v1516_v53 = vpop.xlane.xlu0 %1515 }
 0x8a9   :  { %v1521_v13 = vsub.f32 %v1517_v15, %v1519_v7  ;;  %v1518_v19 = vmul.f32 0.03125, %v1516_v53 }
 0x8ab   :  { %v1525_v56 = vadd.f32 1e-05, %v1521_v13  ;;  %v1522_v48 = vsub.f32 %v1518_v19, %v1520_v5 }
 0x8ad   :  { %14489 = vrsqrt.f32 %v1525_v56  ;;  %v1526_v58 = vadd.f32 1e-05, %v1522_v48 }
 0x8af   :  { %14491 = vrsqrt.f32 %v1526_v58 }
 0x8b7   :  { %v14490_v12 = vpop.eup %14489 }
 0x8b8   :  { %v1529_v38 = vmul.f32 %v14490_v12, %v1523_v10 }
 0x8b9   :  { %v14492_v61 = vpop.eup %14491 }
 0x8ba   :  { %v1530_v46 = vmul.f32 %v14492_v61, %v1524_v17  ;;  %v1537_v1 = vmul.f32 %v9734_v63, %v1529_v38 }
 0x8bc   :  { %v1538_v54 = vmul.f32 %v9734_v63, %v1530_v46  ;;  %v15290_v39 = vadd.f32 %v9735_v20, %v1537_v1 }
 0x8be   :  { %v15292_v35 = vadd.f32 %v9735_v20, %v1538_v54 }
 0x8c0   :  { %v1561_v3 = vpack.c.bf16 %v15292_v35, %v15290_v39 }
 0x8c2   :  { %11526 = vmatmul.mubr.msk.bf16.vlgmr.msra.gmra.mrb[16].mxu0 %vm288_vm1, %v1561_v3 }
 0x8c3   :  { %12676 = vmatpush3.bf16.msra.mxu0 %v14971_v49 }
 0x8c4   :  { %12678 = vmatprep.subr.bf16.mxu0 %v14974_v52 }
 0x8c7   :  { %12680 = vmatpush3.bf16.msra.mxu0 %v14974_v52 }
 0x8c8   :  { %12682 = vmatprep.subr.bf16.mxu0 %v14981_v55 }
 0x8cb   :  { %12684 = vmatpush3.bf16.msra.mxu0 %v14981_v55 }
 0x8cc   :  { %12686 = vmatprep.subr.bf16.mxu0 %v14987_v59 }
 0x8cf   :  { %12688 = vmatpush3.bf16.msra.mxu0 %v14987_v59 }
 0x8d0   :  { %12690 = vmatprep.subr.bf16.mxu0 %v15001_v36 }
 0x8d3   :  { %12692 = vmatpush3.bf16.msra.mxu0 %v15001_v36 }
 0x8d4   :  { %12694 = vmatprep.subr.bf16.mxu0 %v15009_v41 }
 0x8d7   :  { %12696 = vmatpush3.bf16.msra.mxu0 %v15009_v41 }
 0x8d8   :  { %12698 = vmatprep.subr.bf16.mxu0 %v15019_v43 }
 0x8db   :  { %12700 = vmatpush3.bf16.msra.mxu0 %v15019_v43 }
 0x8dc   :  { %12702 = vmatprep.subr.bf16.mxu0 %v15029_v47 }
 0x8df   :  { %12704 = vmatpush3.bf16.msra.mxu0 %v15029_v47 }
 0x995   :  { %v1617_v42 = vpop.f32.mrb[16].mxu0 }
 0x996   :  { %v15313_v4 = vadd.f32 %v9746_v32, %v1617_v42  ;;  %v11527_v40 = vpop.f32.mrb[17].mxu0 }
 0x997   :  { %v1620_v0 = vpop.f32.mrb[18].mxu0 }
 0x998   :  { %v15315_v11 = vadd.f32 %v9746_v32, %v1620_v0  ;;  %v11528_v34 = vpop.f32.mrb[19].mxu0  ;;  %11561 = vmatprep.mubr.msk.f32.mxu1 %vm288_vm1, %v15313_v4  ;;  %v1626_v7 = vmul.f32 %v15313_v4, %v14836_v22  ;;  %v1624_v53 = vmul.f32 %v15313_v4, %v14838_v23  ;;  %v1632_v58 = vmul.f32 %v15313_v4, %v14859_v31 }
 0x999   :  { %v1628_v10 = vmul.f32 %v15313_v4, %v14846_v27  ;;  %v1636_v61 = vmul.f32 %v15313_v4, %v14886_v50  ;;  %v1630_v46 = vmul.f32 %v15313_v4, %v14850_v29  ;;  %v1634_v3 = vmul.f32 %v15313_v4, %v14866_v37 }
 0x99a   :  { %v1627_v15 = vmul.f32 %v15315_v11, %v14840_v24  ;;  %v1625_v5 = vmul.f32 %v15315_v11, %v14842_v25  ;;  %v1633_v56 = vmul.f32 %v15315_v11, %v14857_v30  ;;  %v1629_v48 = vmul.f32 %v15315_v11, %v14844_v26 }
 0x99b   :  { %v1637_v17 = vmul.f32 %v15315_v11, %v14880_v45  ;;  %v1631_v38 = vmul.f32 %v15315_v11, %v14848_v28  ;;  %v1635_v54 = vmul.f32 %v15315_v11, %v14862_v33  ;;  %v1639_v42 = vmul.f32 %v15315_v11, %v14898_v57 }
 0x99c   :  { %v13656_v13 = vpack.i.bf16 %v1627_v15, %v1626_v7  ;;  %v13651_v19 = vpack.i.bf16 %v1625_v5, %v1624_v53  ;;  %v13671_v12 = vpack.i.bf16 %v1633_v56, %v1632_v58  ;;  %v13661_v63 = vpack.i.bf16 %v1629_v48, %v1628_v10 }
 0x99d   :  { %v13681_v1 = vpack.i.bf16 %v1637_v17, %v1636_v61  ;;  %v13666_v20 = vpack.i.bf16 %v1631_v38, %v1630_v46  ;;  %v13676_v32 = vpack.i.bf16 %v1635_v54, %v1634_v3  ;;  %v1638_v40 = vmul.f32 %v15313_v4, %v14906_v60 }
 0x99e   :  { %13657 = vrot.lane.b32.xlu0 %v13656_v13, %s14681_s19  ;;  %13652 = vrot.lane.b32.xlu1 %v13651_v19, %s14681_s19 }
 0x99f   :  { %v13686_v0 = vpack.i.bf16 %v1639_v42, %v1638_v40 }
 0x9a2   :  { %13672 = vrot.lane.b32.xlu0 %v13671_v12, %s14681_s19  ;;  %13662 = vrot.lane.b32.xlu1 %v13661_v63, %s14681_s19 }
 0x9a6   :  { %13682 = vrot.lane.b32.xlu0 %v13681_v1, %s14681_s19  ;;  %13667 = vrot.lane.b32.xlu1 %v13666_v20, %s14681_s19 }
 0x9aa   :  { %13677 = vrot.lane.b32.xlu1 %v13676_v32, %s14681_s19 }
 0x9ae   :  { %13687 = vrot.lane.b32.xlu1 %v13686_v0, %s14681_s19 }
 0xa10   :  { %v13658_v34 = vpop.permute.xlu0 %13657  ;;  %v13653_v7 = vpop.permute.xlu1 %13652 }
 0xa11   :  { %v13660_v15 = vunpack.i.h.bf16 %v13658_v34  ;;  %v13659_v53 = vunpack.i.l.bf16 %v13658_v34  ;;  %v13655_v5 = vunpack.i.h.bf16 %v13653_v7  ;;  %v13654_v13 = vunpack.i.l.bf16 %v13653_v7 }
 0xa13   :  { %v12625_v19 = vpack.c.bf16 %v13655_v5, %v13654_v13  ;;  %v12631_v56 = vpack.c.bf16 %v13660_v15, %v13659_v53 }
 0xa14   :  { %v13663_v48 = vpop.permute.xlu1 %13662  ;;  %v13673_v46 = vpop.permute.xlu0 %13672 }
 0xa15   :  { %12627 = vmatprep.subr.msk.bf16.mxu1 %vm14922_vm2, %v12625_v19  ;;  %v13665_v58 = vunpack.i.h.bf16 %v13663_v48  ;;  %v13664_v10 = vunpack.i.l.bf16 %v13663_v48  ;;  %v13675_v1 = vunpack.i.h.bf16 %v13673_v46  ;;  %v13674_v20 = vunpack.i.l.bf16 %v13673_v46  ;;  %v15397_v48 = vld [vmem:[%s14995_s27 + $0x8] sm:$0xff] }
 0xa16   :  { %12630 = vmatpush3.bf16.xpose.msk.msra.mxu1 %vm14922_vm2, %v12625_v19  ;;  %v1647_v46 = vmul.f32 %v15315_v11, %v15083_v62 }
 0xa17   :  { %12633 = vmatprep.subr.msk.bf16.mxu1 %vm14922_vm2, %v12631_v56  ;;  %v12637_v12 = vpack.c.bf16 %v13665_v58, %v13664_v10  ;;  %v12649_v54 = vpack.c.bf16 %v13675_v1, %v13674_v20  ;;  %v1646_v1 = vmul.f32 %v15313_v4, %v15090_v8  ;;  %v1641_v20 = vmul.f32 %v15315_v11, %v15055_v14 }
 0xa18   :  { %v13668_v63 = vpop.permute.xlu1 %13667  ;;  %v13683_v0 = vpop.permute.xlu0 %13682 }
 0xa19   :  { %v13670_v17 = vunpack.i.h.bf16 %v13668_v63  ;;  %v13669_v38 = vunpack.i.l.bf16 %v13668_v63  ;;  %v13685_v34 = vunpack.i.h.bf16 %v13683_v0  ;;  %v13684_v7 = vunpack.i.l.bf16 %v13683_v0 }
 0xa1a   :  { %v1645_v0 = vmul.f32 %v15315_v11, %v15072_v51 }
 0xa1b   :  { %v12643_v61 = vpack.c.bf16 %v13670_v17, %v13669_v38  ;;  %v12661_v15 = vpack.c.bf16 %v13685_v34, %v13684_v7  ;;  %v1643_v17 = vmul.f32 %v15315_v11, %v15063_v18  ;;  %v1642_v38 = vmul.f32 %v15313_v4, %v15067_v21  ;;  %v17864_v7 = vld [vmem:[#allocation27_spill] sm:$0xff] }
 0xa1c   :  { %v13678_v3 = vpop.permute.xlu1 %13677 }
 0xa1d   :  { %v13680_v32 = vunpack.i.h.bf16 %v13678_v3  ;;  %v13679_v42 = vunpack.i.l.bf16 %v13678_v3  ;;  %v1640_v3 = vmul.f32 %v15313_v4, %v15059_v16 }
 0xa1e   :  { %12636 = vmatpush3.bf16.xpose.msk.msra.mxu1 %vm14922_vm2, %v12631_v56 }
 0xa1f   :  { %12639 = vmatprep.subr.msk.bf16.mxu1 %vm14922_vm2, %v12637_v12  ;;  %v12655_v40 = vpack.c.bf16 %v13680_v32, %v13679_v42  ;;  %v1651_v32 = vmul.f32 %v15315_v11, %v15105_v9  ;;  %v13691_v42 = vpack.i.bf16 %v1641_v20, %v1640_v3  ;;  %v17869_v20 = vld [vmem:[#allocation32_spill] sm:$0xff]  ;;  %v17870_v3 = vld [vmem:[#allocation33_spill] sm:$0xff] }
 0xa20   :  { %v13688_v53 = vpop.permute.xlu1 %13687 }
 0xa21   :  { %v13690_v5 = vunpack.i.h.bf16 %v13688_v53  ;;  %v13689_v13 = vunpack.i.l.bf16 %v13688_v53  ;;  %v17865_v53 = vld [vmem:[#allocation34_spill] sm:$0xff] }
 0xa23   :  { %v12667_v19 = vpack.c.bf16 %v13690_v5, %v13689_v13  ;;  %v1655_v5 = vmul.f32 %v15315_v11, %v17865_v53 }
 0xa26   :  { %12642 = vmatpush3.bf16.xpose.msk.msra.mxu1 %vm14922_vm2, %v12637_v12  ;;  %v15401_v12 = vld [vmem:[%s14995_s27] sm:$0xff]  ;;  %s14708_s27 = smov 20  }
 0xa27   :  { %12645 = vmatprep.subr.msk.bf16.mxu1 %vm14922_vm2, %v12643_v61 }
 0xa2e   :  { %12648 = vmatpush3.bf16.xpose.msk.msra.mxu1 %vm14922_vm2, %v12643_v61  ;;  %v13696_v61 = vpack.i.bf16 %v1643_v17, %v1642_v38 }
 0xa2f   :  { %12651 = vmatprep.subr.msk.bf16.mxu1 %vm14922_vm2, %v12649_v54 }
 0xa36   :  { %12654 = vmatpush3.bf16.xpose.msk.msra.mxu1 %vm14922_vm2, %v12649_v54  ;;  %v13706_v54 = vpack.i.bf16 %v1647_v46, %v1646_v1 }
 0xa37   :  { %12657 = vmatprep.subr.msk.bf16.mxu1 %vm14922_vm2, %v12655_v40 }
 0xa3e   :  { %12660 = vmatpush3.bf16.xpose.msk.msra.mxu1 %vm14922_vm2, %v12655_v40  ;;  %v1650_v40 = vmul.f32 %v15313_v4, %v15109_v6 }
 0xa3f   :  { %12663 = vmatprep.subr.msk.bf16.mxu1 %vm14922_vm2, %v12661_v15 }
 0xa40   :  { %v13716_v34 = vpack.i.bf16 %v1651_v32, %v1650_v40  ;;  %v1652_v32 = vmul.f32 %v15313_v4, %v17870_v3 }
 0xa46   :  { %12666 = vmatpush3.bf16.xpose.msk.msra.mxu1 %vm14922_vm2, %v12661_v15  ;;  %v1644_v15 = vmul.f32 %v15313_v4, %v17864_v7 }
 0xa47   :  { %12669 = vmatprep.subr.msk.bf16.mxu1 %vm14922_vm2, %v12667_v19 }
 0xa48   :  { %v13701_v13 = vpack.i.bf16 %v1645_v0, %v1644_v15 }
 0xa4e   :  { %12672 = vmatpush3.bf16.xpose.msk.msra.mxu1 %vm14922_vm2, %v12667_v19  ;;  %v17866_v19 = vld [vmem:[#allocation35_spill] sm:$0xff] }
 0xa4f   :  { %11634 = vmatprep.subr.bf16.mxu1 %v17863_v2 }
 0xa55   :  { %11562 = vmatmul.mubr.msk.f32.vlgmr.msra.gmra.mrb[2].mxu1 %vm288_vm1, %v15315_v11 }
 0xa56   :  { %11638 = vmatprep.mubr.msk.bf16.mxu1 %vm14677_vm0, %v17863_v2 }
 0xb28   :  { %v11563_v56 = vpop.f32.mrb[2].mxu1 }
 0xb29   :  { %v1814_v58 = vadd.f32 %v15397_v48, %v11563_v56  ;;  %v1808_v10 = vpop.f32.mrb[3].mxu1  ;;  %v1654_v56 = vmul.f32 %v15313_v4, %v17866_v19 }
 0xb2a   :  { %v1809_v63 = vadd.f32 %v15401_v12, %v1808_v10  ;;  %v17867_v10 = vld [vmem:[#allocation28_spill] sm:$0xff] }
 0xb2b   :  { %1819 = vmax.xlane.f32.xlu1 %v1814_v58  ;;  %v1649_v17 = vmul.f32 %v15315_v11, %v17867_v10  ;;  %v13726_v38 = vpack.i.bf16 %v1655_v5, %v1654_v56 }
 0xb2c   :  { %1817 = vmax.xlane.f32.xlu0 %v1809_v63 }
 0xb3c   :  { %13697 = vrot.lane.b32.xlu1 %v13696_v61, %s17804_s28  ;;  %v17868_v61 = vld [vmem:[#allocation29_spill] sm:$0xff] }
 0xb3d   :  { %v1648_v46 = vmul.f32 %v15313_v4, %v17868_v61 }
 0xb3f   :  { %v13711_v1 = vpack.i.bf16 %v1649_v17, %v1648_v46 }
 0xb40   :  { %13707 = vrot.lane.b32.xlu1 %v13706_v54, %s17804_s28  ;;  %v1653_v54 = vmul.f32 %v15315_v11, %v17869_v20 }
 0xb42   :  { %13692 = vrot.lane.b32.xlu0 %v13691_v42, %s17804_s28  ;;  %v13721_v42 = vpack.i.bf16 %v1653_v54, %v1652_v32 }
 0xb44   :  { %13717 = vrot.lane.b32.xlu1 %v13716_v34, %s17804_s28 }
 0xb46   :  { %13702 = vrot.lane.b32.xlu0 %v13701_v13, %s17804_s28 }
 0xb48   :  { %13727 = vrot.lane.b32.xlu1 %v13726_v38, %s17804_s28 }
 0xb4a   :  { %13712 = vrot.lane.b32.xlu0 %v13711_v1, %s17804_s28 }
 0xb4e   :  { %13722 = vrot.lane.b32.xlu0 %v13721_v42, %s17804_s28 }
 0xbb8   :  { %v1820_v40 = vpop.xlane.xlu1 %1819 }
 0xbb9   :  { %v1822_v0 = vsub.f32 %v1814_v58, %v1820_v40  ;;  %v1818_v34 = vpop.xlane.xlu0 %1817 }
 0xbba   :  { %v1821_v15 = vsub.f32 %v1809_v63, %v1818_v34 }
 0xbbb   :  { %v1825_v5 = vmul.f32 1.442695, %v1822_v0 }
 0xbbc   :  { %v1823_v13 = vmul.f32 1.442695, %v1821_v15  ;;  %v13698_v46 = vpop.permute.xlu1 %13697 }
 0xbbd   :  { %v13693_v56 = vpop.permute.xlu0 %13692  ;;  %v13700_v1 = vunpack.i.h.bf16 %v13698_v46  ;;  %v13699_v20 = vunpack.i.l.bf16 %v13698_v46 }
 0xbbe   :  { %14493 = vpow2.f32 %v1823_v13  ;;  %v13695_v17 = vunpack.i.h.bf16 %v13693_v56  ;;  %v13694_v38 = vunpack.i.l.bf16 %v13693_v56 }
 0xbbf   :  { %14495 = vpow2.f32 %v1825_v5  ;;  %v12709_v63 = vpack.c.bf16 %v13700_v1, %v13699_v20 }
 0xbc0   :  { %v12705_v11 = vpack.c.bf16 %v13695_v17, %v13694_v38  ;;  %v13708_v40 = vpop.permute.xlu1 %13707 }
 0xbc1   :  { %v13703_v4 = vpop.permute.xlu0 %13702  ;;  %v13710_v0 = vunpack.i.h.bf16 %v13708_v40  ;;  %v13709_v34 = vunpack.i.l.bf16 %v13708_v40 }
 0xbc2   :  { %12706 = vmatprep.subr.bf16.mxu0 %v12705_v11  ;;  %v13705_v42 = vunpack.i.h.bf16 %v13703_v4  ;;  %v13704_v58 = vunpack.i.l.bf16 %v13703_v4 }
 0xbc3   :  { %v12717_v17 = vpack.c.bf16 %v13710_v0, %v13709_v34  ;;  %v14221_v34 = vld [vmem:[%s15136_s2 + $0x10] sm:$0xff]  }
 0xbc4   :  { %v12713_v15 = vpack.c.bf16 %v13705_v42, %v13704_v58  ;;  %v13718_v38 = vpop.permute.xlu1 %13717  ;;  %11635 = vmatpush3.bf16.msra.mxu1 %v14221_v34 }
 0xbc5   :  { %v13713_v5 = vpop.permute.xlu0 %13712  ;;  %v13720_v46 = vunpack.i.h.bf16 %v13718_v38  ;;  %v13719_v3 = vunpack.i.l.bf16 %v13718_v38  ;;  %11636 = vmatprep.subr.bf16.mxu1 %v17863_v2  ;;  %v14222_v38 = vld [vmem:[%s15136_s2 + $0x18] sm:$0xff]  }
 0xbc6   :  { %v13715_v13 = vunpack.i.h.bf16 %v13713_v5  ;;  %v13714_v56 = vunpack.i.l.bf16 %v13713_v5 }
 0xbc7   :  { %v12725_v1 = vpack.c.bf16 %v13720_v46, %v13719_v3 }
 0xbc8   :  { %v14494_v54 = vpop.eup %14493  ;;  %v12721_v4 = vpack.c.bf16 %v13715_v13, %v13714_v56  ;;  %v13728_v42 = vpop.permute.xlu1 %13727  ;;  %11637 = vmatpush3.bf16.msra.mxu1 %v14222_v38  ;;  %v14228_v38 = vld [vmem:[%s15170_s10 + $0x4c] ss:$16 sps:$4 sm:$0xff]  }
 0xbc9   :  { %v14496_v32 = vpop.eup %14495  ;;  %11596 = vmatprep.mubr.f32.mxu0 %v14494_v54  ;;  %v13723_v61 = vpop.permute.xlu0 %13722  ;;  %v13730_v58 = vunpack.i.h.bf16 %v13728_v42  ;;  %2279 = vmatprep.subr.bf16.mxu1 %v14228_v38 }
 0xbca   :  { %11597 = vmatmul.mubr.f32.vlgmr.msra.gmra.mrb[20].mxu0 %v14496_v32  ;;  %v13725_v20 = vunpack.i.h.bf16 %v13723_v61 }
 0xbcb   :  { %12708 = vmatpush3.bf16.msra.mxu0 %v12705_v11  ;;  %v13724_v11 = vunpack.i.l.bf16 %v13723_v61 }
 0xbcc   :  { %12710 = vmatprep.subr.bf16.mxu0 %v12709_v63 }
 0xbcd   :  { %v12729_v40 = vpack.c.bf16 %v13725_v20, %v13724_v11  ;;  %v9768_v11 = vld [vmem:[%s15147_s7 + $0x1] ss:$0 sm:$0xff] }
 0xbcf   :  { %12712 = vmatpush3.bf16.msra.mxu0 %v12709_v63  ;;  %v13729_v63 = vunpack.i.l.bf16 %v13728_v42 }
 0xbd0   :  { %12714 = vmatprep.subr.bf16.mxu0 %v12713_v15 }
 0xbd1   :  { %v12733_v0 = vpack.c.bf16 %v13730_v58, %v13729_v63 }
 0xbd3   :  { %12716 = vmatpush3.bf16.msra.mxu0 %v12713_v15 }
 0xbd4   :  { %12718 = vmatprep.subr.bf16.mxu0 %v12717_v17 }
 0xbd7   :  { %12720 = vmatpush3.bf16.msra.mxu0 %v12717_v17  ;;  %v17871_v17 = vmov 0  }
 0xbd8   :  { %12722 = vmatprep.subr.bf16.mxu0 %v12721_v4 }
 0xbdb   :  { %12724 = vmatpush3.bf16.msra.mxu0 %v12721_v4 }
 0xbdc   :  { %12726 = vmatprep.subr.bf16.mxu0 %v12725_v1 }
 0xbdf   :  { %12728 = vmatpush3.bf16.msra.mxu0 %v12725_v1 }
 0xbe0   :  { %12730 = vmatprep.subr.bf16.mxu0 %v12729_v40 }
 0xbe3   :  { %12732 = vmatpush3.bf16.msra.mxu0 %v12729_v40 }
 0xbe4   :  { %12734 = vmatprep.subr.bf16.mxu0 %v12733_v0 }
 0xbe7   :  { %12736 = vmatpush3.bf16.msra.mxu0 %v12733_v0 }
 0xc9d   :  { %v11598_v15 = vpop.f32.mrb[20].mxu0 }
 0xc9e   :  { %14497 = vrcp.f32 %v11598_v15  ;;  %v1893_v61 = vpop.f32.mrb[21].mxu0 }
 0xc9f   :  { %14499 = vrcp.f32 %v1893_v61 }
 0xca8   :  { %v14498_v3 = vpop.eup %14497 }
 0xca9   :  { %v14500_v5 = vpop.eup %14499  ;;  %v1905_v56 = vmul.f32 %v14498_v3, %v14496_v32 }
 0xcaa   :  { %v1903_v13 = vmul.f32 %v14500_v5, %v14494_v54 }
 0xcac   :  { %11631 = vmatprep.mubr.f32.mxu0 %v1903_v13  ;;  %v14223_v13 = vld [vmem:[%s15170_s10 + $0x40] ss:$16 sps:$4 sm:$0xff]  }
 0xcad   :  { %11632 = vmatmul.mubr.f32.vlgmr.msra.gmra.mrb[22].mxu0 %v1905_v56  ;;  %v14226_v56 = vld [vmem:[%s15170_s10 + $0x48] ss:$16 sps:$4 sm:$0xff]  }
 0xcae   :  { %2268 = vmatprep.mubr.bf16.mxu0 %v17871_v17 }
 0xd80   :  { %v11633_v46 = vpop.f32.mrb[22].mxu0 }
 0xd81   :  { %v2036_v4 = vpop.f32.mrb[23].mxu0 }
 0xd82   :  { %v2045_v20 = vpack.c.bf16 %v11633_v46, %v2036_v4  ;;  %v14231_v46 = vld [vmem:[%s15170_s10 + $0x64] ss:$16 sps:$4 sm:$0xff]   ;;  %v14234_v4 = vld [vmem:[%s15170_s10 + $0x6c] ss:$16 sps:$4 sm:$0xff]  }
 0xd84   :  { %11639 = vmatmul.mubr.msk.bf16.vlgmr.msra.gmra.mrb[16].mxu1 %vm288_vm1, %v2045_v20  ;;  %v14229_v20 = vld [vmem:[%s15170_s10 + $0x60] ss:$16 sps:$4 sm:$0xff]  }
 0xd85   :  { %2311 = vmatprep.mubr.bf16.mxu1 %v17871_v17  ;;  %2280 = vmatpush1.bf16.msra.mxu1 %v14226_v56 }
 0xd86   :  { %2281 = vmatprep.subr.bf16.mxu1 %v14234_v4 }
 0xe57   :  { %v2101_v1 = vpop.f32.mrb[16].mxu1 }
 0xe58   :  { %v2102_v42 = vadd.f32 %v9768_v11, %v2101_v1  ;;  %v11640_v58 = vpop.f32.mrb[17].mxu1  ;;  %v14235_v1 = vld [vmem:[%s15185_s16 + $0x140] sm:$0xff]  }
 0xe59   :  { %v2104_v54 = vpop.f32.mrb[18].mxu1 }
 0xe5a   :  { %v2108_v32 = vadd.f32 %v2102_v42, %v15290_v39  ;;  %v2105_v63 = vadd.f32 %v9768_v11, %v2104_v54  ;;  %v11641_v40 = vpop.f32.mrb[19].mxu1  ;;  %v14232_v11 = vld [vmem:[%s15170_s10 + $0x68] ss:$16 sps:$4 sm:$0xff]   ;;  %v14236_v42 = vld [vmem:[%s15185_s16 + $0x1c0] sm:$0xff]  }
 0xe5b   :  { %2282 = vmatpush1.bf16.msra.mxu1 %v14232_v11  ;;  %v9774_v11 = vld [vmem:[%s15192_s22 + $0x1] ss:$0 sm:$0xff] }
 0xe5c   :  { %v2109_v0 = vadd.f32 %v2105_v63, %v15292_v35  ;;  %v2114_v34 = vsel %vm288_vm1, %v2108_v32, 0.0  ;;  %v2122_v15 = vmul.f32 %v2108_v32, %v2108_v32  ;;  %v14225_v35 = vld [vmem:[%s15170_s10 + $0x44] ss:$16 sps:$4 sm:$0xff]   ;;  %10773 = vmatprep.subr.bf16.mxu1 %v14236_v42 }
 0xe5d   :  { %2115 = vadd.xlane.f32.xlu0 %v2114_v34  ;;  %2236 = vmatprep.subr.bf16.mxu0 %v14225_v35 }
 0xe5e   :  { %v2117_v61 = vsel %vm288_vm1, %v2109_v0, 0.0  ;;  %v2124_v3 = vsel %vm288_vm1, %v2122_v15, 0.0  ;;  %v2123_v5 = vmul.f32 %v2109_v0, %v2109_v0  ;;  %2237 = vmatpush1.bf16.msra.mxu0 %v14223_v13 }
 0xe5f   :  { %2118 = vadd.xlane.f32.xlu1 %v2117_v61  ;;  %2238 = vmatprep.subr.bf16.mxu0 %v14231_v46 }
 0xe60   :  { %v2127_v39 = vsel %vm288_vm1, %v2123_v5, 0.0 }
 0xe61   :  { %2125 = vadd.xlane.f32.xlu0 %v2124_v3 }
 0xe62   :  { %2239 = vmatpush1.bf16.msra.mxu0 %v14229_v20 }
 0xe63   :  { %10751 = vmatprep.subr.bf16.mxu0 %v14235_v1 }
 0xe65   :  { %2128 = vadd.xlane.f32.xlu0 %v2127_v39 }
 0xeea   :  { %v2116_v58 = vpop.xlane.xlu0 %2115 }
 0xeeb   :  { %v2120_v54 = vmul.f32 0.03125, %v2116_v58 }
 0xeec   :  { %v2119_v63 = vpop.xlane.xlu1 %2118 }
 0xeed   :  { %v2132_v34 = vmul.f32 %v2120_v54, %v2120_v54  ;;  %v2121_v15 = vmul.f32 0.03125, %v2119_v63  ;;  %v2136_v46 = vsub.f32 %v2108_v32, %v2120_v54  ;;  %v14238_v32 = vld [vmem:[%s15185_s16 + $0x180] sm:$0xff]  }
 0xeee   :  { %v2126_v40 = vpop.xlane.xlu0 %2125 }
 0xeef   :  { %v2130_v61 = vmul.f32 0.03125, %v2126_v40  ;;  %v2133_v39 = vmul.f32 %v2121_v15, %v2121_v15  ;;  %v2137_v1 = vsub.f32 %v2109_v0, %v2121_v15  ;;  %v9775_v40 = vld [vmem:[%s15197_s26 + $0x1] ss:$0 sm:$0xff]  ;;  %v14239_v0 = vld [vmem:[%s15185_s16 + $0x148] sm:$0xff]  }
 0xef0   :  { %v14240_v15 = vld [vmem:[%s15185_s16 + $0x1c8] sm:$0xff]  }
 0xef1   :  { %v2134_v3 = vsub.f32 %v2130_v61, %v2132_v34 }
 0xef2   :  { %v2129_v5 = vpop.xlane.xlu0 %2128 }
 0xef3   :  { %v2138_v13 = vadd.f32 1e-05, %v2134_v3  ;;  %v2131_v35 = vmul.f32 0.03125, %v2129_v5  ;;  %v14237_v5 = vld [vmem:[%s15185_s16 + $0x100] sm:$0xff]  }
 0xef5   :  { %14501 = vrsqrt.f32 %v2138_v13  ;;  %v2135_v56 = vsub.f32 %v2131_v35, %v2133_v39  ;;  %v14241_v39 = vld [vmem:[%s15185_s16 + $0x108] sm:$0xff]   ;;  %v14243_v35 = vld [vmem:[%s15185_s16 + $0x150] sm:$0xff]  }
 0xef6   :  { %v14242_v13 = vld [vmem:[%s15185_s16 + $0x188] sm:$0xff]  }
 0xef7   :  { %v2139_v38 = vadd.f32 1e-05, %v2135_v56  ;;  %v14244_v56 = vld [vmem:[%s15185_s16 + $0x1d0] sm:$0xff]  }
 0xef9   :  { %14503 = vrsqrt.f32 %v2139_v38  ;;  %v14245_v38 = vld [vmem:[%s15185_s16 + $0x110] sm:$0xff]  }
 0xeff   :  { %v14502_v4 = vpop.eup %14501 }
 0xf00   :  { %v2142_v20 = vmul.f32 %v14502_v4, %v2136_v46  ;;  %v14246_v46 = vld [vmem:[%s15185_s16 + $0x190] sm:$0xff]   ;;  %v14247_v4 = vld [vmem:[%s15185_s16 + $0x158] sm:$0xff]  }
 0xf02   :  { %v2150_v63 = vmul.f32 %v9774_v11, %v2142_v20  ;;  %v14248_v20 = vld [vmem:[%s15185_s16 + $0x1d8] sm:$0xff]  }
 0xf03   :  { %v14504_v42 = vpop.eup %14503 }
 0xf04   :  { %v2143_v58 = vmul.f32 %v14504_v42, %v2137_v1  ;;  %v15469_v61 = vadd.f32 %v9775_v40, %v2150_v63  ;;  %v14250_v1 = vld [vmem:[%s15185_s16 + $0x198] sm:$0xff]   ;;  %v14251_v42 = vld [vmem:[%s15185_s16 + $0x160] sm:$0xff]  }
 0xf05   :  { %v14253_v63 = vld [vmem:[%s15185_s16 + $0x120] sm:$0xff]  }
 0xf06   :  { %v2151_v34 = vmul.f32 %v9774_v11, %v2143_v58  ;;  %v14249_v11 = vld [vmem:[%s15185_s16 + $0x118] sm:$0xff]   ;;  %v14252_v58 = vld [vmem:[%s15185_s16 + $0x1e0] sm:$0xff]  }
 0xf08   :  { %v15471_v3 = vadd.f32 %v9775_v40, %v2151_v34  ;;  %v14254_v40 = vld [vmem:[%s15185_s16 + $0x1a0] sm:$0xff]   ;;  %v14255_v34 = vld [vmem:[%s15185_s16 + $0x168] sm:$0xff]  }
 0xf0a   :  { %v2171_v54 = vpack.c.bf16 %v15471_v3, %v15469_v61 }
 0xf0c   :  { %9793 = vmatmul.mubr.msk.bf16.vlgmr.msra.gmra.mrb[24].mxu0 %vm288_vm1, %v2171_v54  ;;  %9794 = vmatmul.mubr.msk.bf16.vlgmr.msra.gmra.mrb[20].mxu1 %vm288_vm1, %v2171_v54  ;;  %v14258_v54 = vld [vmem:[%s15185_s16 + $0x1a8] sm:$0xff]  }
 0xf0d   :  { %10752 = vmatpush3.bf16.msra.mxu0 %v14237_v5  ;;  %10774 = vmatpush3.bf16.msra.mxu1 %v14238_v32  ;;  %v14256_v5 = vld [vmem:[%s15185_s16 + $0x1e8] sm:$0xff]  }
 0xf0e   :  { %10753 = vmatprep.subr.bf16.mxu0 %v14239_v0  ;;  %10775 = vmatprep.subr.bf16.mxu1 %v14240_v15  ;;  %v14257_v32 = vld [vmem:[%s15185_s16 + $0x128] sm:$0xff]   ;;  %v14259_v0 = vld [vmem:[%s15185_s16 + $0x170] sm:$0xff]  }
 0xf0f   :  { %v14260_v15 = vld [vmem:[%s15185_s16 + $0x1f0] sm:$0xff]  }
 0xf11   :  { %10754 = vmatpush3.bf16.msra.mxu0 %v14241_v39  ;;  %10776 = vmatpush3.bf16.msra.mxu1 %v14242_v13  ;;  %v14261_v39 = vld [vmem:[%s15185_s16 + $0x130] sm:$0xff]  }
 0xf12   :  { %10755 = vmatprep.subr.bf16.mxu0 %v14243_v35  ;;  %10777 = vmatprep.subr.bf16.mxu1 %v14244_v56  ;;  %v14262_v13 = vld [vmem:[%s15185_s16 + $0x1b0] sm:$0xff]   ;;  %v14263_v35 = vld [vmem:[%s15185_s16 + $0x178] sm:$0xff]  }
 0xf13   :  { %v14264_v56 = vld [vmem:[%s15185_s16 + $0x1f8] sm:$0xff]  }
 0xf15   :  { %10756 = vmatpush3.bf16.msra.mxu0 %v14245_v38  ;;  %10778 = vmatpush3.bf16.msra.mxu1 %v14246_v46  ;;  %v14265_v38 = vld [vmem:[%s15185_s16 + $0x138] sm:$0xff]  }
 0xf16   :  { %10757 = vmatprep.subr.bf16.mxu0 %v14247_v4  ;;  %10779 = vmatprep.subr.bf16.mxu1 %v14248_v20  ;;  %v14266_v46 = vld [vmem:[%s15185_s16 + $0x1b8] sm:$0xff]   ;;  %v9784_v4 = vld [vmem:[%s15245_s3 + $0x4] sm:$0xf]  ;;  %v17872_v20 = vld [vmem:[#allocation36_spill] sm:$0xff] }
 0xf19   :  { %10758 = vmatpush3.bf16.msra.mxu0 %v14249_v11  ;;  %10780 = vmatpush3.bf16.msra.mxu1 %v14250_v1  ;;  %v2176_v11 = vrot.slane %v9784_v4, %v17872_v20  ;;  %v17873_v1 = vld [vmem:[#allocation37_spill] sm:$0xff] }
 0xf1a   :  { %10759 = vmatprep.subr.bf16.mxu0 %v14251_v42  ;;  %10781 = vmatprep.subr.bf16.mxu1 %v14252_v58  ;;  %v2184_v42 = vrot.slane %v9784_v4, %v17873_v1  ;;  %v17874_v58 = vld [vmem:[#allocation38_spill] sm:$0xff] }
 0xf1d   :  { %10760 = vmatpush3.bf16.msra.mxu0 %v14253_v63  ;;  %10782 = vmatpush3.bf16.msra.mxu1 %v14254_v40  ;;  %v2180_v63 = vrot.slane %v9784_v4, %v17874_v58  ;;  %v17875_v40 = vld [vmem:[#allocation39_spill] sm:$0xff] }
 0xf1e   :  { %10761 = vmatprep.subr.bf16.mxu0 %v14255_v34  ;;  %10783 = vmatprep.subr.bf16.mxu1 %v14256_v5  ;;  %v2188_v34 = vrot.slane %v9784_v4, %v17875_v40 }
 0xf21   :  { %10762 = vmatpush3.bf16.msra.mxu0 %v14257_v32  ;;  %10784 = vmatpush3.bf16.msra.mxu1 %v14258_v54 }
 0xf22   :  { %10763 = vmatprep.subr.bf16.mxu0 %v14259_v0  ;;  %10785 = vmatprep.subr.bf16.mxu1 %v14260_v15 }
 0xf25   :  { %10764 = vmatpush3.bf16.msra.mxu0 %v14261_v39  ;;  %10786 = vmatpush3.bf16.msra.mxu1 %v14262_v13 }
 0xf26   :  { %10765 = vmatprep.subr.bf16.mxu0 %v14263_v35  ;;  %10787 = vmatprep.subr.bf16.mxu1 %v14264_v56 }
 0xf29   :  { %10766 = vmatpush3.bf16.msra.mxu0 %v14265_v38  ;;  %10788 = vmatpush3.bf16.msra.mxu1 %v14266_v46 }
 0xf2a   :  { %11642 = vmatprep.subr.bf16.mxu0 %v17863_v2 }
 0xfdf   :  { %v2270_v5 = vpop.f32.mrb[24].mxu0  ;;  %v2313_v32 = vpop.f32.mrb[20].mxu1 }
 0xfe0   :  { %v2271_v54 = vadd.f32 %v2270_v5, %v2176_v11  ;;  %v2314_v0 = vadd.f32 %v2313_v32, %v2184_v42  ;;  %v2272_v15 = vpop.f32.mrb[25].mxu0  ;;  %v2315_v39 = vpop.f32.mrb[21].mxu1 }
 0xfe1   :  { %v2273_v13 = vadd.f32 %v2272_v15, %v2180_v63  ;;  %v2316_v35 = vadd.f32 %v2315_v39, %v2188_v34  ;;  %v2274_v56 = vpop.f32.mrb[26].mxu0  ;;  %v2317_v38 = vpop.f32.mrb[22].mxu1 }
 0xfe2   :  { %v2275_v46 = vadd.f32 %v2274_v56, %v2176_v11  ;;  %v2318_v17 = vadd.f32 %v2317_v38, %v2184_v42  ;;  %v2276_v10 = vpop.f32.mrb[27].mxu0  ;;  %v2319_v20 = vpop.f32.mrb[23].mxu1  ;;  %v2322_v53 = vmax.f32 %v2271_v54, 0.0  ;;  %v2324_v58 = vmax.f32 %v2314_v0, 0.0  ;;  %v9860_v11 = vld [vmem:[%s15265_s9 + $0x1] ss:$0 sm:$0xff] }
 0xfe3   :  { %v2277_v19 = vadd.f32 %v2276_v10, %v2180_v63  ;;  %v2320_v1 = vadd.f32 %v2319_v20, %v2188_v34  ;;  %v2323_v40 = vmax.f32 %v2273_v13, 0.0  ;;  %v2325_v5 = vmax.f32 %v2316_v35, 0.0 }
 0xfe4   :  { %v2326_v7 = vmax.f32 %v2275_v46, 0.0  ;;  %v2328_v4 = vmax.f32 %v2318_v17, 0.0 }
 0xfe5   :  { %v2327_v32 = vmax.f32 %v2277_v19, 0.0  ;;  %v2329_v51 = vmax.f32 %v2320_v1, 0.0 }
 0xfe6   :  { %v2397_v6 = vpack.c.bf16 %v2326_v7, %v2322_v53  ;;  %v2399_v15 = vpack.c.bf16 %v2328_v4, %v2324_v58 }
 0xfe7   :  { %v2398_v39 = vpack.c.bf16 %v2327_v32, %v2323_v40  ;;  %v2400_v9 = vpack.c.bf16 %v2329_v51, %v2325_v5  ;;  %v14267_v32 = vld [vmem:[%s14734_s6 + $0x20] sm:$0xff]  }
 0xfe9   :  { %2631 = vmatprep.mubr.bf16.mxu0 %v2398_v39  ;;  %2672 = vmatprep.mubr.bf16.mxu1 %v2400_v9 }
 0xfea   :  { %2632 = vmatmul.mubr.bf16.vlgmr.msra.gmra.mrb[28].mxu0 %v2397_v6  ;;  %2673 = vmatmul.mubr.bf16.vlgmr.msra.gmra.mrb[24].mxu1 %v2399_v15 }
 0xfeb   :  { %11646 = vmatprep.mubr.msk.bf16.mxu0 %vm14677_vm0, %v17863_v2  ;;  %11643 = vmatpush3.bf16.msra.mxu0 %v14267_v32 }
 0xfec   :  { %11644 = vmatprep.subr.bf16.mxu0 %v17863_v2 }
0x10bd   :  { %v10767_v10 = vpop.f32.mrb[28].mxu0  ;;  %v10789_v20 = vpop.f32.mrb[24].mxu1 }
0x10be   :  { %v10768_v17 = vpop.f32.mrb[29].mxu0  ;;  %v10790_v42 = vpop.f32.mrb[25].mxu1 }
0x10bf   :  { %v10769_v63 = vadd.f32 %v10768_v17, %v10767_v10  ;;  %v10791_v34 = vadd.f32 %v10790_v42, %v10789_v20  ;;  %v10770_v19 = vpop.f32.mrb[30].mxu0  ;;  %v10792_v1 = vpop.f32.mrb[26].mxu1 }
0x10c0   :  { %v10771_v7 = vpop.f32.mrb[31].mxu0  ;;  %v10793_v53 = vpop.f32.mrb[27].mxu1 }
0x10c1   :  { %v2634_v58 = vadd.f32 %v10769_v63, %v9860_v11  ;;  %v10772_v51 = vadd.f32 %v10771_v7, %v10770_v19  ;;  %v10794_v40 = vadd.f32 %v10793_v53, %v10792_v1 }
0x10c3   :  { %v2675_v9 = vadd.f32 %v10791_v34, %v2634_v58  ;;  %v2637_v6 = vadd.f32 %v10772_v51, %v9860_v11 }
0x10c5   :  { %v2681_v54 = vadd.f32 %v2675_v9, %v15469_v61  ;;  %v2678_v0 = vadd.f32 %v10794_v40, %v2637_v6  ;;  %v14268_v61 = vld [vmem:[%s14734_s6 + $0x28] sm:$0xff]   ;;  %v9895_v40 = vld [vmem:[%s15281_s17 + $0x1] ss:$0 sm:$0xff]  ;;  %s14695_s6 = smov 28  }
0x10c6   :  { %11645 = vmatpush3.bf16.msra.mxu0 %v14268_v61 }
0x10c7   :  { %v2682_v13 = vadd.f32 %v2678_v0, %v15471_v3  ;;  %v2687_v35 = vsel %vm288_vm1, %v2681_v54, 0.0  ;;  %v2695_v56 = vmul.f32 %v2681_v54, %v2681_v54  ;;  %12786 = vmatprep.subr.bf16.mxu0 %v14971_v49 }
0x10c8   :  { %2688 = vadd.xlane.f32.xlu1 %v2687_v35 }
0x10c9   :  { %v2690_v38 = vsel %vm288_vm1, %v2682_v13, 0.0  ;;  %v2696_v46 = vmul.f32 %v2682_v13, %v2682_v13  ;;  %v2697_v4 = vsel %vm288_vm1, %v2695_v56, 0.0 }
0x10ca   :  { %2691 = vadd.xlane.f32.xlu0 %v2690_v38  ;;  %v9896_v38 = vld [vmem:[%s15286_s24 + $0x1] ss:$0 sm:$0xff] }
0x10cb   :  { %v2700_v5 = vsel %vm288_vm1, %v2696_v46, 0.0 }
0x10cc   :  { %2698 = vadd.xlane.f32.xlu1 %v2697_v4 }
0x10ce   :  { %2701 = vadd.xlane.f32.xlu0 %v2700_v5 }
0x1155   :  { %v2689_v3 = vpop.xlane.xlu1 %2688 }
0x1156   :  { %v2693_v15 = vmul.f32 0.03125, %v2689_v3 }
0x1157   :  { %v2692_v39 = vpop.xlane.xlu0 %2691 }
0x1158   :  { %v2694_v10 = vmul.f32 0.03125, %v2692_v39  ;;  %v2705_v11 = vmul.f32 %v2693_v15, %v2693_v15  ;;  %v2709_v58 = vsub.f32 %v2681_v54, %v2693_v15  ;;  %v9907_v54 = vld [vmem:[%s14855_s18 + $0x2] ss:$0 sm:$0xff]  ;;  %s14702_s18 = smov 10  }
0x1159   :  { %v2699_v20 = vpop.xlane.xlu1 %2698 }
0x115a   :  { %v2703_v17 = vmul.f32 0.03125, %v2699_v20  ;;  %v2706_v63 = vmul.f32 %v2694_v10, %v2694_v10  ;;  %v2710_v9 = vsub.f32 %v2682_v13, %v2694_v10 }
0x115b   :  { %v2702_v42 = vpop.xlane.xlu0 %2701 }
0x115c   :  { %v2707_v34 = vsub.f32 %v2703_v17, %v2705_v11  ;;  %v2704_v19 = vmul.f32 0.03125, %v2702_v42 }
0x115e   :  { %v2711_v1 = vadd.f32 1e-05, %v2707_v34  ;;  %v2708_v7 = vsub.f32 %v2704_v19, %v2706_v63 }
0x1160   :  { %14505 = vrsqrt.f32 %v2711_v1  ;;  %v2712_v53 = vadd.f32 1e-05, %v2708_v7 }
0x1162   :  { %14507 = vrsqrt.f32 %v2712_v53 }
0x116a   :  { %v14506_v51 = vpop.eup %14505 }
0x116b   :  { %v2715_v6 = vmul.f32 %v14506_v51, %v2709_v58 }
0x116c   :  { %v14508_v0 = vpop.eup %14507 }
0x116d   :  { %v2716_v35 = vmul.f32 %v14508_v0, %v2710_v9  ;;  %v2723_v56 = vmul.f32 %v9895_v40, %v2715_v6 }
0x116f   :  { %v2724_v46 = vmul.f32 %v9895_v40, %v2716_v35  ;;  %v15528_v4 = vadd.f32 %v9896_v38, %v2723_v56 }
0x1171   :  { %v15530_v5 = vadd.f32 %v9896_v38, %v2724_v46 }
0x1173   :  { %v2747_v32 = vpack.c.bf16 %v15530_v5, %v15528_v4 }
0x1175   :  { %11647 = vmatmul.mubr.msk.bf16.vlgmr.msra.gmra.mrb[32].mxu0 %vm288_vm1, %v2747_v32 }
0x1176   :  { %12788 = vmatpush3.bf16.msra.mxu0 %v14971_v49 }
0x1177   :  { %12790 = vmatprep.subr.bf16.mxu0 %v14974_v52 }
0x117a   :  { %12792 = vmatpush3.bf16.msra.mxu0 %v14974_v52 }
0x117b   :  { %12794 = vmatprep.subr.bf16.mxu0 %v14981_v55 }
0x117e   :  { %12796 = vmatpush3.bf16.msra.mxu0 %v14981_v55 }
0x117f   :  { %12798 = vmatprep.subr.bf16.mxu0 %v14987_v59 }
0x1182   :  { %12800 = vmatpush3.bf16.msra.mxu0 %v14987_v59 }
0x1183   :  { %12802 = vmatprep.subr.bf16.mxu0 %v15001_v36 }
0x1186   :  { %12804 = vmatpush3.bf16.msra.mxu0 %v15001_v36 }
0x1187   :  { %12806 = vmatprep.subr.bf16.mxu0 %v15009_v41 }
0x118a   :  { %12808 = vmatpush3.bf16.msra.mxu0 %v15009_v41 }
0x118b   :  { %12810 = vmatprep.subr.bf16.mxu0 %v15019_v43 }
0x118e   :  { %12812 = vmatpush3.bf16.msra.mxu0 %v15019_v43 }
0x118f   :  { %12814 = vmatprep.subr.bf16.mxu0 %v15029_v47 }
0x1192   :  { %12816 = vmatpush3.bf16.msra.mxu0 %v15029_v47 }
0x1248   :  { %v2803_v13 = vpop.f32.mrb[32].mxu0 }
0x1249   :  { %v15551_v61 = vadd.f32 %v9907_v54, %v2803_v13  ;;  %v11648_v3 = vpop.f32.mrb[33].mxu0 }
0x124a   :  { %v2806_v15 = vpop.f32.mrb[34].mxu0 }
0x124b   :  { %v15553_v39 = vadd.f32 %v9907_v54, %v2806_v15  ;;  %v11649_v10 = vpop.f32.mrb[35].mxu0  ;;  %11682 = vmatprep.mubr.msk.f32.mxu1 %vm288_vm1, %v15551_v61  ;;  %v2812_v20 = vmul.f32 %v15551_v61, %v14836_v22  ;;  %v2810_v17 = vmul.f32 %v15551_v61, %v14838_v23  ;;  %v2818_v7 = vmul.f32 %v15551_v61, %v14859_v31 }
0x124c   :  { %v2814_v53 = vmul.f32 %v15551_v61, %v14846_v27  ;;  %v2822_v6 = vmul.f32 %v15551_v61, %v14886_v50  ;;  %v2816_v0 = vmul.f32 %v15551_v61, %v14850_v29  ;;  %v2820_v46 = vmul.f32 %v15551_v61, %v14866_v37 }
0x124d   :  { %v2813_v11 = vmul.f32 %v15553_v39, %v14840_v24  ;;  %v2811_v42 = vmul.f32 %v15553_v39, %v14842_v25  ;;  %v2819_v19 = vmul.f32 %v15553_v39, %v14857_v30  ;;  %v2815_v1 = vmul.f32 %v15553_v39, %v14844_v26  ;;  %v10060_v30 = vld [vmem:[%s15869_s4] ss:$0 sm:$0xff] }
0x124e   :  { %v2823_v40 = vmul.f32 %v15553_v39, %v14880_v45  ;;  %v2817_v9 = vmul.f32 %v15553_v39, %v14848_v28  ;;  %v2821_v38 = vmul.f32 %v15553_v39, %v14862_v33  ;;  %v2825_v54 = vmul.f32 %v15553_v39, %v14898_v57 }
0x124f   :  { %v13736_v63 = vpack.i.bf16 %v2813_v11, %v2812_v20  ;;  %v13731_v34 = vpack.i.bf16 %v2811_v42, %v2810_v17  ;;  %v13751_v58 = vpack.i.bf16 %v2819_v19, %v2818_v7  ;;  %v13741_v51 = vpack.i.bf16 %v2815_v1, %v2814_v53 }
0x1250   :  { %v13761_v35 = vpack.i.bf16 %v2823_v40, %v2822_v6  ;;  %v13746_v56 = vpack.i.bf16 %v2817_v9, %v2816_v0  ;;  %v13756_v32 = vpack.i.bf16 %v2821_v38, %v2820_v46  ;;  %v2824_v13 = vmul.f32 %v15551_v61, %v14906_v60 }
0x1251   :  { %13737 = vrot.lane.b32.xlu0 %v13736_v63, %s14681_s19  ;;  %13732 = vrot.lane.b32.xlu1 %v13731_v34, %s14681_s19 }
0x1252   :  { %v13766_v3 = vpack.i.bf16 %v2825_v54, %v2824_v13 }
0x1255   :  { %13752 = vrot.lane.b32.xlu0 %v13751_v58, %s14681_s19  ;;  %13742 = vrot.lane.b32.xlu1 %v13741_v51, %s14681_s19 }
0x1259   :  { %13762 = vrot.lane.b32.xlu0 %v13761_v35, %s14681_s19  ;;  %13747 = vrot.lane.b32.xlu1 %v13746_v56, %s14681_s19 }
0x125d   :  { %13757 = vrot.lane.b32.xlu1 %v13756_v32, %s14681_s19 }
0x1261   :  { %13767 = vrot.lane.b32.xlu1 %v13766_v3, %s14681_s19 }
0x12c3   :  { %v13738_v15 = vpop.permute.xlu0 %13737  ;;  %v13733_v10 = vpop.permute.xlu1 %13732 }
0x12c4   :  { %v13740_v20 = vunpack.i.h.bf16 %v13738_v15  ;;  %v13739_v11 = vunpack.i.l.bf16 %v13738_v15  ;;  %v13735_v17 = vunpack.i.h.bf16 %v13733_v10  ;;  %v13734_v42 = vunpack.i.l.bf16 %v13733_v10 }
0x12c6   :  { %v12737_v63 = vpack.c.bf16 %v13735_v17, %v13734_v42  ;;  %v12743_v34 = vpack.c.bf16 %v13740_v20, %v13739_v11 }
0x12c7   :  { %v13743_v19 = vpop.permute.xlu1 %13742  ;;  %v13753_v6 = vpop.permute.xlu0 %13752 }
0x12c8   :  { %12739 = vmatprep.subr.msk.bf16.mxu1 %vm14922_vm2, %v12737_v63  ;;  %v13745_v1 = vunpack.i.h.bf16 %v13743_v19  ;;  %v13744_v7 = vunpack.i.l.bf16 %v13743_v19  ;;  %v13755_v0 = vunpack.i.h.bf16 %v13753_v6  ;;  %v13754_v35 = vunpack.i.l.bf16 %v13753_v6 }
0x12c9   :  { %12742 = vmatpush3.bf16.xpose.msk.msra.mxu1 %vm14922_vm2, %v12737_v63 }
0x12ca   :  { %12745 = vmatprep.subr.msk.bf16.mxu1 %vm14922_vm2, %v12743_v34  ;;  %v12749_v53 = vpack.c.bf16 %v13745_v1, %v13744_v7  ;;  %v12761_v56 = vpack.c.bf16 %v13755_v0, %v13754_v35  ;;  %v2829_v7 = vmul.f32 %v15553_v39, %v15063_v18  ;;  %v17876_v18 = vld [vmem:[#allocation30_spill] sm:$0xff]  ;;  %v17877_v0 = vld [vmem:[#allocation31_spill] sm:$0xff] }
0x12cb   :  { %v13748_v58 = vpop.permute.xlu1 %13747  ;;  %v13763_v13 = vpop.permute.xlu0 %13762  ;;  %v2837_v6 = vmul.f32 %v15553_v39, %v17876_v18  ;;  %v17878_v35 = vld [vmem:[#allocation26_spill] sm:$0xff] }
0x12cc   :  { %v13750_v51 = vunpack.i.h.bf16 %v13748_v58  ;;  %v13749_v40 = vunpack.i.l.bf16 %v13748_v58  ;;  %v13765_v3 = vunpack.i.h.bf16 %v13763_v13  ;;  %v13764_v15 = vunpack.i.l.bf16 %v13763_v13 }
0x12ce   :  { %v12755_v9 = vpack.c.bf16 %v13750_v51, %v13749_v40  ;;  %v12773_v10 = vpack.c.bf16 %v13765_v3, %v13764_v15  ;;  %v2833_v51 = vmul.f32 %v15553_v39, %v15083_v62  ;;  %v2836_v62 = vmul.f32 %v15551_v61, %v17877_v0  ;;  %v17882_v3 = vld [vmem:[#allocation28_spill] sm:$0xff] }
0x12cf   :  { %v13758_v38 = vpop.permute.xlu1 %13757  ;;  %v2835_v15 = vmul.f32 %v15553_v39, %v17882_v3 }
0x12d0   :  { %v13760_v46 = vunpack.i.h.bf16 %v13758_v38  ;;  %v13759_v32 = vunpack.i.l.bf16 %v13758_v38 }
0x12d1   :  { %12748 = vmatpush3.bf16.xpose.msk.msra.mxu1 %vm14922_vm2, %v12743_v34 }
0x12d2   :  { %12751 = vmatprep.subr.msk.bf16.mxu1 %vm14922_vm2, %v12749_v53  ;;  %v12767_v54 = vpack.c.bf16 %v13760_v46, %v13759_v32  ;;  %v17880_v46 = vld [vmem:[#allocation34_spill] sm:$0xff] }
0x12d3   :  { %v13768_v20 = vpop.permute.xlu1 %13767 }
0x12d4   :  { %v13770_v11 = vunpack.i.h.bf16 %v13768_v20  ;;  %v13769_v17 = vunpack.i.l.bf16 %v13768_v20  ;;  %v17883_v20 = vld [vmem:[#allocation29_spill] sm:$0xff] }
0x12d6   :  { %v12779_v42 = vpack.c.bf16 %v13770_v11, %v13769_v17  ;;  %v2834_v11 = vmul.f32 %v15551_v61, %v17883_v20 }
0x12d8   :  { %v13791_v17 = vpack.i.bf16 %v2835_v15, %v2834_v11 }
0x12d9   :  { %12754 = vmatpush3.bf16.xpose.msk.msra.mxu1 %vm14922_vm2, %v12749_v53  ;;  %v2828_v53 = vmul.f32 %v15551_v61, %v15067_v21 }
0x12da   :  { %12757 = vmatprep.subr.msk.bf16.mxu1 %vm14922_vm2, %v12755_v9 }
0x12db   :  { %v13776_v58 = vpack.i.bf16 %v2829_v7, %v2828_v53 }
0x12e1   :  { %12760 = vmatpush3.bf16.xpose.msk.msra.mxu1 %vm14922_vm2, %v12755_v9  ;;  %v2826_v9 = vmul.f32 %v15551_v61, %v15059_v16  ;;  %v2841_v16 = vmul.f32 %v15553_v39, %v17880_v46 }
0x12e2   :  { %12763 = vmatprep.subr.msk.bf16.mxu1 %vm14922_vm2, %v12761_v56 }
0x12e9   :  { %12766 = vmatpush3.bf16.xpose.msk.msra.mxu1 %vm14922_vm2, %v12761_v56  ;;  %v2831_v56 = vmul.f32 %v15553_v39, %v17878_v35 }
0x12ea   :  { %12769 = vmatprep.subr.msk.bf16.mxu1 %vm14922_vm2, %v12767_v54 }
0x12f1   :  { %12772 = vmatpush3.bf16.xpose.msk.msra.mxu1 %vm14922_vm2, %v12767_v54  ;;  %v17881_v54 = vld [vmem:[#allocation35_spill] sm:$0xff] }
0x12f2   :  { %12775 = vmatprep.subr.msk.bf16.mxu1 %vm14922_vm2, %v12773_v10  ;;  %v2840_v13 = vmul.f32 %v15551_v61, %v17881_v54 }
0x12f9   :  { %12778 = vmatpush3.bf16.xpose.msk.msra.mxu1 %vm14922_vm2, %v12773_v10  ;;  %v13806_v10 = vpack.i.bf16 %v2841_v16, %v2840_v13 }
0x12fa   :  { %12781 = vmatprep.subr.msk.bf16.mxu1 %vm14922_vm2, %v12779_v42 }
0x1301   :  { %12784 = vmatpush3.bf16.xpose.msk.msra.mxu1 %vm14922_vm2, %v12779_v42  ;;  %v17884_v42 = vld [vmem:[#allocation32_spill] sm:$0xff] }
0x1302   :  { %11755 = vmatprep.subr.bf16.mxu1 %v17863_v2 }
0x1308   :  { %11683 = vmatmul.mubr.msk.f32.vlgmr.msra.gmra.mrb[28].mxu1 %vm288_vm1, %v15553_v39 }
0x1309   :  { %11759 = vmatprep.mubr.msk.bf16.mxu1 %vm14677_vm0, %v17863_v2 }
0x13db   :  { %v11684_v63 = vpop.f32.mrb[28].mxu1 }
0x13dc   :  { %v3000_v34 = vadd.f32 %v15397_v48, %v11684_v63  ;;  %v2994_v19 = vpop.f32.mrb[29].mxu1  ;;  %v2832_v48 = vmul.f32 %v15551_v61, %v15090_v8  ;;  %v13796_v8 = vpack.i.bf16 %v2837_v6, %v2836_v62  ;;  %v2839_v63 = vmul.f32 %v15553_v39, %v17884_v42 }
0x13dd   :  { %v2995_v1 = vadd.f32 %v15401_v12, %v2994_v19  ;;  %v2827_v12 = vmul.f32 %v15553_v39, %v15055_v14  ;;  %v17879_v14 = vld [vmem:[#allocation27_spill] sm:$0xff]  ;;  %v17885_v19 = vld [vmem:[#allocation33_spill] sm:$0xff] }
0x13de   :  { %3005 = vmax.xlane.f32.xlu1 %v3000_v34  ;;  %v13786_v40 = vpack.i.bf16 %v2833_v51, %v2832_v48  ;;  %v2830_v38 = vmul.f32 %v15551_v61, %v17879_v14  ;;  %v2838_v7 = vmul.f32 %v15551_v61, %v17885_v19 }
0x13df   :  { %3003 = vmax.xlane.f32.xlu0 %v2995_v1  ;;  %v13771_v21 = vpack.i.bf16 %v2827_v12, %v2826_v9 }
0x13e0   :  { %v13781_v32 = vpack.i.bf16 %v2831_v56, %v2830_v38  ;;  %v13801_v53 = vpack.i.bf16 %v2839_v63, %v2838_v7 }
0x13ef   :  { %13777 = vrot.lane.b32.xlu1 %v13776_v58, %s17804_s28 }
0x13f3   :  { %13787 = vrot.lane.b32.xlu1 %v13786_v40, %s17804_s28 }
0x13f5   :  { %13772 = vrot.lane.b32.xlu0 %v13771_v21, %s17804_s28 }
0x13f7   :  { %13797 = vrot.lane.b32.xlu1 %v13796_v8, %s17804_s28 }
0x13f9   :  { %13782 = vrot.lane.b32.xlu0 %v13781_v32, %s17804_s28 }
0x13fb   :  { %13807 = vrot.lane.b32.xlu1 %v13806_v10, %s17804_s28 }
0x13fd   :  { %13792 = vrot.lane.b32.xlu0 %v13791_v17, %s17804_s28 }
0x1401   :  { %13802 = vrot.lane.b32.xlu0 %v13801_v53, %s17804_s28 }
0x146b   :  { %v3006_v58 = vpop.xlane.xlu1 %3005 }
0x146c   :  { %v3008_v51 = vsub.f32 %v3000_v34, %v3006_v58  ;;  %v3004_v48 = vpop.xlane.xlu0 %3003 }
0x146d   :  { %v3007_v12 = vsub.f32 %v2995_v1, %v3004_v48 }
0x146e   :  { %v3011_v40 = vmul.f32 1.442695, %v3008_v51 }
0x146f   :  { %v3009_v9 = vmul.f32 1.442695, %v3007_v12  ;;  %v13778_v0 = vpop.permute.xlu1 %13777 }
0x1470   :  { %v13773_v18 = vpop.permute.xlu0 %13772  ;;  %v13780_v62 = vunpack.i.h.bf16 %v13778_v0  ;;  %v13779_v35 = vunpack.i.l.bf16 %v13778_v0 }
0x1471   :  { %14509 = vpow2.f32 %v3009_v9  ;;  %v13775_v6 = vunpack.i.h.bf16 %v13773_v18  ;;  %v13774_v21 = vunpack.i.l.bf16 %v13773_v18 }
0x1472   :  { %14511 = vpow2.f32 %v3011_v40  ;;  %v12821_v1 = vpack.c.bf16 %v13780_v62, %v13779_v35  ;;  %v14269_v40 = vld [vmem:[%s15136_s2 + $0x20] sm:$0xff]   ;;  %v17886_v62 = vmov 0   ;;  %v14270_v35 = vld [vmem:[%s15136_s2 + $0x28] sm:$0xff]   ;;  %s15742_s2 = sld [smem:[%s17682_s0 + %s14695_s6]]  }
0x1473   :  { %v12817_v39 = vpack.c.bf16 %v13775_v6, %v13774_v21  ;;  %v13788_v38 = vpop.permute.xlu1 %13787  ;;  %11756 = vmatpush3.bf16.msra.mxu1 %v14269_v40 }
0x1474   :  { %v13783_v61 = vpop.permute.xlu0 %13782  ;;  %v13790_v46 = vunpack.i.h.bf16 %v13788_v38  ;;  %v13789_v16 = vunpack.i.l.bf16 %v13788_v38  ;;  %11757 = vmatprep.subr.bf16.mxu1 %v17863_v2 }
0x1475   :  { %12818 = vmatprep.subr.bf16.mxu0 %v12817_v39  ;;  %v13785_v14 = vunpack.i.h.bf16 %v13783_v61  ;;  %v13784_v34 = vunpack.i.l.bf16 %v13783_v61 }
0x1476   :  { %v12829_v15 = vpack.c.bf16 %v13790_v46, %v13789_v16 }
0x1477   :  { %v12825_v32 = vpack.c.bf16 %v13785_v14, %v13784_v34  ;;  %v13798_v10 = vpop.permute.xlu1 %13797  ;;  %11758 = vmatpush3.bf16.msra.mxu1 %v14270_v35 }
0x1478   :  { %v13793_v54 = vpop.permute.xlu0 %13792  ;;  %v13800_v20 = vunpack.i.h.bf16 %v13798_v10  ;;  %v13799_v11 = vunpack.i.l.bf16 %v13798_v10 }
0x1479   :  { %v13795_v13 = vunpack.i.h.bf16 %v13793_v54  ;;  %v13794_v3 = vunpack.i.l.bf16 %v13793_v54 }
0x147a   :  { %v12837_v7 = vpack.c.bf16 %v13800_v20, %v13799_v11 }
0x147b   :  { %v14510_v56 = vpop.eup %14509  ;;  %v12833_v17 = vpack.c.bf16 %v13795_v13, %v13794_v3  ;;  %v13808_v53 = vpop.permute.xlu1 %13807 }
0x147c   :  { %v14512_v8 = vpop.eup %14511  ;;  %11717 = vmatprep.mubr.f32.mxu0 %v14510_v56  ;;  %v13803_v42 = vpop.permute.xlu0 %13802  ;;  %v13810_v58 = vunpack.i.h.bf16 %v13808_v53  ;;  %v13809_v51 = vunpack.i.l.bf16 %v13808_v53  ;;  %v14277_v53 = vld [vmem:[%s15170_s10 + $0xa0] ss:$16 sps:$4 sm:$0xff]  }
0x147d   :  { %11718 = vmatmul.mubr.f32.vlgmr.msra.gmra.mrb[36].mxu0 %v14512_v8  ;;  %v13805_v63 = vunpack.i.h.bf16 %v13803_v42  ;;  %v13804_v19 = vunpack.i.l.bf16 %v13803_v42  ;;  %v14274_v42 = vld [vmem:[%s15170_s10 + $0x88] ss:$16 sps:$4 sm:$0xff]  }
0x147e   :  { %12820 = vmatpush3.bf16.msra.mxu0 %v12817_v39  ;;  %v12845_v12 = vpack.c.bf16 %v13810_v58, %v13809_v51  ;;  %v14280_v58 = vld [vmem:[%s15170_s10 + $0xa8] ss:$16 sps:$4 sm:$0xff]   ;;  %v14283_v51 = vld [vmem:[%s15185_s16 + $0x240] sm:$0xff]  }
0x147f   :  { %12822 = vmatprep.subr.bf16.mxu0 %v12821_v1  ;;  %v12841_v48 = vpack.c.bf16 %v13805_v63, %v13804_v19  ;;  %v14276_v63 = vld [vmem:[%s15170_s10 + $0x8c] ss:$16 sps:$4 sm:$0xff]   ;;  %v14279_v19 = vld [vmem:[%s15170_s10 + $0xa4] ss:$16 sps:$4 sm:$0xff]  }
0x1480   :  { %3465 = vmatprep.subr.bf16.mxu1 %v14276_v63  ;;  %v14289_v63 = vld [vmem:[%s15185_s16 + $0x2c8] sm:$0xff]  }
0x1482   :  { %12824 = vmatpush3.bf16.msra.mxu0 %v12821_v1  ;;  %v9929_v1 = vld [vmem:[%s15147_s7 + $0x2] ss:$0 sm:$0xff]  ;;  %s14696_s7 = smov 6  }
0x1483   :  { %12826 = vmatprep.subr.bf16.mxu0 %v12825_v32  ;;  %s15748_s25 = sld [smem:[%s17682_s0 + %s14696_s7]]   ;;  %s14713_s7 = smov 11  }
0x1486   :  { %12828 = vmatpush3.bf16.msra.mxu0 %v12825_v32 }
0x1487   :  { %12830 = vmatprep.subr.bf16.mxu0 %v12829_v15 }
0x148a   :  { %12832 = vmatpush3.bf16.msra.mxu0 %v12829_v15 }
0x148b   :  { %12834 = vmatprep.subr.bf16.mxu0 %v12833_v17 }
0x148e   :  { %12836 = vmatpush3.bf16.msra.mxu0 %v12833_v17  ;;  %v14271_v17 = vld [vmem:[%s15170_s10 + $0x80] ss:$16 sps:$4 sm:$0xff]  }
0x148f   :  { %12838 = vmatprep.subr.bf16.mxu0 %v12837_v7 }
0x1492   :  { %12840 = vmatpush3.bf16.msra.mxu0 %v12837_v7  ;;  %v14282_v7 = vld [vmem:[%s15170_s10 + $0xac] ss:$16 sps:$4 sm:$0xff]  }
0x1493   :  { %12842 = vmatprep.subr.bf16.mxu0 %v12841_v48 }
0x1496   :  { %12844 = vmatpush3.bf16.msra.mxu0 %v12841_v48  ;;  %v14285_v48 = vld [vmem:[%s15185_s16 + $0x2c0] sm:$0xff]  }
0x1497   :  { %12846 = vmatprep.subr.bf16.mxu0 %v12845_v12 }
0x149a   :  { %12848 = vmatpush3.bf16.msra.mxu0 %v12845_v12 }
0x1550   :  { %v11719_v9 = vpop.f32.mrb[36].mxu0 }
0x1551   :  { %14513 = vrcp.f32 %v11719_v9  ;;  %v3079_v18 = vpop.f32.mrb[37].mxu0 }
0x1552   :  { %14515 = vrcp.f32 %v3079_v18 }
0x155b   :  { %v14514_v6 = vpop.eup %14513 }
0x155c   :  { %v14516_v21 = vpop.eup %14515  ;;  %v3091_v0 = vmul.f32 %v14514_v6, %v14512_v8 }
0x155d   :  { %v3089_v39 = vmul.f32 %v14516_v21, %v14510_v56 }
0x155f   :  { %11752 = vmatprep.mubr.f32.mxu0 %v3089_v39 }
0x1560   :  { %11753 = vmatmul.mubr.f32.vlgmr.msra.gmra.mrb[38].mxu0 %v3091_v0 }
0x1561   :  { %3454 = vmatprep.mubr.bf16.mxu0 %v17886_v62 }
0x1633   :  { %v11754_v61 = vpop.f32.mrb[38].mxu0 }
0x1634   :  { %v3222_v14 = vpop.f32.mrb[39].mxu0 }
0x1635   :  { %v3231_v34 = vpack.c.bf16 %v11754_v61, %v3222_v14 }
0x1637   :  { %11760 = vmatmul.mubr.msk.bf16.vlgmr.msra.gmra.mrb[32].mxu1 %vm288_vm1, %v3231_v34 }
0x1638   :  { %3497 = vmatprep.mubr.bf16.mxu1 %v17886_v62  ;;  %3466 = vmatpush1.bf16.msra.mxu1 %v14274_v42 }
0x1639   :  { %3467 = vmatprep.subr.bf16.mxu1 %v14282_v7  ;;  %v14290_v7 = vld [vmem:[%s15185_s16 + $0x288] sm:$0xff]  }
0x163c   :  { %3468 = vmatpush1.bf16.msra.mxu1 %v14280_v58  ;;  %v14293_v58 = vld [vmem:[%s15185_s16 + $0x2d0] sm:$0xff]  }
0x163d   :  { %10877 = vmatprep.subr.bf16.mxu1 %v14285_v48  ;;  %v14294_v48 = vld [vmem:[%s15185_s16 + $0x290] sm:$0xff]  }
0x170a   :  { %v3287_v38 = vpop.f32.mrb[32].mxu1 }
0x170b   :  { %v3288_v46 = vadd.f32 %v9929_v1, %v3287_v38  ;;  %v11761_v16 = vpop.f32.mrb[33].mxu1 }
0x170c   :  { %v3290_v56 = vpop.f32.mrb[34].mxu1 }
0x170d   :  { %v3294_v8 = vadd.f32 %v3288_v46, %v15528_v4  ;;  %v3291_v32 = vadd.f32 %v9929_v1, %v3290_v56  ;;  %v11762_v54 = vpop.f32.mrb[35].mxu1 }
0x170f   :  { %v3295_v13 = vadd.f32 %v3291_v32, %v15530_v5  ;;  %v3300_v3 = vsel %vm288_vm1, %v3294_v8, 0.0  ;;  %v3308_v15 = vmul.f32 %v3294_v8, %v3294_v8  ;;  %v14273_v5 = vld [vmem:[%s15170_s10 + $0x84] ss:$16 sps:$4 sm:$0xff]   ;;  %v9935_v32 = vld [vmem:[%s15192_s22 + $0x2] ss:$0 sm:$0xff]  ;;  %s16189_s10 = sld [smem:[%s17682_s0 + %s14702_s18]]   ;;  %s14703_s22 = smov 44  }
0x1710   :  { %3301 = vadd.xlane.f32.xlu0 %v3300_v3  ;;  %3422 = vmatprep.subr.bf16.mxu0 %v14273_v5  ;;  %v14284_v5 = vld [vmem:[%s15185_s16 + $0x200] sm:$0xff]  }
0x1711   :  { %v3303_v10 = vsel %vm288_vm1, %v3295_v13, 0.0  ;;  %v3310_v20 = vsel %vm288_vm1, %v3308_v15, 0.0  ;;  %v3309_v11 = vmul.f32 %v3295_v13, %v3295_v13  ;;  %3423 = vmatpush1.bf16.msra.mxu0 %v14271_v17 }
0x1712   :  { %3304 = vadd.xlane.f32.xlu1 %v3303_v10  ;;  %3424 = vmatprep.subr.bf16.mxu0 %v14279_v19  ;;  %v14288_v19 = vld [vmem:[%s15185_s16 + $0x208] sm:$0xff]  }
0x1713   :  { %v3313_v4 = vsel %vm288_vm1, %v3309_v11, 0.0 }
0x1714   :  { %3311 = vadd.xlane.f32.xlu0 %v3310_v20  ;;  %v9936_v20 = vld [vmem:[%s15197_s26 + $0x2] ss:$0 sm:$0xff]  ;;  %s14704_s26 = smov 43  }
0x1715   :  { %3425 = vmatpush1.bf16.msra.mxu0 %v14277_v53  ;;  %v14291_v53 = vld [vmem:[%s15185_s16 + $0x250] sm:$0xff]   ;;  %s9660_s1 = sld [smem:[%s17682_s0 + %s14704_s26]]   ;;  %s14714_s26 = smov 16  }
0x1716   :  { %10855 = vmatprep.subr.bf16.mxu0 %v14283_v51  ;;  %v14292_v51 = vld [vmem:[%s15185_s16 + $0x210] sm:$0xff]  }
0x1718   :  { %3314 = vadd.xlane.f32.xlu0 %v3313_v4 }
0x179d   :  { %v3302_v12 = vpop.xlane.xlu0 %3301 }
0x179e   :  { %v3306_v40 = vmul.f32 0.03125, %v3302_v12  ;;  %v14295_v12 = vld [vmem:[%s15185_s16 + $0x258] sm:$0xff]  }
0x179f   :  { %v3305_v9 = vpop.xlane.xlu1 %3304 }
0x17a0   :  { %v3318_v6 = vmul.f32 %v3306_v40, %v3306_v40  ;;  %v3307_v21 = vmul.f32 0.03125, %v3305_v9  ;;  %v3322_v46 = vsub.f32 %v3294_v8, %v3306_v40  ;;  %v14286_v8 = vld [vmem:[%s15185_s16 + $0x280] sm:$0xff]   ;;  %v14297_v40 = vld [vmem:[%s15185_s16 + $0x2d8] sm:$0xff]  }
0x17a1   :  { %v3312_v18 = vpop.xlane.xlu0 %3311  ;;  %v14296_v9 = vld [vmem:[%s15185_s16 + $0x218] sm:$0xff]  }
0x17a2   :  { %v3316_v39 = vmul.f32 0.03125, %v3312_v18  ;;  %v3319_v61 = vmul.f32 %v3307_v21, %v3307_v21  ;;  %v3323_v54 = vsub.f32 %v3295_v13, %v3307_v21  ;;  %v14287_v13 = vld [vmem:[%s15185_s16 + $0x248] sm:$0xff]   ;;  %v14298_v18 = vld [vmem:[%s15185_s16 + $0x298] sm:$0xff]   ;;  %v14301_v21 = vld [vmem:[%s15185_s16 + $0x2e0] sm:$0xff]  }
0x17a4   :  { %v3320_v0 = vsub.f32 %v3316_v39, %v3318_v6  ;;  %v14299_v6 = vld [vmem:[%s15185_s16 + $0x260] sm:$0xff]  }
0x17a5   :  { %v3315_v35 = vpop.xlane.xlu0 %3314  ;;  %v14300_v39 = vld [vmem:[%s15185_s16 + $0x220] sm:$0xff]  }
0x17a6   :  { %v3324_v14 = vadd.f32 1e-05, %v3320_v0  ;;  %v3317_v34 = vmul.f32 0.03125, %v3315_v35  ;;  %v14302_v0 = vld [vmem:[%s15185_s16 + $0x2a0] sm:$0xff]   ;;  %v14303_v35 = vld [vmem:[%s15185_s16 + $0x268] sm:$0xff]  }
0x17a8   :  { %14517 = vrsqrt.f32 %v3324_v14  ;;  %v3321_v1 = vsub.f32 %v3317_v34, %v3319_v61  ;;  %v14305_v61 = vld [vmem:[%s15185_s16 + $0x2e8] sm:$0xff]  }
0x17a9   :  { %v14304_v14 = vld [vmem:[%s15185_s16 + $0x228] sm:$0xff]  }
0x17aa   :  { %v3325_v38 = vadd.f32 1e-05, %v3321_v1  ;;  %v14306_v34 = vld [vmem:[%s15185_s16 + $0x2a8] sm:$0xff]   ;;  %v14307_v1 = vld [vmem:[%s15185_s16 + $0x270] sm:$0xff]  }
0x17ac   :  { %14519 = vrsqrt.f32 %v3325_v38  ;;  %v14308_v38 = vld [vmem:[%s15185_s16 + $0x230] sm:$0xff]  }
0x17b2   :  { %v14518_v16 = vpop.eup %14517 }
0x17b3   :  { %v3328_v56 = vmul.f32 %v14518_v16, %v3322_v46  ;;  %v14309_v46 = vld [vmem:[%s15185_s16 + $0x2f0] sm:$0xff]  }
0x17b4   :  { %v14310_v16 = vld [vmem:[%s15185_s16 + $0x2b0] sm:$0xff]  }
0x17b5   :  { %v3336_v10 = vmul.f32 %v9935_v32, %v3328_v56  ;;  %v14311_v56 = vld [vmem:[%s15185_s16 + $0x278] sm:$0xff]  }
0x17b6   :  { %v14520_v3 = vpop.eup %14519 }
0x17b7   :  { %v3329_v15 = vmul.f32 %v14520_v3, %v3323_v54  ;;  %v15701_v4 = vadd.f32 %v9936_v20, %v3336_v10  ;;  %v14312_v54 = vld [vmem:[%s15185_s16 + $0x238] sm:$0xff]   ;;  %v15754_v10 = vld [vmem:[%s15748_s25 + $0x8] sm:$0xff] }
0x17b8   :  { %v14314_v3 = vld [vmem:[%s15185_s16 + $0x2b8] sm:$0xff]   ;;  %4060 = vrot.lane.b32.xlu0 %v15754_v10, %s14679_s14 }
0x17b9   :  { %v3337_v11 = vmul.f32 %v9935_v32, %v3329_v15  ;;  %v14313_v32 = vld [vmem:[%s15185_s16 + $0x2f8] sm:$0xff]   ;;  %v15751_v15 = vld [vmem:[%s15748_s25] sm:$0xff]  ;;  %s9661_s16 = sld [smem:[%s17682_s0 + %s14703_s22]]  }
0x17ba   :  { %4058 = vrot.lane.b32.xlu1 %v15751_v15, %s14679_s14  ;;  %s16556_s22 = sld [smem:[%s17682_s0 + %s14716_s23]]  }
0x17bb   :  { %v15703_v17 = vadd.f32 %v9936_v20, %v3337_v11  ;;  %v15761_v20 = vld [vmem:[%s15748_s25 + $0x10] sm:$0xff]  ;;  %v15764_v11 = vld [vmem:[%s15748_s25 + $0x20] sm:$0xff] }
0x17bc   :  { %4066 = vrot.lane.b32.xlu0 %v15764_v11, %s14679_s14 }
0x17bd   :  { %v3357_v42 = vpack.c.bf16 %v15703_v17, %v15701_v4 }
0x17be   :  { %4062 = vrot.lane.b32.xlu1 %v15761_v20, %s14679_s14 }
0x17bf   :  { %9954 = vmatmul.mubr.msk.bf16.vlgmr.msra.gmra.mrb[40].mxu0 %vm288_vm1, %v3357_v42  ;;  %9955 = vmatmul.mubr.msk.bf16.vlgmr.msra.gmra.mrb[36].mxu1 %vm288_vm1, %v3357_v42  ;;  %v15781_v42 = vld [vmem:[%s15748_s25 + $0x28] sm:$0xff] }
0x17c0   :  { %10856 = vmatpush3.bf16.msra.mxu0 %v14284_v5  ;;  %10878 = vmatpush3.bf16.msra.mxu1 %v14286_v8  ;;  %v15771_v5 = vld [vmem:[%s15748_s25 + $0x18] sm:$0xff]  ;;  %v15774_v8 = vld [vmem:[%s15748_s25 + $0x30] sm:$0xff] }
0x17c1   :  { %10857 = vmatprep.subr.bf16.mxu0 %v14287_v13  ;;  %10879 = vmatprep.subr.bf16.mxu1 %v14289_v63  ;;  %v15784_v13 = vld [vmem:[%s15748_s25 + $0x40] sm:$0xff]  ;;  %v15791_v63 = vld [vmem:[%s15748_s25 + $0x38] sm:$0xff] }
0x17c2   :  { %4064 = vrot.lane.b32.xlu1 %v15771_v5, %s14679_s14  ;;  %4070 = vrot.lane.b32.xlu0 %v15774_v8, %s14679_s14 }
0x17c4   :  { %10858 = vmatpush3.bf16.msra.mxu0 %v14288_v19  ;;  %10880 = vmatpush3.bf16.msra.mxu1 %v14290_v7  ;;  %v15794_v19 = vld [vmem:[%s15748_s25 + $0x50] sm:$0xff]  ;;  %v15801_v7 = vld [vmem:[%s15748_s25 + $0x48] sm:$0xff] }
0x17c5   :  { %10859 = vmatprep.subr.bf16.mxu0 %v14291_v53  ;;  %10881 = vmatprep.subr.bf16.mxu1 %v14293_v58  ;;  %v15804_v53 = vld [vmem:[%s15748_s25 + $0x60] sm:$0xff]  ;;  %v15811_v58 = vld [vmem:[%s15748_s25 + $0x58] sm:$0xff] }
0x17c6   :  { %4068 = vrot.lane.b32.xlu1 %v15781_v42, %s14679_s14  ;;  %4074 = vrot.lane.b32.xlu0 %v15784_v13, %s14679_s14 }
0x17c8   :  { %10860 = vmatpush3.bf16.msra.mxu0 %v14292_v51  ;;  %10882 = vmatpush3.bf16.msra.mxu1 %v14294_v48  ;;  %v15814_v51 = vld [vmem:[%s15748_s25 + $0x70] sm:$0xff]  ;;  %v15821_v48 = vld [vmem:[%s15748_s25 + $0x68] sm:$0xff] }
0x17c9   :  { %10861 = vmatprep.subr.bf16.mxu0 %v14295_v12  ;;  %10883 = vmatprep.subr.bf16.mxu1 %v14297_v40  ;;  %v15826_v12 = vld [vmem:[%s15748_s25 + $0x78] sm:$0xff]  ;;  %v9945_v40 = vld [vmem:[%s15245_s3 + $0x8] sm:$0xf]  ;;  %s14705_s3 = smov 14   ;;  %s16397_s25 = sld [smem:[%s17682_s0 + %s14708_s27]]  }
0x17ca   :  { %4072 = vrot.lane.b32.xlu1 %v15791_v63, %s14679_s14  ;;  %4078 = vrot.lane.b32.xlu0 %v15794_v19, %s14679_s14 }
0x17cc   :  { %10862 = vmatpush3.bf16.msra.mxu0 %v14296_v9  ;;  %10884 = vmatpush3.bf16.msra.mxu1 %v14298_v18  ;;  %v17887_v9 = vld [vmem:[#allocation36_spill] sm:$0xff] }
0x17cd   :  { %10863 = vmatprep.subr.bf16.mxu0 %v14299_v6  ;;  %10885 = vmatprep.subr.bf16.mxu1 %v14301_v21  ;;  %v3362_v18 = vrot.slane %v9945_v40, %v17887_v9  ;;  %v17888_v6 = vld [vmem:[#allocation37_spill] sm:$0xff] }
0x17ce   :  { %4076 = vrot.lane.b32.xlu1 %v15801_v7, %s14679_s14  ;;  %4082 = vrot.lane.b32.xlu0 %v15804_v53, %s14679_s14  ;;  %v3370_v21 = vrot.slane %v9945_v40, %v17888_v6 }
0x17d0   :  { %10864 = vmatpush3.bf16.msra.mxu0 %v14300_v39  ;;  %10886 = vmatpush3.bf16.msra.mxu1 %v14302_v0  ;;  %v17889_v39 = vld [vmem:[#allocation38_spill] sm:$0xff] }
0x17d1   :  { %10865 = vmatprep.subr.bf16.mxu0 %v14303_v35  ;;  %10887 = vmatprep.subr.bf16.mxu1 %v14305_v61  ;;  %v3366_v0 = vrot.slane %v9945_v40, %v17889_v39  ;;  %v17890_v35 = vld [vmem:[#allocation39_spill] sm:$0xff] }
0x17d2   :  { %4080 = vrot.lane.b32.xlu1 %v15811_v58, %s14679_s14  ;;  %4086 = vrot.lane.b32.xlu0 %v15814_v51, %s14679_s14  ;;  %v3374_v61 = vrot.slane %v9945_v40, %v17890_v35 }
0x17d4   :  { %10866 = vmatpush3.bf16.msra.mxu0 %v14304_v14  ;;  %10888 = vmatpush3.bf16.msra.mxu1 %v14306_v34 }
0x17d5   :  { %10867 = vmatprep.subr.bf16.mxu0 %v14307_v1  ;;  %10889 = vmatprep.subr.bf16.mxu1 %v14309_v46 }
0x17d6   :  { %4084 = vrot.lane.b32.xlu1 %v15821_v48, %s14679_s14 }
0x17d8   :  { %10868 = vmatpush3.bf16.msra.mxu0 %v14308_v38  ;;  %10890 = vmatpush3.bf16.msra.mxu1 %v14310_v16 }
0x17d9   :  { %10869 = vmatprep.subr.bf16.mxu0 %v14311_v56  ;;  %10891 = vmatprep.subr.bf16.mxu1 %v14313_v32 }
0x17da   :  { %4088 = vrot.lane.b32.xlu1 %v15826_v12, %s14679_s14  ;;  %s14697_s14 = smov 1  }
0x17db   :  { %s9618_s29 = sld [smem:[%s17682_s0 + %s14697_s14]]   ;;  %s14709_s14 = smov 19  }
0x17dc   :  { %10870 = vmatpush3.bf16.msra.mxu0 %v14312_v54  ;;  %10892 = vmatpush3.bf16.msra.mxu1 %v14314_v3 }
0x17dd   :  { %11763 = vmatprep.subr.bf16.mxu0 %v17863_v2 }
0x1892   :  { %v3456_v14 = vpop.f32.mrb[40].mxu0  ;;  %v3499_v34 = vpop.f32.mrb[36].mxu1 }
0x1893   :  { %v3457_v1 = vadd.f32 %v3456_v14, %v3362_v18  ;;  %v3500_v38 = vadd.f32 %v3499_v34, %v3370_v21  ;;  %v3458_v46 = vpop.f32.mrb[41].mxu0  ;;  %v3501_v16 = vpop.f32.mrb[37].mxu1 }
0x1894   :  { %v3459_v56 = vadd.f32 %v3458_v46, %v3366_v0  ;;  %v3502_v32 = vadd.f32 %v3501_v16, %v3374_v61  ;;  %v3460_v54 = vpop.f32.mrb[42].mxu0  ;;  %v3503_v3 = vpop.f32.mrb[38].mxu1 }
0x1895   :  { %v3461_v62 = vadd.f32 %v3460_v54, %v3362_v18  ;;  %v3504_v57 = vadd.f32 %v3503_v3, %v3370_v21  ;;  %v3462_v60 = vpop.f32.mrb[43].mxu0  ;;  %v3505_v9 = vpop.f32.mrb[39].mxu1  ;;  %v3508_v40 = vmax.f32 %v3457_v1, 0.0  ;;  %v3510_v14 = vmax.f32 %v3500_v38, 0.0 }
0x1896   :  { %v3463_v33 = vadd.f32 %v3462_v60, %v3366_v0  ;;  %v3506_v6 = vadd.f32 %v3505_v9, %v3374_v61  ;;  %v3509_v16 = vmax.f32 %v3459_v56, 0.0  ;;  %v3511_v35 = vmax.f32 %v3502_v32, 0.0  ;;  %v14315_v0 = vld [vmem:[%s15742_s2] sm:$0xff]   ;;  %v14316_v9 = vld [vmem:[%s15742_s2 + $0x8] sm:$0xff]   ;;  %v15856_v61 = vpop.permute.xlu0 %4060 }
0x1897   :  { %v3512_v34 = vmax.f32 %v3461_v62, 0.0  ;;  %v3514_v46 = vmax.f32 %v3504_v57, 0.0  ;;  %v15842_v62 = vld [vmem:[%s9618_s29] sm:$0xff]  ;;  %v15844_v57 = vld [vmem:[%s9618_s29 + $0x8] sm:$0xff]  ;;  %17891 = vst [vmem:[#allocation30_spill] sm:$0xff] %v15856_v61  ;;  %s16402_s29 = sld [smem:[%s17682_s0 + %s14709_s14]]   ;;  %s14717_s14 = smov 21  }
0x1898   :  { %v3513_v39 = vmax.f32 %v3463_v33, 0.0  ;;  %v3515_v18 = vmax.f32 %v3506_v6, 0.0  ;;  %v3979_v33 = vpack.c.bf16 %v15844_v57, %v15842_v62  ;;  %v15850_v6 = vpop.permute.xlu1 %4058 }
0x1899   :  { %v3583_v21 = vpack.c.bf16 %v3512_v34, %v3508_v40  ;;  %v3585_v54 = vpack.c.bf16 %v3514_v46, %v3510_v14  ;;  %v10021_v46 = vld [vmem:[%s15265_s9 + $0x2] ss:$0 sm:$0xff]  ;;  %s16226_s9 = sld [smem:[%s17682_s0 + %s14705_s3]]  }
0x189a   :  { %v3584_v3 = vpack.c.bf16 %v3513_v39, %v3509_v16  ;;  %v3586_v60 = vpack.c.bf16 %v3515_v18, %v3511_v35  ;;  %v15860_v38 = vpop.permute.xlu0 %4066  ;;  %s16536_s3 = sld [smem:[%s17682_s0 + %s14714_s26]]  }
0x189b   :  { %17893 = vst [vmem:[#allocation26_spill] sm:$0xff] %v15860_v38 }
0x189c   :  { %3817 = vmatprep.mubr.bf16.mxu0 %v3584_v3  ;;  %3858 = vmatprep.mubr.bf16.mxu1 %v3586_v60  ;;  %v15852_v39 = vpop.permute.xlu1 %4062 }
0x189d   :  { %3818 = vmatmul.mubr.bf16.vlgmr.msra.gmra.mrb[44].mxu0 %v3583_v21  ;;  %3859 = vmatmul.mubr.bf16.vlgmr.msra.gmra.mrb[40].mxu1 %v3585_v54 }
0x189e   :  { %11764 = vmatpush3.bf16.msra.mxu0 %v14315_v0  ;;  %11767 = vmatprep.mubr.msk.bf16.mxu0 %vm14677_vm0, %v17863_v2  ;;  %v15864_v32 = vpop.permute.xlu0 %4070 }
0x189f   :  { %11765 = vmatprep.subr.bf16.mxu0 %v17863_v2  ;;  %17895 = vst [vmem:[#allocation34_spill] sm:$0xff] %v15864_v32 }
0x18a0   :  { %v15854_v35 = vpop.permute.xlu1 %4064 }
0x18a2   :  { %11766 = vmatpush3.bf16.msra.mxu0 %v14316_v9 }
0x18a4   :  { %v15858_v1 = vpop.permute.xlu1 %4068 }
0x18a5   :  { %11768 = vmatmul.mubr.msk.bf16.vlgmr.msra.gmra.mrb[48].mxu0 %vm288_vm1, %v3979_v33  ;;  %17892 = vst [vmem:[#allocation31_spill] sm:$0xff] %v15858_v1  ;;  %v15874_v33 = vpop.permute.xlu0 %4074 }
0x18a6   :  { %17897 = vst [vmem:[#allocation28_spill] sm:$0xff] %v15874_v33 }
0x18a8   :  { %v15862_v56 = vpop.permute.xlu1 %4072 }
0x18a9   :  { %17894 = vst [vmem:[#allocation27_spill] sm:$0xff] %v15862_v56 }
0x18ac   :  { %v15871_v40 = vpop.permute.xlu1 %4076 }
0x18ad   :  { %17896 = vst [vmem:[#allocation35_spill] sm:$0xff] %v15871_v40 }
0x18b0   :  { %v15881_v26 = vpop.permute.xlu1 %4080 }
0x18b1   :  { %17898 = vst [vmem:[#allocation29_spill] sm:$0xff] %v15881_v26 }
0x1970   :  { %v10871_v14 = vpop.f32.mrb[44].mxu0  ;;  %v10893_v34 = vpop.f32.mrb[40].mxu1 }
0x1971   :  { %v10872_v16 = vpop.f32.mrb[45].mxu0  ;;  %v10894_v18 = vpop.f32.mrb[41].mxu1 }
0x1972   :  { %v10873_v21 = vadd.f32 %v10872_v16, %v10871_v14  ;;  %v10895_v54 = vadd.f32 %v10894_v18, %v10893_v34  ;;  %v10874_v3 = vpop.f32.mrb[46].mxu0  ;;  %v10896_v60 = vpop.f32.mrb[42].mxu1 }
0x1973   :  { %v10875_v0 = vpop.f32.mrb[47].mxu0  ;;  %v10897_v9 = vpop.f32.mrb[43].mxu1 }
0x1974   :  { %v3820_v37 = vadd.f32 %v10873_v21, %v10021_v46  ;;  %v10876_v45 = vadd.f32 %v10875_v0, %v10874_v3  ;;  %v10898_v50 = vadd.f32 %v10897_v9, %v10896_v60  ;;  %v15885_v16 = vpop.permute.xlu0 %4078 }
0x1975   :  { %17899 = vst [vmem:[#allocation32_spill] sm:$0xff] %v15885_v16 }
0x1976   :  { %v15876_v28 = vadd.f32 %v10895_v54, %v3820_v37  ;;  %v3823_v29 = vadd.f32 %v10876_v45, %v10021_v46 }
0x1978   :  { %v15879_v31 = vadd.f32 %v10898_v50, %v3823_v29  ;;  %v4035_v27 = vpop.f32.mrb[48].mxu0  ;;  %v15899_v50 = vpop.permute.xlu1 %4084 }
0x1979   :  { %v15883_v14 = vadd.f32 %v10060_v30, %v4035_v27  ;;  %v11769_v34 = vpop.f32.mrb[49].mxu0  ;;  %17900 = vst [vmem:[#allocation33_spill] sm:$0xff] %v15899_v50  ;;  %v15905_v60 = vpop.permute.xlu0 %4082 }
0x197a   :  { %v4038_v18 = vpop.f32.mrb[50].mxu0  ;;  %17901 = vst [vmem:[#allocation40_spill] sm:$0xff] %v15905_v60 }
0x197b   :  { %v15887_v24 = vadd.f32 %v10060_v30, %v4038_v18  ;;  %v11770_v21 = vpop.f32.mrb[51].mxu0  ;;  %11803 = vmatprep.mubr.msk.f32.mxu1 %vm288_vm1, %v15883_v14  ;;  %v4106_v37 = vmul.f32 %v15850_v6, %v15883_v14  ;;  %v4108_v27 = vmul.f32 %v15852_v39, %v15883_v14  ;;  %v4110_v0 = vmul.f32 %v15860_v38, %v15883_v14 }
0x197c   :  { %v4112_v9 = vmul.f32 %v15864_v32, %v15883_v14 }
0x197d   :  { %v4107_v29 = vmul.f32 %v15856_v61, %v15887_v24  ;;  %v4109_v45 = vmul.f32 %v15854_v35, %v15887_v24  ;;  %v4111_v54 = vmul.f32 %v15858_v1, %v15887_v24  ;;  %v4113_v3 = vmul.f32 %v15862_v56, %v15887_v24 }
0x197e   :  { %v4115_v21 = vmul.f32 %v15871_v40, %v15887_v24 }
0x197f   :  { %v13811_v30 = vpack.i.bf16 %v4107_v29, %v4106_v37  ;;  %v13816_v46 = vpack.i.bf16 %v4109_v45, %v4108_v27  ;;  %v13821_v34 = vpack.i.bf16 %v4111_v54, %v4110_v0  ;;  %v13826_v18 = vpack.i.bf16 %v4113_v3, %v4112_v9  ;;  %v15917_v29 = vpop.permute.xlu1 %4088 }
0x1980   :  { %v4117_v37 = vmul.f32 %v15881_v26, %v15887_v24  ;;  %17902 = vst [vmem:[#allocation41_spill] sm:$0xff] %v15917_v29  ;;  %v4114_v27 = vmul.f32 %v15874_v33, %v15883_v14  ;;  %v4116_v45 = vmul.f32 %v15885_v16, %v15883_v14  ;;  %v4119_v0 = vmul.f32 %v15899_v50, %v15887_v24 }
0x1981   :  { %13812 = vrot.lane.b32.xlu0 %v13811_v30, %s14681_s19  ;;  %13817 = vrot.lane.b32.xlu1 %v13816_v46, %s14681_s19  ;;  %v15925_v30 = vpop.permute.xlu0 %4086  ;;  %v4121_v46 = vmul.f32 %v15917_v29, %v15887_v24 }
0x1982   :  { %17903 = vst [vmem:[#allocation42_spill] sm:$0xff] %v15925_v30  ;;  %v13831_v54 = vpack.i.bf16 %v4115_v21, %v4114_v27  ;;  %v13836_v3 = vpack.i.bf16 %v4117_v37, %v4116_v45  ;;  %v4120_v9 = vmul.f32 %v15925_v30, %v15883_v14 }
0x1984   :  { %v13846_v16 = vpack.i.bf16 %v4121_v46, %v4120_v9 }
0x1985   :  { %13822 = vrot.lane.b32.xlu0 %v13821_v34, %s14681_s19  ;;  %13827 = vrot.lane.b32.xlu1 %v13826_v18, %s14681_s19  ;;  %v4118_v34 = vmul.f32 %v15905_v60, %v15883_v14 }
0x1987   :  { %v13841_v18 = vpack.i.bf16 %v4119_v0, %v4118_v34 }
0x1989   :  { %13832 = vrot.lane.b32.xlu0 %v13831_v54, %s14681_s19  ;;  %13837 = vrot.lane.b32.xlu1 %v13836_v3, %s14681_s19 }
0x198d   :  { %13842 = vrot.lane.b32.xlu0 %v13841_v18, %s14681_s19  ;;  %13847 = vrot.lane.b32.xlu1 %v13846_v16, %s14681_s19 }
0x19f3   :  { %v13813_v21 = vpop.permute.xlu0 %13812  ;;  %v13818_v37 = vpop.permute.xlu1 %13817 }
0x19f4   :  { %v13815_v27 = vunpack.i.h.bf16 %v13813_v21  ;;  %v13814_v45 = vunpack.i.l.bf16 %v13813_v21  ;;  %v13820_v29 = vunpack.i.h.bf16 %v13818_v37  ;;  %v13819_v26 = vunpack.i.l.bf16 %v13818_v37 }
0x19f6   :  { %v12849_v30 = vpack.c.bf16 %v13815_v27, %v13814_v45  ;;  %v12855_v32 = vpack.c.bf16 %v13820_v29, %v13819_v26 }
0x19f7   :  { %v13823_v54 = vpop.permute.xlu0 %13822  ;;  %v13828_v0 = vpop.permute.xlu1 %13827 }
0x19f8   :  { %12851 = vmatprep.subr.msk.bf16.mxu1 %vm14922_vm2, %v12849_v30  ;;  %v13825_v46 = vunpack.i.h.bf16 %v13823_v54  ;;  %v13824_v16 = vunpack.i.l.bf16 %v13823_v54  ;;  %v13830_v26 = vunpack.i.h.bf16 %v13828_v0  ;;  %v13829_v29 = vunpack.i.l.bf16 %v13828_v0 }
0x19f9   :  { %12854 = vmatpush3.bf16.xpose.msk.msra.mxu1 %vm14922_vm2, %v12849_v30 }
0x19fa   :  { %12857 = vmatprep.subr.msk.bf16.mxu1 %vm14922_vm2, %v12855_v32  ;;  %v12861_v3 = vpack.c.bf16 %v13825_v46, %v13824_v16  ;;  %v12867_v9 = vpack.c.bf16 %v13830_v26, %v13829_v29 }
0x19fb   :  { %v13833_v34 = vpop.permute.xlu0 %13832  ;;  %v13838_v37 = vpop.permute.xlu1 %13837 }
0x19fc   :  { %v13835_v30 = vunpack.i.h.bf16 %v13833_v34  ;;  %v13834_v18 = vunpack.i.l.bf16 %v13833_v34  ;;  %v13839_v27 = vunpack.i.l.bf16 %v13838_v37  ;;  %v241_v34 = vld [vmem:[%s15979_s11] sm:$0xff] }
0x19fe   :  { %v12873_v21 = vpack.c.bf16 %v13835_v30, %v13834_v18  ;;  %v242_v30 = vld [vmem:[%s15979_s11 + $0x8] sm:$0xff]  ;;  %v243_v18 = vld [vmem:[%s15979_s11 + $0x10] sm:$0xff] }
0x19ff   :  { %v13843_v54 = vpop.permute.xlu0 %13842  ;;  %v13848_v0 = vpop.permute.xlu1 %13847 }
0x1a00   :  { %v13845_v46 = vunpack.i.h.bf16 %v13843_v54  ;;  %v13844_v16 = vunpack.i.l.bf16 %v13843_v54  ;;  %v13850_v26 = vunpack.i.h.bf16 %v13848_v0  ;;  %v13849_v29 = vunpack.i.l.bf16 %v13848_v0  ;;  %v190_v0 = vld [vmem:[%s16008_s21 + $0x8] sm:$0xff] }
0x1a01   :  { %12860 = vmatpush3.bf16.xpose.msk.msra.mxu1 %vm14922_vm2, %v12855_v32  ;;  %v13840_v32 = vunpack.i.h.bf16 %v13838_v37  ;;  %v244_v37 = vld [vmem:[%s15979_s11 + $0x18] sm:$0xff] }
0x1a02   :  { %12863 = vmatprep.subr.msk.bf16.mxu1 %vm14922_vm2, %v12861_v3 }
0x1a03   :  { %v12879_v45 = vpack.c.bf16 %v13840_v32, %v13839_v27  ;;  %v15987_v32 = vpack.c.bf16 %v244_v37, %v243_v18  ;;  %v245_v27 = vld [vmem:[%s15979_s11 + $0x20] sm:$0xff]  ;;  %v250_v37 = vld [vmem:[%s15979_s11 + $0x48] sm:$0xff] }
0x1a04   :  { %v249_v18 = vld [vmem:[%s15979_s11 + $0x40] sm:$0xff] }
0x1a09   :  { %12866 = vmatpush3.bf16.xpose.msk.msra.mxu1 %vm14922_vm2, %v12861_v3  ;;  %v12885_v3 = vpack.c.bf16 %v13845_v46, %v13844_v16  ;;  %v247_v46 = vld [vmem:[%s15979_s11 + $0x30] sm:$0xff]  ;;  %v248_v16 = vld [vmem:[%s15979_s11 + $0x38] sm:$0xff] }
0x1a0a   :  { %12869 = vmatprep.subr.msk.bf16.mxu1 %vm14922_vm2, %v12867_v9 }
0x1a11   :  { %12872 = vmatpush3.bf16.xpose.msk.msra.mxu1 %vm14922_vm2, %v12867_v9  ;;  %v12891_v9 = vpack.c.bf16 %v13850_v26, %v13849_v29  ;;  %v189_v26 = vld [vmem:[%s16008_s21] sm:$0xff] }
0x1a12   :  { %12875 = vmatprep.subr.msk.bf16.mxu1 %vm14922_vm2, %v12873_v21 }
0x1a19   :  { %12878 = vmatpush3.bf16.xpose.msk.msra.mxu1 %vm14922_vm2, %v12873_v21  ;;  %v15984_v21 = vpack.c.bf16 %v242_v30, %v241_v34 }
0x1a1a   :  { %12881 = vmatprep.subr.msk.bf16.mxu1 %vm14922_vm2, %v12879_v45 }
0x1a1b   :  { %12898 = vmatprep.subr.bf16.mxu0 %v15984_v21 }
0x1a1c   :  { %12900 = vmatpush3.bf16.msra.mxu0 %v15984_v21 }
0x1a1d   :  { %12902 = vmatprep.subr.bf16.mxu0 %v15987_v32 }
0x1a20   :  { %12904 = vmatpush3.bf16.msra.mxu0 %v15987_v32 }
0x1a21   :  { %12884 = vmatpush3.bf16.xpose.msk.msra.mxu1 %vm14922_vm2, %v12879_v45  ;;  %v246_v45 = vld [vmem:[%s15979_s11 + $0x28] sm:$0xff] }
0x1a22   :  { %12887 = vmatprep.subr.msk.bf16.mxu1 %vm14922_vm2, %v12885_v3  ;;  %v15994_v54 = vpack.c.bf16 %v246_v45, %v245_v27  ;;  %v251_v27 = vld [vmem:[%s15979_s11 + $0x50] sm:$0xff]  ;;  %v16017_v45 = vpack.c.bf16 %v250_v37, %v249_v18 }
0x1a24   :  { %12906 = vmatprep.subr.bf16.mxu0 %v15994_v54 }
0x1a25   :  { %12908 = vmatpush3.bf16.msra.mxu0 %v15994_v54 }
0x1a29   :  { %12890 = vmatpush3.bf16.xpose.msk.msra.mxu1 %vm14922_vm2, %v12885_v3  ;;  %v16000_v3 = vpack.c.bf16 %v248_v16, %v247_v46  ;;  %v252_v46 = vld [vmem:[%s15979_s11 + $0x58] sm:$0xff] }
0x1a2a   :  { %12893 = vmatprep.subr.msk.bf16.mxu1 %vm14922_vm2, %v12891_v9  ;;  %v16022_v16 = vpack.c.bf16 %v252_v46, %v251_v27 }
0x1a2b   :  { %12910 = vmatprep.subr.bf16.mxu0 %v16000_v3 }
0x1a2c   :  { %12912 = vmatpush3.bf16.msra.mxu0 %v16000_v3 }
0x1a2d   :  { %12914 = vmatprep.subr.bf16.mxu0 %v16017_v45 }
0x1a30   :  { %12916 = vmatpush3.bf16.msra.mxu0 %v16017_v45 }
0x1a31   :  { %12896 = vmatpush3.bf16.xpose.msk.msra.mxu1 %vm14922_vm2, %v12891_v9  ;;  %12918 = vmatprep.subr.bf16.mxu0 %v16022_v16 }
0x1a32   :  { %11876 = vmatprep.subr.bf16.mxu1 %v17863_v2 }
0x1a34   :  { %12920 = vmatpush3.bf16.msra.mxu0 %v16022_v16 }
0x1a38   :  { %11804 = vmatmul.mubr.msk.f32.vlgmr.msra.gmra.mrb[30].mxu1 %vm288_vm1, %v15887_v24 }
0x1a39   :  { %11880 = vmatprep.mubr.msk.bf16.mxu1 %vm14677_vm0, %v17863_v2 }
0x1b0b   :  { %v11805_v29 = vpop.f32.mrb[30].mxu1 }
0x1b0c   :  { %v4344_v9 = vadd.f32 %v11805_v29, %v190_v0  ;;  %v4338_v34 = vpop.f32.mrb[31].mxu1  ;;  %v254_v0 = vld [vmem:[%s15979_s11 + $0x68] sm:$0xff]  ;;  %v256_v29 = vld [vmem:[%s15979_s11 + $0x78] sm:$0xff] }
0x1b0d   :  { %v4339_v30 = vadd.f32 %v4338_v34, %v189_v26 }
0x1b0e   :  { %4349 = vmax.xlane.f32.xlu1 %v4344_v9 }
0x1b0f   :  { %4347 = vmax.xlane.f32.xlu0 %v4339_v30 }
0x1b1f   :  { %4124 = vrot.lane.b32.xlu1 %v15754_v10, %s17804_s28  ;;  %v253_v10 = vld [vmem:[%s15979_s11 + $0x60] sm:$0xff] }
0x1b20   :  { %v16031_v26 = vpack.c.bf16 %v254_v0, %v253_v10 }
0x1b22   :  { %12922 = vmatprep.subr.bf16.mxu0 %v16031_v26 }
0x1b23   :  { %4128 = vrot.lane.b32.xlu1 %v15771_v5, %s17804_s28  ;;  %v255_v5 = vld [vmem:[%s15979_s11 + $0x70] sm:$0xff]  ;;  %12924 = vmatpush3.bf16.msra.mxu0 %v16031_v26  ;;  %s14706_s11 = smov 25  }
0x1b24   :  { %s16234_s20 = sld [smem:[%s17682_s0 + %s14706_s11]]  }
0x1b25   :  { %4122 = vrot.lane.b32.xlu0 %v15751_v15, %s17804_s28  ;;  %v16041_v15 = vpack.c.bf16 %v256_v29, %v255_v5 }
0x1b27   :  { %4132 = vrot.lane.b32.xlu1 %v15781_v42, %s17804_s28  ;;  %12926 = vmatprep.subr.bf16.mxu0 %v16041_v15 }
0x1b28   :  { %12928 = vmatpush3.bf16.msra.mxu0 %v16041_v15 }
0x1b29   :  { %4126 = vrot.lane.b32.xlu0 %v15761_v20, %s17804_s28 }
0x1b2b   :  { %4136 = vrot.lane.b32.xlu1 %v15791_v63, %s17804_s28 }
0x1b2d   :  { %4130 = vrot.lane.b32.xlu0 %v15764_v11, %s17804_s28 }
0x1b2f   :  { %4140 = vrot.lane.b32.xlu1 %v15801_v7, %s17804_s28 }
0x1b31   :  { %4134 = vrot.lane.b32.xlu0 %v15774_v8, %s17804_s28 }
0x1b33   :  { %4144 = vrot.lane.b32.xlu1 %v15811_v58, %s17804_s28 }
0x1b35   :  { %4138 = vrot.lane.b32.xlu0 %v15784_v13, %s17804_s28 }
0x1b37   :  { %4148 = vrot.lane.b32.xlu1 %v15821_v48, %s17804_s28 }
0x1b39   :  { %4142 = vrot.lane.b32.xlu0 %v15794_v19, %s17804_s28 }
0x1b3b   :  { %4152 = vrot.lane.b32.xlu1 %v15826_v12, %s17804_s28 }
0x1b3d   :  { %4146 = vrot.lane.b32.xlu0 %v15804_v53, %s17804_s28 }
0x1b41   :  { %4150 = vrot.lane.b32.xlu0 %v15814_v51, %s17804_s28 }
0x1b9b   :  { %v4350_v20 = vpop.xlane.xlu1 %4349 }
0x1b9c   :  { %v4352_v11 = vsub.f32 %v4344_v9, %v4350_v20  ;;  %v4348_v8 = vpop.xlane.xlu0 %4347 }
0x1b9d   :  { %v4351_v42 = vsub.f32 %v4339_v30, %v4348_v8 }
0x1b9e   :  { %v4355_v13 = vmul.f32 1.442695, %v4352_v11 }
0x1b9f   :  { %v4353_v63 = vmul.f32 1.442695, %v4351_v42  ;;  %v16068_v7 = vpop.permute.xlu1 %4124 }
0x1ba0   :  { %17904 = vst [vmem:[#allocation43_spill] sm:$0xff] %v16068_v7  ;;  %v4171_v19 = vmul.f32 %v16068_v7, %v15887_v24  ;;  %v16072_v58 = vpop.permute.xlu0 %4122 }
0x1ba1   :  { %17905 = vst [vmem:[#allocation44_spill] sm:$0xff] %v16072_v58  ;;  %14521 = vpow2.f32 %v4353_v63  ;;  %v4170_v53 = vmul.f32 %v16072_v58, %v15883_v14 }
0x1ba2   :  { %14523 = vpow2.f32 %v4355_v13 }
0x1ba3   :  { %v16076_v48 = vpop.permute.xlu1 %4128  ;;  %v13851_v51 = vpack.i.bf16 %v4171_v19, %v4170_v53 }
0x1ba4   :  { %17906 = vst [vmem:[#allocation45_spill] sm:$0xff] %v16076_v48  ;;  %v4173_v12 = vmul.f32 %v16076_v48, %v15887_v24  ;;  %v16080_v9 = vpop.permute.xlu0 %4126 }
0x1ba5   :  { %17907 = vst [vmem:[#allocation46_spill] sm:$0xff] %v16080_v9  ;;  %v4172_v34 = vmul.f32 %v16080_v9, %v15883_v14  ;;  %13852 = vrot.lane.b32.xlu0 %v13851_v51, %s17804_s28 }
0x1ba7   :  { %v16085_v30 = vpop.permute.xlu1 %4132  ;;  %v13856_v18 = vpack.i.bf16 %v4173_v12, %v4172_v34 }
0x1ba8   :  { %17908 = vst [vmem:[#allocation47_spill] sm:$0xff] %v16085_v30  ;;  %v4175_v37 = vmul.f32 %v16085_v30, %v15887_v24  ;;  %v16089_v27 = vpop.permute.xlu0 %4130 }
0x1ba9   :  { %17909 = vst [vmem:[#allocation48_spill] sm:$0xff] %v16089_v27  ;;  %v4174_v46 = vmul.f32 %v16089_v27, %v15883_v14  ;;  %13857 = vrot.lane.b32.xlu1 %v13856_v18, %s17804_s28 }
0x1bab   :  { %v16094_v10 = vpop.eup %14521  ;;  %v16096_v0 = vpop.permute.xlu1 %4136  ;;  %v13861_v5 = vpack.i.bf16 %v4175_v37, %v4174_v46 }
0x1bac   :  { %17910 = vst [vmem:[#allocation49_spill] sm:$0xff] %v16096_v0  ;;  %v16098_v29 = vpop.eup %14523  ;;  %v4177_v20 = vmul.f32 %v16096_v0, %v15887_v24  ;;  %11838 = vmatprep.mubr.f32.mxu0 %v16094_v10  ;;  %v16103_v11 = vpop.permute.xlu0 %4134 }
0x1bad   :  { %17911 = vst [vmem:[#allocation50_spill] sm:$0xff] %v16103_v11  ;;  %v4176_v8 = vmul.f32 %v16103_v11, %v15883_v14  ;;  %11839 = vmatmul.mubr.f32.vlgmr.msra.gmra.mrb[52].mxu0 %v16098_v29  ;;  %13862 = vrot.lane.b32.xlu0 %v13861_v5, %s17804_s28 }
0x1baf   :  { %v16109_v42 = vpop.permute.xlu1 %4140  ;;  %v13866_v13 = vpack.i.bf16 %v4177_v20, %v4176_v8 }
0x1bb0   :  { %17912 = vst [vmem:[#allocation51_spill] sm:$0xff] %v16109_v42  ;;  %v4179_v63 = vmul.f32 %v16109_v42, %v15887_v24  ;;  %v16113_v19 = vpop.permute.xlu0 %4138 }
0x1bb1   :  { %17913 = vst [vmem:[#allocation52_spill] sm:$0xff] %v16113_v19  ;;  %v4178_v53 = vmul.f32 %v16113_v19, %v15883_v14  ;;  %13867 = vrot.lane.b32.xlu1 %v13866_v13, %s17804_s28 }
0x1bb3   :  { %v16118_v51 = vpop.permute.xlu1 %4144  ;;  %v13871_v12 = vpack.i.bf16 %v4179_v63, %v4178_v53 }
0x1bb4   :  { %17914 = vst [vmem:[#allocation53_spill] sm:$0xff] %v16118_v51  ;;  %v4181_v34 = vmul.f32 %v16118_v51, %v15887_v24  ;;  %v16122_v18 = vpop.permute.xlu0 %4142 }
0x1bb5   :  { %17915 = vst [vmem:[#allocation54_spill] sm:$0xff] %v16122_v18  ;;  %v4180_v37 = vmul.f32 %v16122_v18, %v15883_v14  ;;  %13872 = vrot.lane.b32.xlu0 %v13871_v12, %s17804_s28  ;;  %v10057_v18 = vld [vmem:[%s15286_s24 + $0x2] ss:$0 sm:$0xff]  ;;  %s14719_s24 = smov 17  }
0x1bb6   :  { %s16619_s26 = sld [smem:[%s17682_s0 + %s14719_s24]]   ;;  %s14721_s24 = smov 23  }
0x1bb7   :  { %v16127_v46 = vpop.permute.xlu1 %4148  ;;  %v13876_v5 = vpack.i.bf16 %v4181_v34, %v4180_v37 }
0x1bb8   :  { %17916 = vst [vmem:[#allocation55_spill] sm:$0xff] %v16127_v46  ;;  %v4183_v20 = vmul.f32 %v16127_v46, %v15887_v24  ;;  %v16131_v8 = vpop.permute.xlu0 %4146 }
0x1bb9   :  { %17917 = vst [vmem:[#allocation56_spill] sm:$0xff] %v16131_v8  ;;  %v4182_v13 = vmul.f32 %v16131_v8, %v15883_v14  ;;  %13877 = vrot.lane.b32.xlu1 %v13876_v5, %s17804_s28  ;;  %v16148_v8 = vadd.f32 %v15876_v28, %v15701_v4  ;;  %v16152_v5 = vadd.f32 %v15879_v31, %v15703_v17 }
0x1bbb   :  { %v16136_v63 = vpop.permute.xlu1 %4152  ;;  %v13881_v53 = vpack.i.bf16 %v4183_v20, %v4182_v13  ;;  %v3881_v20 = vmul.f32 %v16148_v8, %v16148_v8  ;;  %v3876_v31 = vsel %vm288_vm1, %v16152_v5, 0.0 }
0x1bbc   :  { %17918 = vst [vmem:[#allocation57_spill] sm:$0xff] %v16136_v63  ;;  %v4185_v19 = vmul.f32 %v16136_v63, %v15887_v24  ;;  %v16140_v12 = vpop.permute.xlu0 %4150  ;;  %v3873_v24 = vsel %vm288_vm1, %v16148_v8, 0.0 }
0x1bbd   :  { %17919 = vst [vmem:[#allocation58_spill] sm:$0xff] %v16140_v12  ;;  %v4184_v34 = vmul.f32 %v16140_v12, %v15883_v14  ;;  %13882 = vrot.lane.b32.xlu0 %v13881_v53, %s17804_s28  ;;  %v3883_v14 = vsel %vm288_vm1, %v3881_v20, 0.0 }
0x1bbf   :  { %v13886_v37 = vpack.i.bf16 %v4185_v19, %v4184_v34  ;;  %v3882_v19 = vmul.f32 %v16152_v5, %v16152_v5 }
0x1bc1   :  { %13887 = vrot.lane.b32.xlu1 %v13886_v37, %s17804_s28  ;;  %v3886_v28 = vsel %vm288_vm1, %v3882_v19, 0.0  ;;  %s16640_s28 = sld [smem:[%s17682_s0 + %s14721_s24]]  }
0x1bdc   :  { %3874 = vadd.xlane.f32.xlu0 %v3873_v24 }
0x1be0   :  { %3884 = vadd.xlane.f32.xlu0 %v3883_v14 }
0x1be4   :  { %3887 = vadd.xlane.f32.xlu0 %v3886_v28 }
0x1be5   :  { %3877 = vadd.xlane.f32.xlu1 %v3876_v31 }
0x1c17   :  { %v13853_v4 = vpop.permute.xlu0 %13852 }
0x1c18   :  { %v13855_v17 = vunpack.i.h.bf16 %v13853_v4  ;;  %v13854_v13 = vunpack.i.l.bf16 %v13853_v4 }
0x1c1a   :  { %v12929_v53 = vpack.c.bf16 %v13855_v17, %v13854_v13 }
0x1c1b   :  { %v13858_v34 = vpop.permute.xlu1 %13857 }
0x1c1c   :  { %v13860_v37 = vunpack.i.h.bf16 %v13858_v34  ;;  %v13859_v24 = vunpack.i.l.bf16 %v13858_v34  ;;  %12930 = vmatprep.subr.bf16.mxu0 %v12929_v53 }
0x1c1d   :  { %12932 = vmatpush3.bf16.msra.mxu0 %v12929_v53 }
0x1c1e   :  { %v12933_v20 = vpack.c.bf16 %v13860_v37, %v13859_v24 }
0x1c1f   :  { %v13863_v46 = vpop.permute.xlu0 %13862 }
0x1c20   :  { %v13865_v42 = vunpack.i.h.bf16 %v13863_v46  ;;  %v13864_v14 = vunpack.i.l.bf16 %v13863_v46  ;;  %12934 = vmatprep.subr.bf16.mxu0 %v12933_v20 }
0x1c21   :  { %12936 = vmatpush3.bf16.msra.mxu0 %v12933_v20 }
0x1c22   :  { %v12937_v19 = vpack.c.bf16 %v13865_v42, %v13864_v14 }
0x1c23   :  { %v13868_v28 = vpop.permute.xlu1 %13867 }
0x1c24   :  { %v13870_v12 = vunpack.i.h.bf16 %v13868_v28  ;;  %v13869_v63 = vunpack.i.l.bf16 %v13868_v28  ;;  %12938 = vmatprep.subr.bf16.mxu0 %v12937_v19 }
0x1c25   :  { %12940 = vmatpush3.bf16.msra.mxu0 %v12937_v19 }
0x1c26   :  { %v12941_v31 = vpack.c.bf16 %v13870_v12, %v13869_v63 }
0x1c27   :  { %v13873_v4 = vpop.permute.xlu0 %13872 }
0x1c28   :  { %v13875_v17 = vunpack.i.h.bf16 %v13873_v4  ;;  %v13874_v13 = vunpack.i.l.bf16 %v13873_v4  ;;  %12942 = vmatprep.subr.bf16.mxu0 %v12941_v31 }
0x1c29   :  { %12944 = vmatpush3.bf16.msra.mxu0 %v12941_v31 }
0x1c2a   :  { %v12945_v34 = vpack.c.bf16 %v13875_v17, %v13874_v13 }
0x1c2b   :  { %v13878_v53 = vpop.permute.xlu1 %13877 }
0x1c2c   :  { %v13880_v37 = vunpack.i.h.bf16 %v13878_v53  ;;  %v13879_v24 = vunpack.i.l.bf16 %v13878_v53  ;;  %12946 = vmatprep.subr.bf16.mxu0 %v12945_v34 }
0x1c2d   :  { %12948 = vmatpush3.bf16.msra.mxu0 %v12945_v34 }
0x1c2e   :  { %v12949_v46 = vpack.c.bf16 %v13880_v37, %v13879_v24 }
0x1c2f   :  { %v13883_v20 = vpop.permute.xlu0 %13882 }
0x1c30   :  { %v13885_v42 = vunpack.i.h.bf16 %v13883_v20  ;;  %v13884_v14 = vunpack.i.l.bf16 %v13883_v20  ;;  %12950 = vmatprep.subr.bf16.mxu0 %v12949_v46 }
0x1c31   :  { %12952 = vmatpush3.bf16.msra.mxu0 %v12949_v46 }
0x1c32   :  { %v12953_v28 = vpack.c.bf16 %v13885_v42, %v13884_v14 }
0x1c33   :  { %v13888_v19 = vpop.permute.xlu1 %13887 }
0x1c34   :  { %v13890_v63 = vunpack.i.h.bf16 %v13888_v19  ;;  %v13889_v12 = vunpack.i.l.bf16 %v13888_v19  ;;  %12954 = vmatprep.subr.bf16.mxu0 %v12953_v28 }
0x1c35   :  { %12956 = vmatpush3.bf16.msra.mxu0 %v12953_v28 }
0x1c36   :  { %v12957_v4 = vpack.c.bf16 %v13890_v63, %v13889_v12 }
0x1c38   :  { %12958 = vmatprep.subr.bf16.mxu0 %v12957_v4 }
0x1c39   :  { %12960 = vmatpush3.bf16.msra.mxu0 %v12957_v4 }
0x1c3a   :  { %11884 = vmatprep.subr.bf16.mxu0 %v17863_v2 }
0x1c69   :  { %v3875_v31 = vpop.xlane.xlu0 %3874 }
0x1c6a   :  { %v3879_v17 = vmul.f32 0.03125, %v3875_v31  ;;  %v10056_v31 = vld [vmem:[%s15281_s17 + $0x2] ss:$0 sm:$0xff]  ;;  %s14701_s17 = smov 26  }
0x1c6b   :  { %s16180_s6 = sld [smem:[%s17682_s0 + %s14701_s17]]   ;;  %s14707_s17 = smov 9  }
0x1c6c   :  { %v3891_v34 = vmul.f32 %v3879_v17, %v3879_v17  ;;  %v3895_v12 = vsub.f32 %v16148_v8, %v3879_v17  ;;  %s16240_s18 = sld [smem:[%s17682_s0 + %s14707_s17]]   ;;  %s14712_s17 = smov 12  }
0x1c6d   :  { %v3885_v13 = vpop.xlane.xlu0 %3884  ;;  %s16513_s27 = sld [smem:[%s17682_s0 + %s14712_s17]]  }
0x1c6e   :  { %v3889_v53 = vmul.f32 0.03125, %v3885_v13  ;;  %s16545_s17 = sld [smem:[%s17682_s0 + %s14715_s8]]   ;;  %s14718_s8 = smov 15  }
0x1c6f   :  { %s16607_s23 = sld [smem:[%s17682_s0 + %s14718_s8]]  }
0x1c70   :  { %v3893_v37 = vsub.f32 %v3889_v53, %v3891_v34 }
0x1c71   :  { %v3888_v46 = vpop.xlane.xlu0 %3887 }
0x1c72   :  { %v3897_v24 = vadd.f32 1e-05, %v3893_v37  ;;  %v3878_v20 = vpop.xlane.xlu1 %3877  ;;  %v3890_v14 = vmul.f32 0.03125, %v3888_v46 }
0x1c73   :  { %v3880_v42 = vmul.f32 0.03125, %v3878_v20 }
0x1c74   :  { %14525 = vrsqrt.f32 %v3897_v24 }
0x1c75   :  { %v3892_v28 = vmul.f32 %v3880_v42, %v3880_v42  ;;  %v3896_v37 = vsub.f32 %v16152_v5, %v3880_v42 }
0x1c77   :  { %v3894_v19 = vsub.f32 %v3890_v14, %v3892_v28 }
0x1c79   :  { %v3898_v63 = vadd.f32 1e-05, %v3894_v19 }
0x1c7b   :  { %14527 = vrsqrt.f32 %v3898_v63 }
0x1c7e   :  { %v14526_v4 = vpop.eup %14525 }
0x1c7f   :  { %v3901_v27 = vmul.f32 %v14526_v4, %v3895_v12 }
0x1c80   :  { %v11840_v30 = vpop.f32.mrb[52].mxu0 }
0x1c81   :  { %14529 = vrcp.f32 %v11840_v30  ;;  %v4423_v13 = vpop.f32.mrb[53].mxu0  ;;  %v3909_v34 = vmul.f32 %v10056_v31, %v3901_v27 }
0x1c82   :  { %14531 = vrcp.f32 %v4423_v13 }
0x1c83   :  { %v3917_v53 = vadd.f32 %v10057_v18, %v3909_v34 }
0x1c85   :  { %v14528_v24 = vpop.eup %14527  ;;  %v3921_v46 = vsel %vm288_vm1, %v3917_v53, 0.0  ;;  %v3929_v20 = vmul.f32 %v3917_v53, %v3917_v53 }
0x1c86   :  { %v3902_v14 = vmul.f32 %v14528_v24, %v3896_v37  ;;  %3922 = vadd.xlane.f32.xlu1 %v3921_v46 }
0x1c87   :  { %v3931_v8 = vsel %vm288_vm1, %v3929_v20, 0.0 }
0x1c88   :  { %v3910_v28 = vmul.f32 %v10056_v31, %v3902_v14 }
0x1c8a   :  { %3932 = vadd.xlane.f32.xlu1 %v3931_v8  ;;  %v3918_v17 = vadd.f32 %v10057_v18, %v3910_v28  ;;  %v14317_v18 = vld [vmem:[%s16180_s6] sm:$0xff]  }
0x1c8b   :  { %v14530_v19 = vpop.eup %14529  ;;  %11877 = vmatpush3.bf16.msra.mxu1 %v14317_v18 }
0x1c8c   :  { %v14532_v63 = vpop.eup %14531  ;;  %v3924_v30 = vsel %vm288_vm1, %v3918_v17, 0.0  ;;  %v3930_v27 = vmul.f32 %v3918_v17, %v3918_v17  ;;  %v4435_v5 = vmul.f32 %v14530_v19, %v16098_v29  ;;  %11878 = vmatprep.subr.bf16.mxu1 %v17863_v2 }
0x1c8d   :  { %3925 = vadd.xlane.f32.xlu0 %v3924_v30  ;;  %v4433_v12 = vmul.f32 %v14532_v63, %v16094_v10  ;;  %v14318_v10 = vld [vmem:[%s16180_s6 + $0x8] sm:$0xff]  }
0x1c8e   :  { %v3934_v42 = vsel %vm288_vm1, %v3930_v27, 0.0 }
0x1c8f   :  { %11873 = vmatprep.mubr.f32.mxu0 %v4433_v12  ;;  %11879 = vmatpush3.bf16.msra.mxu1 %v14318_v10 }
0x1c90   :  { %11874 = vmatmul.mubr.f32.vlgmr.msra.gmra.mrb[54].mxu0 %v4435_v5  ;;  %11892 = vmatprep.subr.bf16.mxu1 %v17863_v2 }
0x1c91   :  { %3935 = vadd.xlane.f32.xlu0 %v3934_v42  ;;  %11888 = vmatprep.mubr.msk.bf16.mxu0 %vm14677_vm0, %v17863_v2 }
0x1d13   :  { %v3923_v4 = vpop.xlane.xlu1 %3922 }
0x1d14   :  { %v3927_v37 = vmul.f32 0.03125, %v3923_v4  ;;  %v14319_v4 = vld [vmem:[%s16189_s10] sm:$0xff]  }
0x1d16   :  { %v3939_v14 = vmul.f32 %v3927_v37, %v3927_v37  ;;  %v3943_v5 = vsub.f32 %v3917_v53, %v3927_v37 }
0x1d17   :  { %v3933_v34 = vpop.xlane.xlu1 %3932 }
0x1d18   :  { %v3937_v46 = vmul.f32 0.03125, %v3933_v34 }
0x1d1a   :  { %v3926_v29 = vpop.xlane.xlu0 %3925  ;;  %v3941_v8 = vsub.f32 %v3937_v46, %v3939_v14  ;;  %v14321_v14 = vld [vmem:[%s16226_s9] sm:$0xff]  }
0x1d1b   :  { %v3928_v13 = vmul.f32 0.03125, %v3926_v29  ;;  %11885 = vmatpush3.bf16.msra.mxu0 %v14321_v14  ;;  %v14619_v14 = vld [vmem:[%s14744_s13] sm:$0xff] }
0x1d1c   :  { %v3945_v63 = vadd.f32 1e-05, %v3941_v8  ;;  %11886 = vmatprep.subr.bf16.mxu0 %v17863_v2  ;;  %v10082_v8 = vld [vmem:[%s16234_s20] ss:$0 sm:$0xff] }
0x1d1d   :  { %v3940_v20 = vmul.f32 %v3928_v13, %v3928_v13  ;;  %v3944_v27 = vsub.f32 %v3918_v17, %v3928_v13  ;;  %v14320_v17 = vld [vmem:[%s16189_s10 + $0x8] sm:$0xff]   ;;  %v10059_v13 = vld [vmem:[%s9660_s1] ss:$0 sm:$0xff]  ;;  %s16561_s1 = sld [smem:[%s17682_s0 + %s14717_s14]]  }
0x1d1e   :  { %v3936_v31 = vpop.xlane.xlu0 %3935 }
0x1d1f   :  { %v3938_v24 = vmul.f32 0.03125, %v3936_v31  ;;  %v10058_v31 = vld [vmem:[%s9661_s16] ss:$0 sm:$0xff]  ;;  %s16524_s16 = sld [smem:[%s17682_s0 + %s14713_s7]]  }
0x1d21   :  { %v3942_v28 = vsub.f32 %v3938_v24, %v3940_v20 }
0x1d23   :  { %v3946_v19 = vadd.f32 1e-05, %v3942_v28  ;;  %v14322_v28 = vld [vmem:[%s16226_s9 + $0x8] sm:$0xff]  }
0x1d24   :  { %11887 = vmatpush3.bf16.msra.mxu0 %v14322_v28 }
0x1d25   :  { %14533 = vrsqrt.f32 %v3946_v19 }
0x1d26   :  { %14535 = vrsqrt.f32 %v3945_v63 }
0x1d2f   :  { %v14534_v30 = vpop.eup %14533 }
0x1d30   :  { %v14536_v12 = vpop.eup %14535  ;;  %v3950_v42 = vmul.f32 %v14534_v30, %v3944_v27 }
0x1d31   :  { %v3949_v18 = vmul.f32 %v14536_v12, %v3943_v5 }
0x1d32   :  { %v3958_v24 = vmul.f32 %v10058_v31, %v3950_v42 }
0x1d33   :  { %v3957_v46 = vmul.f32 %v10058_v31, %v3949_v18 }
0x1d34   :  { %v3966_v53 = vadd.f32 %v10059_v13, %v3958_v24 }
0x1d35   :  { %v3965_v37 = vadd.f32 %v10059_v13, %v3957_v46 }
0x1d37   :  { %v16203_v20 = vpack.c.bf16 %v3966_v53, %v3965_v37 }
0x1d39   :  { %17920 = vst [vmem:[#allocation59_spill] sm:$0xff] %v16203_v20 }
0x1d63   :  { %v11875_v10 = vpop.f32.mrb[54].mxu0 }
0x1d64   :  { %v4566_v29 = vpop.f32.mrb[55].mxu0 }
0x1d65   :  { %v4575_v34 = vpack.c.bf16 %v11875_v10, %v4566_v29 }
0x1d67   :  { %11881 = vmatmul.mubr.msk.bf16.vlgmr.msra.gmra.mrb[44].mxu1 %vm288_vm1, %v4575_v34 }
0x1d68   :  { %11893 = vmatpush3.bf16.msra.mxu1 %v14319_v4  ;;  %11896 = vmatprep.mubr.msk.bf16.mxu1 %vm14677_vm0, %v17863_v2  ;;  %v10092_v4 = vld [vmem:[%s16240_s18] ss:$0 sm:$0xff] }
0x1d69   :  { %11894 = vmatprep.subr.bf16.mxu1 %v17863_v2 }
0x1d6c   :  { %11895 = vmatpush3.bf16.msra.mxu1 %v14320_v17 }
0x1d6d   :  { %13010 = vmatprep.subr.bf16.mxu1 %v14971_v49 }
0x1d6f   :  { %11897 = vmatmul.mubr.msk.bf16.vlgmr.msra.gmra.mrb[48].mxu1 %vm288_vm1, %v16203_v20 }
0x1d70   :  { %13012 = vmatpush3.bf16.msra.mxu1 %v14971_v49 }
0x1d71   :  { %13014 = vmatprep.subr.bf16.mxu1 %v14974_v52 }
0x1d74   :  { %13016 = vmatpush3.bf16.msra.mxu1 %v14974_v52  ;;  %v17933_v52 = vld [vmem:[#allocation16_spill] sm:$0xff] }
0x1d75   :  { %13018 = vmatprep.subr.bf16.mxu1 %v14981_v55 }
0x1d78   :  { %13020 = vmatpush3.bf16.msra.mxu1 %v14981_v55  ;;  %v17932_v55 = vld [vmem:[#allocation17_spill] sm:$0xff] }
0x1d79   :  { %13022 = vmatprep.subr.bf16.mxu1 %v14987_v59 }
0x1d7c   :  { %13024 = vmatpush3.bf16.msra.mxu1 %v14987_v59 }
0x1d7d   :  { %13026 = vmatprep.subr.bf16.mxu1 %v15001_v36 }
0x1d80   :  { %13028 = vmatpush3.bf16.msra.mxu1 %v15001_v36 }
0x1d81   :  { %13030 = vmatprep.subr.bf16.mxu1 %v15009_v41 }
0x1d84   :  { %13032 = vmatpush3.bf16.msra.mxu1 %v15009_v41 }
0x1d85   :  { %13034 = vmatprep.subr.bf16.mxu1 %v15019_v43 }
0x1d88   :  { %13036 = vmatpush3.bf16.msra.mxu1 %v15019_v43 }
0x1d89   :  { %13038 = vmatprep.subr.bf16.mxu1 %v15029_v47 }
0x1d8c   :  { %13040 = vmatpush3.bf16.msra.mxu1 %v15029_v47 }
0x1e3a   :  { %v4631_v19 = vpop.f32.mrb[44].mxu1 }
0x1e3b   :  { %v4632_v63 = vadd.f32 %v10082_v8, %v4631_v19  ;;  %v11882_v30 = vpop.f32.mrb[45].mxu1 }
0x1e3c   :  { %v4634_v27 = vpop.f32.mrb[46].mxu1 }
0x1e3d   :  { %v16243_v12 = vadd.f32 %v4632_v63, %v15842_v62  ;;  %v4635_v5 = vadd.f32 %v10082_v8, %v4634_v27  ;;  %v11883_v42 = vpop.f32.mrb[47].mxu1  ;;  %v14620_v8 = vld [vmem:[%s14744_s13 + $0x10] sm:$0xff]  ;;  %v14621_v63 = vld [vmem:[%s14744_s13 + $0x20] sm:$0xff] }
0x1e3e   :  { %v14622_v27 = vld [vmem:[%s14744_s13 + $0x30] sm:$0xff]  ;;  %v14623_v42 = vld [vmem:[%s14744_s13 + $0x40] sm:$0xff] }
0x1e3f   :  { %v16246_v18 = vadd.f32 %v4635_v5, %v15844_v57  ;;  %v4642_v10 = vsel %vm288_vm1, %v16243_v12, 0.0  ;;  %v4650_v29 = vmul.f32 %v16243_v12, %v16243_v12 }
0x1e40   :  { %4643 = vadd.xlane.f32.xlu1 %v4642_v10 }
0x1e41   :  { %v4645_v31 = vsel %vm288_vm1, %v16246_v18, 0.0  ;;  %v4651_v62 = vmul.f32 %v16246_v18, %v16246_v18  ;;  %v4652_v46 = vsel %vm288_vm1, %v4650_v29, 0.0  ;;  %v14624_v29 = vld [vmem:[%s14744_s13 + $0x50] sm:$0xff] }
0x1e42   :  { %4646 = vadd.xlane.f32.xlu0 %v4645_v31  ;;  %v4822_v57 = vpop.f32.mrb[48].mxu1  ;;  %v14625_v31 = vld [vmem:[%s14744_s13 + $0x60] sm:$0xff] }
0x1e43   :  { %v16257_v34 = vadd.f32 %v10092_v4, %v4822_v57  ;;  %v11898_v24 = vpop.f32.mrb[49].mxu1  ;;  %v4655_v13 = vsel %vm288_vm1, %v4651_v62, 0.0  ;;  %v14626_v57 = vld [vmem:[%s14744_s13 + $0x8] sm:$0xff] }
0x1e44   :  { %4653 = vadd.xlane.f32.xlu1 %v4652_v46  ;;  %v4825_v17 = vpop.f32.mrb[50].mxu1  ;;  %v14627_v46 = vld [vmem:[%s14744_s13 + $0x18] sm:$0xff] }
0x1e45   :  { %v16261_v53 = vadd.f32 %v10092_v4, %v4825_v17  ;;  %v11899_v37 = vpop.f32.mrb[51].mxu1  ;;  %v4829_v28 = vmul.f32 %v14619_v14, %v16257_v34  ;;  %v4831_v19 = vmul.f32 %v14620_v8, %v16257_v34  ;;  %v4833_v30 = vmul.f32 %v14621_v63, %v16257_v34  ;;  %v14629_v14 = vld [vmem:[%s14744_s13 + $0x38] sm:$0xff]  ;;  %v14630_v63 = vld [vmem:[%s14744_s13 + $0x48] sm:$0xff] }
0x1e46   :  { %4656 = vadd.xlane.f32.xlu0 %v4655_v13  ;;  %v4835_v5 = vmul.f32 %v14622_v27, %v16257_v34  ;;  %v4837_v10 = vmul.f32 %v14623_v42, %v16257_v34  ;;  %v4839_v4 = vmul.f32 %v14624_v29, %v16257_v34  ;;  %v4841_v62 = vmul.f32 %v14625_v31, %v16257_v34  ;;  %v14628_v13 = vld [vmem:[%s14744_s13 + $0x28] sm:$0xff]  ;;  %v14631_v42 = vld [vmem:[%s14744_s13 + $0x58] sm:$0xff] }
0x1e47   :  { %v4830_v24 = vmul.f32 %v14626_v57, %v16261_v53  ;;  %v4832_v17 = vmul.f32 %v14627_v46, %v16261_v53  ;;  %v4834_v37 = vmul.f32 %v14628_v13, %v16261_v53  ;;  %v4836_v8 = vmul.f32 %v14629_v14, %v16261_v53  ;;  %v14632_v31 = vld [vmem:[%s14744_s13 + $0x68] sm:$0xff]  ;;  %v14633_v57 = vld [vmem:[%s14744_s13 + $0x70] sm:$0xff] }
0x1e48   :  { %v4838_v27 = vmul.f32 %v14630_v63, %v16261_v53  ;;  %v4840_v29 = vmul.f32 %v14631_v42, %v16261_v53  ;;  %v4842_v47 = vmul.f32 %v14632_v31, %v16261_v53  ;;  %v4843_v43 = vmul.f32 %v14633_v57, %v16257_v34  ;;  %v14634_v42 = vld [vmem:[%s14744_s13 + $0x78] sm:$0xff] }
0x1e49   :  { %v16293_v46 = vpack.c.bf16 %v4830_v24, %v4829_v28  ;;  %v16295_v41 = vpack.c.bf16 %v4832_v17, %v4831_v19  ;;  %v16297_v13 = vpack.c.bf16 %v4834_v37, %v4833_v30  ;;  %v16299_v14 = vpack.c.bf16 %v4836_v8, %v4835_v5  ;;  %v17923_v24 = vld [vmem:[#allocation6_spill] sm:$0xff]  ;;  %v17924_v37 = vld [vmem:[#allocation11_spill] sm:$0xff] }
0x1e4a   :  { %v16301_v36 = vpack.c.bf16 %v4838_v27, %v4837_v10  ;;  %v16303_v63 = vpack.c.bf16 %v4840_v29, %v4839_v4  ;;  %v16305_v59 = vpack.c.bf16 %v4842_v47, %v4841_v62  ;;  %v4844_v31 = vmul.f32 %v14634_v42, %v16261_v53  ;;  %v17921_v47 = vld [vmem:[#allocation4_spill] sm:$0xff]  ;;  %v17922_v4 = vld [vmem:[#allocation7_spill] sm:$0xff]  ;;  %v17926_v42 = vld [vmem:[#allocation9_spill] sm:$0xff] }
0x1e4b   :  { %12963 = vmatprep.subr.msk.bf16.mxu0 %vm14922_vm2, %v16293_v46  ;;  %v16314_v28 = vmul.f32 %v16257_v34, %v14838_v23  ;;  %v16318_v19 = vmul.f32 %v16261_v53, %v14842_v25  ;;  %v16322_v30 = vmul.f32 %v16257_v34, %v14836_v22  ;;  %v16326_v5 = vmul.f32 %v16261_v53, %v17921_v47  ;;  %v17928_v47 = vld [vmem:[#allocation15_spill] sm:$0xff]  ;;  %v17929_v29 = vld [vmem:[#allocation14_spill] sm:$0xff] }
0x1e4c   :  { %v16328_v10 = vpack.c.bf16 %v4844_v31, %v4843_v43  ;;  %v16332_v62 = vmul.f32 %v16257_v34, %v17922_v4  ;;  %v16336_v17 = vmul.f32 %v16261_v53, %v17923_v24  ;;  %v16340_v8 = vmul.f32 %v16257_v34, %v17924_v37  ;;  %v17925_v43 = vld [vmem:[#allocation10_spill] sm:$0xff]  ;;  %v17927_v4 = vld [vmem:[#allocation8_spill] sm:$0xff] }
0x1e4d   :  { %v16348_v57 = vmul.f32 %v16261_v53, %v17925_v43  ;;  %v16352_v31 = vmul.f32 %v16257_v34, %v17926_v42  ;;  %v16358_v37 = vmul.f32 %v16261_v53, %v17927_v4  ;;  %v16362_v27 = vmul.f32 %v16257_v34, %v17928_v47  ;;  %v17930_v42 = vld [vmem:[#allocation13_spill] sm:$0xff]  ;;  %v17931_v24 = vld [vmem:[#allocation12_spill] sm:$0xff] }
0x1e4e   :  { %v16366_v22 = vmul.f32 %v16261_v53, %v17929_v29  ;;  %v16372_v25 = vmul.f32 %v16257_v34, %v17930_v42  ;;  %v16376_v23 = vmul.f32 %v16261_v53, %v17931_v24  ;;  %v16384_v29 = vmul.f32 %v16257_v34, %v17932_v55 }
0x1e4f   :  { %v16388_v43 = vmul.f32 %v16261_v53, %v17933_v52 }
0x1e50   :  { %v13916_v42 = vpack.i.bf16 %v16376_v23, %v16372_v25 }
0x1ecd   :  { %v4644_v20 = vpop.xlane.xlu1 %4643 }
0x1ece   :  { %v4648_v49 = vmul.f32 0.03125, %v4644_v20 }
0x1ecf   :  { %v4647_v4 = vpop.xlane.xlu0 %4646 }
0x1ed0   :  { %v4649_v51 = vmul.f32 0.03125, %v4647_v4  ;;  %v4660_v47 = vmul.f32 %v4648_v49, %v4648_v49 }
0x1ed1   :  { %v4654_v58 = vpop.xlane.xlu1 %4653 }
0x1ed2   :  { %v4658_v7 = vmul.f32 0.03125, %v4654_v58  ;;  %v4661_v34 = vmul.f32 %v4649_v51, %v4649_v51  ;;  %v10086_v58 = vld [vmem:[%s16397_s25] ss:$0 sm:$0xff] }
0x1ed3   :  { %v4657_v11 = vpop.xlane.xlu0 %4656 }
0x1ed4   :  { %v4662_v55 = vsub.f32 %v4658_v7, %v4660_v47  ;;  %v4659_v0 = vmul.f32 0.03125, %v4657_v11  ;;  %v10087_v47 = vld [vmem:[%s16402_s29] ss:$0 sm:$0xff] }
0x1ed6   :  { %v4666_v9 = vadd.f32 1e-05, %v4662_v55  ;;  %v4663_v53 = vsub.f32 %v4659_v0, %v4661_v34  ;;  %v4664_v55 = vsub.f32 %v16243_v12, %v4648_v49  ;;  %v10088_v49 = vld [vmem:[%s16464_s5] ss:$0 sm:$0xff] }
0x1ed8   :  { %14537 = vrsqrt.f32 %v4666_v9  ;;  %v4667_v52 = vadd.f32 1e-05, %v4663_v53 }
0x1eda   :  { %14539 = vrsqrt.f32 %v4667_v52  ;;  %v4665_v52 = vsub.f32 %v16246_v18, %v4649_v51 }
0x1ee2   :  { %v14538_v7 = vpop.eup %14537 }
0x1ee3   :  { %v4670_v9 = vmul.f32 %v14538_v7, %v4664_v55  ;;  %v17934_v55 = vpack.i.bf16 %v16318_v19, %v16314_v28  ;;  %v17935_v7 = vpack.i.bf16 %v16326_v5, %v16322_v30  ;;  %v17938_v28 = vpack.i.bf16 %v16358_v37, %v16352_v31 }
0x1ee4   :  { %v14540_v0 = vpop.eup %14539  ;;  %v17939_v19 = vpack.i.bf16 %v16366_v22, %v16362_v27  ;;  %v17940_v30 = vpack.i.bf16 %v16388_v43, %v16384_v29 }
0x1ee5   :  { %v4671_v11 = vmul.f32 %v14540_v0, %v4665_v52  ;;  %v4678_v20 = vmul.f32 %v10086_v58, %v4670_v9  ;;  %v17937_v52 = vpack.i.bf16 %v16348_v57, %v16340_v8 }
0x1ee7   :  { %v4679_v4 = vmul.f32 %v10086_v58, %v4671_v11  ;;  %v16408_v34 = vadd.f32 %v10087_v47, %v4678_v20  ;;  %v17936_v58 = vpack.i.bf16 %v16336_v17, %v16332_v62 }
0x1ee9   :  { %v16410_v53 = vadd.f32 %v10087_v47, %v4679_v4 }
0x1eeb   :  { %v4703_v24 = vpack.c.bf16 %v16410_v53, %v16408_v34 }
0x1eed   :  { %11889 = vmatmul.mubr.msk.bf16.vlgmr.msra.gmra.mrb[56].mxu0 %vm288_vm1, %v4703_v24 }
0x1eee   :  { %12966 = vmatpush3.bf16.xpose.msk.msra.mxu0 %vm14922_vm2, %v16293_v46  ;;  %v192_v46 = vld [vmem:[%s16474_s15 + $0x8] sm:$0xff] }
0x1eef   :  { %12969 = vmatprep.subr.msk.bf16.mxu0 %vm14922_vm2, %v16295_v41 }
0x1ef6   :  { %12972 = vmatpush3.bf16.xpose.msk.msra.mxu0 %vm14922_vm2, %v16295_v41 }
0x1ef7   :  { %12975 = vmatprep.subr.msk.bf16.mxu0 %vm14922_vm2, %v16297_v13 }
0x1efe   :  { %12978 = vmatpush3.bf16.xpose.msk.msra.mxu0 %vm14922_vm2, %v16297_v13  ;;  %v191_v13 = vld [vmem:[%s16474_s15] sm:$0xff] }
0x1eff   :  { %12981 = vmatprep.subr.msk.bf16.mxu0 %vm14922_vm2, %v16299_v14 }
0x1f06   :  { %12984 = vmatpush3.bf16.xpose.msk.msra.mxu0 %vm14922_vm2, %v16299_v14 }
0x1f07   :  { %12987 = vmatprep.subr.msk.bf16.mxu0 %vm14922_vm2, %v16301_v36 }
0x1f0e   :  { %12990 = vmatpush3.bf16.xpose.msk.msra.mxu0 %vm14922_vm2, %v16301_v36 }
0x1f0f   :  { %12993 = vmatprep.subr.msk.bf16.mxu0 %vm14922_vm2, %v16303_v63 }
0x1f16   :  { %12996 = vmatpush3.bf16.xpose.msk.msra.mxu0 %vm14922_vm2, %v16303_v63 }
0x1f17   :  { %12999 = vmatprep.subr.msk.bf16.mxu0 %vm14922_vm2, %v16305_v59 }
0x1f1e   :  { %13002 = vmatpush3.bf16.xpose.msk.msra.mxu0 %vm14922_vm2, %v16305_v59 }
0x1f1f   :  { %13005 = vmatprep.subr.msk.bf16.mxu0 %vm14922_vm2, %v16328_v10 }
0x1f26   :  { %13008 = vmatpush3.bf16.xpose.msk.msra.mxu0 %vm14922_vm2, %v16328_v10 }
0x1f27   :  { %12005 = vmatprep.subr.bf16.mxu0 %v17863_v2 }
0x1fc0   :  { %v4759_v36 = vpop.f32.mrb[56].mxu0 }
0x1fc1   :  { %v4760_v59 = vadd.f32 %v10088_v49, %v4759_v36  ;;  %v11890_v41 = vpop.f32.mrb[57].mxu0 }
0x1fc2   :  { %v4762_v51 = vpop.f32.mrb[58].mxu0 }
0x1fc3   :  { %v4763_v12 = vadd.f32 %v10088_v49, %v4762_v51  ;;  %v11891_v18 = vpop.f32.mrb[59].mxu0  ;;  %11932 = vmatprep.mubr.msk.f32.mxu0 %vm288_vm1, %v4760_v59 }
0x1fc5   :  { %11933 = vmatmul.mubr.msk.f32.vlgmr.msra.gmra.mrb[60].mxu0 %vm288_vm1, %v4763_v12 }
0x1fc6   :  { %12009 = vmatprep.mubr.msk.bf16.mxu0 %vm14677_vm0, %v17863_v2 }
0x2098   :  { %v11934_v14 = vpop.f32.mrb[60].mxu0 }
0x2099   :  { %v4987_v63 = vadd.f32 %v11934_v14, %v192_v46  ;;  %v4981_v10 = vpop.f32.mrb[61].mxu0 }
0x209a   :  { %v4982_v24 = vadd.f32 %v4981_v10, %v191_v13 }
0x209b   :  { %4992 = vmax.xlane.f32.xlu0 %v4987_v63 }
0x209c   :  { %4990 = vmax.xlane.f32.xlu1 %v4982_v24 }
0x20ad   :  { %13892 = vrot.lane.b32.xlu1 %v17934_v55, %s14681_s19 }
0x20b1   :  { %13897 = vrot.lane.b32.xlu0 %v17935_v7, %s14681_s19  ;;  %13902 = vrot.lane.b32.xlu1 %v17936_v58, %s14681_s19 }
0x20b5   :  { %13912 = vrot.lane.b32.xlu0 %v17937_v52, %s14681_s19  ;;  %13907 = vrot.lane.b32.xlu1 %v17938_v28, %s14681_s19 }
0x20b9   :  { %13922 = vrot.lane.b32.xlu0 %v17939_v19, %s14681_s19  ;;  %13917 = vrot.lane.b32.xlu1 %v13916_v42, %s14681_s19 }
0x20bd   :  { %13927 = vrot.lane.b32.xlu1 %v17940_v30, %s14681_s19 }
0x2128   :  { %v4993_v5 = vpop.xlane.xlu0 %4992 }
0x2129   :  { %v4995_v62 = vsub.f32 %v4987_v63, %v4993_v5  ;;  %v4991_v17 = vpop.xlane.xlu1 %4990  ;;  %v14323_v5 = vld [vmem:[%s16513_s27] sm:$0xff]  }
0x212a   :  { %v4994_v37 = vsub.f32 %v4982_v24, %v4991_v17  ;;  %12006 = vmatpush3.bf16.msra.mxu0 %v14323_v5 }
0x212b   :  { %v4998_v8 = vmul.f32 1.442695, %v4995_v62  ;;  %12007 = vmatprep.subr.bf16.mxu0 %v17863_v2 }
0x212c   :  { %v4996_v57 = vmul.f32 1.442695, %v4994_v37  ;;  %v13898_v23 = vpop.permute.xlu0 %13897 }
0x212d   :  { %v13893_v31 = vpop.permute.xlu1 %13892  ;;  %v13900_v42 = vunpack.i.h.bf16 %v13898_v23  ;;  %v13899_v0 = vunpack.i.l.bf16 %v13898_v23 }
0x212e   :  { %14541 = vpow2.f32 %v4996_v57  ;;  %v13895_v22 = vunpack.i.h.bf16 %v13893_v31  ;;  %v13894_v27 = vunpack.i.l.bf16 %v13893_v31 }
0x212f   :  { %14543 = vpow2.f32 %v4998_v8  ;;  %v13045_v47 = vpack.c.bf16 %v13900_v42, %v13899_v0  ;;  %v10114_v42 = vld [vmem:[%s16524_s16] ss:$0 sm:$0xff] }
0x2130   :  { %v13041_v9 = vpack.c.bf16 %v13895_v22, %v13894_v27  ;;  %v13913_v41 = vpop.permute.xlu0 %13912  ;;  %v17941_v22 = vmov 0   ;;  %v14324_v27 = vld [vmem:[%s16513_s27 + $0x8] sm:$0xff]  }
0x2131   :  { %v13903_v25 = vpop.permute.xlu1 %13902  ;;  %v13915_v51 = vunpack.i.h.bf16 %v13913_v41  ;;  %v13914_v12 = vunpack.i.l.bf16 %v13913_v41  ;;  %12008 = vmatpush3.bf16.msra.mxu0 %v14324_v27 }
0x2132   :  { %13042 = vmatprep.subr.bf16.mxu1 %v13041_v9  ;;  %v13905_v43 = vunpack.i.h.bf16 %v13903_v25  ;;  %v13904_v20 = vunpack.i.l.bf16 %v13903_v25 }
0x2133   :  { %v13057_v13 = vpack.c.bf16 %v13915_v51, %v13914_v12 }
0x2134   :  { %v13049_v49 = vpack.c.bf16 %v13905_v43, %v13904_v20  ;;  %v13923_v10 = vpop.permute.xlu0 %13922 }
0x2135   :  { %v13908_v4 = vpop.permute.xlu1 %13907  ;;  %v13925_v24 = vunpack.i.h.bf16 %v13923_v10  ;;  %v13924_v55 = vunpack.i.l.bf16 %v13923_v10  ;;  %v14334_v10 = vld [vmem:[%s16536_s3 + $0x28] ss:$16 sps:$4 sm:$0xff]  }
0x2136   :  { %v13910_v36 = vunpack.i.h.bf16 %v13908_v4  ;;  %v13909_v59 = vunpack.i.l.bf16 %v13908_v4 }
0x2137   :  { %v13065_v52 = vpack.c.bf16 %v13925_v24, %v13924_v55  ;;  %v14336_v24 = vld [vmem:[%s16536_s3 + $0x2c] ss:$16 sps:$4 sm:$0xff]   ;;  %v14337_v55 = vld [vmem:[%s16545_s17 + $0x40] sm:$0xff]  }
0x2138   :  { %v14542_v11 = vpop.eup %14541  ;;  %v13053_v18 = vpack.c.bf16 %v13910_v36, %v13909_v59 }
0x2139   :  { %v14544_v29 = vpop.eup %14543  ;;  %11967 = vmatprep.mubr.f32.mxu1 %v14542_v11  ;;  %v13918_v46 = vpop.permute.xlu1 %13917 }
0x213a   :  { %11968 = vmatmul.mubr.f32.vlgmr.msra.gmra.mrb[52].mxu1 %v14544_v29  ;;  %v13920_v14 = vunpack.i.h.bf16 %v13918_v46  ;;  %v13919_v63 = vunpack.i.l.bf16 %v13918_v46  ;;  %v14328_v46 = vld [vmem:[%s16536_s3 + $0x8] ss:$16 sps:$4 sm:$0xff]  }
0x213b   :  { %13044 = vmatpush3.bf16.msra.mxu1 %v13041_v9 }
0x213c   :  { %13046 = vmatprep.subr.bf16.mxu1 %v13045_v47  ;;  %v13061_v7 = vpack.c.bf16 %v13920_v14, %v13919_v63  ;;  %v14333_v14 = vld [vmem:[%s16536_s3 + $0x24] ss:$16 sps:$4 sm:$0xff]   ;;  %v14331_v63 = vld [vmem:[%s16536_s3 + $0x20] ss:$16 sps:$4 sm:$0xff]  }
0x213d   :  { %v13928_v58 = vpop.permute.xlu1 %13927 }
0x213e   :  { %v13930_v28 = vunpack.i.h.bf16 %v13928_v58  ;;  %v13929_v19 = vunpack.i.l.bf16 %v13928_v58 }
0x213f   :  { %13048 = vmatpush3.bf16.msra.mxu1 %v13045_v47 }
0x2140   :  { %13050 = vmatprep.subr.bf16.mxu1 %v13049_v49  ;;  %v13069_v30 = vpack.c.bf16 %v13930_v28, %v13929_v19 }
0x2143   :  { %13052 = vmatpush3.bf16.msra.mxu1 %v13049_v49 }
0x2144   :  { %13054 = vmatprep.subr.bf16.mxu1 %v13053_v18 }
0x2147   :  { %13056 = vmatpush3.bf16.msra.mxu1 %v13053_v18 }
0x2148   :  { %13058 = vmatprep.subr.bf16.mxu1 %v13057_v13 }
0x214b   :  { %13060 = vmatpush3.bf16.msra.mxu1 %v13057_v13  ;;  %v14330_v13 = vld [vmem:[%s16536_s3 + $0xc] ss:$16 sps:$4 sm:$0xff]  }
0x214c   :  { %13062 = vmatprep.subr.bf16.mxu1 %v13061_v7  ;;  %5448 = vmatprep.subr.bf16.mxu0 %v14330_v13  ;;  %v14346_v13 = vld [vmem:[%s16545_s17 + $0xd0] sm:$0xff]  }
0x214f   :  { %13064 = vmatpush3.bf16.msra.mxu1 %v13061_v7  ;;  %v14338_v7 = vld [vmem:[%s16545_s17 + $0xc0] sm:$0xff]  }
0x2150   :  { %13066 = vmatprep.subr.bf16.mxu1 %v13065_v52 }
0x2153   :  { %13068 = vmatpush3.bf16.msra.mxu1 %v13065_v52 }
0x2154   :  { %13070 = vmatprep.subr.bf16.mxu1 %v13069_v30 }
0x2157   :  { %13072 = vmatpush3.bf16.msra.mxu1 %v13069_v30 }
0x220d   :  { %v11969_v62 = vpop.f32.mrb[52].mxu1 }
0x220e   :  { %14545 = vrcp.f32 %v11969_v62  ;;  %v5066_v17 = vpop.f32.mrb[53].mxu1 }
0x220f   :  { %14547 = vrcp.f32 %v5066_v17 }
0x2218   :  { %v14546_v37 = vpop.eup %14545 }
0x2219   :  { %v14548_v8 = vpop.eup %14547  ;;  %v5078_v31 = vmul.f32 %v14546_v37, %v14544_v29 }
0x221a   :  { %v5076_v57 = vmul.f32 %v14548_v8, %v14542_v11 }
0x221c   :  { %12002 = vmatprep.mubr.f32.mxu1 %v5076_v57 }
0x221d   :  { %12003 = vmatmul.mubr.f32.vlgmr.msra.gmra.mrb[54].mxu1 %v5078_v31 }
0x221e   :  { %5437 = vmatprep.mubr.bf16.mxu1 %v17941_v22 }
0x22f0   :  { %v12004_v9 = vpop.f32.mrb[54].mxu1 }
0x22f1   :  { %v5209_v23 = vpop.f32.mrb[55].mxu1 }
0x22f2   :  { %v5218_v25 = vpack.c.bf16 %v12004_v9, %v5209_v23 }
0x22f4   :  { %12010 = vmatmul.mubr.msk.bf16.vlgmr.msra.gmra.mrb[64].mxu0 %vm288_vm1, %v5218_v25 }
0x22f5   :  { %5480 = vmatprep.mubr.bf16.mxu0 %v17941_v22  ;;  %5449 = vmatpush1.bf16.msra.mxu0 %v14328_v46  ;;  %v14345_v46 = vld [vmem:[%s16545_s17 + $0x50] sm:$0xff]  }
0x22f6   :  { %5450 = vmatprep.subr.bf16.mxu0 %v14336_v24  ;;  %v14350_v24 = vld [vmem:[%s16545_s17 + $0xd8] sm:$0xff]  }
0x22f9   :  { %5451 = vmatpush1.bf16.msra.mxu0 %v14334_v10  ;;  %v14349_v10 = vld [vmem:[%s16545_s17 + $0x58] sm:$0xff]  }
0x22fa   :  { %11044 = vmatprep.subr.bf16.mxu0 %v14338_v7  ;;  %v14352_v7 = vld [vmem:[%s16545_s17 + $0x98] sm:$0xff]  }
0x23c7   :  { %v5274_v0 = vpop.f32.mrb[64].mxu0 }
0x23c8   :  { %v5275_v11 = vadd.f32 %v10114_v42, %v5274_v0  ;;  %v12011_v29 = vpop.f32.mrb[65].mxu0  ;;  %v10118_v0 = vld [vmem:[%s16556_s22] ss:$0 sm:$0xff] }
0x23c9   :  { %v5277_v43 = vpop.f32.mrb[66].mxu0 }
0x23ca   :  { %v5281_v20 = vadd.f32 %v5275_v11, %v16408_v34  ;;  %v5278_v47 = vadd.f32 %v10114_v42, %v5277_v43  ;;  %v12012_v4 = vpop.f32.mrb[67].mxu0  ;;  %v14325_v34 = vld [vmem:[%s16536_s3] ss:$16 sps:$4 sm:$0xff]  }
0x23cb   :  { %v10119_v4 = vld [vmem:[%s16561_s1] ss:$0 sm:$0xff] }
0x23cc   :  { %v5282_v49 = vadd.f32 %v5278_v47, %v16410_v53  ;;  %v5285_v36 = vsel %vm288_vm1, %v5281_v20, 0.0  ;;  %v5293_v59 = vmul.f32 %v5281_v20, %v5281_v20  ;;  %v14327_v53 = vld [vmem:[%s16536_s3 + $0x4] ss:$16 sps:$4 sm:$0xff]  }
0x23cd   :  { %5286 = vadd.xlane.f32.xlu0 %v5285_v36  ;;  %5405 = vmatprep.subr.bf16.mxu1 %v14327_v53  ;;  %v14344_v53 = vld [vmem:[%s16545_s17 + $0x88] sm:$0xff]  }
0x23ce   :  { %v5288_v41 = vsel %vm288_vm1, %v5282_v49, 0.0  ;;  %v5295_v51 = vsel %vm288_vm1, %v5293_v59, 0.0  ;;  %v5294_v12 = vmul.f32 %v5282_v49, %v5282_v49  ;;  %5406 = vmatpush1.bf16.msra.mxu1 %v14325_v34  ;;  %v14343_v34 = vld [vmem:[%s16545_s17 + $0x8] sm:$0xff]  }
0x23cf   :  { %5289 = vadd.xlane.f32.xlu1 %v5288_v41  ;;  %5407 = vmatprep.subr.bf16.mxu1 %v14333_v14  ;;  %v14347_v14 = vld [vmem:[%s16545_s17 + $0x10] sm:$0xff]  }
0x23d0   :  { %v5298_v18 = vsel %vm288_vm1, %v5294_v12, 0.0 }
0x23d1   :  { %5296 = vadd.xlane.f32.xlu0 %v5295_v51  ;;  %v14339_v51 = vld [vmem:[%s16545_s17] sm:$0xff]  }
0x23d2   :  { %5408 = vmatpush1.bf16.msra.mxu1 %v14331_v63  ;;  %v14348_v63 = vld [vmem:[%s16545_s17 + $0x90] sm:$0xff]  }
0x23d3   :  { %11022 = vmatprep.subr.bf16.mxu1 %v14337_v55  ;;  %v14351_v55 = vld [vmem:[%s16545_s17 + $0x18] sm:$0xff]  }
0x23d5   :  { %5299 = vadd.xlane.f32.xlu0 %v5298_v18  ;;  %v14342_v18 = vld [vmem:[%s16545_s17 + $0xc8] sm:$0xff]  }
0x245a   :  { %v5287_v58 = vpop.xlane.xlu0 %5286 }
0x245b   :  { %v5291_v52 = vmul.f32 0.03125, %v5287_v58  ;;  %v14353_v58 = vld [vmem:[%s16545_s17 + $0x60] sm:$0xff]  }
0x245c   :  { %v5290_v28 = vpop.xlane.xlu1 %5289 }
0x245d   :  { %v5303_v30 = vmul.f32 %v5291_v52, %v5291_v52  ;;  %v5292_v5 = vmul.f32 0.03125, %v5290_v28  ;;  %v5307_v23 = vsub.f32 %v5281_v20, %v5291_v52  ;;  %v14340_v20 = vld [vmem:[%s16545_s17 + $0x80] sm:$0xff]  }
0x245e   :  { %v5297_v19 = vpop.xlane.xlu0 %5296  ;;  %v14354_v52 = vld [vmem:[%s16545_s17 + $0xe0] sm:$0xff]  }
0x245f   :  { %v5301_v62 = vmul.f32 0.03125, %v5297_v19  ;;  %v5304_v8 = vmul.f32 %v5292_v5, %v5292_v5  ;;  %v5308_v11 = vsub.f32 %v5282_v49, %v5292_v5  ;;  %v14341_v49 = vld [vmem:[%s16545_s17 + $0x48] sm:$0xff]   ;;  %v14355_v28 = vld [vmem:[%s16545_s17 + $0x20] sm:$0xff]  }
0x2460   :  { %v14356_v19 = vld [vmem:[%s16545_s17 + $0xa0] sm:$0xff]   ;;  %v14358_v5 = vld [vmem:[%s16545_s17 + $0xe8] sm:$0xff]  }
0x2461   :  { %v5305_v17 = vsub.f32 %v5301_v62, %v5303_v30  ;;  %v14357_v30 = vld [vmem:[%s16545_s17 + $0x68] sm:$0xff]  }
0x2462   :  { %v5300_v37 = vpop.xlane.xlu0 %5299  ;;  %v14359_v62 = vld [vmem:[%s16545_s17 + $0x28] sm:$0xff]  }
0x2463   :  { %v5309_v57 = vadd.f32 1e-05, %v5305_v17  ;;  %v5302_v31 = vmul.f32 0.03125, %v5300_v37  ;;  %v14360_v17 = vld [vmem:[%s16545_s17 + $0xa8] sm:$0xff]   ;;  %v14361_v37 = vld [vmem:[%s16545_s17 + $0x70] sm:$0xff]  }
0x2465   :  { %14549 = vrsqrt.f32 %v5309_v57  ;;  %v5306_v27 = vsub.f32 %v5302_v31, %v5304_v8  ;;  %v14362_v8 = vld [vmem:[%s16545_s17 + $0xf0] sm:$0xff]  }
0x2466   :  { %v14363_v57 = vld [vmem:[%s16545_s17 + $0x30] sm:$0xff]  }
0x2467   :  { %v5310_v9 = vadd.f32 1e-05, %v5306_v27  ;;  %v14364_v31 = vld [vmem:[%s16545_s17 + $0xb0] sm:$0xff]   ;;  %v14365_v27 = vld [vmem:[%s16545_s17 + $0x78] sm:$0xff]  }
0x2469   :  { %14551 = vrsqrt.f32 %v5310_v9  ;;  %v14366_v9 = vld [vmem:[%s16545_s17 + $0xf8] sm:$0xff]  }
0x246f   :  { %v14550_v25 = vpop.eup %14549 }
0x2470   :  { %v5313_v42 = vmul.f32 %v14550_v25, %v5307_v23  ;;  %v14367_v23 = vld [vmem:[%s16545_s17 + $0x38] sm:$0xff]  }
0x2471   :  { %v14368_v25 = vld [vmem:[%s16545_s17 + $0xb8] sm:$0xff]  }
0x2472   :  { %v5321_v47 = vmul.f32 %v10118_v0, %v5313_v42  ;;  %v5339_v42 = vld [vmem:[%s16607_s23] sm:$0xf] }
0x2473   :  { %v14552_v29 = vpop.eup %14551 }
0x2474   :  { %v5314_v43 = vmul.f32 %v14552_v29, %v5308_v11  ;;  %v16565_v59 = vadd.f32 %v10119_v4, %v5321_v47  ;;  %v17943_v29 = vld [vmem:[#allocation37_spill] sm:$0xff]  ;;  %v17944_v47 = vld [vmem:[#allocation38_spill] sm:$0xff] }
0x2476   :  { %v5322_v36 = vmul.f32 %v10118_v0, %v5314_v43  ;;  %v17942_v0 = vld [vmem:[#allocation36_spill] sm:$0xff]  ;;  %v5353_v43 = vrot.slane %v5339_v42, %v17943_v29 }
0x2477   :  { %v5345_v11 = vrot.slane %v5339_v42, %v17942_v0 }
0x2478   :  { %v16567_v41 = vadd.f32 %v10119_v4, %v5322_v36  ;;  %v5349_v4 = vrot.slane %v5339_v42, %v17944_v47  ;;  %v17945_v36 = vld [vmem:[#allocation39_spill] sm:$0xff] }
0x247a   :  { %v5340_v12 = vpack.c.bf16 %v16567_v41, %v16565_v59 }
0x247c   :  { %10128 = vmatmul.mubr.msk.bf16.vlgmr.msra.gmra.mrb[56].mxu1 %vm288_vm1, %v5340_v12  ;;  %10129 = vmatmul.mubr.msk.bf16.vlgmr.msra.gmra.mrb[68].mxu0 %vm288_vm1, %v5340_v12 }
0x247d   :  { %11023 = vmatpush3.bf16.msra.mxu1 %v14339_v51  ;;  %11045 = vmatpush3.bf16.msra.mxu0 %v14340_v20  ;;  %v5357_v51 = vrot.slane %v5339_v42, %v17945_v36  ;;  %v10130_v42 = vld [vmem:[%s16619_s26] ss:$0 sm:$0xff] }
0x247e   :  { %11024 = vmatprep.subr.bf16.mxu1 %v14341_v49  ;;  %11046 = vmatprep.subr.bf16.mxu0 %v14342_v18 }
0x2481   :  { %11025 = vmatpush3.bf16.msra.mxu1 %v14343_v34  ;;  %11047 = vmatpush3.bf16.msra.mxu0 %v14344_v53 }
0x2482   :  { %11026 = vmatprep.subr.bf16.mxu1 %v14345_v46  ;;  %11048 = vmatprep.subr.bf16.mxu0 %v14346_v13 }
0x2485   :  { %11027 = vmatpush3.bf16.msra.mxu1 %v14347_v14  ;;  %11049 = vmatpush3.bf16.msra.mxu0 %v14348_v63 }
0x2486   :  { %11028 = vmatprep.subr.bf16.mxu1 %v14349_v10  ;;  %11050 = vmatprep.subr.bf16.mxu0 %v14350_v24 }
0x2489   :  { %11029 = vmatpush3.bf16.msra.mxu1 %v14351_v55  ;;  %11051 = vmatpush3.bf16.msra.mxu0 %v14352_v7 }
0x248a   :  { %11030 = vmatprep.subr.bf16.mxu1 %v14353_v58  ;;  %11052 = vmatprep.subr.bf16.mxu0 %v14354_v52 }
0x248d   :  { %11031 = vmatpush3.bf16.msra.mxu1 %v14355_v28  ;;  %11053 = vmatpush3.bf16.msra.mxu0 %v14356_v19 }
0x248e   :  { %11032 = vmatprep.subr.bf16.mxu1 %v14357_v30  ;;  %11054 = vmatprep.subr.bf16.mxu0 %v14358_v5 }
0x2491   :  { %11033 = vmatpush3.bf16.msra.mxu1 %v14359_v62  ;;  %11055 = vmatpush3.bf16.msra.mxu0 %v14360_v17 }
0x2492   :  { %11034 = vmatprep.subr.bf16.mxu1 %v14361_v37  ;;  %11056 = vmatprep.subr.bf16.mxu0 %v14362_v8 }
0x2495   :  { %11035 = vmatpush3.bf16.msra.mxu1 %v14363_v57  ;;  %11057 = vmatpush3.bf16.msra.mxu0 %v14364_v31 }
0x2496   :  { %11036 = vmatprep.subr.bf16.mxu1 %v14365_v27  ;;  %11058 = vmatprep.subr.bf16.mxu0 %v14366_v9 }
0x2499   :  { %11037 = vmatpush3.bf16.msra.mxu1 %v14367_v23  ;;  %11059 = vmatpush3.bf16.msra.mxu0 %v14368_v25 }
0x249a   :  { %12013 = vmatprep.subr.bf16.mxu1 %v17863_v2 }
0x254f   :  { %v5439_v20 = vpop.f32.mrb[56].mxu1  ;;  %v5482_v12 = vpop.f32.mrb[68].mxu0 }
0x2550   :  { %v5440_v49 = vadd.f32 %v5439_v20, %v5345_v11  ;;  %v5483_v18 = vadd.f32 %v5482_v12, %v5353_v43  ;;  %v5441_v34 = vpop.f32.mrb[57].mxu1  ;;  %v5484_v53 = vpop.f32.mrb[69].mxu0 }
0x2551   :  { %v5442_v46 = vadd.f32 %v5441_v34, %v5349_v4  ;;  %v5485_v13 = vadd.f32 %v5484_v53, %v5357_v51  ;;  %v5443_v14 = vpop.f32.mrb[58].mxu1  ;;  %v5486_v63 = vpop.f32.mrb[70].mxu0 }
0x2552   :  { %v5444_v10 = vadd.f32 %v5443_v14, %v5345_v11  ;;  %v5487_v24 = vadd.f32 %v5486_v63, %v5353_v43  ;;  %v5445_v55 = vpop.f32.mrb[59].mxu1  ;;  %v5488_v7 = vpop.f32.mrb[71].mxu0  ;;  %v5491_v28 = vmax.f32 %v5440_v49, 0.0  ;;  %v5493_v19 = vmax.f32 %v5483_v18, 0.0 }
0x2553   :  { %v5446_v58 = vadd.f32 %v5445_v55, %v5349_v4  ;;  %v5489_v52 = vadd.f32 %v5488_v7, %v5357_v51  ;;  %v5492_v62 = vmax.f32 %v5442_v46, 0.0  ;;  %v5494_v17 = vmax.f32 %v5485_v13, 0.0 }
0x2554   :  { %v5495_v30 = vmax.f32 %v5444_v10, 0.0  ;;  %v5497_v5 = vmax.f32 %v5487_v24, 0.0 }
0x2555   :  { %v5496_v37 = vmax.f32 %v5446_v58, 0.0  ;;  %v5498_v8 = vmax.f32 %v5489_v52, 0.0 }
0x2556   :  { %v5564_v57 = vpack.c.bf16 %v5495_v30, %v5491_v28  ;;  %v5566_v31 = vpack.c.bf16 %v5497_v5, %v5493_v19  ;;  %v14369_v30 = vld [vmem:[%s15742_s2 + $0x10] sm:$0xff]  }
0x2557   :  { %v5565_v27 = vpack.c.bf16 %v5496_v37, %v5492_v62  ;;  %v5567_v9 = vpack.c.bf16 %v5498_v8, %v5494_v17 }
0x2559   :  { %5798 = vmatprep.mubr.bf16.mxu1 %v5565_v27  ;;  %5839 = vmatprep.mubr.bf16.mxu0 %v5567_v9 }
0x255a   :  { %5799 = vmatmul.mubr.bf16.vlgmr.msra.gmra.mrb[60].mxu1 %v5564_v57  ;;  %5840 = vmatmul.mubr.bf16.vlgmr.msra.gmra.mrb[72].mxu0 %v5566_v31 }
0x255b   :  { %12017 = vmatprep.mubr.msk.bf16.mxu1 %vm14677_vm0, %v17863_v2  ;;  %12014 = vmatpush3.bf16.msra.mxu1 %v14369_v30 }
0x255c   :  { %12015 = vmatprep.subr.bf16.mxu1 %v17863_v2 }
0x262d   :  { %v11038_v23 = vpop.f32.mrb[60].mxu1  ;;  %v11060_v25 = vpop.f32.mrb[72].mxu0 }
0x262e   :  { %v11039_v11 = vpop.f32.mrb[61].mxu1  ;;  %v11061_v43 = vpop.f32.mrb[73].mxu0 }
0x262f   :  { %v11040_v4 = vadd.f32 %v11039_v11, %v11038_v23  ;;  %v11062_v51 = vadd.f32 %v11061_v43, %v11060_v25  ;;  %v11041_v20 = vpop.f32.mrb[62].mxu1  ;;  %v11063_v12 = vpop.f32.mrb[74].mxu0 }
0x2630   :  { %v11042_v49 = vpop.f32.mrb[63].mxu1  ;;  %v11064_v18 = vpop.f32.mrb[75].mxu0 }
0x2631   :  { %v5801_v34 = vadd.f32 %v11040_v4, %v10130_v42  ;;  %v11043_v53 = vadd.f32 %v11042_v49, %v11041_v20  ;;  %v11065_v46 = vadd.f32 %v11064_v18, %v11063_v12 }
0x2633   :  { %v5842_v13 = vadd.f32 %v11062_v51, %v5801_v34  ;;  %v5804_v14 = vadd.f32 %v11043_v53, %v10130_v42  ;;  %v10163_v51 = vld [vmem:[%s16635_s12] ss:$0 sm:$0xff] }
0x2634   :  { %v10164_v53 = vld [vmem:[%s16640_s28] ss:$0 sm:$0xff] }
0x2635   :  { %v5848_v63 = vadd.f32 %v5842_v13, %v16565_v59  ;;  %v5845_v10 = vadd.f32 %v11065_v46, %v5804_v14  ;;  %v14370_v59 = vld [vmem:[%s15742_s2 + $0x18] sm:$0xff]  }
0x2636   :  { %12016 = vmatpush3.bf16.msra.mxu1 %v14370_v59 }
0x2637   :  { %v5849_v24 = vadd.f32 %v5845_v10, %v16567_v41  ;;  %v5852_v55 = vsel %vm288_vm1, %v5848_v63, 0.0  ;;  %v5860_v7 = vmul.f32 %v5848_v63, %v5848_v63  ;;  %13122 = vmatprep.subr.bf16.mxu1 %v15984_v21 }
0x2638   :  { %5853 = vadd.xlane.f32.xlu1 %v5852_v55 }
0x2639   :  { %v5855_v58 = vsel %vm288_vm1, %v5849_v24, 0.0  ;;  %v5861_v52 = vmul.f32 %v5849_v24, %v5849_v24  ;;  %v5862_v28 = vsel %vm288_vm1, %v5860_v7, 0.0 }
0x263a   :  { %5856 = vadd.xlane.f32.xlu0 %v5855_v58 }
0x263b   :  { %v5865_v19 = vsel %vm288_vm1, %v5861_v52, 0.0 }
0x263c   :  { %5863 = vadd.xlane.f32.xlu1 %v5862_v28 }
0x263e   :  { %5866 = vadd.xlane.f32.xlu0 %v5865_v19 }
0x26c5   :  { %v5854_v41 = vpop.xlane.xlu1 %5853 }
0x26c6   :  { %v5858_v5 = vmul.f32 0.03125, %v5854_v41 }
0x26c7   :  { %v5857_v62 = vpop.xlane.xlu0 %5856 }
0x26c8   :  { %v5859_v17 = vmul.f32 0.03125, %v5857_v62  ;;  %v5870_v8 = vmul.f32 %v5858_v5, %v5858_v5  ;;  %v5874_v43 = vsub.f32 %v5848_v63, %v5858_v5  ;;  %v10175_v63 = vld [vmem:[%s15869_s4 + $0x1] ss:$0 sm:$0xff] }
0x26c9   :  { %v5864_v37 = vpop.xlane.xlu1 %5863 }
0x26ca   :  { %v5868_v57 = vmul.f32 0.03125, %v5864_v37  ;;  %v5871_v27 = vmul.f32 %v5859_v17, %v5859_v17  ;;  %v5875_v20 = vsub.f32 %v5849_v24, %v5859_v17 }
0x26cb   :  { %v5867_v31 = vpop.xlane.xlu0 %5866 }
0x26cc   :  { %v5872_v9 = vsub.f32 %v5868_v57, %v5870_v8  ;;  %v5869_v23 = vmul.f32 0.03125, %v5867_v31 }
0x26ce   :  { %v5876_v25 = vadd.f32 1e-05, %v5872_v9  ;;  %v5873_v42 = vsub.f32 %v5869_v23, %v5871_v27 }
0x26d0   :  { %14553 = vrsqrt.f32 %v5876_v25  ;;  %v5877_v11 = vadd.f32 1e-05, %v5873_v42  ;;  %v17946_v42 = vld [vmem:[#allocation34_spill] sm:$0xff] }
0x26d2   :  { %14555 = vrsqrt.f32 %v5877_v11 }
0x26da   :  { %v14554_v4 = vpop.eup %14553 }
0x26db   :  { %v5880_v12 = vmul.f32 %v14554_v4, %v5874_v43 }
0x26dc   :  { %v14556_v49 = vpop.eup %14555 }
0x26dd   :  { %v5881_v18 = vmul.f32 %v14556_v49, %v5875_v20  ;;  %v5888_v34 = vmul.f32 %v10163_v51, %v5880_v12  ;;  %v17948_v12 = vld [vmem:[#allocation32_spill] sm:$0xff] }
0x26df   :  { %v5889_v46 = vmul.f32 %v10163_v51, %v5881_v18  ;;  %v16644_v13 = vadd.f32 %v10164_v53, %v5888_v34  ;;  %v17947_v51 = vld [vmem:[#allocation29_spill] sm:$0xff] }
0x26e0   :  { %v17949_v34 = vld [vmem:[#allocation41_spill] sm:$0xff] }
0x26e1   :  { %v16646_v14 = vadd.f32 %v10164_v53, %v5889_v46  ;;  %v17950_v46 = vld [vmem:[#allocation42_spill] sm:$0xff] }
0x26e3   :  { %v5912_v10 = vpack.c.bf16 %v16646_v14, %v16644_v13 }
0x26e5   :  { %12018 = vmatmul.mubr.msk.bf16.vlgmr.msra.gmra.mrb[64].mxu1 %vm288_vm1, %v5912_v10 }
0x26e6   :  { %13124 = vmatpush3.bf16.msra.mxu1 %v15984_v21 }
0x26e7   :  { %13126 = vmatprep.subr.bf16.mxu1 %v15987_v32 }
0x26ea   :  { %13128 = vmatpush3.bf16.msra.mxu1 %v15987_v32 }
0x26eb   :  { %13130 = vmatprep.subr.bf16.mxu1 %v15994_v54 }
0x26ee   :  { %13132 = vmatpush3.bf16.msra.mxu1 %v15994_v54 }
0x26ef   :  { %13134 = vmatprep.subr.bf16.mxu1 %v16000_v3 }
0x26f2   :  { %13136 = vmatpush3.bf16.msra.mxu1 %v16000_v3 }
0x26f3   :  { %13138 = vmatprep.subr.bf16.mxu1 %v16017_v45 }
0x26f6   :  { %13140 = vmatpush3.bf16.msra.mxu1 %v16017_v45 }
0x26f7   :  { %13142 = vmatprep.subr.bf16.mxu1 %v16022_v16 }
0x26fa   :  { %13144 = vmatpush3.bf16.msra.mxu1 %v16022_v16 }
0x26fb   :  { %13146 = vmatprep.subr.bf16.mxu1 %v16031_v26 }
0x26fe   :  { %13148 = vmatpush3.bf16.msra.mxu1 %v16031_v26 }
0x26ff   :  { %13150 = vmatprep.subr.bf16.mxu1 %v16041_v15 }
0x2702   :  { %13152 = vmatpush3.bf16.msra.mxu1 %v16041_v15 }
0x27b8   :  { %v5968_v24 = vpop.f32.mrb[64].mxu1 }
0x27b9   :  { %v16667_v55 = vadd.f32 %v10175_v63, %v5968_v24  ;;  %v12019_v7 = vpop.f32.mrb[65].mxu1 }
0x27ba   :  { %v5971_v58 = vpop.f32.mrb[66].mxu1 }
0x27bb   :  { %v16669_v52 = vadd.f32 %v10175_v63, %v5971_v58  ;;  %v12020_v28 = vpop.f32.mrb[67].mxu1  ;;  %12053 = vmatprep.mubr.msk.f32.mxu0 %vm288_vm1, %v16667_v55  ;;  %v5977_v19 = vmul.f32 %v16667_v55, %v15852_v39  ;;  %v5975_v59 = vmul.f32 %v16667_v55, %v15850_v6  ;;  %v5983_v8 = vmul.f32 %v16667_v55, %v15874_v33  ;;  %v10203_v33 = vld [vmem:[%s16397_s25 + $0x1] ss:$0 sm:$0xff] }
0x27bc   :  { %v5979_v57 = vmul.f32 %v16667_v55, %v15860_v38  ;;  %v5987_v25 = vmul.f32 %v16667_v55, %v15905_v60  ;;  %v5981_v11 = vmul.f32 %v16667_v55, %v17946_v42  ;;  %v5985_v49 = vmul.f32 %v16667_v55, %v17948_v12 }
0x27bd   :  { %v5978_v30 = vmul.f32 %v16669_v52, %v15854_v35  ;;  %v5976_v41 = vmul.f32 %v16669_v52, %v15856_v61  ;;  %v5984_v17 = vmul.f32 %v16669_v52, %v15871_v40  ;;  %v5980_v37 = vmul.f32 %v16669_v52, %v15858_v1 }
0x27be   :  { %v5988_v9 = vmul.f32 %v16669_v52, %v15899_v50  ;;  %v5982_v23 = vmul.f32 %v16669_v52, %v15862_v56  ;;  %v5986_v20 = vmul.f32 %v16669_v52, %v17947_v51  ;;  %v5990_v53 = vmul.f32 %v16669_v52, %v17949_v34 }
0x27bf   :  { %v13936_v5 = vpack.i.bf16 %v5978_v30, %v5977_v19  ;;  %v13931_v62 = vpack.i.bf16 %v5976_v41, %v5975_v59  ;;  %v13951_v31 = vpack.i.bf16 %v5984_v17, %v5983_v8  ;;  %v13941_v27 = vpack.i.bf16 %v5980_v37, %v5979_v57 }
0x27c0   :  { %v13961_v43 = vpack.i.bf16 %v5988_v9, %v5987_v25  ;;  %v13946_v4 = vpack.i.bf16 %v5982_v23, %v5981_v11  ;;  %v13956_v18 = vpack.i.bf16 %v5986_v20, %v5985_v49  ;;  %v5989_v10 = vmul.f32 %v16667_v55, %v17950_v46  ;;  %v17991_v46 = vld [vmem:[#allocation16_spill] sm:$0xff] }
0x27c1   :  { %13937 = vrot.lane.b32.xlu0 %v13936_v5, %s14681_s19  ;;  %13932 = vrot.lane.b32.xlu1 %v13931_v62, %s14681_s19 }
0x27c2   :  { %v13966_v63 = vpack.i.bf16 %v5990_v53, %v5989_v10 }
0x27c5   :  { %13952 = vrot.lane.b32.xlu0 %v13951_v31, %s14681_s19  ;;  %13942 = vrot.lane.b32.xlu1 %v13941_v27, %s14681_s19 }
0x27c9   :  { %13962 = vrot.lane.b32.xlu0 %v13961_v43, %s14681_s19  ;;  %13947 = vrot.lane.b32.xlu1 %v13946_v4, %s14681_s19 }
0x27cd   :  { %13957 = vrot.lane.b32.xlu1 %v13956_v18, %s14681_s19 }
0x27d1   :  { %13967 = vrot.lane.b32.xlu1 %v13966_v63, %s14681_s19 }
0x2833   :  { %v13938_v24 = vpop.permute.xlu0 %13937  ;;  %v13933_v7 = vpop.permute.xlu1 %13932 }
0x2834   :  { %v13940_v58 = vunpack.i.h.bf16 %v13938_v24  ;;  %v13939_v28 = vunpack.i.l.bf16 %v13938_v24  ;;  %v13935_v19 = vunpack.i.h.bf16 %v13933_v7  ;;  %v13934_v30 = vunpack.i.l.bf16 %v13933_v7 }
0x2836   :  { %v13073_v59 = vpack.c.bf16 %v13935_v19, %v13934_v30  ;;  %v13079_v41 = vpack.c.bf16 %v13940_v58, %v13939_v28  ;;  %v14635_v30 = vld [vmem:[%s16008_s21 + $0x8] sm:$0xff] }
0x2837   :  { %v13943_v5 = vpop.permute.xlu1 %13942  ;;  %v13953_v9 = vpop.permute.xlu0 %13952 }
0x2838   :  { %13075 = vmatprep.subr.msk.bf16.mxu0 %vm14922_vm2, %v13073_v59  ;;  %v13945_v62 = vunpack.i.h.bf16 %v13943_v5  ;;  %v13944_v17 = vunpack.i.l.bf16 %v13943_v5  ;;  %v13955_v23 = vunpack.i.h.bf16 %v13953_v9  ;;  %v13954_v25 = vunpack.i.l.bf16 %v13953_v9  ;;  %v14636_v5 = vld [vmem:[%s16008_s21] sm:$0xff] }
0x2839   :  { %13078 = vmatpush3.bf16.xpose.msk.msra.mxu0 %vm14922_vm2, %v13073_v59  ;;  %v17954_v9 = vld [vmem:[#allocation50_spill] sm:$0xff] }
0x283a   :  { %13081 = vmatprep.subr.msk.bf16.mxu0 %vm14922_vm2, %v13079_v41  ;;  %v13085_v37 = vpack.c.bf16 %v13945_v62, %v13944_v17  ;;  %v13097_v11 = vpack.c.bf16 %v13955_v23, %v13954_v25  ;;  %v5994_v17 = vmul.f32 %v16669_v52, %v16076_v48  ;;  %v5997_v23 = vmul.f32 %v16667_v55, %v17954_v9  ;;  %v17955_v25 = vld [vmem:[#allocation43_spill] sm:$0xff]  ;;  %v17990_v48 = vld [vmem:[#allocation17_spill] sm:$0xff] }
0x283b   :  { %v13948_v8 = vpop.permute.xlu1 %13947  ;;  %v13963_v18 = vpop.permute.xlu0 %13962 }
0x283c   :  { %v13950_v57 = vunpack.i.h.bf16 %v13948_v8  ;;  %v13949_v31 = vunpack.i.l.bf16 %v13948_v8  ;;  %v13965_v53 = vunpack.i.h.bf16 %v13963_v18  ;;  %v13964_v10 = vunpack.i.l.bf16 %v13963_v18 }
0x283e   :  { %v13091_v27 = vpack.c.bf16 %v13950_v57, %v13949_v31  ;;  %v13109_v63 = vpack.c.bf16 %v13965_v53, %v13964_v10  ;;  %v17952_v31 = vld [vmem:[#allocation49_spill] sm:$0xff]  ;;  %v17958_v10 = vld [vmem:[#allocation54_spill] sm:$0xff] }
0x283f   :  { %v13958_v43 = vpop.permute.xlu1 %13957 }
0x2840   :  { %v13960_v4 = vunpack.i.h.bf16 %v13958_v43  ;;  %v13959_v20 = vunpack.i.l.bf16 %v13958_v43 }
0x2841   :  { %13084 = vmatpush3.bf16.xpose.msk.msra.mxu0 %vm14922_vm2, %v13079_v41 }
0x2842   :  { %13087 = vmatprep.subr.msk.bf16.mxu0 %vm14922_vm2, %v13085_v37  ;;  %v13103_v49 = vpack.c.bf16 %v13960_v4, %v13959_v20  ;;  %v17956_v4 = vld [vmem:[#allocation44_spill] sm:$0xff] }
0x2843   :  { %v13968_v24 = vpop.permute.xlu1 %13967  ;;  %v5991_v20 = vmul.f32 %v16667_v55, %v17956_v4 }
0x2844   :  { %v13970_v7 = vunpack.i.h.bf16 %v13968_v24  ;;  %v13969_v58 = vunpack.i.l.bf16 %v13968_v24  ;;  %v17959_v24 = vld [vmem:[#allocation47_spill] sm:$0xff] }
0x2846   :  { %v13115_v28 = vpack.c.bf16 %v13970_v7, %v13969_v58  ;;  %v5996_v7 = vmul.f32 %v16669_v52, %v17959_v24  ;;  %v14650_v24 = vld [vmem:[%s14744_s13 + $0x68] sm:$0xff] }
0x2849   :  { %13090 = vmatpush3.bf16.xpose.msk.msra.mxu0 %vm14922_vm2, %v13085_v37  ;;  %v17951_v37 = vld [vmem:[#allocation46_spill] sm:$0xff] }
0x284a   :  { %13093 = vmatprep.subr.msk.bf16.mxu0 %vm14922_vm2, %v13091_v27  ;;  %v5993_v8 = vmul.f32 %v16667_v55, %v17951_v37 }
0x284c   :  { %v13976_v57 = vpack.i.bf16 %v5994_v17, %v5993_v8  ;;  %v17962_v17 = vld [vmem:[#allocation58_spill] sm:$0xff] }
0x284d   :  { %v6005_v8 = vmul.f32 %v16667_v55, %v17962_v17 }
0x2851   :  { %13096 = vmatpush3.bf16.xpose.msk.msra.mxu0 %vm14922_vm2, %v13091_v27  ;;  %v5998_v27 = vmul.f32 %v16669_v52, %v17952_v31 }
0x2852   :  { %13099 = vmatprep.subr.msk.bf16.mxu0 %vm14922_vm2, %v13097_v11 }
0x2853   :  { %v13986_v43 = vpack.i.bf16 %v5998_v27, %v5997_v23 }
0x2859   :  { %13102 = vmatpush3.bf16.xpose.msk.msra.mxu0 %vm14922_vm2, %v13097_v11  ;;  %v5992_v11 = vmul.f32 %v16669_v52, %v17955_v25 }
0x285a   :  { %13105 = vmatprep.subr.msk.bf16.mxu0 %vm14922_vm2, %v13103_v49 }
0x285b   :  { %v13971_v53 = vpack.i.bf16 %v5992_v11, %v5991_v20  ;;  %v17964_v11 = vld [vmem:[#allocation52_spill] sm:$0xff] }
0x2861   :  { %13108 = vmatpush3.bf16.xpose.msk.msra.mxu0 %vm14922_vm2, %v13103_v49  ;;  %v17957_v49 = vld [vmem:[#allocation53_spill] sm:$0xff] }
0x2862   :  { %13111 = vmatprep.subr.msk.bf16.mxu0 %vm14922_vm2, %v13109_v63  ;;  %v6002_v18 = vmul.f32 %v16669_v52, %v17957_v49 }
0x2869   :  { %13114 = vmatpush3.bf16.xpose.msk.msra.mxu0 %vm14922_vm2, %v13109_v63  ;;  %v6001_v63 = vmul.f32 %v16667_v55, %v17958_v10  ;;  %v14651_v10 = vld [vmem:[%s14744_s13 + $0x70] sm:$0xff] }
0x286a   :  { %13117 = vmatprep.subr.msk.bf16.mxu0 %vm14922_vm2, %v13115_v28 }
0x286b   :  { %v13996_v58 = vpack.i.bf16 %v6002_v18, %v6001_v63  ;;  %v17965_v18 = vld [vmem:[#allocation55_spill] sm:$0xff]  ;;  %v17966_v63 = vld [vmem:[#allocation56_spill] sm:$0xff] }
0x2871   :  { %13120 = vmatpush3.bf16.xpose.msk.msra.mxu0 %vm14922_vm2, %v13115_v28  ;;  %v17960_v28 = vld [vmem:[#allocation48_spill] sm:$0xff] }
0x2872   :  { %12126 = vmatprep.subr.bf16.mxu0 %v17863_v2 }
0x2878   :  { %12054 = vmatmul.mubr.msk.f32.vlgmr.msra.gmra.mrb[62].mxu0 %vm288_vm1, %v16669_v52 }
0x2879   :  { %12130 = vmatprep.mubr.msk.bf16.mxu0 %vm14677_vm0, %v17863_v2 }
0x294b   :  { %v12055_v19 = vpop.f32.mrb[62].mxu0 }
0x294c   :  { %v6165_v59 = vadd.f32 %v14635_v30, %v12055_v19  ;;  %v6159_v41 = vpop.f32.mrb[63].mxu0  ;;  %v5995_v19 = vmul.f32 %v16667_v55, %v17960_v28  ;;  %v17961_v30 = vld [vmem:[#allocation57_spill] sm:$0xff] }
0x294d   :  { %v6160_v62 = vadd.f32 %v14636_v5, %v6159_v41  ;;  %v6006_v41 = vmul.f32 %v16669_v52, %v17961_v30  ;;  %v14649_v28 = vld [vmem:[%s14744_s13 + $0x58] sm:$0xff] }
0x294e   :  { %6170 = vmax.xlane.f32.xlu1 %v6165_v59  ;;  %v13981_v5 = vpack.i.bf16 %v5996_v7, %v5995_v19  ;;  %v6003_v7 = vmul.f32 %v16667_v55, %v17966_v63 }
0x294f   :  { %6168 = vmax.xlane.f32.xlu0 %v6160_v62  ;;  %v14006_v23 = vpack.i.bf16 %v6006_v41, %v6005_v8 }
0x295f   :  { %13977 = vrot.lane.b32.xlu1 %v13976_v57, %s17953_s30  ;;  %v17963_v57 = vld [vmem:[#allocation51_spill] sm:$0xff] }
0x2960   :  { %v6000_v27 = vmul.f32 %v16669_v52, %v17963_v57 }
0x2963   :  { %13987 = vrot.lane.b32.xlu1 %v13986_v43, %s17953_s30  ;;  %v5999_v43 = vmul.f32 %v16667_v55, %v17964_v11 }
0x2965   :  { %13972 = vrot.lane.b32.xlu0 %v13971_v53, %s17953_s30  ;;  %v13991_v20 = vpack.i.bf16 %v6000_v27, %v5999_v43  ;;  %v6004_v53 = vmul.f32 %v16669_v52, %v17965_v18 }
0x2967   :  { %13997 = vrot.lane.b32.xlu1 %v13996_v58, %s17953_s30  ;;  %v14001_v58 = vpack.i.bf16 %v6004_v53, %v6003_v7 }
0x2969   :  { %13982 = vrot.lane.b32.xlu0 %v13981_v5, %s17953_s30 }
0x296b   :  { %14007 = vrot.lane.b32.xlu1 %v14006_v23, %s17953_s30 }
0x296d   :  { %13992 = vrot.lane.b32.xlu0 %v13991_v20, %s17953_s30 }
0x2971   :  { %14002 = vrot.lane.b32.xlu0 %v14001_v58, %s17953_s30 }
0x29db   :  { %v6171_v19 = vpop.xlane.xlu1 %6170 }
0x29dc   :  { %v6173_v5 = vsub.f32 %v6165_v59, %v6171_v19  ;;  %v6169_v41 = vpop.xlane.xlu0 %6168 }
0x29dd   :  { %v6172_v8 = vsub.f32 %v6160_v62, %v6169_v41 }
0x29de   :  { %v6176_v57 = vmul.f32 1.442695, %v6173_v5 }
0x29df   :  { %v6174_v11 = vmul.f32 1.442695, %v6172_v8  ;;  %v13978_v43 = vpop.permute.xlu1 %13977 }
0x29e0   :  { %v13973_v17 = vpop.permute.xlu0 %13972  ;;  %v13980_v20 = vunpack.i.h.bf16 %v13978_v43  ;;  %v13979_v18 = vunpack.i.l.bf16 %v13978_v43 }
0x29e1   :  { %14557 = vpow2.f32 %v6174_v11  ;;  %v13975_v27 = vunpack.i.h.bf16 %v13973_v17  ;;  %v13974_v23 = vunpack.i.l.bf16 %v13973_v17 }
0x29e2   :  { %14559 = vpow2.f32 %v6176_v57  ;;  %v13157_v58 = vpack.c.bf16 %v13980_v20, %v13979_v18 }
0x29e3   :  { %v13153_v52 = vpack.c.bf16 %v13975_v27, %v13974_v23  ;;  %v13988_v62 = vpop.permute.xlu1 %13987 }
0x29e4   :  { %v13983_v55 = vpop.permute.xlu0 %13982  ;;  %v13990_v11 = vunpack.i.h.bf16 %v13988_v62  ;;  %v13989_v5 = vunpack.i.l.bf16 %v13988_v62 }
0x29e5   :  { %13154 = vmatprep.subr.bf16.mxu1 %v13153_v52  ;;  %v13985_v59 = vunpack.i.h.bf16 %v13983_v55  ;;  %v13984_v19 = vunpack.i.l.bf16 %v13983_v55 }
0x29e6   :  { %v13165_v41 = vpack.c.bf16 %v13990_v11, %v13989_v5 }
0x29e7   :  { %v13161_v17 = vpack.c.bf16 %v13985_v59, %v13984_v19  ;;  %v13998_v23 = vpop.permute.xlu1 %13997 }
0x29e8   :  { %v13993_v57 = vpop.permute.xlu0 %13992  ;;  %v14000_v43 = vunpack.i.h.bf16 %v13998_v23  ;;  %v13999_v18 = vunpack.i.l.bf16 %v13998_v23 }
0x29e9   :  { %v13995_v8 = vunpack.i.h.bf16 %v13993_v57  ;;  %v13994_v27 = vunpack.i.l.bf16 %v13993_v57 }
0x29eb   :  { %v14558_v53 = vpop.eup %14557  ;;  %v13169_v20 = vpack.c.bf16 %v13995_v8, %v13994_v27  ;;  %v14008_v59 = vpop.permute.xlu1 %14007 }
0x29ec   :  { %v14560_v7 = vpop.eup %14559  ;;  %12088 = vmatprep.mubr.f32.mxu1 %v14558_v53  ;;  %v14003_v55 = vpop.permute.xlu0 %14002  ;;  %v14009_v19 = vunpack.i.l.bf16 %v14008_v59 }
0x29ed   :  { %12089 = vmatmul.mubr.f32.vlgmr.msra.gmra.mrb[68].mxu1 %v14560_v7  ;;  %v14005_v63 = vunpack.i.h.bf16 %v14003_v55  ;;  %v14004_v62 = vunpack.i.l.bf16 %v14003_v55  ;;  %v14373_v55 = vld [vmem:[%s16189_s10 + $0x10] sm:$0xff]  }
0x29ee   :  { %13156 = vmatpush3.bf16.msra.mxu1 %v13153_v52  ;;  %v13173_v52 = vpack.c.bf16 %v14000_v43, %v13999_v18  ;;  %v14372_v43 = vld [vmem:[%s16180_s6 + $0x18] sm:$0xff]  }
0x29ef   :  { %13158 = vmatprep.subr.bf16.mxu1 %v13157_v58  ;;  %v13177_v11 = vpack.c.bf16 %v14005_v63, %v14004_v62  ;;  %v14374_v62 = vld [vmem:[%s16189_s10 + $0x18] sm:$0xff]  }
0x29f2   :  { %13160 = vmatpush3.bf16.msra.mxu1 %v13157_v58  ;;  %v14010_v58 = vunpack.i.h.bf16 %v14008_v59  ;;  %v17969_v59 = vld [vmem:[#allocation19_spill] sm:$0xff] }
0x29f3   :  { %13162 = vmatprep.subr.bf16.mxu1 %v13161_v17 }
0x29f4   :  { %v13181_v5 = vpack.c.bf16 %v14010_v58, %v14009_v19  ;;  %v17970_v58 = vld [vmem:[#allocation20_spill] sm:$0xff]  ;;  %v17971_v19 = vld [vmem:[#allocation21_spill] sm:$0xff] }
0x29f6   :  { %13164 = vmatpush3.bf16.msra.mxu1 %v13161_v17  ;;  %v14371_v17 = vld [vmem:[%s16180_s6 + $0x10] sm:$0xff]  }
0x29f7   :  { %13166 = vmatprep.subr.bf16.mxu1 %v13165_v41  ;;  %12127 = vmatpush3.bf16.msra.mxu0 %v14371_v17  ;;  %v17974_v17 = vld [vmem:[#allocation24_spill] sm:$0xff] }
0x29f8   :  { %12128 = vmatprep.subr.bf16.mxu0 %v17863_v2 }
0x29fa   :  { %13168 = vmatpush3.bf16.msra.mxu1 %v13165_v41 }
0x29fb   :  { %13170 = vmatprep.subr.bf16.mxu1 %v13169_v20  ;;  %12129 = vmatpush3.bf16.msra.mxu0 %v14372_v43 }
0x29fc   :  { %12142 = vmatprep.subr.bf16.mxu0 %v17863_v2 }
0x29fe   :  { %13172 = vmatpush3.bf16.msra.mxu1 %v13169_v20 }
0x29ff   :  { %13174 = vmatprep.subr.bf16.mxu1 %v13173_v52 }
0x2a02   :  { %13176 = vmatpush3.bf16.msra.mxu1 %v13173_v52 }
0x2a03   :  { %13178 = vmatprep.subr.bf16.mxu1 %v13177_v11 }
0x2a06   :  { %13180 = vmatpush3.bf16.msra.mxu1 %v13177_v11  ;;  %v17972_v11 = vld [vmem:[#allocation22_spill] sm:$0xff] }
0x2a07   :  { %13182 = vmatprep.subr.bf16.mxu1 %v13181_v5 }
0x2a0a   :  { %13184 = vmatpush3.bf16.msra.mxu1 %v13181_v5  ;;  %v17973_v5 = vld [vmem:[#allocation23_spill] sm:$0xff] }
0x2a0b   :  { %12134 = vmatprep.subr.bf16.mxu1 %v17863_v2 }
0x2ac0   :  { %v12090_v57 = vpop.f32.mrb[68].mxu1 }
0x2ac1   :  { %14561 = vrcp.f32 %v12090_v57  ;;  %v6244_v41 = vpop.f32.mrb[69].mxu1  ;;  %v17975_v57 = vld [vmem:[#allocation25_spill] sm:$0xff] }
0x2ac2   :  { %14563 = vrcp.f32 %v6244_v41  ;;  %v14375_v41 = vld [vmem:[%s16226_s9 + $0x10] sm:$0xff]  }
0x2acb   :  { %v14562_v8 = vpop.eup %14561 }
0x2acc   :  { %v14564_v63 = vpop.eup %14563  ;;  %v6256_v23 = vmul.f32 %v14562_v8, %v14560_v7  ;;  %v17968_v7 = vld [vmem:[#allocation59_spill] sm:$0xff]  ;;  %v14376_v8 = vld [vmem:[%s16226_s9 + $0x18] sm:$0xff]  }
0x2acd   :  { %v6254_v27 = vmul.f32 %v14564_v63, %v14558_v53  ;;  %v17967_v53 = vld [vmem:[#allocation18_spill] sm:$0xff] }
0x2ace   :  { %v10197_v63 = vld [vmem:[%s16234_s20 + $0x1] ss:$0 sm:$0xff] }
0x2acf   :  { %12123 = vmatprep.mubr.f32.mxu1 %v6254_v27 }
0x2ad0   :  { %12124 = vmatmul.mubr.f32.vlgmr.msra.gmra.mrb[70].mxu1 %v6256_v23 }
0x2ad1   :  { %12138 = vmatprep.mubr.msk.bf16.mxu1 %vm14677_vm0, %v17863_v2  ;;  %12135 = vmatpush3.bf16.msra.mxu1 %v14375_v41 }
0x2ad2   :  { %12136 = vmatprep.subr.bf16.mxu1 %v17863_v2 }
0x2ad5   :  { %12137 = vmatpush3.bf16.msra.mxu1 %v14376_v8 }
0x2ba3   :  { %v12125_v18 = vpop.f32.mrb[70].mxu1 }
0x2ba4   :  { %v6387_v20 = vpop.f32.mrb[71].mxu1 }
0x2ba5   :  { %v6396_v52 = vpack.c.bf16 %v12125_v18, %v6387_v20 }
0x2ba7   :  { %12131 = vmatmul.mubr.msk.bf16.vlgmr.msra.gmra.mrb[76].mxu0 %vm288_vm1, %v6396_v52 }
0x2ba8   :  { %12143 = vmatpush3.bf16.msra.mxu0 %v14373_v55  ;;  %12146 = vmatprep.mubr.msk.bf16.mxu0 %vm14677_vm0, %v17863_v2 }
0x2ba9   :  { %12144 = vmatprep.subr.bf16.mxu0 %v17863_v2 }
0x2bac   :  { %12145 = vmatpush3.bf16.msra.mxu0 %v14374_v62 }
0x2bad   :  { %13234 = vmatprep.subr.bf16.mxu0 %v17967_v53 }
0x2baf   :  { %12147 = vmatmul.mubr.msk.bf16.vlgmr.msra.gmra.mrb[80].mxu0 %vm288_vm1, %v17968_v7 }
0x2bb0   :  { %13236 = vmatpush3.bf16.msra.mxu0 %v17967_v53  ;;  %v14647_v53 = vld [vmem:[%s14744_s13 + $0x38] sm:$0xff] }
0x2bb1   :  { %13238 = vmatprep.subr.bf16.mxu0 %v17969_v59 }
0x2bb4   :  { %13240 = vmatpush3.bf16.msra.mxu0 %v17969_v59 }
0x2bb5   :  { %13242 = vmatprep.subr.bf16.mxu0 %v17970_v58 }
0x2bb8   :  { %13244 = vmatpush3.bf16.msra.mxu0 %v17970_v58 }
0x2bb9   :  { %13246 = vmatprep.subr.bf16.mxu0 %v17971_v19 }
0x2bbc   :  { %13248 = vmatpush3.bf16.msra.mxu0 %v17971_v19 }
0x2bbd   :  { %13250 = vmatprep.subr.bf16.mxu0 %v17972_v11 }
0x2bc0   :  { %13252 = vmatpush3.bf16.msra.mxu0 %v17972_v11 }
0x2bc1   :  { %13254 = vmatprep.subr.bf16.mxu0 %v17973_v5 }
0x2bc4   :  { %13256 = vmatpush3.bf16.msra.mxu0 %v17973_v5  ;;  %v14639_v5 = vld [vmem:[%s14744_s13 + $0x20] sm:$0xff] }
0x2bc5   :  { %13258 = vmatprep.subr.bf16.mxu0 %v17974_v17 }
0x2bc8   :  { %13260 = vmatpush3.bf16.msra.mxu0 %v17974_v17  ;;  %v14637_v17 = vld [vmem:[%s14744_s13] sm:$0xff] }
0x2bc9   :  { %13262 = vmatprep.subr.bf16.mxu0 %v17975_v57 }
0x2bcc   :  { %13264 = vmatpush3.bf16.msra.mxu0 %v17975_v57 }
0x2c7a   :  { %v6452_v27 = vpop.f32.mrb[76].mxu0 }
0x2c7b   :  { %v6453_v23 = vadd.f32 %v10197_v63, %v6452_v27  ;;  %v12132_v43 = vpop.f32.mrb[77].mxu0  ;;  %v10224_v27 = vld [vmem:[%s16240_s18 + $0x1] ss:$0 sm:$0xff] }
0x2c7c   :  { %v6455_v18 = vpop.f32.mrb[78].mxu0 }
0x2c7d   :  { %v16828_v20 = vadd.f32 %v6453_v23, %v16644_v13  ;;  %v6456_v55 = vadd.f32 %v10197_v63, %v6455_v18  ;;  %v12133_v52 = vpop.f32.mrb[79].mxu0 }
0x2c7f   :  { %v16831_v62 = vadd.f32 %v6456_v55, %v16646_v14  ;;  %v6465_v41 = vsel %vm288_vm1, %v16828_v20, 0.0  ;;  %v6473_v8 = vmul.f32 %v16828_v20, %v16828_v20 }
0x2c80   :  { %6466 = vadd.xlane.f32.xlu0 %v6465_v41 }
0x2c81   :  { %v6468_v43 = vsel %vm288_vm1, %v16831_v62, 0.0  ;;  %v6474_v13 = vmul.f32 %v16831_v62, %v16831_v62  ;;  %v6475_v18 = vsel %vm288_vm1, %v6473_v8, 0.0 }
0x2c82   :  { %6469 = vadd.xlane.f32.xlu1 %v6468_v43  ;;  %v6647_v14 = vpop.f32.mrb[80].mxu0 }
0x2c83   :  { %v16842_v63 = vadd.f32 %v10224_v27, %v6647_v14  ;;  %v12148_v23 = vpop.f32.mrb[81].mxu0  ;;  %v6478_v52 = vsel %vm288_vm1, %v6474_v13, 0.0  ;;  %v14638_v14 = vld [vmem:[%s14744_s13 + $0x10] sm:$0xff] }
0x2c84   :  { %6476 = vadd.xlane.f32.xlu0 %v6475_v18  ;;  %v6650_v55 = vpop.f32.mrb[82].mxu0  ;;  %v14640_v18 = vld [vmem:[%s14744_s13 + $0x30] sm:$0xff] }
0x2c85   :  { %v16846_v41 = vadd.f32 %v10224_v27, %v6650_v55  ;;  %v12149_v57 = vpop.f32.mrb[83].mxu0  ;;  %v6654_v43 = vmul.f32 %v14637_v17, %v16842_v63  ;;  %v6656_v23 = vmul.f32 %v14638_v14, %v16842_v63  ;;  %v6658_v8 = vmul.f32 %v14639_v5, %v16842_v63  ;;  %v14641_v27 = vld [vmem:[%s14744_s13 + $0x40] sm:$0xff]  ;;  %v14644_v14 = vld [vmem:[%s14744_s13 + $0x8] sm:$0xff]  ;;  %v14645_v5 = vld [vmem:[%s14744_s13 + $0x18] sm:$0xff] }
0x2c86   :  { %v6660_v11 = vmul.f32 %v14640_v18, %v16842_v63  ;;  %v6662_v13 = vmul.f32 %v14641_v27, %v16842_v63  ;;  %v14642_v57 = vld [vmem:[%s14744_s13 + $0x50] sm:$0xff]  ;;  %v14643_v17 = vld [vmem:[%s14744_s13 + $0x60] sm:$0xff]  ;;  %v14646_v18 = vld [vmem:[%s14744_s13 + $0x28] sm:$0xff] }
0x2c87   :  { %v6664_v55 = vmul.f32 %v14642_v57, %v16842_v63  ;;  %v6666_v19 = vmul.f32 %v14643_v17, %v16842_v63  ;;  %v6655_v58 = vmul.f32 %v14644_v14, %v16846_v41  ;;  %v6657_v59 = vmul.f32 %v14645_v5, %v16846_v41  ;;  %v14648_v57 = vld [vmem:[%s14744_s13 + $0x48] sm:$0xff] }
0x2c88   :  { %v6659_v7 = vmul.f32 %v14646_v18, %v16846_v41  ;;  %v6661_v27 = vmul.f32 %v14647_v53, %v16846_v41  ;;  %6479 = vadd.xlane.f32.xlu0 %v6478_v52  ;;  %v6663_v30 = vmul.f32 %v14648_v57, %v16846_v41  ;;  %v6665_v17 = vmul.f32 %v14649_v28, %v16846_v41  ;;  %v14652_v28 = vld [vmem:[%s14744_s13 + $0x78] sm:$0xff] }
0x2c89   :  { %v6667_v14 = vmul.f32 %v14650_v24, %v16846_v41  ;;  %v6668_v5 = vmul.f32 %v14651_v10, %v16842_v63  ;;  %v16878_v49 = vpack.c.bf16 %v6655_v58, %v6654_v43  ;;  %v16880_v18 = vpack.c.bf16 %v6657_v59, %v6656_v23  ;;  %v17976_v10 = vld [vmem:[#allocation3_spill] sm:$0xff] }
0x2c8a   :  { %v16882_v4 = vpack.c.bf16 %v6659_v7, %v6658_v8  ;;  %v16884_v53 = vpack.c.bf16 %v6661_v27, %v6660_v11  ;;  %v16886_v52 = vpack.c.bf16 %v6663_v30, %v6662_v13  ;;  %v16888_v57 = vpack.c.bf16 %v6665_v17, %v6664_v55  ;;  %v17977_v7 = vld [vmem:[#allocation5_spill] sm:$0xff]  ;;  %v17978_v30 = vld [vmem:[#allocation2_spill] sm:$0xff]  ;;  %v17980_v8 = vld [vmem:[#allocation7_spill] sm:$0xff] }
0x2c8b   :  { %v16890_v25 = vpack.c.bf16 %v6667_v14, %v6666_v19  ;;  %v6669_v24 = vmul.f32 %v14652_v28, %v16846_v41  ;;  %13187 = vmatprep.subr.msk.bf16.mxu1 %vm14922_vm2, %v16878_v49  ;;  %v16899_v59 = vmul.f32 %v16842_v63, %v17976_v10  ;;  %v16903_v58 = vmul.f32 %v16846_v41, %v17977_v7  ;;  %v17979_v19 = vld [vmem:[#allocation4_spill] sm:$0xff]  ;;  %v17981_v55 = vld [vmem:[#allocation6_spill] sm:$0xff]  ;;  %v17982_v17 = vld [vmem:[#allocation11_spill] sm:$0xff] }
0x2c8c   :  { %v16907_v11 = vmul.f32 %v16842_v63, %v17978_v30  ;;  %v16911_v43 = vmul.f32 %v16846_v41, %v17979_v19  ;;  %v16917_v13 = vmul.f32 %v16842_v63, %v17980_v8  ;;  %v16921_v27 = vmul.f32 %v16846_v41, %v17981_v55  ;;  %v17984_v8 = vld [vmem:[#allocation9_spill] sm:$0xff]  ;;  %v17985_v7 = vld [vmem:[#allocation8_spill] sm:$0xff]  ;;  %v17986_v10 = vld [vmem:[#allocation15_spill] sm:$0xff] }
0x2c8d   :  { %v16913_v23 = vpack.c.bf16 %v6669_v24, %v6668_v5  ;;  %v16925_v14 = vmul.f32 %v16842_v63, %v17982_v17  ;;  %v17983_v5 = vld [vmem:[#allocation10_spill] sm:$0xff]  ;;  %v16937_v30 = vmul.f32 %v16842_v63, %v17984_v8  ;;  %v16943_v17 = vmul.f32 %v16846_v41, %v17985_v7  ;;  %v17988_v8 = vld [vmem:[#allocation13_spill] sm:$0xff]  ;;  %v17989_v55 = vld [vmem:[#allocation12_spill] sm:$0xff] }
0x2c8e   :  { %v16933_v24 = vmul.f32 %v16846_v41, %v17983_v5  ;;  %v16947_v28 = vmul.f32 %v16842_v63, %v17986_v10  ;;  %v17987_v19 = vld [vmem:[#allocation14_spill] sm:$0xff]  ;;  %v16957_v31 = vmul.f32 %v16842_v63, %v17988_v8  ;;  %v16961_v37 = vmul.f32 %v16846_v41, %v17989_v55 }
0x2c8f   :  { %v16951_v9 = vmul.f32 %v16846_v41, %v17987_v19  ;;  %v16969_v19 = vmul.f32 %v16842_v63, %v17990_v48  ;;  %v16973_v5 = vmul.f32 %v16846_v41, %v17991_v46 }
0x2d0d   :  { %v6467_v34 = vpop.xlane.xlu0 %6466 }
0x2d0e   :  { %v6471_v12 = vmul.f32 0.03125, %v6467_v34 }
0x2d0f   :  { %v6470_v7 = vpop.xlane.xlu1 %6469 }
0x2d10   :  { %v6483_v10 = vmul.f32 %v6471_v12, %v6471_v12  ;;  %v6472_v42 = vmul.f32 0.03125, %v6470_v7  ;;  %v6487_v55 = vsub.f32 %v16828_v20, %v6471_v12 }
0x2d11   :  { %v6477_v51 = vpop.xlane.xlu0 %6476 }
0x2d12   :  { %v6481_v60 = vmul.f32 0.03125, %v6477_v51  ;;  %v6484_v56 = vmul.f32 %v6472_v42, %v6472_v42  ;;  %v6488_v1 = vsub.f32 %v16831_v62, %v6472_v42  ;;  %v17992_v62 = vpack.i.bf16 %v16903_v58, %v16899_v59 }
0x2d13   :  { %v17997_v59 = vpack.i.bf16 %v16951_v9, %v16947_v28  ;;  %v17998_v58 = vpack.i.bf16 %v16961_v37, %v16957_v31 }
0x2d14   :  { %v6485_v63 = vsub.f32 %v6481_v60, %v6483_v10  ;;  %v10204_v60 = vld [vmem:[%s16402_s29 + $0x1] ss:$0 sm:$0xff] }
0x2d15   :  { %v6480_v48 = vpop.xlane.xlu0 %6479 }
0x2d16   :  { %v6489_v41 = vadd.f32 1e-05, %v6485_v63  ;;  %v6482_v46 = vmul.f32 0.03125, %v6480_v48 }
0x2d18   :  { %14565 = vrsqrt.f32 %v6489_v41  ;;  %v6486_v50 = vsub.f32 %v6482_v46, %v6484_v56  ;;  %v14653_v46 = vld [vmem:[%s16474_s15 + $0x8] sm:$0xff] }
0x2d1a   :  { %v6490_v8 = vadd.f32 1e-05, %v6486_v50 }
0x2d1c   :  { %14567 = vrsqrt.f32 %v6490_v8 }
0x2d22   :  { %v14566_v38 = vpop.eup %14565 }
0x2d23   :  { %v6493_v34 = vmul.f32 %v14566_v38, %v6487_v55 }
0x2d25   :  { %v6501_v51 = vmul.f32 %v10203_v33, %v6493_v34 }
0x2d26   :  { %v14568_v40 = vpop.eup %14567 }
0x2d27   :  { %v6494_v7 = vmul.f32 %v14568_v40, %v6488_v1  ;;  %v16983_v61 = vadd.f32 %v10204_v60, %v6501_v51  ;;  %v10220_v1 = vld [vmem:[%s16464_s5 + $0x1] ss:$0 sm:$0xff] }
0x2d29   :  { %v6502_v10 = vmul.f32 %v10203_v33, %v6494_v7 }
0x2d2b   :  { %v16985_v63 = vadd.f32 %v10204_v60, %v6502_v10 }
0x2d2d   :  { %v6532_v56 = vpack.c.bf16 %v16985_v63, %v16983_v61 }
0x2d2f   :  { %12139 = vmatmul.mubr.msk.bf16.vlgmr.msra.gmra.mrb[72].mxu1 %vm288_vm1, %v6532_v56 }
0x2d30   :  { %13190 = vmatpush3.bf16.xpose.msk.msra.mxu1 %vm14922_vm2, %v16878_v49  ;;  %v14654_v49 = vld [vmem:[%s16474_s15] sm:$0xff] }
0x2d31   :  { %13193 = vmatprep.subr.msk.bf16.mxu1 %vm14922_vm2, %v16880_v18 }
0x2d38   :  { %13196 = vmatpush3.bf16.xpose.msk.msra.mxu1 %vm14922_vm2, %v16880_v18  ;;  %v17993_v18 = vpack.i.bf16 %v16911_v43, %v16907_v11  ;;  %v17999_v11 = vpack.i.bf16 %v16973_v5, %v16969_v19 }
0x2d39   :  { %13199 = vmatprep.subr.msk.bf16.mxu1 %vm14922_vm2, %v16882_v4 }
0x2d40   :  { %13202 = vmatpush3.bf16.xpose.msk.msra.mxu1 %vm14922_vm2, %v16882_v4 }
0x2d41   :  { %13205 = vmatprep.subr.msk.bf16.mxu1 %vm14922_vm2, %v16884_v53 }
0x2d48   :  { %13208 = vmatpush3.bf16.xpose.msk.msra.mxu1 %vm14922_vm2, %v16884_v53  ;;  %v17994_v53 = vpack.i.bf16 %v16921_v27, %v16917_v13 }
0x2d49   :  { %13211 = vmatprep.subr.msk.bf16.mxu1 %vm14922_vm2, %v16886_v52 }
0x2d50   :  { %13214 = vmatpush3.bf16.xpose.msk.msra.mxu1 %vm14922_vm2, %v16886_v52  ;;  %v17995_v52 = vpack.i.bf16 %v16933_v24, %v16925_v14 }
0x2d51   :  { %13217 = vmatprep.subr.msk.bf16.mxu1 %vm14922_vm2, %v16888_v57 }
0x2d58   :  { %13220 = vmatpush3.bf16.xpose.msk.msra.mxu1 %vm14922_vm2, %v16888_v57  ;;  %v17996_v57 = vpack.i.bf16 %v16943_v17, %v16937_v30 }
0x2d59   :  { %13223 = vmatprep.subr.msk.bf16.mxu1 %vm14922_vm2, %v16890_v25 }
0x2d60   :  { %13226 = vmatpush3.bf16.xpose.msk.msra.mxu1 %vm14922_vm2, %v16890_v25 }
0x2d61   :  { %13229 = vmatprep.subr.msk.bf16.mxu1 %vm14922_vm2, %v16913_v23 }
0x2d68   :  { %13232 = vmatpush3.bf16.xpose.msk.msra.mxu1 %vm14922_vm2, %v16913_v23 }
0x2d69   :  { %12255 = vmatprep.subr.bf16.mxu1 %v17863_v2 }
0x2e02   :  { %v6588_v38 = vpop.f32.mrb[72].mxu1 }
0x2e03   :  { %v6589_v40 = vadd.f32 %v10220_v1, %v6588_v38  ;;  %v12140_v33 = vpop.f32.mrb[73].mxu1 }
0x2e04   :  { %v6591_v50 = vpop.f32.mrb[74].mxu1 }
0x2e05   :  { %v6592_v48 = vadd.f32 %v10220_v1, %v6591_v50  ;;  %v12141_v42 = vpop.f32.mrb[75].mxu1  ;;  %12182 = vmatprep.mubr.msk.f32.mxu1 %vm288_vm1, %v6589_v40 }
0x2e07   :  { %12183 = vmatmul.mubr.msk.f32.vlgmr.msra.gmra.mrb[76].mxu1 %vm288_vm1, %v6592_v48 }
0x2e08   :  { %12259 = vmatprep.mubr.msk.bf16.mxu1 %vm14677_vm0, %v17863_v2 }
0x2eda   :  { %v12184_v12 = vpop.f32.mrb[76].mxu1 }
0x2edb   :  { %v6812_v25 = vadd.f32 %v14653_v46, %v12184_v12  ;;  %v6806_v4 = vpop.f32.mrb[77].mxu1 }
0x2edc   :  { %v6807_v20 = vadd.f32 %v14654_v49, %v6806_v4 }
0x2edd   :  { %6817 = vmax.xlane.f32.xlu0 %v6812_v25 }
0x2ede   :  { %6815 = vmax.xlane.f32.xlu1 %v6807_v20 }
0x2eef   :  { %14012 = vrot.lane.b32.xlu1 %v17992_v62, %s14681_s19 }
0x2ef3   :  { %14017 = vrot.lane.b32.xlu0 %v17993_v18, %s14681_s19  ;;  %14022 = vrot.lane.b32.xlu1 %v17994_v53, %s14681_s19 }
0x2ef7   :  { %14032 = vrot.lane.b32.xlu0 %v17995_v52, %s14681_s19  ;;  %14027 = vrot.lane.b32.xlu1 %v17996_v57, %s14681_s19  ;;  %v14377_v57 = vld [vmem:[%s16513_s27 + $0x10] sm:$0xff]  }
0x2ef8   :  { %12256 = vmatpush3.bf16.msra.mxu1 %v14377_v57 }
0x2ef9   :  { %12257 = vmatprep.subr.bf16.mxu1 %v17863_v2 }
0x2efb   :  { %14042 = vrot.lane.b32.xlu0 %v17997_v59, %s14681_s19  ;;  %14037 = vrot.lane.b32.xlu1 %v17998_v58, %s14681_s19 }
0x2eff   :  { %14047 = vrot.lane.b32.xlu1 %v17999_v11, %s14681_s19 }
0x2f6a   :  { %v6818_v43 = vpop.xlane.xlu0 %6817 }
0x2f6b   :  { %v6820_v23 = vsub.f32 %v6812_v25, %v6818_v43  ;;  %v6816_v8 = vpop.xlane.xlu1 %6815 }
0x2f6c   :  { %v6819_v30 = vsub.f32 %v6807_v20, %v6816_v8 }
0x2f6d   :  { %v6823_v13 = vmul.f32 1.442695, %v6820_v23 }
0x2f6e   :  { %v6821_v55 = vmul.f32 1.442695, %v6819_v30  ;;  %v14018_v37 = vpop.permute.xlu0 %14017  ;;  %v14378_v30 = vld [vmem:[%s16513_s27 + $0x18] sm:$0xff]  }
0x2f6f   :  { %v14013_v27 = vpop.permute.xlu1 %14012  ;;  %v14020_v28 = vunpack.i.h.bf16 %v14018_v37  ;;  %v14019_v24 = vunpack.i.l.bf16 %v14018_v37  ;;  %12258 = vmatpush3.bf16.msra.mxu1 %v14378_v30  ;;  %v10252_v30 = vld [vmem:[%s16556_s22 + $0x1] ss:$0 sm:$0xff] }
0x2f70   :  { %14569 = vpow2.f32 %v6821_v55  ;;  %v14015_v9 = vunpack.i.h.bf16 %v14013_v27  ;;  %v14014_v17 = vunpack.i.l.bf16 %v14013_v27 }
0x2f71   :  { %14571 = vpow2.f32 %v6823_v13  ;;  %v13269_v5 = vpack.c.bf16 %v14020_v28, %v14019_v24 }
0x2f72   :  { %v13265_v14 = vpack.c.bf16 %v14015_v9, %v14014_v17  ;;  %v14033_v1 = vpop.permute.xlu0 %14032  ;;  %v10246_v9 = vld [vmem:[%s16524_s16 + $0x1] ss:$0 sm:$0xff] }
0x2f73   :  { %v14023_v31 = vpop.permute.xlu1 %14022  ;;  %v14035_v38 = vunpack.i.h.bf16 %v14033_v1  ;;  %v14034_v40 = vunpack.i.l.bf16 %v14033_v1  ;;  %v14384_v1 = vld [vmem:[%s16536_s3 + $0x4c] ss:$16 sps:$4 sm:$0xff]  }
0x2f74   :  { %13266 = vmatprep.subr.bf16.mxu0 %v13265_v14  ;;  %v14025_v34 = vunpack.i.h.bf16 %v14023_v31  ;;  %v14024_v7 = vunpack.i.l.bf16 %v14023_v31  ;;  %7277 = vmatprep.subr.bf16.mxu1 %v14384_v1  ;;  %v14405_v1 = vld [vmem:[%s16545_s17 + $0x118] sm:$0xff]  }
0x2f75   :  { %v13281_v48 = vpack.c.bf16 %v14035_v38, %v14034_v40  ;;  %v14387_v38 = vld [vmem:[%s16536_s3 + $0x64] ss:$16 sps:$4 sm:$0xff]   ;;  %v14390_v40 = vld [vmem:[%s16536_s3 + $0x6c] ss:$16 sps:$4 sm:$0xff]  }
0x2f76   :  { %v13273_v60 = vpack.c.bf16 %v14025_v34, %v14024_v7  ;;  %v14043_v46 = vpop.permute.xlu0 %14042 }
0x2f77   :  { %v14028_v51 = vpop.permute.xlu1 %14027  ;;  %v14045_v25 = vunpack.i.h.bf16 %v14043_v46  ;;  %v14044_v4 = vunpack.i.l.bf16 %v14043_v46 }
0x2f78   :  { %v14030_v10 = vunpack.i.h.bf16 %v14028_v51  ;;  %v14029_v56 = vunpack.i.l.bf16 %v14028_v51 }
0x2f79   :  { %v13289_v62 = vpack.c.bf16 %v14045_v25, %v14044_v4 }
0x2f7a   :  { %v14570_v41 = vpop.eup %14569  ;;  %v13277_v33 = vpack.c.bf16 %v14030_v10, %v14029_v56  ;;  %v14379_v10 = vld [vmem:[%s16536_s3 + $0x40] ss:$16 sps:$4 sm:$0xff]   ;;  %v14382_v56 = vld [vmem:[%s16536_s3 + $0x48] ss:$16 sps:$4 sm:$0xff]  }
0x2f7b   :  { %v14572_v19 = vpop.eup %14571  ;;  %12217 = vmatprep.mubr.f32.mxu0 %v14570_v41  ;;  %v14038_v50 = vpop.permute.xlu1 %14037 }
0x2f7c   :  { %12218 = vmatmul.mubr.f32.vlgmr.msra.gmra.mrb[84].mxu0 %v14572_v19  ;;  %v14040_v42 = vunpack.i.h.bf16 %v14038_v50  ;;  %v14039_v12 = vunpack.i.l.bf16 %v14038_v50  ;;  %v14388_v50 = vld [vmem:[%s16536_s3 + $0x68] ss:$16 sps:$4 sm:$0xff]  }
0x2f7d   :  { %13268 = vmatpush3.bf16.msra.mxu0 %v13265_v14 }
0x2f7e   :  { %13270 = vmatprep.subr.bf16.mxu0 %v13269_v5  ;;  %v13285_v49 = vpack.c.bf16 %v14040_v42, %v14039_v12  ;;  %v14392_v42 = vld [vmem:[%s16545_s17 + $0x1c0] sm:$0xff]  }
0x2f7f   :  { %v14048_v20 = vpop.permute.xlu1 %14047 }
0x2f80   :  { %v14050_v18 = vunpack.i.h.bf16 %v14048_v20  ;;  %v14049_v53 = vunpack.i.l.bf16 %v14048_v20 }
0x2f81   :  { %13272 = vmatpush3.bf16.msra.mxu0 %v13269_v5 }
0x2f82   :  { %13274 = vmatprep.subr.bf16.mxu0 %v13273_v60  ;;  %v13293_v52 = vpack.c.bf16 %v14050_v18, %v14049_v53 }
0x2f85   :  { %13276 = vmatpush3.bf16.msra.mxu0 %v13273_v60 }
0x2f86   :  { %13278 = vmatprep.subr.bf16.mxu0 %v13277_v33 }
0x2f89   :  { %13280 = vmatpush3.bf16.msra.mxu0 %v13277_v33  ;;  %v14385_v33 = vld [vmem:[%s16536_s3 + $0x60] ss:$16 sps:$4 sm:$0xff]  }
0x2f8a   :  { %13282 = vmatprep.subr.bf16.mxu0 %v13281_v48 }
0x2f8d   :  { %13284 = vmatpush3.bf16.msra.mxu0 %v13281_v48  ;;  %v14391_v48 = vld [vmem:[%s16545_s17 + $0x140] sm:$0xff]  }
0x2f8e   :  { %13286 = vmatprep.subr.bf16.mxu0 %v13285_v49 }
0x2f91   :  { %13288 = vmatpush3.bf16.msra.mxu0 %v13285_v49 }
0x2f92   :  { %13290 = vmatprep.subr.bf16.mxu0 %v13289_v62 }
0x2f95   :  { %13292 = vmatpush3.bf16.msra.mxu0 %v13289_v62 }
0x2f96   :  { %13294 = vmatprep.subr.bf16.mxu0 %v13293_v52 }
0x2f99   :  { %13296 = vmatpush3.bf16.msra.mxu0 %v13293_v52 }
0x304f   :  { %v12219_v59 = vpop.f32.mrb[84].mxu0 }
0x3050   :  { %14573 = vrcp.f32 %v12219_v59  ;;  %v6891_v58 = vpop.f32.mrb[85].mxu0 }
0x3051   :  { %14575 = vrcp.f32 %v6891_v58 }
0x305a   :  { %v14574_v11 = vpop.eup %14573 }
0x305b   :  { %v14576_v43 = vpop.eup %14575  ;;  %v6903_v8 = vmul.f32 %v14574_v11, %v14572_v19 }
0x305c   :  { %v6901_v23 = vmul.f32 %v14576_v43, %v14570_v41 }
0x305e   :  { %12252 = vmatprep.mubr.f32.mxu0 %v6901_v23 }
0x305f   :  { %12253 = vmatmul.mubr.f32.vlgmr.msra.gmra.mrb[86].mxu0 %v6903_v8 }
0x3060   :  { %7266 = vmatprep.mubr.bf16.mxu0 %v17941_v22 }
0x3132   :  { %v12254_v13 = vpop.f32.mrb[86].mxu0 }
0x3133   :  { %v7034_v55 = vpop.f32.mrb[87].mxu0 }
0x3134   :  { %v7043_v27 = vpack.c.bf16 %v12254_v13, %v7034_v55 }
0x3136   :  { %12260 = vmatmul.mubr.msk.bf16.vlgmr.msra.gmra.mrb[80].mxu1 %vm288_vm1, %v7043_v27 }
0x3137   :  { %7309 = vmatprep.mubr.bf16.mxu1 %v17941_v22  ;;  %7278 = vmatpush1.bf16.msra.mxu1 %v14382_v56  ;;  %v14404_v56 = vld [vmem:[%s16545_s17 + $0x1d8] sm:$0xff]  }
0x3138   :  { %7279 = vmatprep.subr.bf16.mxu1 %v14390_v40  ;;  %v14407_v40 = vld [vmem:[%s16545_s17 + $0x160] sm:$0xff]  }
0x313b   :  { %7280 = vmatpush1.bf16.msra.mxu1 %v14388_v50  ;;  %v14409_v50 = vld [vmem:[%s16545_s17 + $0x120] sm:$0xff]  }
0x313c   :  { %11211 = vmatprep.subr.bf16.mxu1 %v14392_v42  ;;  %v14411_v42 = vld [vmem:[%s16545_s17 + $0x168] sm:$0xff]  }
0x3209   :  { %v7099_v17 = vpop.f32.mrb[80].mxu1 }
0x320a   :  { %v7100_v14 = vadd.f32 %v10246_v9, %v7099_v17  ;;  %v12261_v37 = vpop.f32.mrb[81].mxu1  ;;  %v10253_v17 = vld [vmem:[%s16561_s1 + $0x1] ss:$0 sm:$0xff] }
0x320b   :  { %v7102_v31 = vpop.f32.mrb[82].mxu1 }
0x320c   :  { %v7106_v28 = vadd.f32 %v7100_v14, %v16983_v61  ;;  %v7103_v24 = vadd.f32 %v10246_v9, %v7102_v31  ;;  %v12262_v41 = vpop.f32.mrb[83].mxu1 }
0x320e   :  { %v7107_v19 = vadd.f32 %v7103_v24, %v16985_v63  ;;  %v7112_v5 = vsel %vm288_vm1, %v7106_v28, 0.0  ;;  %v7120_v34 = vmul.f32 %v7106_v28, %v7106_v28  ;;  %v14381_v63 = vld [vmem:[%s16536_s3 + $0x44] ss:$16 sps:$4 sm:$0xff]  }
0x320f   :  { %7113 = vadd.xlane.f32.xlu0 %v7112_v5  ;;  %7234 = vmatprep.subr.bf16.mxu0 %v14381_v63  ;;  %v14393_v24 = vld [vmem:[%s16545_s17 + $0x100] sm:$0xff]   ;;  %v14396_v5 = vld [vmem:[%s16545_s17 + $0x1c8] sm:$0xff]   ;;  %v14403_v63 = vld [vmem:[%s16545_s17 + $0x158] sm:$0xff]  }
0x3210   :  { %v7115_v7 = vsel %vm288_vm1, %v7107_v19, 0.0  ;;  %v7122_v51 = vsel %vm288_vm1, %v7120_v34, 0.0  ;;  %v7121_v60 = vmul.f32 %v7107_v19, %v7107_v19  ;;  %7235 = vmatpush1.bf16.msra.mxu0 %v14379_v10  ;;  %v14397_v34 = vld [vmem:[%s16545_s17 + $0x108] sm:$0xff]   ;;  %v14402_v10 = vld [vmem:[%s16545_s17 + $0x190] sm:$0xff]  }
0x3211   :  { %7116 = vadd.xlane.f32.xlu1 %v7115_v7  ;;  %7236 = vmatprep.subr.bf16.mxu0 %v14387_v38  ;;  %v14398_v7 = vld [vmem:[%s16545_s17 + $0x188] sm:$0xff]   ;;  %v14406_v38 = vld [vmem:[%s16545_s17 + $0x198] sm:$0xff]  }
0x3212   :  { %v7125_v61 = vsel %vm288_vm1, %v7121_v60, 0.0  ;;  %v14400_v60 = vld [vmem:[%s16545_s17 + $0x1d0] sm:$0xff]  }
0x3213   :  { %7123 = vadd.xlane.f32.xlu0 %v7122_v51  ;;  %v14399_v51 = vld [vmem:[%s16545_s17 + $0x150] sm:$0xff]  }
0x3214   :  { %7237 = vmatpush1.bf16.msra.mxu0 %v14385_v33  ;;  %v14408_v33 = vld [vmem:[%s16545_s17 + $0x1e0] sm:$0xff]  }
0x3215   :  { %11189 = vmatprep.subr.bf16.mxu0 %v14391_v48  ;;  %v14410_v48 = vld [vmem:[%s16545_s17 + $0x1a0] sm:$0xff]  }
0x3217   :  { %7126 = vadd.xlane.f32.xlu0 %v7125_v61  ;;  %v14401_v61 = vld [vmem:[%s16545_s17 + $0x110] sm:$0xff]  }
0x329c   :  { %v7114_v12 = vpop.xlane.xlu0 %7113 }
0x329d   :  { %v7118_v46 = vmul.f32 0.03125, %v7114_v12  ;;  %v14412_v12 = vld [vmem:[%s16545_s17 + $0x1e8] sm:$0xff]  }
0x329e   :  { %v7117_v25 = vpop.xlane.xlu1 %7116 }
0x329f   :  { %v7130_v49 = vmul.f32 %v7118_v46, %v7118_v46  ;;  %v7119_v20 = vmul.f32 0.03125, %v7117_v25  ;;  %v7134_v43 = vsub.f32 %v7106_v28, %v7118_v46  ;;  %v14394_v28 = vld [vmem:[%s16545_s17 + $0x180] sm:$0xff]   ;;  %v14413_v46 = vld [vmem:[%s16545_s17 + $0x128] sm:$0xff]  }
0x32a0   :  { %v7124_v4 = vpop.xlane.xlu0 %7123  ;;  %v14414_v25 = vld [vmem:[%s16545_s17 + $0x1a8] sm:$0xff]  }
0x32a1   :  { %v7128_v62 = vmul.f32 0.03125, %v7124_v4  ;;  %v7131_v52 = vmul.f32 %v7119_v20, %v7119_v20  ;;  %v7135_v13 = vsub.f32 %v7107_v19, %v7119_v20  ;;  %v14395_v19 = vld [vmem:[%s16545_s17 + $0x148] sm:$0xff]   ;;  %v14415_v4 = vld [vmem:[%s16545_s17 + $0x170] sm:$0xff]  }
0x32a2   :  { %v14417_v20 = vld [vmem:[%s16545_s17 + $0x130] sm:$0xff]  }
0x32a3   :  { %v7132_v18 = vsub.f32 %v7128_v62, %v7130_v49  ;;  %v14416_v49 = vld [vmem:[%s16545_s17 + $0x1f0] sm:$0xff]  }
0x32a4   :  { %v7127_v53 = vpop.xlane.xlu0 %7126  ;;  %v14418_v62 = vld [vmem:[%s16545_s17 + $0x1b0] sm:$0xff]  }
0x32a5   :  { %v7136_v57 = vadd.f32 1e-05, %v7132_v18  ;;  %v7129_v59 = vmul.f32 0.03125, %v7127_v53  ;;  %v14419_v18 = vld [vmem:[%s16545_s17 + $0x178] sm:$0xff]  }
0x32a6   :  { %v14420_v53 = vld [vmem:[%s16545_s17 + $0x1f8] sm:$0xff]  }
0x32a7   :  { %14577 = vrsqrt.f32 %v7136_v57  ;;  %v7133_v58 = vsub.f32 %v7129_v59, %v7131_v52  ;;  %v14421_v52 = vld [vmem:[%s16545_s17 + $0x138] sm:$0xff]   ;;  %v10262_v59 = vld [vmem:[%s16607_s23 + $0x4] sm:$0xf] }
0x32a8   :  { %v14422_v57 = vld [vmem:[%s16545_s17 + $0x1b8] sm:$0xff]  }
0x32a9   :  { %v7137_v11 = vadd.f32 1e-05, %v7133_v58  ;;  %v7174_v58 = vrot.slane %v10262_v59, %v17942_v0 }
0x32ab   :  { %14579 = vrsqrt.f32 %v7137_v11  ;;  %v7182_v11 = vrot.slane %v10262_v59, %v17943_v29 }
0x32b1   :  { %v14578_v23 = vpop.eup %14577 }
0x32b2   :  { %v7140_v8 = vmul.f32 %v14578_v23, %v7134_v43  ;;  %v7178_v43 = vrot.slane %v10262_v59, %v17944_v47  ;;  %v7186_v23 = vrot.slane %v10262_v59, %v17945_v36 }
0x32b4   :  { %v7148_v9 = vmul.f32 %v10252_v30, %v7140_v8 }
0x32b5   :  { %v14580_v55 = vpop.eup %14579 }
0x32b6   :  { %v7141_v27 = vmul.f32 %v14580_v55, %v7135_v13  ;;  %v17100_v37 = vadd.f32 %v10253_v17, %v7148_v9 }
0x32b8   :  { %v7149_v14 = vmul.f32 %v10252_v30, %v7141_v27 }
0x32ba   :  { %v17102_v31 = vadd.f32 %v10253_v17, %v7149_v14 }
0x32bc   :  { %v7169_v41 = vpack.c.bf16 %v17102_v31, %v17100_v37 }
0x32be   :  { %10271 = vmatmul.mubr.msk.bf16.vlgmr.msra.gmra.mrb[88].mxu0 %vm288_vm1, %v7169_v41  ;;  %10272 = vmatmul.mubr.msk.bf16.vlgmr.msra.gmra.mrb[84].mxu1 %vm288_vm1, %v7169_v41 }
0x32bf   :  { %11190 = vmatpush3.bf16.msra.mxu0 %v14393_v24  ;;  %11212 = vmatpush3.bf16.msra.mxu1 %v14394_v28 }
0x32c0   :  { %11191 = vmatprep.subr.bf16.mxu0 %v14395_v19  ;;  %11213 = vmatprep.subr.bf16.mxu1 %v14396_v5 }
0x32c3   :  { %11192 = vmatpush3.bf16.msra.mxu0 %v14397_v34  ;;  %11214 = vmatpush3.bf16.msra.mxu1 %v14398_v7 }
0x32c4   :  { %11193 = vmatprep.subr.bf16.mxu0 %v14399_v51  ;;  %11215 = vmatprep.subr.bf16.mxu1 %v14400_v60 }
0x32c7   :  { %11194 = vmatpush3.bf16.msra.mxu0 %v14401_v61  ;;  %11216 = vmatpush3.bf16.msra.mxu1 %v14402_v10 }
0x32c8   :  { %11195 = vmatprep.subr.bf16.mxu0 %v14403_v63  ;;  %11217 = vmatprep.subr.bf16.mxu1 %v14404_v56 }
0x32cb   :  { %11196 = vmatpush3.bf16.msra.mxu0 %v14405_v1  ;;  %11218 = vmatpush3.bf16.msra.mxu1 %v14406_v38 }
0x32cc   :  { %11197 = vmatprep.subr.bf16.mxu0 %v14407_v40  ;;  %11219 = vmatprep.subr.bf16.mxu1 %v14408_v33 }
0x32cf   :  { %11198 = vmatpush3.bf16.msra.mxu0 %v14409_v50  ;;  %11220 = vmatpush3.bf16.msra.mxu1 %v14410_v48 }
0x32d0   :  { %11199 = vmatprep.subr.bf16.mxu0 %v14411_v42  ;;  %11221 = vmatprep.subr.bf16.mxu1 %v14412_v12 }
0x32d3   :  { %11200 = vmatpush3.bf16.msra.mxu0 %v14413_v46  ;;  %11222 = vmatpush3.bf16.msra.mxu1 %v14414_v25  ;;  %v10338_v25 = vld [vmem:[%s16619_s26 + $0x1] ss:$0 sm:$0xff] }
0x32d4   :  { %11201 = vmatprep.subr.bf16.mxu0 %v14415_v4  ;;  %11223 = vmatprep.subr.bf16.mxu1 %v14416_v49 }
0x32d7   :  { %11202 = vmatpush3.bf16.msra.mxu0 %v14417_v20  ;;  %11224 = vmatpush3.bf16.msra.mxu1 %v14418_v62 }
0x32d8   :  { %11203 = vmatprep.subr.bf16.mxu0 %v14419_v18  ;;  %11225 = vmatprep.subr.bf16.mxu1 %v14420_v53 }
0x32db   :  { %11204 = vmatpush3.bf16.msra.mxu0 %v14421_v52  ;;  %11226 = vmatpush3.bf16.msra.mxu1 %v14422_v57 }
0x32dc   :  { %12263 = vmatprep.subr.bf16.mxu0 %v17863_v2 }
0x3391   :  { %v7268_v8 = vpop.f32.mrb[88].mxu0  ;;  %v7311_v30 = vpop.f32.mrb[84].mxu1 }
0x3392   :  { %v7269_v13 = vadd.f32 %v7268_v8, %v7174_v58  ;;  %v7312_v55 = vadd.f32 %v7311_v30, %v7182_v11  ;;  %v7270_v27 = vpop.f32.mrb[89].mxu0  ;;  %v7313_v9 = vpop.f32.mrb[85].mxu1 }
0x3393   :  { %v7271_v17 = vadd.f32 %v7270_v27, %v7178_v43  ;;  %v7314_v14 = vadd.f32 %v7313_v9, %v7186_v23  ;;  %v7272_v24 = vpop.f32.mrb[90].mxu0  ;;  %v7315_v28 = vpop.f32.mrb[86].mxu1 }
0x3394   :  { %v7273_v41 = vadd.f32 %v7272_v24, %v7174_v58  ;;  %v7316_v19 = vadd.f32 %v7315_v28, %v7182_v11  ;;  %v7274_v5 = vpop.f32.mrb[91].mxu0  ;;  %v7317_v34 = vpop.f32.mrb[87].mxu1  ;;  %v7320_v60 = vmax.f32 %v7269_v13, 0.0  ;;  %v7322_v61 = vmax.f32 %v7312_v55, 0.0  ;;  %v14423_v28 = vld [vmem:[%s15742_s2 + $0x20] sm:$0xff]  }
0x3395   :  { %v7275_v7 = vadd.f32 %v7274_v5, %v7178_v43  ;;  %v7318_v51 = vadd.f32 %v7317_v34, %v7186_v23  ;;  %v7321_v56 = vmax.f32 %v7271_v17, 0.0  ;;  %v7323_v1 = vmax.f32 %v7314_v14, 0.0 }
0x3396   :  { %v7324_v10 = vmax.f32 %v7273_v41, 0.0  ;;  %v7326_v63 = vmax.f32 %v7316_v19, 0.0 }
0x3397   :  { %v7325_v38 = vmax.f32 %v7275_v7, 0.0  ;;  %v7327_v40 = vmax.f32 %v7318_v51, 0.0 }
0x3398   :  { %v7395_v33 = vpack.c.bf16 %v7324_v10, %v7320_v60  ;;  %v7397_v50 = vpack.c.bf16 %v7326_v63, %v7322_v61 }
0x3399   :  { %v7396_v48 = vpack.c.bf16 %v7325_v38, %v7321_v56  ;;  %v7398_v42 = vpack.c.bf16 %v7327_v40, %v7323_v1 }
0x339b   :  { %7629 = vmatprep.mubr.bf16.mxu0 %v7396_v48  ;;  %7670 = vmatprep.mubr.bf16.mxu1 %v7398_v42 }
0x339c   :  { %7630 = vmatmul.mubr.bf16.vlgmr.msra.gmra.mrb[92].mxu0 %v7395_v33  ;;  %7671 = vmatmul.mubr.bf16.vlgmr.msra.gmra.mrb[88].mxu1 %v7397_v50  ;;  %v10373_v50 = vld [vmem:[%s16635_s12 + $0x1] ss:$0 sm:$0xff] }
0x339d   :  { %12267 = vmatprep.mubr.msk.bf16.mxu0 %vm14677_vm0, %v17863_v2  ;;  %12264 = vmatpush3.bf16.msra.mxu0 %v14423_v28  ;;  %v18007_v28 = vld [vmem:[#allocation40_spill] sm:$0xff] }
0x339e   :  { %12265 = vmatprep.subr.bf16.mxu0 %v17863_v2 }
0x346f   :  { %v11205_v12 = vpop.f32.mrb[92].mxu0  ;;  %v11227_v46 = vpop.f32.mrb[88].mxu1 }
0x3470   :  { %v11206_v4 = vpop.f32.mrb[93].mxu0  ;;  %v11228_v49 = vpop.f32.mrb[89].mxu1 }
0x3471   :  { %v11207_v20 = vadd.f32 %v11206_v4, %v11205_v12  ;;  %v11229_v62 = vadd.f32 %v11228_v49, %v11227_v46  ;;  %v11208_v18 = vpop.f32.mrb[94].mxu0  ;;  %v11230_v53 = vpop.f32.mrb[90].mxu1  ;;  %v10374_v4 = vld [vmem:[%s16640_s28 + $0x1] ss:$0 sm:$0xff] }
0x3472   :  { %v11209_v52 = vpop.f32.mrb[95].mxu0  ;;  %v11231_v57 = vpop.f32.mrb[91].mxu1 }
0x3473   :  { %v7632_v59 = vadd.f32 %v11207_v20, %v10338_v25  ;;  %v11210_v58 = vadd.f32 %v11209_v52, %v11208_v18  ;;  %v11232_v11 = vadd.f32 %v11231_v57, %v11230_v53  ;;  %v18000_v57 = vld [vmem:[#allocation30_spill] sm:$0xff] }
0x3475   :  { %v7673_v43 = vadd.f32 %v11229_v62, %v7632_v59  ;;  %v7635_v23 = vadd.f32 %v11210_v58, %v10338_v25 }
0x3477   :  { %v7679_v8 = vadd.f32 %v7673_v43, %v17100_v37  ;;  %v7676_v30 = vadd.f32 %v11232_v11, %v7635_v23  ;;  %v14424_v37 = vld [vmem:[%s15742_s2 + $0x28] sm:$0xff]  }
0x3478   :  { %12266 = vmatpush3.bf16.msra.mxu0 %v14424_v37  ;;  %v18001_v43 = vld [vmem:[#allocation35_spill] sm:$0xff] }
0x3479   :  { %v7680_v13 = vadd.f32 %v7676_v30, %v17102_v31  ;;  %v7685_v55 = vsel %vm288_vm1, %v7679_v8, 0.0  ;;  %v7693_v27 = vmul.f32 %v7679_v8, %v7679_v8  ;;  %13346 = vmatprep.subr.bf16.mxu0 %v15984_v21 }
0x347a   :  { %7686 = vadd.xlane.f32.xlu1 %v7685_v55 }
0x347b   :  { %v7688_v9 = vsel %vm288_vm1, %v7680_v13, 0.0  ;;  %v7694_v17 = vmul.f32 %v7680_v13, %v7680_v13  ;;  %v7695_v14 = vsel %vm288_vm1, %v7693_v27, 0.0 }
0x347c   :  { %7689 = vadd.xlane.f32.xlu0 %v7688_v9  ;;  %v18005_v9 = vld [vmem:[#allocation33_spill] sm:$0xff] }
0x347d   :  { %v7698_v24 = vsel %vm288_vm1, %v7694_v17, 0.0 }
0x347e   :  { %7696 = vadd.xlane.f32.xlu1 %v7695_v14  ;;  %v18006_v14 = vld [vmem:[#allocation27_spill] sm:$0xff] }
0x3480   :  { %7699 = vadd.xlane.f32.xlu0 %v7698_v24 }
0x3507   :  { %v7687_v31 = vpop.xlane.xlu1 %7686 }
0x3508   :  { %v7691_v41 = vmul.f32 0.03125, %v7687_v31  ;;  %v18008_v31 = vld [vmem:[#allocation34_spill] sm:$0xff] }
0x3509   :  { %v7690_v19 = vpop.xlane.xlu0 %7689 }
0x350a   :  { %v7692_v5 = vmul.f32 0.03125, %v7690_v19  ;;  %v7703_v7 = vmul.f32 %v7691_v41, %v7691_v41  ;;  %v7707_v40 = vsub.f32 %v7679_v8, %v7691_v41  ;;  %v18002_v8 = vld [vmem:[#allocation31_spill] sm:$0xff] }
0x350b   :  { %v7697_v34 = vpop.xlane.xlu1 %7696 }
0x350c   :  { %v7701_v51 = vmul.f32 0.03125, %v7697_v34  ;;  %v7704_v61 = vmul.f32 %v7692_v5, %v7692_v5  ;;  %v7708_v48 = vsub.f32 %v7680_v13, %v7692_v5  ;;  %v18004_v13 = vld [vmem:[#allocation26_spill] sm:$0xff]  ;;  %v18009_v34 = vld [vmem:[#allocation29_spill] sm:$0xff] }
0x350d   :  { %v7700_v60 = vpop.xlane.xlu0 %7699 }
0x350e   :  { %v7705_v10 = vsub.f32 %v7701_v51, %v7703_v7  ;;  %v7702_v63 = vmul.f32 0.03125, %v7700_v60  ;;  %v18010_v51 = vld [vmem:[#allocation32_spill] sm:$0xff] }
0x3510   :  { %v7709_v56 = vadd.f32 1e-05, %v7705_v10  ;;  %v7706_v1 = vsub.f32 %v7702_v63, %v7704_v61  ;;  %v18011_v10 = vld [vmem:[#allocation41_spill] sm:$0xff] }
0x3512   :  { %14581 = vrsqrt.f32 %v7709_v56  ;;  %v7710_v38 = vadd.f32 1e-05, %v7706_v1  ;;  %v18012_v56 = vld [vmem:[#allocation42_spill] sm:$0xff] }
0x3514   :  { %14583 = vrsqrt.f32 %v7710_v38 }
0x351c   :  { %v14582_v33 = vpop.eup %14581 }
0x351d   :  { %v7713_v42 = vmul.f32 %v14582_v33, %v7707_v40 }
0x351e   :  { %v14584_v12 = vpop.eup %14583 }
0x351f   :  { %v7714_v46 = vmul.f32 %v14584_v12, %v7708_v48  ;;  %v7721_v25 = vmul.f32 %v10373_v50, %v7713_v42 }
0x3521   :  { %v7722_v49 = vmul.f32 %v10373_v50, %v7714_v46  ;;  %v17159_v20 = vadd.f32 %v10374_v4, %v7721_v25 }
0x3523   :  { %v17161_v62 = vadd.f32 %v10374_v4, %v7722_v49 }
0x3525   :  { %v7745_v18 = vpack.c.bf16 %v17161_v62, %v17159_v20 }
0x3527   :  { %12268 = vmatmul.mubr.msk.bf16.vlgmr.msra.gmra.mrb[96].mxu0 %vm288_vm1, %v7745_v18 }
0x3528   :  { %13348 = vmatpush3.bf16.msra.mxu0 %v15984_v21  ;;  %v10385_v21 = vld [vmem:[%s15869_s4 + $0x2] ss:$0 sm:$0xff]  ;;  %s14723_s4 = smov 29  }
0x3529   :  { %13350 = vmatprep.subr.bf16.mxu0 %v15987_v32 }
0x352c   :  { %13352 = vmatpush3.bf16.msra.mxu0 %v15987_v32 }
0x352d   :  { %13354 = vmatprep.subr.bf16.mxu0 %v15994_v54 }
0x3530   :  { %13356 = vmatpush3.bf16.msra.mxu0 %v15994_v54 }
0x3531   :  { %13358 = vmatprep.subr.bf16.mxu0 %v16000_v3 }
0x3534   :  { %13360 = vmatpush3.bf16.msra.mxu0 %v16000_v3 }
0x3535   :  { %13362 = vmatprep.subr.bf16.mxu0 %v16017_v45 }
0x3538   :  { %13364 = vmatpush3.bf16.msra.mxu0 %v16017_v45 }
0x3539   :  { %13366 = vmatprep.subr.bf16.mxu0 %v16022_v16 }
0x353c   :  { %13368 = vmatpush3.bf16.msra.mxu0 %v16022_v16 }
0x353d   :  { %13370 = vmatprep.subr.bf16.mxu0 %v16031_v26 }
0x3540   :  { %13372 = vmatpush3.bf16.msra.mxu0 %v16031_v26 }
0x3541   :  { %13374 = vmatprep.subr.bf16.mxu0 %v16041_v15 }
0x3544   :  { %13376 = vmatpush3.bf16.msra.mxu0 %v16041_v15 }
0x35fa   :  { %v7801_v32 = vpop.f32.mrb[96].mxu0 }
0x35fb   :  { %v17182_v54 = vadd.f32 %v10385_v21, %v7801_v32  ;;  %v12269_v3 = vpop.f32.mrb[97].mxu0 }
0x35fc   :  { %v7804_v53 = vpop.f32.mrb[98].mxu0 }
0x35fd   :  { %v17184_v52 = vadd.f32 %v10385_v21, %v7804_v53  ;;  %v12270_v45 = vpop.f32.mrb[99].mxu0  ;;  %12303 = vmatprep.mubr.msk.f32.mxu1 %vm288_vm1, %v17182_v54  ;;  %v7810_v16 = vmul.f32 %v17182_v54, %v15852_v39  ;;  %v7808_v15 = vmul.f32 %v17182_v54, %v15850_v6  ;;  %v18003_v39 = vld [vmem:[#allocation28_spill] sm:$0xff]  ;;  %v7812_v6 = vmul.f32 %v17182_v54, %v18004_v13 }
0x35fe   :  { %v7820_v37 = vmul.f32 %v17182_v54, %v18007_v28  ;;  %v7814_v41 = vmul.f32 %v17182_v54, %v18008_v31  ;;  %v7818_v60 = vmul.f32 %v17182_v54, %v18010_v51  ;;  %v7822_v1 = vmul.f32 %v17182_v54, %v18012_v56  ;;  %v18016_v51 = vld [vmem:[#allocation50_spill] sm:$0xff]  ;;  %v18018_v56 = vld [vmem:[#allocation44_spill] sm:$0xff] }
0x35ff   :  { %v7811_v26 = vmul.f32 %v17184_v52, %v15854_v35  ;;  %v7809_v59 = vmul.f32 %v17184_v52, %v18000_v57  ;;  %v7817_v23 = vmul.f32 %v17184_v52, %v18001_v43  ;;  %v7813_v30 = vmul.f32 %v17184_v52, %v18002_v8 }
0x3600   :  { %v7816_v35 = vmul.f32 %v17182_v54, %v18003_v39  ;;  %v7821_v17 = vmul.f32 %v17184_v52, %v18005_v9  ;;  %v7815_v24 = vmul.f32 %v17184_v52, %v18006_v14  ;;  %v7819_v7 = vmul.f32 %v17184_v52, %v18009_v34  ;;  %v14655_v9 = vld [vmem:[%s16008_s21 + $0x8] sm:$0xff]  ;;  %v18015_v34 = vld [vmem:[#allocation49_spill] sm:$0xff] }
0x3601   :  { %v14056_v58 = vpack.i.bf16 %v7811_v26, %v7810_v16  ;;  %v14051_v11 = vpack.i.bf16 %v7809_v59, %v7808_v15  ;;  %v14061_v27 = vpack.i.bf16 %v7813_v30, %v7812_v6  ;;  %v7823_v63 = vmul.f32 %v17184_v52, %v18011_v10 }
0x3602   :  { %v14071_v55 = vpack.i.bf16 %v7817_v23, %v7816_v35  ;;  %v14081_v19 = vpack.i.bf16 %v7821_v17, %v7820_v37  ;;  %v14066_v5 = vpack.i.bf16 %v7815_v24, %v7814_v41  ;;  %v14076_v61 = vpack.i.bf16 %v7819_v7, %v7818_v60  ;;  %v14656_v24 = vld [vmem:[%s16008_s21] sm:$0xff]  ;;  %v18013_v37 = vld [vmem:[#allocation45_spill] sm:$0xff] }
0x3603   :  { %14057 = vrot.lane.b32.xlu0 %v14056_v58, %s14681_s19  ;;  %14052 = vrot.lane.b32.xlu1 %v14051_v11, %s14681_s19  ;;  %v14086_v38 = vpack.i.bf16 %v7823_v63, %v7822_v1  ;;  %v7827_v31 = vmul.f32 %v17184_v52, %v18013_v37  ;;  %v18014_v41 = vld [vmem:[#allocation46_spill] sm:$0xff]  ;;  %v7831_v7 = vmul.f32 %v17184_v52, %v18015_v34 }
0x3604   :  { %v7830_v60 = vmul.f32 %v17182_v54, %v18016_v51  ;;  %v7824_v1 = vmul.f32 %v17182_v54, %v18018_v56 }
0x3606   :  { %v14106_v63 = vpack.i.bf16 %v7831_v7, %v7830_v60 }
0x3607   :  { %14072 = vrot.lane.b32.xlu0 %v14071_v55, %s14681_s19  ;;  %14062 = vrot.lane.b32.xlu1 %v14061_v27, %s14681_s19 }
0x360b   :  { %14082 = vrot.lane.b32.xlu0 %v14081_v19, %s14681_s19  ;;  %14067 = vrot.lane.b32.xlu1 %v14066_v5, %s14681_s19  ;;  %v7826_v19 = vmul.f32 %v17182_v54, %v18014_v41 }
0x360d   :  { %v14096_v5 = vpack.i.bf16 %v7827_v31, %v7826_v19 }
0x360f   :  { %14077 = vrot.lane.b32.xlu1 %v14076_v61, %s14681_s19  ;;  %v18017_v61 = vld [vmem:[#allocation43_spill] sm:$0xff] }
0x3610   :  { %v7825_v10 = vmul.f32 %v17184_v52, %v18017_v61 }
0x3613   :  { %14087 = vrot.lane.b32.xlu1 %v14086_v38, %s14681_s19  ;;  %v18019_v38 = vld [vmem:[#allocation53_spill] sm:$0xff] }
0x3675   :  { %v14058_v40 = vpop.permute.xlu0 %14057  ;;  %v14053_v33 = vpop.permute.xlu1 %14052 }
0x3676   :  { %v14060_v50 = vunpack.i.h.bf16 %v14058_v40  ;;  %v14059_v48 = vunpack.i.l.bf16 %v14058_v40  ;;  %v14055_v42 = vunpack.i.h.bf16 %v14053_v33  ;;  %v14054_v12 = vunpack.i.l.bf16 %v14053_v33 }
0x3677   :  { %v7835_v40 = vmul.f32 %v17184_v52, %v18019_v38  ;;  %v14091_v33 = vpack.i.bf16 %v7825_v10, %v7824_v1 }
0x3678   :  { %v13297_v46 = vpack.c.bf16 %v14055_v42, %v14054_v12  ;;  %v13303_v25 = vpack.c.bf16 %v14060_v50, %v14059_v48  ;;  %v18020_v50 = vld [vmem:[#allocation54_spill] sm:$0xff]  ;;  %v18021_v42 = vld [vmem:[#allocation47_spill] sm:$0xff] }
0x3679   :  { %v14063_v4 = vpop.permute.xlu1 %14062  ;;  %v14073_v16 = vpop.permute.xlu0 %14072  ;;  %v7834_v48 = vmul.f32 %v17182_v54, %v18020_v50  ;;  %v7829_v12 = vmul.f32 %v17184_v52, %v18021_v42 }
0x367a   :  { %13299 = vmatprep.subr.msk.bf16.mxu1 %vm14922_vm2, %v13297_v46  ;;  %v14065_v49 = vunpack.i.h.bf16 %v14063_v4  ;;  %v14064_v18 = vunpack.i.l.bf16 %v14063_v4  ;;  %v14075_v26 = vunpack.i.h.bf16 %v14073_v16  ;;  %v14074_v15 = vunpack.i.l.bf16 %v14073_v16 }
0x367b   :  { %13302 = vmatpush3.bf16.xpose.msk.msra.mxu1 %vm14922_vm2, %v13297_v46  ;;  %v14116_v46 = vpack.i.bf16 %v7835_v40, %v7834_v48 }
0x367c   :  { %13305 = vmatprep.subr.msk.bf16.mxu1 %vm14922_vm2, %v13303_v25  ;;  %v13309_v21 = vpack.c.bf16 %v14065_v49, %v14064_v18  ;;  %v13321_v57 = vpack.c.bf16 %v14075_v26, %v14074_v15  ;;  %v18023_v49 = vld [vmem:[#allocation57_spill] sm:$0xff]  ;;  %v18026_v26 = vld [vmem:[#allocation52_spill] sm:$0xff] }
0x367d   :  { %v14068_v32 = vpop.permute.xlu1 %14067  ;;  %v14083_v23 = vpop.permute.xlu0 %14082  ;;  %v7839_v18 = vmul.f32 %v17184_v52, %v18023_v49  ;;  %v7832_v15 = vmul.f32 %v17182_v54, %v18026_v26  ;;  %v14426_v26 = vld [vmem:[%s16180_s6 + $0x28] sm:$0xff]  }
0x367e   :  { %v14070_v3 = vunpack.i.h.bf16 %v14068_v32  ;;  %v14069_v53 = vunpack.i.l.bf16 %v14068_v32  ;;  %v14085_v8 = vunpack.i.h.bf16 %v14083_v23  ;;  %v14084_v30 = vunpack.i.l.bf16 %v14083_v23  ;;  %v18024_v32 = vld [vmem:[#allocation58_spill] sm:$0xff] }
0x3680   :  { %v13315_v45 = vpack.c.bf16 %v14070_v3, %v14069_v53  ;;  %v13333_v39 = vpack.c.bf16 %v14085_v8, %v14084_v30  ;;  %v7838_v3 = vmul.f32 %v17182_v54, %v18024_v32  ;;  %v18025_v53 = vld [vmem:[#allocation51_spill] sm:$0xff] }
0x3681   :  { %v14078_v59 = vpop.permute.xlu1 %14077 }
0x3682   :  { %v14080_v58 = vunpack.i.h.bf16 %v14078_v59  ;;  %v14079_v11 = vunpack.i.l.bf16 %v14078_v59  ;;  %v14126_v16 = vpack.i.bf16 %v7839_v18, %v7838_v3  ;;  %v18027_v59 = vld [vmem:[#allocation55_spill] sm:$0xff]  ;;  %v14425_v18 = vld [vmem:[%s16180_s6 + $0x20] sm:$0xff]  }
0x3683   :  { %13308 = vmatpush3.bf16.xpose.msk.msra.mxu1 %vm14922_vm2, %v13303_v25  ;;  %v18022_v25 = vld [vmem:[#allocation48_spill] sm:$0xff] }
0x3684   :  { %13311 = vmatprep.subr.msk.bf16.mxu1 %vm14922_vm2, %v13309_v21  ;;  %v13327_v43 = vpack.c.bf16 %v14080_v58, %v14079_v11  ;;  %v7828_v4 = vmul.f32 %v17182_v54, %v18022_v25  ;;  %v7837_v58 = vmul.f32 %v17184_v52, %v18027_v59  ;;  %v18028_v11 = vld [vmem:[#allocation56_spill] sm:$0xff]  ;;  %v14427_v59 = vld [vmem:[%s16189_s10 + $0x20] sm:$0xff]  }
0x3685   :  { %v14088_v35 = vpop.permute.xlu1 %14087 }
0x3686   :  { %v14090_v13 = vunpack.i.h.bf16 %v14088_v35  ;;  %v14089_v6 = vunpack.i.l.bf16 %v14088_v35 }
0x3688   :  { %v13339_v55 = vpack.c.bf16 %v14090_v13, %v14089_v6 }
0x368b   :  { %13314 = vmatpush3.bf16.xpose.msk.msra.mxu1 %vm14922_vm2, %v13309_v21  ;;  %v14101_v21 = vpack.i.bf16 %v7829_v12, %v7828_v4 }
0x368c   :  { %13317 = vmatprep.subr.msk.bf16.mxu1 %vm14922_vm2, %v13315_v45 }
0x3693   :  { %13320 = vmatpush3.bf16.xpose.msk.msra.mxu1 %vm14922_vm2, %v13315_v45  ;;  %v7833_v45 = vmul.f32 %v17184_v52, %v18025_v53 }
0x3694   :  { %13323 = vmatprep.subr.msk.bf16.mxu1 %vm14922_vm2, %v13321_v57 }
0x369b   :  { %13326 = vmatpush3.bf16.xpose.msk.msra.mxu1 %vm14922_vm2, %v13321_v57  ;;  %v14111_v57 = vpack.i.bf16 %v7833_v45, %v7832_v15 }
0x369c   :  { %13329 = vmatprep.subr.msk.bf16.mxu1 %vm14922_vm2, %v13327_v43 }
0x36a3   :  { %13332 = vmatpush3.bf16.xpose.msk.msra.mxu1 %vm14922_vm2, %v13327_v43  ;;  %v7836_v43 = vmul.f32 %v17182_v54, %v18028_v11  ;;  %v14428_v11 = vld [vmem:[%s16189_s10 + $0x28] sm:$0xff]   ;;  %s9646_s10 = sld [smem:[%s17682_s0 + %s14723_s4]]  }
0x36a4   :  { %13335 = vmatprep.subr.msk.bf16.mxu1 %vm14922_vm2, %v13333_v39 }
0x36a5   :  { %v14121_v23 = vpack.i.bf16 %v7837_v58, %v7836_v43  ;;  %v18029_v43 = vld [vmem:[#allocation18_spill] sm:$0xff] }
0x36ab   :  { %13338 = vmatpush3.bf16.xpose.msk.msra.mxu1 %vm14922_vm2, %v13333_v39 }
0x36ac   :  { %13341 = vmatprep.subr.msk.bf16.mxu1 %vm14922_vm2, %v13339_v55 }
0x36b3   :  { %13344 = vmatpush3.bf16.xpose.msk.msra.mxu1 %vm14922_vm2, %v13339_v55 }
0x36b4   :  { %12376 = vmatprep.subr.bf16.mxu1 %v17863_v2 }
0x36ba   :  { %12304 = vmatmul.mubr.msk.f32.vlgmr.msra.gmra.mrb[78].mxu1 %vm288_vm1, %v17184_v52 }
0x36bb   :  { %12380 = vmatprep.mubr.msk.bf16.mxu1 %vm14677_vm0, %v17863_v2  ;;  %12377 = vmatpush3.bf16.msra.mxu1 %v14425_v18 }
0x36bc   :  { %12378 = vmatprep.subr.bf16.mxu1 %v17863_v2 }
0x36bf   :  { %12379 = vmatpush3.bf16.msra.mxu1 %v14426_v26  ;;  %v14666_v26 = vld [vmem:[%s14744_s13 + $0x28] sm:$0xff] }
0x36c0   :  { %12392 = vmatprep.subr.bf16.mxu1 %v17863_v2 }
0x378d   :  { %v12305_v27 = vpop.f32.mrb[78].mxu1 }
0x378e   :  { %v7998_v17 = vadd.f32 %v14655_v9, %v12305_v27  ;;  %v7992_v14 = vpop.f32.mrb[79].mxu1 }
0x378f   :  { %v7993_v28 = vadd.f32 %v14656_v24, %v7992_v14 }
0x3790   :  { %8003 = vmax.xlane.f32.xlu1 %v7998_v17 }
0x3791   :  { %8001 = vmax.xlane.f32.xlu0 %v7993_v28 }
0x37a1   :  { %14097 = vrot.lane.b32.xlu1 %v14096_v5, %s17953_s30 }
0x37a5   :  { %14107 = vrot.lane.b32.xlu1 %v14106_v63, %s17953_s30 }
0x37a7   :  { %14092 = vrot.lane.b32.xlu0 %v14091_v33, %s17953_s30 }
0x37a9   :  { %14117 = vrot.lane.b32.xlu1 %v14116_v46, %s17953_s30 }
0x37ab   :  { %14102 = vrot.lane.b32.xlu0 %v14101_v21, %s17953_s30 }
0x37ad   :  { %14127 = vrot.lane.b32.xlu1 %v14126_v16, %s17953_s30 }
0x37af   :  { %14112 = vrot.lane.b32.xlu0 %v14111_v57, %s17953_s30 }
0x37b3   :  { %14122 = vrot.lane.b32.xlu0 %v14121_v23, %s17953_s30  ;;  %v18030_v23 = vld [vmem:[#allocation59_spill] sm:$0xff] }
0x381d   :  { %v8004_v8 = vpop.xlane.xlu1 %8003 }
0x381e   :  { %v8006_v30 = vsub.f32 %v7998_v17, %v8004_v8  ;;  %v8002_v39 = vpop.xlane.xlu0 %8001  ;;  %v18031_v8 = vld [vmem:[#allocation19_spill] sm:$0xff] }
0x381f   :  { %v8005_v35 = vsub.f32 %v7993_v28, %v8002_v39  ;;  %v18033_v39 = vld [vmem:[#allocation21_spill] sm:$0xff] }
0x3820   :  { %v8009_v13 = vmul.f32 1.442695, %v8006_v30  ;;  %v18032_v30 = vld [vmem:[#allocation20_spill] sm:$0xff] }
0x3821   :  { %v8007_v6 = vmul.f32 1.442695, %v8005_v35  ;;  %v14098_v14 = vpop.permute.xlu1 %14097  ;;  %v18034_v35 = vld [vmem:[#allocation22_spill] sm:$0xff] }
0x3822   :  { %v14093_v55 = vpop.permute.xlu0 %14092  ;;  %v14100_v24 = vunpack.i.h.bf16 %v14098_v14  ;;  %v14099_v37 = vunpack.i.l.bf16 %v14098_v14 }
0x3823   :  { %14585 = vpow2.f32 %v8007_v6  ;;  %v14095_v27 = vunpack.i.h.bf16 %v14093_v55  ;;  %v14094_v9 = vunpack.i.l.bf16 %v14093_v55  ;;  %v18036_v6 = vld [vmem:[#allocation24_spill] sm:$0xff]  ;;  %v18037_v55 = vld [vmem:[#allocation25_spill] sm:$0xff] }
0x3824   :  { %14587 = vpow2.f32 %v8009_v13  ;;  %v13381_v19 = vpack.c.bf16 %v14100_v24, %v14099_v37  ;;  %v18035_v13 = vld [vmem:[#allocation23_spill] sm:$0xff] }
0x3825   :  { %v13377_v52 = vpack.c.bf16 %v14095_v27, %v14094_v9  ;;  %v14108_v28 = vpop.permute.xlu1 %14107  ;;  %v14429_v27 = vld [vmem:[%s16226_s9 + $0x20] sm:$0xff]   ;;  %v14430_v9 = vld [vmem:[%s16226_s9 + $0x28] sm:$0xff]   ;;  %s14724_s9 = smov 45  }
0x3826   :  { %v14103_v54 = vpop.permute.xlu0 %14102  ;;  %v14110_v34 = vunpack.i.h.bf16 %v14108_v28  ;;  %v14109_v7 = vunpack.i.l.bf16 %v14108_v28 }
0x3827   :  { %13378 = vmatprep.subr.bf16.mxu0 %v13377_v52  ;;  %v14105_v17 = vunpack.i.h.bf16 %v14103_v54  ;;  %v14104_v5 = vunpack.i.l.bf16 %v14103_v54 }
0x3828   :  { %v13389_v61 = vpack.c.bf16 %v14110_v34, %v14109_v7  ;;  %v10434_v34 = vld [vmem:[%s16240_s18 + $0x2] ss:$0 sm:$0xff] }
0x3829   :  { %v13385_v51 = vpack.c.bf16 %v14105_v17, %v14104_v5  ;;  %v14118_v56 = vpop.permute.xlu1 %14117 }
0x382a   :  { %v14113_v60 = vpop.permute.xlu0 %14112  ;;  %v14120_v1 = vunpack.i.h.bf16 %v14118_v56  ;;  %v14119_v38 = vunpack.i.l.bf16 %v14118_v56 }
0x382b   :  { %v14115_v10 = vunpack.i.h.bf16 %v14113_v60  ;;  %v14114_v63 = vunpack.i.l.bf16 %v14113_v60 }
0x382c   :  { %v13397_v50 = vpack.c.bf16 %v14120_v1, %v14119_v38  ;;  %v14657_v38 = vld [vmem:[%s14744_s13] sm:$0xff] }
0x382d   :  { %v14586_v31 = vpop.eup %14585  ;;  %v13393_v40 = vpack.c.bf16 %v14115_v10, %v14114_v63  ;;  %v14128_v12 = vpop.permute.xlu1 %14127 }
0x382e   :  { %v14588_v41 = vpop.eup %14587  ;;  %12338 = vmatprep.mubr.f32.mxu0 %v14586_v31  ;;  %v14123_v33 = vpop.permute.xlu0 %14122  ;;  %v14130_v46 = vunpack.i.h.bf16 %v14128_v12  ;;  %v14129_v25 = vunpack.i.l.bf16 %v14128_v12  ;;  %v14660_v12 = vld [vmem:[%s14744_s13 + $0x30] sm:$0xff] }
0x382f   :  { %12339 = vmatmul.mubr.f32.vlgmr.msra.gmra.mrb[100].mxu0 %v14588_v41  ;;  %v14125_v48 = vunpack.i.h.bf16 %v14123_v33  ;;  %v14124_v42 = vunpack.i.l.bf16 %v14123_v33  ;;  %v14658_v33 = vld [vmem:[%s14744_s13 + $0x10] sm:$0xff] }
0x3830   :  { %13380 = vmatpush3.bf16.msra.mxu0 %v13377_v52  ;;  %v13405_v49 = vpack.c.bf16 %v14130_v46, %v14129_v25  ;;  %v10407_v52 = vld [vmem:[%s16234_s20 + $0x2] ss:$0 sm:$0xff] }
0x3831   :  { %13382 = vmatprep.subr.bf16.mxu0 %v13381_v19  ;;  %v13401_v4 = vpack.c.bf16 %v14125_v48, %v14124_v42  ;;  %v14659_v48 = vld [vmem:[%s14744_s13 + $0x20] sm:$0xff] }
0x3832   :  { %v14661_v25 = vld [vmem:[%s14744_s13 + $0x40] sm:$0xff] }
0x3834   :  { %13384 = vmatpush3.bf16.msra.mxu0 %v13381_v19 }
0x3835   :  { %13386 = vmatprep.subr.bf16.mxu0 %v13385_v51 }
0x3838   :  { %13388 = vmatpush3.bf16.msra.mxu0 %v13385_v51 }
0x3839   :  { %13390 = vmatprep.subr.bf16.mxu0 %v13389_v61 }
0x383c   :  { %13392 = vmatpush3.bf16.msra.mxu0 %v13389_v61 }
0x383d   :  { %13394 = vmatprep.subr.bf16.mxu0 %v13393_v40 }
0x3840   :  { %13396 = vmatpush3.bf16.msra.mxu0 %v13393_v40 }
0x3841   :  { %13398 = vmatprep.subr.bf16.mxu0 %v13397_v50 }
0x3844   :  { %13400 = vmatpush3.bf16.msra.mxu0 %v13397_v50 }
0x3845   :  { %13402 = vmatprep.subr.bf16.mxu0 %v13401_v4 }
0x3848   :  { %13404 = vmatpush3.bf16.msra.mxu0 %v13401_v4 }
0x3849   :  { %13406 = vmatprep.subr.bf16.mxu0 %v13405_v49 }
0x384c   :  { %13408 = vmatpush3.bf16.msra.mxu0 %v13405_v49  ;;  %v14662_v49 = vld [vmem:[%s14744_s13 + $0x50] sm:$0xff] }
0x384d   :  { %12384 = vmatprep.subr.bf16.mxu0 %v17863_v2 }
0x3902   :  { %v12340_v21 = vpop.f32.mrb[100].mxu0 }
0x3903   :  { %14589 = vrcp.f32 %v12340_v21  ;;  %v8077_v32 = vpop.f32.mrb[101].mxu0  ;;  %v14663_v21 = vld [vmem:[%s14744_s13 + $0x60] sm:$0xff] }
0x3904   :  { %14591 = vrcp.f32 %v8077_v32 }
0x390d   :  { %v14590_v3 = vpop.eup %14589 }
0x390e   :  { %v14592_v53 = vpop.eup %14591  ;;  %v8089_v16 = vmul.f32 %v14590_v3, %v14588_v41  ;;  %v14664_v3 = vld [vmem:[%s14744_s13 + $0x8] sm:$0xff] }
0x390f   :  { %v8087_v45 = vmul.f32 %v14592_v53, %v14586_v31 }
0x3911   :  { %12373 = vmatprep.mubr.f32.mxu0 %v8087_v45  ;;  %v14665_v45 = vld [vmem:[%s14744_s13 + $0x18] sm:$0xff] }
0x3912   :  { %12374 = vmatmul.mubr.f32.vlgmr.msra.gmra.mrb[102].mxu0 %v8089_v16 }
0x3913   :  { %12388 = vmatprep.mubr.msk.bf16.mxu0 %vm14677_vm0, %v17863_v2  ;;  %12385 = vmatpush3.bf16.msra.mxu0 %v14429_v27 }
0x3914   :  { %12386 = vmatprep.subr.bf16.mxu0 %v17863_v2 }
0x3917   :  { %12387 = vmatpush3.bf16.msra.mxu0 %v14430_v9 }
0x39e5   :  { %v12375_v15 = vpop.f32.mrb[102].mxu0 }
0x39e6   :  { %v8220_v57 = vpop.f32.mrb[103].mxu0 }
0x39e7   :  { %v8229_v58 = vpack.c.bf16 %v12375_v15, %v8220_v57  ;;  %v14667_v57 = vld [vmem:[%s14744_s13 + $0x38] sm:$0xff] }
0x39e9   :  { %12381 = vmatmul.mubr.msk.bf16.vlgmr.msra.gmra.mrb[92].mxu1 %vm288_vm1, %v8229_v58  ;;  %v14668_v58 = vld [vmem:[%s14744_s13 + $0x48] sm:$0xff] }
0x39ea   :  { %12393 = vmatpush3.bf16.msra.mxu1 %v14427_v59  ;;  %12396 = vmatprep.mubr.msk.bf16.mxu1 %vm14677_vm0, %v17863_v2 }
0x39eb   :  { %12394 = vmatprep.subr.bf16.mxu1 %v17863_v2 }
0x39ee   :  { %12395 = vmatpush3.bf16.msra.mxu1 %v14428_v11 }
0x39ef   :  { %13458 = vmatprep.subr.bf16.mxu1 %v18029_v43 }
0x39f1   :  { %12397 = vmatmul.mubr.msk.bf16.vlgmr.msra.gmra.mrb[96].mxu1 %vm288_vm1, %v18030_v23 }
0x39f2   :  { %13460 = vmatpush3.bf16.msra.mxu1 %v18029_v43  ;;  %v14669_v43 = vld [vmem:[%s14744_s13 + $0x58] sm:$0xff] }
0x39f3   :  { %13462 = vmatprep.subr.bf16.mxu1 %v18031_v8 }
0x39f6   :  { %13464 = vmatpush3.bf16.msra.mxu1 %v18031_v8  ;;  %v14670_v8 = vld [vmem:[%s14744_s13 + $0x68] sm:$0xff] }
0x39f7   :  { %13466 = vmatprep.subr.bf16.mxu1 %v18032_v30 }
0x39fa   :  { %13468 = vmatpush3.bf16.msra.mxu1 %v18032_v30 }
0x39fb   :  { %13470 = vmatprep.subr.bf16.mxu1 %v18033_v39 }
0x39fe   :  { %13472 = vmatpush3.bf16.msra.mxu1 %v18033_v39  ;;  %v14671_v39 = vld [vmem:[%s14744_s13 + $0x70] sm:$0xff] }
0x39ff   :  { %13474 = vmatprep.subr.bf16.mxu1 %v18034_v35 }
0x3a02   :  { %13476 = vmatpush3.bf16.msra.mxu1 %v18034_v35 }
0x3a03   :  { %13478 = vmatprep.subr.bf16.mxu1 %v18035_v13 }
0x3a06   :  { %13480 = vmatpush3.bf16.msra.mxu1 %v18035_v13 }
0x3a07   :  { %13482 = vmatprep.subr.bf16.mxu1 %v18036_v6 }
0x3a0a   :  { %13484 = vmatpush3.bf16.msra.mxu1 %v18036_v6 }
0x3a0b   :  { %13486 = vmatprep.subr.bf16.mxu1 %v18037_v55 }
0x3a0e   :  { %13488 = vmatpush3.bf16.msra.mxu1 %v18037_v55 }
0x3abc   :  { %v8285_v14 = vpop.f32.mrb[92].mxu1 }
0x3abd   :  { %v8286_v24 = vadd.f32 %v10407_v52, %v8285_v14  ;;  %v12382_v37 = vpop.f32.mrb[93].mxu1 }
0x3abe   :  { %v8288_v54 = vpop.f32.mrb[94].mxu1 }
0x3abf   :  { %v17343_v31 = vadd.f32 %v8286_v24, %v17159_v20  ;;  %v8289_v41 = vadd.f32 %v10407_v52, %v8288_v54  ;;  %v12383_v19 = vpop.f32.mrb[95].mxu1  ;;  %v14672_v24 = vld [vmem:[%s14744_s13 + $0x78] sm:$0xff]  ;;  %v18038_v54 = vld [vmem:[#allocation3_spill] sm:$0xff]  ;;  %s14722_s13 = smov 30  }
0x3ac0   :  { %v18039_v19 = vld [vmem:[#allocation5_spill] sm:$0xff]  ;;  %s9647_s2 = sld [smem:[%s17682_s0 + %s14722_s13]]  }
0x3ac1   :  { %v17346_v17 = vadd.f32 %v8289_v41, %v17161_v62  ;;  %v8298_v5 = vsel %vm288_vm1, %v17343_v31, 0.0  ;;  %v8306_v28 = vmul.f32 %v17343_v31, %v17343_v31 }
0x3ac2   :  { %8299 = vadd.xlane.f32.xlu0 %v8298_v5 }
0x3ac3   :  { %v8301_v7 = vsel %vm288_vm1, %v17346_v17, 0.0  ;;  %v8307_v20 = vmul.f32 %v17346_v17, %v17346_v17  ;;  %v8308_v61 = vsel %vm288_vm1, %v8306_v28, 0.0  ;;  %v18040_v28 = vld [vmem:[#allocation2_spill] sm:$0xff] }
0x3ac4   :  { %8302 = vadd.xlane.f32.xlu1 %v8301_v7  ;;  %v8480_v62 = vpop.f32.mrb[96].mxu1  ;;  %v18041_v7 = vld [vmem:[#allocation4_spill] sm:$0xff] }
0x3ac5   :  { %v17357_v51 = vadd.f32 %v10434_v34, %v8480_v62  ;;  %v12398_v60 = vpop.f32.mrb[97].mxu1  ;;  %v8311_v63 = vsel %vm288_vm1, %v8307_v20, 0.0 }
0x3ac6   :  { %8309 = vadd.xlane.f32.xlu0 %v8308_v61  ;;  %v8483_v10 = vpop.f32.mrb[98].mxu1  ;;  %v18042_v60 = vld [vmem:[#allocation7_spill] sm:$0xff] }
0x3ac7   :  { %v17361_v56 = vadd.f32 %v10434_v34, %v8483_v10  ;;  %v12399_v1 = vpop.f32.mrb[99].mxu1  ;;  %v8487_v40 = vmul.f32 %v14657_v38, %v17357_v51  ;;  %v8489_v50 = vmul.f32 %v14658_v33, %v17357_v51  ;;  %v8491_v42 = vmul.f32 %v14659_v48, %v17357_v51  ;;  %v18043_v10 = vld [vmem:[#allocation6_spill] sm:$0xff] }
0x3ac8   :  { %v8493_v46 = vmul.f32 %v14660_v12, %v17357_v51  ;;  %v8495_v4 = vmul.f32 %v14661_v25, %v17357_v51  ;;  %v8497_v18 = vmul.f32 %v14662_v49, %v17357_v51  ;;  %v8499_v32 = vmul.f32 %v14663_v21, %v17357_v51  ;;  %v18044_v1 = vld [vmem:[#allocation11_spill] sm:$0xff]  ;;  %v18047_v25 = vld [vmem:[#allocation8_spill] sm:$0xff]  ;;  %v18049_v21 = vld [vmem:[#allocation14_spill] sm:$0xff] }
0x3ac9   :  { %v8488_v53 = vmul.f32 %v14664_v3, %v17361_v56  ;;  %v8490_v16 = vmul.f32 %v14665_v45, %v17361_v56  ;;  %v8492_v15 = vmul.f32 %v14666_v26, %v17361_v56  ;;  %v8494_v59 = vmul.f32 %v14667_v57, %v17361_v56  ;;  %v18048_v49 = vld [vmem:[#allocation15_spill] sm:$0xff] }
0x3aca   :  { %8312 = vadd.xlane.f32.xlu0 %v8311_v63  ;;  %v8496_v11 = vmul.f32 %v14668_v58, %v17361_v56  ;;  %v8498_v23 = vmul.f32 %v14669_v43, %v17361_v56  ;;  %v8500_v30 = vmul.f32 %v14670_v8, %v17361_v56  ;;  %v8501_v35 = vmul.f32 %v14671_v39, %v17357_v51 }
0x3acb   :  { %v17393_v13 = vpack.c.bf16 %v8488_v53, %v8487_v40  ;;  %v17395_v6 = vpack.c.bf16 %v8490_v16, %v8489_v50  ;;  %v17397_v55 = vpack.c.bf16 %v8492_v15, %v8491_v42  ;;  %v17399_v27 = vpack.c.bf16 %v8494_v59, %v8493_v46  ;;  %v18045_v50 = vld [vmem:[#allocation10_spill] sm:$0xff]  ;;  %v18046_v42 = vld [vmem:[#allocation9_spill] sm:$0xff]  ;;  %v18051_v16 = vld [vmem:[#allocation12_spill] sm:$0xff] }
0x3acc   :  { %v17401_v9 = vpack.c.bf16 %v8496_v11, %v8495_v4  ;;  %v17403_v52 = vpack.c.bf16 %v8498_v23, %v8497_v18  ;;  %v17405_v14 = vpack.c.bf16 %v8500_v30, %v8499_v32  ;;  %v8502_v37 = vmul.f32 %v14672_v24, %v17361_v56  ;;  %v18050_v53 = vld [vmem:[#allocation13_spill] sm:$0xff]  ;;  %v18053_v11 = vld [vmem:[#allocation16_spill] sm:$0xff] }
0x3acd   :  { %13411 = vmatprep.subr.msk.bf16.mxu0 %vm14922_vm2, %v17393_v13  ;;  %v17414_v41 = vmul.f32 %v17357_v51, %v18038_v54  ;;  %v17418_v5 = vmul.f32 %v17361_v56, %v18039_v19  ;;  %v17422_v34 = vmul.f32 %v17357_v51, %v18040_v28  ;;  %v17426_v20 = vmul.f32 %v17361_v56, %v18041_v7  ;;  %v18052_v59 = vld [vmem:[#allocation17_spill] sm:$0xff] }
0x3ace   :  { %v17428_v62 = vpack.c.bf16 %v8502_v37, %v8501_v35  ;;  %v17432_v61 = vmul.f32 %v17357_v51, %v18042_v60  ;;  %v17436_v63 = vmul.f32 %v17361_v56, %v18043_v10  ;;  %v17440_v38 = vmul.f32 %v17357_v51, %v18044_v1 }
0x3acf   :  { %v14131_v40 = vpack.i.bf16 %v17418_v5, %v17414_v41  ;;  %v14136_v33 = vpack.i.bf16 %v17426_v20, %v17422_v34  ;;  %v17448_v48 = vmul.f32 %v17361_v56, %v18045_v50  ;;  %v17452_v12 = vmul.f32 %v17357_v51, %v18046_v42 }
0x3ad0   :  { %v14141_v46 = vpack.i.bf16 %v17436_v63, %v17432_v61  ;;  %v17458_v4 = vmul.f32 %v17361_v56, %v18047_v25  ;;  %v17462_v18 = vmul.f32 %v17357_v51, %v18048_v49  ;;  %v17466_v32 = vmul.f32 %v17361_v56, %v18049_v21  ;;  %v10413_v49 = vld [vmem:[%s16397_s25 + $0x2] ss:$0 sm:$0xff]  ;;  %s9662_s25 = sld [smem:[%s17682_s0 + %s14724_s9]]  }
0x3ad1   :  { %v14151_v3 = vpack.i.bf16 %v17448_v48, %v17440_v38  ;;  %v17472_v45 = vmul.f32 %v17357_v51, %v18050_v53  ;;  %v17476_v26 = vmul.f32 %v17361_v56, %v18051_v16  ;;  %v17484_v58 = vmul.f32 %v17357_v51, %v18052_v59 }
0x3ad2   :  { %v14146_v15 = vpack.i.bf16 %v17458_v4, %v17452_v12  ;;  %v14161_v57 = vpack.i.bf16 %v17466_v32, %v17462_v18  ;;  %v17488_v43 = vmul.f32 %v17361_v56, %v18053_v11  ;;  %v10414_v11 = vld [vmem:[%s16402_s29 + $0x2] ss:$0 sm:$0xff] }
0x3ad3   :  { %v14156_v23 = vpack.i.bf16 %v17476_v26, %v17472_v45 }
0x3ad4   :  { %v14166_v8 = vpack.i.bf16 %v17488_v43, %v17484_v58 }
0x3b4f   :  { %v8300_v30 = vpop.xlane.xlu0 %8299 }
0x3b50   :  { %v8304_v39 = vmul.f32 0.03125, %v8300_v30 }
0x3b51   :  { %v8303_v35 = vpop.xlane.xlu1 %8302 }
0x3b52   :  { %v8316_v37 = vmul.f32 %v8304_v39, %v8304_v39  ;;  %v8305_v54 = vmul.f32 0.03125, %v8303_v35  ;;  %v8320_v50 = vsub.f32 %v17343_v31, %v8304_v39  ;;  %v10430_v31 = vld [vmem:[%s16464_s5 + $0x2] ss:$0 sm:$0xff] }
0x3b53   :  { %v8310_v24 = vpop.xlane.xlu0 %8309  ;;  %v14674_v39 = vld [vmem:[%s16474_s15] sm:$0xff] }
0x3b54   :  { %v8314_v19 = vmul.f32 0.03125, %v8310_v24  ;;  %v8317_v7 = vmul.f32 %v8305_v54, %v8305_v54  ;;  %v8321_v21 = vsub.f32 %v17346_v17, %v8305_v54 }
0x3b56   :  { %v8318_v51 = vsub.f32 %v8314_v19, %v8316_v37 }
0x3b57   :  { %v8313_v28 = vpop.xlane.xlu0 %8312 }
0x3b58   :  { %v8322_v56 = vadd.f32 1e-05, %v8318_v51  ;;  %v8315_v60 = vmul.f32 0.03125, %v8313_v28 }
0x3b5a   :  { %14593 = vrsqrt.f32 %v8322_v56  ;;  %v8319_v10 = vsub.f32 %v8315_v60, %v8317_v7 }
0x3b5c   :  { %v8323_v1 = vadd.f32 1e-05, %v8319_v10 }
0x3b5e   :  { %14595 = vrsqrt.f32 %v8323_v1 }
0x3b64   :  { %v14594_v42 = vpop.eup %14593 }
0x3b65   :  { %v8326_v25 = vmul.f32 %v14594_v42, %v8320_v50 }
0x3b67   :  { %v8334_v59 = vmul.f32 %v10413_v49, %v8326_v25 }
0x3b68   :  { %v14596_v53 = vpop.eup %14595 }
0x3b69   :  { %v8327_v16 = vmul.f32 %v14596_v53, %v8321_v21  ;;  %v17498_v35 = vadd.f32 %v10414_v11, %v8334_v59 }
0x3b6b   :  { %v8335_v30 = vmul.f32 %v10413_v49, %v8327_v16 }
0x3b6d   :  { %v17500_v24 = vadd.f32 %v10414_v11, %v8335_v30  ;;  %v14431_v11 = vld [vmem:[%s16513_s27 + $0x20] sm:$0xff]  }
0x3b6f   :  { %v8365_v37 = vpack.c.bf16 %v17500_v24, %v17498_v35 }
0x3b71   :  { %12389 = vmatmul.mubr.msk.bf16.vlgmr.msra.gmra.mrb[104].mxu0 %vm288_vm1, %v8365_v37 }
0x3b72   :  { %13414 = vmatpush3.bf16.xpose.msk.msra.mxu0 %vm14922_vm2, %v17393_v13 }
0x3b73   :  { %13417 = vmatprep.subr.msk.bf16.mxu0 %vm14922_vm2, %v17395_v6 }
0x3b7a   :  { %13420 = vmatpush3.bf16.xpose.msk.msra.mxu0 %vm14922_vm2, %v17395_v6 }
0x3b7b   :  { %13423 = vmatprep.subr.msk.bf16.mxu0 %vm14922_vm2, %v17397_v55 }
0x3b82   :  { %13426 = vmatpush3.bf16.xpose.msk.msra.mxu0 %vm14922_vm2, %v17397_v55 }
0x3b83   :  { %13429 = vmatprep.subr.msk.bf16.mxu0 %vm14922_vm2, %v17399_v27 }
0x3b8a   :  { %13432 = vmatpush3.bf16.xpose.msk.msra.mxu0 %vm14922_vm2, %v17399_v27 }
0x3b8b   :  { %13435 = vmatprep.subr.msk.bf16.mxu0 %vm14922_vm2, %v17401_v9 }
0x3b92   :  { %13438 = vmatpush3.bf16.xpose.msk.msra.mxu0 %vm14922_vm2, %v17401_v9 }
0x3b93   :  { %13441 = vmatprep.subr.msk.bf16.mxu0 %vm14922_vm2, %v17403_v52 }
0x3b9a   :  { %13444 = vmatpush3.bf16.xpose.msk.msra.mxu0 %vm14922_vm2, %v17403_v52 }
0x3b9b   :  { %13447 = vmatprep.subr.msk.bf16.mxu0 %vm14922_vm2, %v17405_v14 }
0x3ba2   :  { %13450 = vmatpush3.bf16.xpose.msk.msra.mxu0 %vm14922_vm2, %v17405_v14 }
0x3ba3   :  { %13453 = vmatprep.subr.msk.bf16.mxu0 %vm14922_vm2, %v17428_v62 }
0x3baa   :  { %13456 = vmatpush3.bf16.xpose.msk.msra.mxu0 %vm14922_vm2, %v17428_v62 }
0x3bab   :  { %12505 = vmatprep.subr.bf16.mxu0 %v17863_v2 }
0x3c44   :  { %v8421_v17 = vpop.f32.mrb[104].mxu0 }
0x3c45   :  { %v8422_v13 = vadd.f32 %v10430_v31, %v8421_v17  ;;  %v12390_v6 = vpop.f32.mrb[105].mxu0 }
0x3c46   :  { %v8424_v55 = vpop.f32.mrb[106].mxu0 }
0x3c47   :  { %v8425_v27 = vadd.f32 %v10430_v31, %v8424_v55  ;;  %v12391_v9 = vpop.f32.mrb[107].mxu0  ;;  %12432 = vmatprep.mubr.msk.f32.mxu0 %vm288_vm1, %v8422_v13  ;;  %v14432_v55 = vld [vmem:[%s16513_s27 + $0x28] sm:$0xff]  }
0x3c49   :  { %12433 = vmatmul.mubr.msk.f32.vlgmr.msra.gmra.mrb[108].mxu0 %vm288_vm1, %v8425_v27 }
0x3c4a   :  { %12509 = vmatprep.mubr.msk.bf16.mxu0 %vm14677_vm0, %v17863_v2  ;;  %12506 = vmatpush3.bf16.msra.mxu0 %v14431_v11 }
0x3c4b   :  { %12507 = vmatprep.subr.bf16.mxu0 %v17863_v2  ;;  %v10456_v2 = vld [vmem:[%s16524_s16 + $0x2] ss:$0 sm:$0xff] }
0x3c4e   :  { %12508 = vmatpush3.bf16.msra.mxu0 %v14432_v55  ;;  %v14451_v55 = vld [vmem:[%s16545_s17 + $0x208] sm:$0xff]  }
0x3d1c   :  { %v12434_v52 = vpop.f32.mrb[108].mxu0 }
0x3d1d   :  { %v8645_v14 = vadd.f32 %v14673_v44, %v12434_v52  ;;  %v8639_v62 = vpop.f32.mrb[109].mxu0 }
0x3d1e   :  { %v8640_v54 = vadd.f32 %v14674_v39, %v8639_v62 }
0x3d1f   :  { %8650 = vmax.xlane.f32.xlu0 %v8645_v14 }
0x3d20   :  { %8648 = vmax.xlane.f32.xlu1 %v8640_v54 }
0x3d31   :  { %14132 = vrot.lane.b32.xlu1 %v14131_v40, %s14681_s19 }
0x3d35   :  { %14137 = vrot.lane.b32.xlu0 %v14136_v33, %s14681_s19  ;;  %14142 = vrot.lane.b32.xlu1 %v14141_v46, %s14681_s19 }
0x3d39   :  { %14152 = vrot.lane.b32.xlu0 %v14151_v3, %s14681_s19  ;;  %14147 = vrot.lane.b32.xlu1 %v14146_v15, %s14681_s19 }
0x3d3d   :  { %14162 = vrot.lane.b32.xlu0 %v14161_v57, %s14681_s19  ;;  %14157 = vrot.lane.b32.xlu1 %v14156_v23, %s14681_s19 }
0x3d41   :  { %14167 = vrot.lane.b32.xlu1 %v14166_v8, %s14681_s19 }
0x3dac   :  { %v8651_v41 = vpop.xlane.xlu0 %8650 }
0x3dad   :  { %v8653_v5 = vsub.f32 %v8645_v14, %v8651_v41  ;;  %v8649_v34 = vpop.xlane.xlu1 %8648 }
0x3dae   :  { %v8652_v20 = vsub.f32 %v8640_v54, %v8649_v34 }
0x3daf   :  { %v8656_v61 = vmul.f32 1.442695, %v8653_v5 }
0x3db0   :  { %v8654_v63 = vmul.f32 1.442695, %v8652_v20  ;;  %v14138_v12 = vpop.permute.xlu0 %14137 }
0x3db1   :  { %v14133_v38 = vpop.permute.xlu1 %14132  ;;  %v14140_v4 = vunpack.i.h.bf16 %v14138_v12  ;;  %v14139_v18 = vunpack.i.l.bf16 %v14138_v12  ;;  %v14441_v12 = vld [vmem:[%s16536_s3 + $0xa4] ss:$16 sps:$4 sm:$0xff]  }
0x3db2   :  { %14597 = vpow2.f32 %v8654_v63  ;;  %v14135_v40 = vunpack.i.h.bf16 %v14133_v38  ;;  %v14134_v33 = vunpack.i.l.bf16 %v14133_v38 }
0x3db3   :  { %14599 = vpow2.f32 %v8656_v61  ;;  %v13493_v45 = vpack.c.bf16 %v14140_v4, %v14139_v18  ;;  %v14439_v4 = vld [vmem:[%s16536_s3 + $0xa0] ss:$16 sps:$4 sm:$0xff]   ;;  %v14442_v18 = vld [vmem:[%s16536_s3 + $0xa8] ss:$16 sps:$4 sm:$0xff]  }
0x3db4   :  { %v13489_v48 = vpack.c.bf16 %v14135_v40, %v14134_v33  ;;  %v14153_v8 = vpop.permute.xlu0 %14152  ;;  %v14433_v40 = vld [vmem:[%s16536_s3 + $0x80] ss:$16 sps:$4 sm:$0xff]   ;;  %v14436_v33 = vld [vmem:[%s16536_s3 + $0x88] ss:$16 sps:$4 sm:$0xff]  }
0x3db5   :  { %v14143_v46 = vpop.permute.xlu1 %14142  ;;  %v14155_v19 = vunpack.i.h.bf16 %v14153_v8  ;;  %v14154_v51 = vunpack.i.l.bf16 %v14153_v8 }
0x3db6   :  { %13490 = vmatprep.subr.bf16.mxu1 %v13489_v48  ;;  %v14145_v26 = vunpack.i.h.bf16 %v14143_v46  ;;  %v14144_v15 = vunpack.i.l.bf16 %v14143_v46  ;;  %v14444_v46 = vld [vmem:[%s16536_s3 + $0xac] ss:$16 sps:$4 sm:$0xff]  }
0x3db7   :  { %v13505_v56 = vpack.c.bf16 %v14155_v19, %v14154_v51 }
0x3db8   :  { %v13497_v58 = vpack.c.bf16 %v14145_v26, %v14144_v15  ;;  %v14163_v1 = vpop.permute.xlu0 %14162 }
0x3db9   :  { %v14148_v57 = vpop.permute.xlu1 %14147  ;;  %v14165_v50 = vunpack.i.h.bf16 %v14163_v1  ;;  %v14164_v42 = vunpack.i.l.bf16 %v14163_v1 }
0x3dba   :  { %v14150_v43 = vunpack.i.h.bf16 %v14148_v57  ;;  %v14149_v23 = vunpack.i.l.bf16 %v14148_v57 }
0x3dbb   :  { %v13513_v21 = vpack.c.bf16 %v14165_v50, %v14164_v42  ;;  %v10462_v42 = vld [vmem:[%s16556_s22 + $0x2] ss:$0 sm:$0xff] }
0x3dbc   :  { %v14598_v32 = vpop.eup %14597  ;;  %v13501_v28 = vpack.c.bf16 %v14150_v43, %v14149_v23 }
0x3dbd   :  { %v14600_v3 = vpop.eup %14599  ;;  %12467 = vmatprep.mubr.f32.mxu1 %v14598_v32  ;;  %v14158_v7 = vpop.permute.xlu1 %14157 }
0x3dbe   :  { %12468 = vmatmul.mubr.f32.vlgmr.msra.gmra.mrb[100].mxu1 %v14600_v3  ;;  %v14160_v60 = vunpack.i.h.bf16 %v14158_v7  ;;  %v14159_v10 = vunpack.i.l.bf16 %v14158_v7 }
0x3dbf   :  { %13492 = vmatpush3.bf16.msra.mxu1 %v13489_v48  ;;  %v14438_v48 = vld [vmem:[%s16536_s3 + $0x8c] ss:$16 sps:$4 sm:$0xff]  }
0x3dc0   :  { %13494 = vmatprep.subr.bf16.mxu1 %v13493_v45  ;;  %v13509_v25 = vpack.c.bf16 %v14160_v60, %v14159_v10  ;;  %9110 = vmatprep.subr.bf16.mxu0 %v14438_v48  ;;  %v14473_v48 = vld [vmem:[%s16545_s17 + $0x278] sm:$0xff]  }
0x3dc1   :  { %v14168_v49 = vpop.permute.xlu1 %14167 }
0x3dc2   :  { %v14170_v53 = vunpack.i.h.bf16 %v14168_v49  ;;  %v14169_v16 = vunpack.i.l.bf16 %v14168_v49 }
0x3dc3   :  { %13496 = vmatpush3.bf16.msra.mxu1 %v13493_v45 }
0x3dc4   :  { %13498 = vmatprep.subr.bf16.mxu1 %v13497_v58  ;;  %v13517_v59 = vpack.c.bf16 %v14170_v53, %v14169_v16  ;;  %v10463_v16 = vld [vmem:[%s16561_s1 + $0x2] ss:$0 sm:$0xff] }
0x3dc7   :  { %13500 = vmatpush3.bf16.msra.mxu1 %v13497_v58 }
0x3dc8   :  { %13502 = vmatprep.subr.bf16.mxu1 %v13501_v28 }
0x3dcb   :  { %13504 = vmatpush3.bf16.msra.mxu1 %v13501_v28 }
0x3dcc   :  { %13506 = vmatprep.subr.bf16.mxu1 %v13505_v56 }
0x3dcf   :  { %13508 = vmatpush3.bf16.msra.mxu1 %v13505_v56 }
0x3dd0   :  { %13510 = vmatprep.subr.bf16.mxu1 %v13509_v25 }
0x3dd3   :  { %13512 = vmatpush3.bf16.msra.mxu1 %v13509_v25 }
0x3dd4   :  { %13514 = vmatprep.subr.bf16.mxu1 %v13513_v21 }
0x3dd7   :  { %13516 = vmatpush3.bf16.msra.mxu1 %v13513_v21 }
0x3dd8   :  { %13518 = vmatprep.subr.bf16.mxu1 %v13517_v59 }
0x3ddb   :  { %13520 = vmatpush3.bf16.msra.mxu1 %v13517_v59 }
0x3e91   :  { %v12469_v30 = vpop.f32.mrb[100].mxu1 }
0x3e92   :  { %14601 = vrcp.f32 %v12469_v30  ;;  %v8724_v37 = vpop.f32.mrb[101].mxu1 }
0x3e93   :  { %14603 = vrcp.f32 %v8724_v37  ;;  %v14447_v37 = vld [vmem:[%s16545_s17 + $0x200] sm:$0xff]  }
0x3e9c   :  { %v14602_v31 = vpop.eup %14601 }
0x3e9d   :  { %v14604_v17 = vpop.eup %14603  ;;  %v8736_v6 = vmul.f32 %v14602_v31, %v14600_v3  ;;  %v14446_v3 = vld [vmem:[%s16545_s17 + $0x2c0] sm:$0xff]  }
0x3e9e   :  { %v8734_v13 = vmul.f32 %v14604_v17, %v14598_v32  ;;  %v14445_v32 = vld [vmem:[%s16545_s17 + $0x240] sm:$0xff]  }
0x3e9f   :  { %v14448_v31 = vld [vmem:[%s16545_s17 + $0x280] sm:$0xff]  }
0x3ea0   :  { %12502 = vmatprep.mubr.f32.mxu1 %v8734_v13  ;;  %v14449_v13 = vld [vmem:[%s16545_s17 + $0x248] sm:$0xff]  }
0x3ea1   :  { %12503 = vmatmul.mubr.f32.vlgmr.msra.gmra.mrb[102].mxu1 %v8736_v6  ;;  %v14450_v6 = vld [vmem:[%s16545_s17 + $0x2c8] sm:$0xff]  }
0x3ea2   :  { %9099 = vmatprep.mubr.bf16.mxu1 %v17941_v22 }
0x3f74   :  { %v12504_v27 = vpop.f32.mrb[102].mxu1 }
0x3f75   :  { %v8867_v9 = vpop.f32.mrb[103].mxu1 }
0x3f76   :  { %v8876_v52 = vpack.c.bf16 %v12504_v27, %v8867_v9  ;;  %v14452_v27 = vld [vmem:[%s16545_s17 + $0x288] sm:$0xff]   ;;  %v14453_v9 = vld [vmem:[%s16545_s17 + $0x250] sm:$0xff]  }
0x3f78   :  { %12510 = vmatmul.mubr.msk.bf16.vlgmr.msra.gmra.mrb[112].mxu0 %vm288_vm1, %v8876_v52  ;;  %v14454_v52 = vld [vmem:[%s16545_s17 + $0x2d0] sm:$0xff]  }
0x3f79   :  { %9142 = vmatprep.mubr.bf16.mxu0 %v17941_v22  ;;  %9111 = vmatpush1.bf16.msra.mxu0 %v14436_v33  ;;  %v14472_v33 = vld [vmem:[%s16545_s17 + $0x2b0] sm:$0xff]  }
0x3f7a   :  { %9112 = vmatprep.subr.bf16.mxu0 %v14444_v46  ;;  %v14475_v46 = vld [vmem:[%s16545_s17 + $0x238] sm:$0xff]  }
0x3f7d   :  { %9113 = vmatpush1.bf16.msra.mxu0 %v14442_v18  ;;  %v10472_v18 = vld [vmem:[%s16607_s23 + $0x8] sm:$0xf] }
0x3f7e   :  { %11378 = vmatprep.subr.bf16.mxu0 %v14446_v3  ;;  %v9015_v3 = vrot.slane %v10472_v18, %v17943_v29 }
0x404b   :  { %v8932_v44 = vpop.f32.mrb[112].mxu0 }
0x404c   :  { %v8933_v14 = vadd.f32 %v10456_v2, %v8932_v44  ;;  %v12511_v62 = vpop.f32.mrb[113].mxu0  ;;  %v14456_v44 = vld [vmem:[%s16545_s17 + $0x290] sm:$0xff]  }
0x404d   :  { %v8935_v39 = vpop.f32.mrb[114].mxu0  ;;  %v14458_v62 = vld [vmem:[%s16545_s17 + $0x2d8] sm:$0xff]  }
0x404e   :  { %v8939_v54 = vadd.f32 %v8933_v14, %v17498_v35  ;;  %v8936_v41 = vadd.f32 %v10456_v2, %v8935_v39  ;;  %v12512_v5 = vpop.f32.mrb[115].mxu0  ;;  %v14455_v2 = vld [vmem:[%s16545_s17 + $0x210] sm:$0xff]   ;;  %v14457_v14 = vld [vmem:[%s16545_s17 + $0x258] sm:$0xff]  }
0x404f   :  { %v14459_v39 = vld [vmem:[%s16545_s17 + $0x218] sm:$0xff]   ;;  %v14462_v5 = vld [vmem:[%s16545_s17 + $0x2e0] sm:$0xff]  }
0x4050   :  { %v8940_v34 = vadd.f32 %v8936_v41, %v17500_v24  ;;  %v8945_v20 = vsel %vm288_vm1, %v8939_v54, 0.0  ;;  %v8953_v22 = vmul.f32 %v8939_v54, %v8939_v54  ;;  %v14435_v24 = vld [vmem:[%s16536_s3 + $0x84] ss:$16 sps:$4 sm:$0xff]  }
0x4051   :  { %8946 = vadd.xlane.f32.xlu0 %v8945_v20  ;;  %9067 = vmatprep.subr.bf16.mxu1 %v14435_v24  ;;  %v14461_v41 = vld [vmem:[%s16545_s17 + $0x260] sm:$0xff]   ;;  %v14471_v24 = vld [vmem:[%s16545_s17 + $0x230] sm:$0xff]  }
0x4052   :  { %v8948_v61 = vsel %vm288_vm1, %v8940_v34, 0.0  ;;  %v8955_v63 = vsel %vm288_vm1, %v8953_v22, 0.0  ;;  %v8954_v38 = vmul.f32 %v8940_v34, %v8940_v34  ;;  %9068 = vmatpush1.bf16.msra.mxu1 %v14433_v40  ;;  %v14464_v20 = vld [vmem:[%s16545_s17 + $0x2a0] sm:$0xff]   ;;  %v14465_v22 = vld [vmem:[%s16545_s17 + $0x268] sm:$0xff]   ;;  %v14470_v40 = vld [vmem:[%s16545_s17 + $0x2f0] sm:$0xff]  }
0x4053   :  { %8949 = vadd.xlane.f32.xlu1 %v8948_v61  ;;  %9069 = vmatprep.subr.bf16.mxu1 %v14441_v12  ;;  %v14466_v61 = vld [vmem:[%s16545_s17 + $0x2e8] sm:$0xff]   ;;  %v14474_v12 = vld [vmem:[%s16545_s17 + $0x2f8] sm:$0xff]  }
0x4054   :  { %v8958_v35 = vsel %vm288_vm1, %v8954_v38, 0.0  ;;  %v14468_v38 = vld [vmem:[%s16545_s17 + $0x2a8] sm:$0xff]  }
0x4055   :  { %8956 = vadd.xlane.f32.xlu0 %v8955_v63  ;;  %v14467_v63 = vld [vmem:[%s16545_s17 + $0x228] sm:$0xff]  }
0x4056   :  { %9070 = vmatpush1.bf16.msra.mxu1 %v14439_v4  ;;  %v14476_v4 = vld [vmem:[%s16545_s17 + $0x2b8] sm:$0xff]  }
0x4057   :  { %11356 = vmatprep.subr.bf16.mxu1 %v14445_v32  ;;  %v9007_v32 = vrot.slane %v10472_v18, %v17942_v0 }
0x4059   :  { %8959 = vadd.xlane.f32.xlu0 %v8958_v35  ;;  %v14469_v35 = vld [vmem:[%s16545_s17 + $0x270] sm:$0xff]  }
0x40de   :  { %v8947_v45 = vpop.xlane.xlu0 %8946 }
0x40df   :  { %v8951_v26 = vmul.f32 0.03125, %v8947_v45  ;;  %v9011_v45 = vrot.slane %v10472_v18, %v17944_v47 }
0x40e0   :  { %v8950_v15 = vpop.xlane.xlu1 %8949 }
0x40e1   :  { %v8963_v58 = vmul.f32 %v8951_v26, %v8951_v26  ;;  %v8952_v43 = vmul.f32 0.03125, %v8950_v15  ;;  %v8967_v10 = vsub.f32 %v8939_v54, %v8951_v26  ;;  %v14460_v54 = vld [vmem:[%s16545_s17 + $0x298] sm:$0xff]   ;;  %v9019_v26 = vrot.slane %v10472_v18, %v17945_v36 }
0x40e2   :  { %v8957_v57 = vpop.xlane.xlu0 %8956 }
0x40e3   :  { %v8961_v23 = vmul.f32 0.03125, %v8957_v57  ;;  %v8964_v51 = vmul.f32 %v8952_v43, %v8952_v43  ;;  %v8968_v25 = vsub.f32 %v8940_v34, %v8952_v43  ;;  %v14463_v34 = vld [vmem:[%s16545_s17 + $0x220] sm:$0xff]  }
0x40e5   :  { %v8965_v8 = vsub.f32 %v8961_v23, %v8963_v58 }
0x40e6   :  { %v8960_v19 = vpop.xlane.xlu0 %8959 }
0x40e7   :  { %v8969_v28 = vadd.f32 1e-05, %v8965_v8  ;;  %v8962_v7 = vmul.f32 0.03125, %v8960_v19 }
0x40e9   :  { %14605 = vrsqrt.f32 %v8969_v28  ;;  %v8966_v56 = vsub.f32 %v8962_v7, %v8964_v51 }
0x40eb   :  { %v8970_v60 = vadd.f32 1e-05, %v8966_v56 }
0x40ed   :  { %14607 = vrsqrt.f32 %v8970_v60 }
0x40f3   :  { %v14606_v1 = vpop.eup %14605 }
0x40f4   :  { %v8973_v50 = vmul.f32 %v14606_v1, %v8967_v10 }
0x40f6   :  { %v8981_v53 = vmul.f32 %v10462_v42, %v8973_v50 }
0x40f7   :  { %v14608_v49 = vpop.eup %14607 }
0x40f8   :  { %v8974_v21 = vmul.f32 %v14608_v49, %v8968_v25  ;;  %v17615_v11 = vadd.f32 %v10463_v16, %v8981_v53 }
0x40fa   :  { %v8982_v59 = vmul.f32 %v10462_v42, %v8974_v21 }
0x40fc   :  { %v17617_v30 = vadd.f32 %v10463_v16, %v8982_v59 }
0x40fe   :  { %v9002_v17 = vpack.c.bf16 %v17617_v30, %v17615_v11 }
0x4100   :  { %10481 = vmatmul.mubr.msk.bf16.vlgmr.msra.gmra.mrb[104].mxu1 %vm288_vm1, %v9002_v17  ;;  %10482 = vmatmul.mubr.msk.bf16.vlgmr.msra.gmra.mrb[116].mxu0 %vm288_vm1, %v9002_v17 }
0x4101   :  { %11357 = vmatpush3.bf16.msra.mxu1 %v14447_v37  ;;  %11379 = vmatpush3.bf16.msra.mxu0 %v14448_v31 }
0x4102   :  { %11358 = vmatprep.subr.bf16.mxu1 %v14449_v13  ;;  %11380 = vmatprep.subr.bf16.mxu0 %v14450_v6  ;;  %v10548_v6 = vld [vmem:[%s16619_s26 + $0x2] ss:$0 sm:$0xff] }
0x4105   :  { %11359 = vmatpush3.bf16.msra.mxu1 %v14451_v55  ;;  %11381 = vmatpush3.bf16.msra.mxu0 %v14452_v27 }
0x4106   :  { %11360 = vmatprep.subr.bf16.mxu1 %v14453_v9  ;;  %11382 = vmatprep.subr.bf16.mxu0 %v14454_v52 }
0x4109   :  { %11361 = vmatpush3.bf16.msra.mxu1 %v14455_v2  ;;  %11383 = vmatpush3.bf16.msra.mxu0 %v14456_v44 }
0x410a   :  { %11362 = vmatprep.subr.bf16.mxu1 %v14457_v14  ;;  %11384 = vmatprep.subr.bf16.mxu0 %v14458_v62 }
0x410d   :  { %11363 = vmatpush3.bf16.msra.mxu1 %v14459_v39  ;;  %11385 = vmatpush3.bf16.msra.mxu0 %v14460_v54 }
0x410e   :  { %11364 = vmatprep.subr.bf16.mxu1 %v14461_v41  ;;  %11386 = vmatprep.subr.bf16.mxu0 %v14462_v5 }
0x4111   :  { %11365 = vmatpush3.bf16.msra.mxu1 %v14463_v34  ;;  %11387 = vmatpush3.bf16.msra.mxu0 %v14464_v20 }
0x4112   :  { %11366 = vmatprep.subr.bf16.mxu1 %v14465_v22  ;;  %11388 = vmatprep.subr.bf16.mxu0 %v14466_v61 }
0x4115   :  { %11367 = vmatpush3.bf16.msra.mxu1 %v14467_v63  ;;  %11389 = vmatpush3.bf16.msra.mxu0 %v14468_v38 }
0x4116   :  { %11368 = vmatprep.subr.bf16.mxu1 %v14469_v35  ;;  %11390 = vmatprep.subr.bf16.mxu0 %v14470_v40 }
0x4119   :  { %11369 = vmatpush3.bf16.msra.mxu1 %v14471_v24  ;;  %11391 = vmatpush3.bf16.msra.mxu0 %v14472_v33 }
0x411a   :  { %11370 = vmatprep.subr.bf16.mxu1 %v14473_v48  ;;  %11392 = vmatprep.subr.bf16.mxu0 %v14474_v12 }
0x411d   :  { %11371 = vmatpush3.bf16.msra.mxu1 %v14475_v46  ;;  %11393 = vmatpush3.bf16.msra.mxu0 %v14476_v4 }
0x41d3   :  { %v9101_v15 = vpop.f32.mrb[104].mxu1  ;;  %v9144_v57 = vpop.f32.mrb[116].mxu0 }
0x41d4   :  { %v9102_v58 = vadd.f32 %v9101_v15, %v9007_v32  ;;  %v9145_v43 = vadd.f32 %v9144_v57, %v9015_v3  ;;  %v9103_v23 = vpop.f32.mrb[105].mxu1  ;;  %v9146_v8 = vpop.f32.mrb[117].mxu0 }
0x41d5   :  { %v9104_v19 = vadd.f32 %v9103_v23, %v9011_v45  ;;  %v9147_v51 = vadd.f32 %v9146_v8, %v9019_v26  ;;  %v9105_v28 = vpop.f32.mrb[106].mxu1  ;;  %v9148_v7 = vpop.f32.mrb[118].mxu0  ;;  %v10583_v8 = vld [vmem:[%s16635_s12 + $0x2] ss:$0 sm:$0xff] }
0x41d6   :  { %v9106_v56 = vadd.f32 %v9105_v28, %v9007_v32  ;;  %v9149_v60 = vadd.f32 %v9148_v7, %v9015_v3  ;;  %v9107_v10 = vpop.f32.mrb[107].mxu1  ;;  %v9150_v0 = vpop.f32.mrb[119].mxu0  ;;  %v9153_v50 = vmax.f32 %v9102_v58, 0.0  ;;  %v9155_v47 = vmax.f32 %v9145_v43, 0.0  ;;  %v10584_v7 = vld [vmem:[%s16640_s28 + $0x2] ss:$0 sm:$0xff] }
0x41d7   :  { %v9108_v1 = vadd.f32 %v9107_v10, %v9011_v45  ;;  %v9151_v29 = vadd.f32 %v9150_v0, %v9019_v26  ;;  %v9154_v25 = vmax.f32 %v9104_v19, 0.0  ;;  %v9156_v49 = vmax.f32 %v9147_v51, 0.0 }
0x41d8   :  { %v9157_v42 = vmax.f32 %v9106_v56, 0.0  ;;  %v9159_v36 = vmax.f32 %v9149_v60, 0.0 }
0x41d9   :  { %v9158_v21 = vmax.f32 %v9108_v1, 0.0  ;;  %v9160_v53 = vmax.f32 %v9151_v29, 0.0 }
0x41da   :  { %v9228_v16 = vpack.c.bf16 %v9157_v42, %v9153_v50  ;;  %v9230_v59 = vpack.c.bf16 %v9159_v36, %v9155_v47 }
0x41db   :  { %v9229_v37 = vpack.c.bf16 %v9158_v21, %v9154_v25  ;;  %v9231_v31 = vpack.c.bf16 %v9160_v53, %v9156_v49 }
0x41dd   :  { %9462 = vmatprep.mubr.bf16.mxu1 %v9229_v37  ;;  %9503 = vmatprep.mubr.bf16.mxu0 %v9231_v31 }
0x41de   :  { %9463 = vmatmul.mubr.bf16.vlgmr.msra.gmra.mrb[108].mxu1 %v9228_v16  ;;  %9504 = vmatmul.mubr.bf16.vlgmr.msra.gmra.mrb[120].mxu0 %v9230_v59 }
0x42b1   :  { %v11372_v17 = vpop.f32.mrb[108].mxu1  ;;  %v11394_v13 = vpop.f32.mrb[120].mxu0 }
0x42b2   :  { %v11373_v55 = vpop.f32.mrb[109].mxu1  ;;  %v11395_v27 = vpop.f32.mrb[121].mxu0 }
0x42b3   :  { %v11374_v9 = vadd.f32 %v11373_v55, %v11372_v17  ;;  %v11396_v52 = vadd.f32 %v11395_v27, %v11394_v13  ;;  %v11375_v2 = vpop.f32.mrb[110].mxu1  ;;  %v11397_v44 = vpop.f32.mrb[122].mxu0 }
0x42b4   :  { %v11376_v14 = vpop.f32.mrb[111].mxu1  ;;  %v11398_v62 = vpop.f32.mrb[123].mxu0 }
0x42b5   :  { %v9465_v39 = vadd.f32 %v11374_v9, %v10548_v6  ;;  %v11377_v54 = vadd.f32 %v11376_v14, %v11375_v2  ;;  %v11399_v41 = vadd.f32 %v11398_v62, %v11397_v44  ;;  %v10585_v14 = vld [vmem:[%s9647_s2] ss:$0 sm:$0xff] }
0x42b7   :  { %v9506_v5 = vadd.f32 %v11396_v52, %v9465_v39  ;;  %v9468_v34 = vadd.f32 %v11377_v54, %v10548_v6 }
0x42b9   :  { %v9512_v20 = vadd.f32 %v9506_v5, %v17615_v11  ;;  %v9509_v22 = vadd.f32 %v11399_v41, %v9468_v34  ;;  %v10586_v41 = vld [vmem:[%s9646_s10] ss:$0 sm:$0xff] }
0x42bb   :  { %v9513_v61 = vadd.f32 %v9509_v22, %v17617_v30  ;;  %v9518_v63 = vsel %vm288_vm1, %v9512_v20, 0.0  ;;  %v9526_v38 = vmul.f32 %v9512_v20, %v9512_v20 }
0x42bc   :  { %9519 = vadd.xlane.f32.xlu1 %v9518_v63 }
0x42bd   :  { %v9521_v35 = vsel %vm288_vm1, %v9513_v61, 0.0  ;;  %v9527_v40 = vmul.f32 %v9513_v61, %v9513_v61  ;;  %v9528_v24 = vsel %vm288_vm1, %v9526_v38, 0.0 }
0x42be   :  { %9522 = vadd.xlane.f32.xlu0 %v9521_v35 }
0x42bf   :  { %v9531_v33 = vsel %vm288_vm1, %v9527_v40, 0.0 }
0x42c0   :  { %9529 = vadd.xlane.f32.xlu1 %v9528_v24 }
0x42c2   :  { %9532 = vadd.xlane.f32.xlu0 %v9531_v33 }
0x4349   :  { %v9520_v48 = vpop.xlane.xlu1 %9519 }
0x434a   :  { %v9524_v12 = vmul.f32 0.03125, %v9520_v48 }
0x434b   :  { %v9523_v11 = vpop.xlane.xlu0 %9522 }
0x434c   :  { %v9525_v46 = vmul.f32 0.03125, %v9523_v11  ;;  %v9536_v4 = vmul.f32 %v9524_v12, %v9524_v12  ;;  %v9540_v43 = vsub.f32 %v9512_v20, %v9524_v12 }
0x434d   :  { %v9530_v30 = vpop.xlane.xlu1 %9529 }
0x434e   :  { %v9534_v18 = vmul.f32 0.03125, %v9530_v30  ;;  %v9537_v3 = vmul.f32 %v9525_v46, %v9525_v46  ;;  %v9541_v19 = vsub.f32 %v9513_v61, %v9525_v46 }
0x434f   :  { %v9533_v32 = vpop.xlane.xlu0 %9532 }
0x4350   :  { %v9538_v45 = vsub.f32 %v9534_v18, %v9536_v4  ;;  %v9535_v26 = vmul.f32 0.03125, %v9533_v32 }
0x4352   :  { %v9542_v15 = vadd.f32 1e-05, %v9538_v45  ;;  %v9539_v57 = vsub.f32 %v9535_v26, %v9537_v3 }
0x4354   :  { %14609 = vrsqrt.f32 %v9542_v15  ;;  %v9543_v58 = vadd.f32 1e-05, %v9539_v57 }
0x4356   :  { %14611 = vrsqrt.f32 %v9543_v58 }
0x435e   :  { %v14610_v23 = vpop.eup %14609 }
0x435f   :  { %v9546_v51 = vmul.f32 %v14610_v23, %v9540_v43 }
0x4360   :  { %v14612_v28 = vpop.eup %14611 }
0x4361   :  { %v9554_v56 = vmul.f32 %v10583_v8, %v9546_v51  ;;  %v9547_v60 = vmul.f32 %v14612_v28, %v9541_v19 }
0x4363   :  { %v9562_v10 = vadd.f32 %v10584_v7, %v9554_v56  ;;  %v9555_v0 = vmul.f32 %v10583_v8, %v9547_v60 }
0x4365   :  { %v9566_v1 = vsel %vm288_vm1, %v9562_v10, 0.0  ;;  %v9563_v29 = vadd.f32 %v10584_v7, %v9555_v0  ;;  %v9574_v50 = vmul.f32 %v9562_v10, %v9562_v10 }
0x4366   :  { %9567 = vadd.xlane.f32.xlu1 %v9566_v1 }
0x4367   :  { %v9569_v47 = vsel %vm288_vm1, %v9563_v29, 0.0  ;;  %v9575_v42 = vmul.f32 %v9563_v29, %v9563_v29  ;;  %v9576_v36 = vsel %vm288_vm1, %v9574_v50, 0.0 }
0x4368   :  { %9570 = vadd.xlane.f32.xlu0 %v9569_v47 }
0x4369   :  { %v9579_v25 = vsel %vm288_vm1, %v9575_v42, 0.0 }
0x436a   :  { %9577 = vadd.xlane.f32.xlu1 %v9576_v36 }
0x436c   :  { %9580 = vadd.xlane.f32.xlu0 %v9579_v25 }
0x43f3   :  { %v9568_v49 = vpop.xlane.xlu1 %9567 }
0x43f4   :  { %v9572_v21 = vmul.f32 0.03125, %v9568_v49 }
0x43f5   :  { %v9571_v53 = vpop.xlane.xlu0 %9570 }
0x43f6   :  { %v9573_v16 = vmul.f32 0.03125, %v9571_v53  ;;  %v9584_v37 = vmul.f32 %v9572_v21, %v9572_v21  ;;  %v9588_v2 = vsub.f32 %v9562_v10, %v9572_v21 }
0x43f7   :  { %v9578_v59 = vpop.xlane.xlu1 %9577 }
0x43f8   :  { %v9582_v31 = vmul.f32 0.03125, %v9578_v59  ;;  %v9585_v13 = vmul.f32 %v9573_v16, %v9573_v16  ;;  %v9589_v62 = vsub.f32 %v9563_v29, %v9573_v16 }
0x43f9   :  { %v9581_v17 = vpop.xlane.xlu0 %9580 }
0x43fa   :  { %v9586_v6 = vsub.f32 %v9582_v31, %v9584_v37  ;;  %v9583_v55 = vmul.f32 0.03125, %v9581_v17 }
0x43fc   :  { %v9590_v27 = vadd.f32 1e-05, %v9586_v6  ;;  %v9587_v9 = vsub.f32 %v9583_v55, %v9585_v13 }
0x43fe   :  { %14613 = vrsqrt.f32 %v9590_v27  ;;  %v9591_v52 = vadd.f32 1e-05, %v9587_v9 }
0x4400   :  { %14615 = vrsqrt.f32 %v9591_v52 }
0x4408   :  { %v14614_v44 = vpop.eup %14613 }
0x4409   :  { %v9594_v39 = vmul.f32 %v14614_v44, %v9588_v2 }
0x440a   :  { %v14616_v54 = vpop.eup %14615 }
0x440b   :  { %v9602_v5 = vmul.f32 %v10585_v14, %v9594_v39  ;;  %v9595_v34 = vmul.f32 %v14616_v54, %v9589_v62 }
0x440d   :  { %v9610_v20 = vadd.f32 %v10586_v41, %v9602_v5  ;;  %v9603_v22 = vmul.f32 %v10585_v14, %v9595_v34 }
0x440f   :  { %9612 = vst.msk [vmem:[%s9662_s25] sm:$0xff] %vm288_vm1, %v9610_v20  ;;  %v9611_v61 = vadd.f32 %v10586_v41, %v9603_v22 }
0x4411   :  { %9613 = vst.msk [vmem:[%s9662_s25 + $0x8] sm:$0xff] %vm288_vm1, %v9611_v61 }

</bundles_post_ra>
